<compile_context>
chip_gen: v7x
topology: tpu7x:2x2x1
jax: 0.10.0
libtpu: 0.0.40
codegen_flags: <defaults>
</compile_context>

<pallas_src>
import math

import jax
import jax.numpy as jnp
from jax import lax
from jax.experimental import pallas as pl
from jax.experimental.pallas import tpu as pltpu

EPS = 1e-5
LANES = 128
VMEM_LIMIT = 48 * 1024 * 1024          # <= v7x physical 64 MiB with headroom
BLOCK_BYTE_BUDGET = 8 * 1024 * 1024    # per block set (x2 for double buffering)


# ------------------------- Pallas kernels -------------------------

def sums_kernel(x_ref, s_ref, ss_ref):
    """Per-(n, c) partial sum / sum-of-squares over one spatial tile.

    Runs on the ORIGINAL channel-first layout (N, Cin, S): no transposed or
    channel-padded copy of x is needed for the statistics pass."""
    x = x_ref[0].astype(jnp.float32)                       # (Cin, tS0)
    s_ref[0, 0] = jnp.sum(x, axis=1, keepdims=True)        # (Cin, 1)
    ss_ref[0, 0] = jnp.sum(x * x, axis=1, keepdims=True)


def stage1_kernel(x_ref, a_ref, b_ref, w_ref, y_ref, s_ref, ss_ref):
    """Fused BNIN-normalize -> ReLU -> 1x1x1 conv (MXU) + partial BN2 stats."""
    x = x_ref[0].astype(jnp.float32)                       # (tS, Cin)
    h = jnp.maximum(x * a_ref[0] + b_ref[0], 0.0)          # VPU, f32
    y = jnp.dot(h.astype(jnp.bfloat16), w_ref[...],        # MXU, bf16 in / f32 acc
                preferred_element_type=jnp.float32)        # (tS, Cout_p)
    y_ref[0] = y.astype(y_ref.dtype)                       # bf16 store: y traffic / 2
    # partial stats of y for the second BatchNorm (no extra HBM pass over y)
    s_ref[0, 0] = jnp.sum(y, axis=0, keepdims=True)
    ss_ref[0, 0] = jnp.sum(y * y, axis=0, keepdims=True)


def stage2_kernel(y_ref, a_ref, b_ref, w_ref, o_ref):
    """Fused BN2-normalize -> ReLU -> 2x2x2 stride-2 conv.

    Grid = (N, Do-tiles, kd, kh); the (kd, kh) parities are reduction axes
    accumulated directly into the resident output block; kw is merged into
    the matmul contraction dim.  The full (4, 2*Cout_p, Cout_p) weight is
    DMAed once (constant index_map) and selected in-kernel."""
    kd, kh = pl.program_id(2), pl.program_id(3)
    first = jnp.logical_and(kd == 0, kh == 0)

    rows = o_ref.shape[1]
    k2 = a_ref.shape[1]
    y = y_ref[...].astype(jnp.float32).reshape(rows, k2)   # (tS2, 2*Cout_p)
    h = jnp.maximum(y * a_ref[...] + b_ref[...], 0.0)      # BN2 affine + ReLU, f32
    contrib = jnp.dot(h.astype(jnp.bfloat16), w_ref[kd * 2 + kh],
                      preferred_element_type=jnp.float32)  # (tS2, Cout_p)

    @pl.when(first)
    def _():
        o_ref[0] = contrib

    @pl.when(jnp.logical_not(first))
    def _():
        o_ref[0] += contrib


# ------------------------- tiling helpers -------------------------

def _round_up(x, m):
    return ((x + m - 1) // m) * m


def _pick_cout_pad(Cout, Wo):
    """Output-channel padding.

    For realistic channel counts (>=128) pad to a lane multiple; for tiny
    Cout pad only enough that stage-2's strided space-to-depth DMA keeps a
    contiguous run (Wo * 2*Cout_p * 2 B, bf16) of >= ~512 B instead of
    inflating HBM traffic 16x by padding to 128."""
    if Cout >= LANES:
        return _round_up(Cout, LANES)
    run_min = -(-128 // max(Wo, 1))        # 4 * Wo * Cout_p >= 512 B
    return min(LANES, max(_round_up(Cout, 8), _round_up(run_min, 8)))


def _pick_rows_tile(total, n_parallel, *, multiple, target, bytes_per_row,
                    budget=BLOCK_BYTE_BUDGET, min_steps=4):
    """Largest divisor of `total` that is a multiple of `multiple`, fits the
    byte budget / target, and (when possible) leaves >= min_steps parallel
    grid steps so both megacore TensorCores get pipelined work."""
    target = max(multiple, min(target, budget // max(bytes_per_row, 1)))
    cands = [t for t in range(multiple, min(total, target) + 1, multiple)
             if total % t == 0]
    if not cands:
        return total                       # full-extent block is always legal
    good = [t for t in cands if n_parallel * (total // t) >= min_steps]
    return max(good) if good else max(cands)


def _pick_do_tile(Do, Ho, Wo, n_parallel, *, bytes_per_row,
                  target_rows=8192, budget=BLOCK_BYTE_BUDGET, min_steps=4):
    hw = Ho * Wo
    target_rows = min(target_rows, budget // max(bytes_per_row, 1))
    cands = [t for t in range(1, Do + 1)
             if Do % t == 0 and t * hw <= target_rows and (t * hw) % 8 == 0]
    if not cands:
        # smallest 8-row-aligned depth tile (never silently fall back to the
        # full depth and risk a VMEM overrun), else the full extent.
        cands = [t for t in range(1, Do + 1)
                 if Do % t == 0 and (t * hw) % 8 == 0]
        return min(cands) if cands else Do
    good = [t for t in cands if n_parallel * (Do // t) >= min_steps]
    return max(good) if good else max(cands)


# ------------------------- Pallas wrappers -------------------------

def channel_partial_sums(x_cf, tS0):
    N, Cin, S = x_cf.shape
    nS = S // tS0
    return pl.pallas_call(
        sums_kernel,
        out_shape=(jax.ShapeDtypeStruct((N, nS, Cin, 1), jnp.float32),
                   jax.ShapeDtypeStruct((N, nS, Cin, 1), jnp.float32)),
        grid=(N, nS),
        in_specs=[pl.BlockSpec((1, Cin, tS0), lambda n, s: (n, 0, s))],
        out_specs=(pl.BlockSpec((1, 1, Cin, 1), lambda n, s: (n, s, 0, 0)),
                   pl.BlockSpec((1, 1, Cin, 1), lambda n, s: (n, s, 0, 0))),
        compiler_params=pltpu.CompilerParams(
            dimension_semantics=("parallel", "parallel"),
            vmem_limit_bytes=VMEM_LIMIT),
    )(x_cf)


def bnin_relu_conv1(x_cl, a1, b1, w1_bf16, tS):
    N, S, Cin = x_cl.shape
    Cout_p = w1_bf16.shape[1]
    nS = S // tS
    return pl.pallas_call(
        stage1_kernel,
        out_shape=(jax.ShapeDtypeStruct((N, S, Cout_p), jnp.bfloat16),
                   jax.ShapeDtypeStruct((N, nS, 1, Cout_p), jnp.float32),
                   jax.ShapeDtypeStruct((N, nS, 1, Cout_p), jnp.float32)),
        grid=(N, nS),
        in_specs=[pl.BlockSpec((1, tS, Cin), lambda n, s: (n, s, 0)),
                  pl.BlockSpec((1, 1, Cin), lambda n, s: (n, 0, 0)),
                  pl.BlockSpec((1, 1, Cin), lambda n, s: (n, 0, 0)),
                  pl.BlockSpec((Cin, Cout_p), lambda n, s: (0, 0))],
        out_specs=(pl.BlockSpec((1, tS, Cout_p), lambda n, s: (n, s, 0)),
                   pl.BlockSpec((1, 1, 1, Cout_p), lambda n, s: (n, s, 0, 0)),
                   pl.BlockSpec((1, 1, 1, Cout_p), lambda n, s: (n, s, 0, 0))),
        compiler_params=pltpu.CompilerParams(
            dimension_semantics=("parallel", "parallel"),
            vmem_limit_bytes=VMEM_LIMIT),
    )(x_cl, a1, b1, w1_bf16)


def bn2_relu_conv_down(y, a2, b2, w2r, Do, Ho, Wo):
    N, S, Cout_p = y.shape
    Cp2 = 2 * Cout_p
    S2 = Do * Ho * Wo
    tDo = _pick_do_tile(Do, Ho, Wo, N, bytes_per_row=Cp2 * 2 + Cout_p * 4)
    nDo = Do // tDo
    tS2 = tDo * Ho * Wo
    # Copy-free reshape: (N, S, Cout_p) -> (N, Do, 2, Ho, 2, Wo, 2*Cout_p).
    # The (kd, kh) parities become grid axes so the strided 2x2x2 gather is
    # performed by the BlockSpec DMA; kw is merged with the channel dim so it
    # simply widens the matmul contraction.
    y_r = y.reshape(N, Do, 2, Ho, 2, Wo, Cp2)
    return pl.pallas_call(
        stage2_kernel,
        out_shape=jax.ShapeDtypeStruct((N, S2, Cout_p), jnp.float32),
        grid=(N, nDo, 2, 2),
        in_specs=[
            pl.BlockSpec((1, tDo, 1, Ho, 1, Wo, Cp2),
                         lambda n, d, kd, kh: (n, d, kd, 0, kh, 0, 0)),
            pl.BlockSpec((1, Cp2), lambda n, d, kd, kh: (0, 0)),
            pl.BlockSpec((1, Cp2), lambda n, d, kd, kh: (0, 0)),
            pl.BlockSpec((4, Cp2, Cout_p), lambda n, d, kd, kh: (0, 0, 0)),
        ],
        out_specs=pl.BlockSpec((1, tS2, Cout_p), lambda n, d, kd, kh: (n, d, 0)),
        compiler_params=pltpu.CompilerParams(
            dimension_semantics=("parallel", "parallel", "arbitrary", "arbitrary"),
            vmem_limit_bytes=VMEM_LIMIT),
    )(y_r, a2, b2, w2r)


# ------------------------- forward pass -------------------------

def transition_bnin_forward(x_ncdhw, params, half1):
    N, Cin, D, H, W = x_ncdhw.shape
    assert D % 2 == 0 and H % 2 == 0 and W % 2 == 0, "even spatial dims required"
    Cout = params["w1"].shape[0]
    S = D * H * W
    Do, Ho, Wo = D // 2, H // 2, W // 2

    Cout_p = _pick_cout_pad(Cout, Wo)
    x = x_ncdhw.astype(jnp.float32)

    # ---- pass 0: tiled per-(n, c) partial sums on the ORIGINAL layout ----
    x_cf = x.reshape(N, Cin, S)                            # copy-free
    tS0 = _pick_rows_tile(S, N, multiple=LANES, target=16384,
                          bytes_per_row=Cin * 4)
    s_p, ss_p = channel_partial_sums(x_cf, tS0)
    s = jnp.sum(s_p, axis=(1, 3))                          # (N, Cin), tiny
    ss = jnp.sum(ss_p, axis=(1, 3))

    cnt = float(N * S)
    # BatchNorm3d half: stats over (N, D, H, W), biased variance
    bn_mean = jnp.sum(s[:, :half1], axis=0) / cnt
    bn_var = jnp.maximum(jnp.sum(ss[:, :half1], axis=0) / cnt - bn_mean * bn_mean, 0.0)
    bn_scale = params["gamma_bn"] / jnp.sqrt(bn_var + EPS)
    bn_shift = params["beta_bn"] - bn_mean * bn_scale
    a_bn = jnp.broadcast_to(bn_scale[None, :], (N, half1))
    b_bn = jnp.broadcast_to(bn_shift[None, :], (N, half1))
    # InstanceNorm3d half: per-sample stats over (D, H, W)
    in_mean = s[:, half1:] / S
    in_var = jnp.maximum(ss[:, half1:] / S - in_mean * in_mean, 0.0)
    in_scale = params["gamma_in"][None, :] / jnp.sqrt(in_var + EPS)
    in_shift = params["beta_in"][None, :] - in_mean * in_scale

    a1 = jnp.concatenate([a_bn, in_scale], axis=1).reshape(N, 1, Cin)
    b1 = jnp.concatenate([b_bn, in_shift], axis=1).reshape(N, 1, Cin)

    # channels-last slab for the matmul stages (unpadded channel dim).
    # TODO(synk): fold this transpose into stage 1 to drop one full HBM pass.
    x_cl = jnp.transpose(x, (0, 2, 3, 4, 1)).reshape(N, S, Cin)

    # conv1 weight -> (Cin, Cout_p), bf16 for the MXU (K = Cin, unpadded)
    w1 = params["w1"][:, :, 0, 0, 0].T
    w1 = jnp.pad(w1, ((0, 0), (0, Cout_p - Cout))).astype(jnp.bfloat16)

    # ---- fused BNIN + relu1 + conv1 (+ partial BN2 stats), y stored bf16 ----
    tS = _pick_rows_tile(S, N, multiple=16, target=4096,
                         bytes_per_row=Cin * 4 + Cout_p * 2)
    y, s2_p, ss2_p = bnin_relu_conv1(x_cl, a1, b1, w1, tS)  # y: (N, S, Cout_p) bf16

    m2 = jnp.sum(s2_p, axis=(0, 1, 2))[:Cout] / cnt
    v2 = jnp.maximum(jnp.sum(ss2_p, axis=(0, 1, 2))[:Cout] / cnt - m2 * m2, 0.0)
    sc2 = params["gamma2"] / jnp.sqrt(v2 + EPS)
    sh2 = params["beta2"] - m2 * sc2
    sc2_p = jnp.pad(sc2, (0, Cout_p - Cout))
    sh2_p = jnp.pad(sh2, (0, Cout_p - Cout))
    a2 = jnp.concatenate([sc2_p, sc2_p]).reshape(1, 2 * Cout_p)
    b2 = jnp.concatenate([sh2_p, sh2_p]).reshape(1, 2 * Cout_p)

    # conv_down weight -> (kd*kh merged, kw*Cin merged, Cout_p), bf16
    w2 = jnp.pad(params["w2"], ((0, Cout_p - Cout), (0, Cout_p - Cout),
                                (0, 0), (0, 0), (0, 0)))
    w2r = jnp.transpose(w2, (2, 3, 4, 1, 0)).reshape(4, 2 * Cout_p, Cout_p)
    w2r = w2r.astype(jnp.bfloat16)

    # ---- fused BN2 + relu2 + conv_down (space-to-depth via BlockSpec grid) ----
    z = bn2_relu_conv_down(y, a2, b2, w2r, Do, Ho, Wo)     # (N, S2, Cout_p) f32
    # TODO(synk): emit the stage-2 output channel-first to drop this small,
    # lightly-padded transpose entirely.
    z = z[:, :, :Cout].reshape(N, Do, Ho, Wo, Cout)
    return jnp.transpose(z, (0, 4, 1, 2, 3))               # back to NCDHW


# ------------------------- reference (pure JAX) -------------------------

def reference_forward(x, params):
    half1 = params["half1"]
    x1, x2 = x[:, :half1], x[:, half1:]
    m = jnp.mean(x1, axis=(0, 2, 3, 4), keepdims=True)
    v = jnp.var(x1, axis=(0, 2, 3, 4), keepdims=True)
    o1 = (x1 - m) / jnp.sqrt(v + EPS) \
        * params["gamma_bn"][None, :, None, None, None] \
        + params["beta_bn"][None, :, None, None, None]
    mi = jnp.mean(x2, axis=(2, 3, 4), keepdims=True)
    vi = jnp.var(x2, axis=(2, 3, 4), keepdims=True)
    o2 = (x2 - mi) / jnp.sqrt(vi + EPS) \
        * params["gamma_in"][None, :, None, None, None] \
        + params["beta_in"][None, :, None, None, None]
    out = jnp.maximum(jnp.concatenate([o1, o2], axis=1), 0.0)
    y = lax.conv_general_dilated(out, params["w1"], (1, 1, 1), "VALID",
                                 dimension_numbers=("NCDHW", "OIDHW", "NCDHW"),
                                 precision=lax.Precision.HIGHEST)
    mm = jnp.mean(y, axis=(0, 2, 3, 4), keepdims=True)
    vv = jnp.var(y, axis=(0, 2, 3, 4), keepdims=True)
    y = (y - mm) / jnp.sqrt(vv + EPS) \
        * params["gamma2"][None, :, None, None, None] \
        + params["beta2"][None, :, None, None, None]
    y = jnp.maximum(y, 0.0)
    z = lax.conv_general_dilated(y, params["w2"], (2, 2, 2), "VALID",
                                 dimension_numbers=("NCDHW", "OIDHW", "NCDHW"),
                                 precision=lax.Precision.HIGHEST)
    return z


# ------------------------- params -------------------------

def init_params(key, inchannel, reduction, half_bn=0.6):
    outchannel = int(math.floor(inchannel * reduction))
    half1 = int(inchannel * half_bn)
    half2 = inchannel - half1
    assert half1 > 0 and half2 > 0
    ks = jax.random.split(key, 8)
    std1 = math.sqrt(2.0 / (inchannel * 1 * 1 * 1))        # kaiming_normal, relu
    std2 = math.sqrt(2.0 / (outchannel * 2 * 2 * 2))
    return dict(
        half1=half1,
        gamma_bn=1.0 + 0.1 * jax.random.normal(ks[0], (half1,), jnp.float32),
        beta_bn=0.1 * jax.random.normal(ks[1], (half1,), jnp.float32),
        gamma_in=1.0 + 0.1 * jax.random.normal(ks[2], (half2,), jnp.float32),
        beta_in=0.1 * jax.random.normal(ks[3], (half2,), jnp.float32),
        w1=std1 * jax.random.normal(ks[4], (outchannel, inchannel, 1, 1, 1),
                                    jnp.float32),
        gamma2=1.0 + 0.1 * jax.random.normal(ks[5], (outchannel,), jnp.float32),
        beta2=0.1 * jax.random.normal(ks[6], (outchannel,), jnp.float32),
        w2=std2 * jax.random.normal(ks[7], (outchannel, outchannel, 2, 2, 2),
                                    jnp.float32),
    )


# ------------------------- main -------------------------

if __name__ == "__main__":
    key = jax.random.PRNGKey(0)
    kx, kp = jax.random.split(key)

    inchannel, reduction = 16, 0.5                 # outchannel = 8
    N, D, H, W = 2, 16, 16, 16
    x = jax.random.normal(kx, (N, inchannel, D, H, W), jnp.float32)
    params = init_params(kp, inchannel, reduction)

    fwd = jax.jit(transition_bnin_forward, static_argnums=(2,))
    out = jax.block_until_ready(fwd(x, params, params["half1"]))
    ref = jax.block_until_ready(reference_forward(x, params))

    assert out.shape == ref.shape == (N, 8, D // 2, H // 2, W // 2), out.shape
    err = float(jnp.max(jnp.abs(out - ref)))
    scale = max(1.0, float(jnp.max(jnp.abs(ref))))
    assert err < 2e-2 * scale, f"mismatch: max abs err {err} (scale {scale})"
    print("KERNEL_OK")
</pallas_src>

<mosaic_0001>
module attributes {stable_mosaic.version = 11 : i64} {
  func.func @sums_kernel(%arg0: i32, %arg1: i32, %arg2: memref<1x16x2048xf32, #tpu.memory_space<vmem>>, %arg3: memref<1x1x16x1xf32, #tpu.memory_space<vmem>>, %arg4: memref<1x1x16x1xf32, #tpu.memory_space<vmem>>) attributes {dimension_semantics = [#tpu.dimension_semantics<parallel>, #tpu.dimension_semantics<parallel>], iteration_bounds = array<i64: 2, 2>, scalar_prefetch = 0 : i64, scratch_operands = 0 : i64, tpu.core_type = #tpu.core_type<tc>, window_params = [{transform_indices = @transform_0, window_bounds = array<i64: 1, 16, 2048>}, {transform_indices = @transform_1, window_bounds = array<i64: 1, 1, 16, 1>}, {transform_indices = @transform_2, window_bounds = array<i64: 1, 1, 16, 1>}]} {
    %c0 = arith.constant 0 : index
    %c0_0 = arith.constant 0 : index
    %c0_1 = arith.constant 0 : index
    %0 = vector.load %arg2[%c0, %c0_0, %c0_1] : memref<1x16x2048xf32, #tpu.memory_space<vmem>>, vector<1x16x2048xf32>
    %1 = vector.shape_cast %0 : vector<1x16x2048xf32> to vector<16x2048xf32>
    %cst = arith.constant dense<0.000000e+00> : vector<16xf32>
    %2 = vector.multi_reduction <add>, %1, %cst [1] : vector<16x2048xf32> to vector<16xf32>
    %3 = vector.shape_cast %2 : vector<16xf32> to vector<16x1xf32>
    %c0_2 = arith.constant 0 : index
    %c0_3 = arith.constant 0 : index
    %c0_4 = arith.constant 0 : index
    %c0_5 = arith.constant 0 : index
    %4 = vector.load %arg3[%c0_2, %c0_3, %c0_4, %c0_5] : memref<1x1x16x1xf32, #tpu.memory_space<vmem>>, vector<1x1x16x1xf32>
    %5 = vector.shape_cast %4 : vector<1x1x16x1xf32> to vector<16x1xf32>
    %6 = vector.shape_cast %3 : vector<16x1xf32> to vector<1x1x16x1xf32>
    tpu.vector_store %arg3[%c0_2, %c0_3, %c0_4, %c0_5], %6 {strides = array<i32>} : memref<1x1x16x1xf32, #tpu.memory_space<vmem>>, vector<1x1x16x1xf32>,
    %7 = arith.mulf %1, %1 : vector<16x2048xf32>
    %cst_6 = arith.constant dense<0.000000e+00> : vector<16xf32>
    %8 = vector.multi_reduction <add>, %7, %cst_6 [1] : vector<16x2048xf32> to vector<16xf32>
    %9 = vector.shape_cast %8 : vector<16xf32> to vector<16x1xf32>
    %c0_7 = arith.constant 0 : index
    %c0_8 = arith.constant 0 : index
    %c0_9 = arith.constant 0 : index
    %c0_10 = arith.constant 0 : index
    %10 = vector.load %arg4[%c0_7, %c0_8, %c0_9, %c0_10] : memref<1x1x16x1xf32, #tpu.memory_space<vmem>>, vector<1x1x16x1xf32>
    %11 = vector.shape_cast %10 : vector<1x1x16x1xf32> to vector<16x1xf32>
    %12 = vector.shape_cast %9 : vector<16x1xf32> to vector<1x1x16x1xf32>
    tpu.vector_store %arg4[%c0_7, %c0_8, %c0_9, %c0_10], %12 {strides = array<i32>} : memref<1x1x16x1xf32, #tpu.memory_space<vmem>>, vector<1x1x16x1xf32>,
    return
  }
  func.func @transform_0(%arg0: i32, %arg1: i32) -> (i32, i32, i32) {
    %c0_i32 = arith.constant 0 : i32
    %c0_i32_0 = arith.constant 0 : i32
    return %arg0, %c0_i32, %arg1 : i32, i32, i32
  }
  func.func @transform_1(%arg0: i32, %arg1: i32) -> (i32, i32, i32, i32) {
    %c0_i32 = arith.constant 0 : i32
    %c0_i32_0 = arith.constant 0 : i32
    %c0_i32_1 = arith.constant 0 : i32
    return %arg0, %arg1, %c0_i32, %c0_i32_0 : i32, i32, i32, i32
  }
  func.func @transform_2(%arg0: i32, %arg1: i32) -> (i32, i32, i32, i32) {
    %c0_i32 = arith.constant 0 : i32
    %c0_i32_0 = arith.constant 0 : i32
    %c0_i32_1 = arith.constant 0 : i32
    return %arg0, %arg1, %c0_i32, %c0_i32_0 : i32, i32, i32, i32
  }
}

module attributes {stable_mosaic.version = 11 : i64} {
  func.func @stage1_kernel(%arg0: i32, %arg1: i32, %arg2: memref<1x2048x16xf32, #tpu.memory_space<vmem>>, %arg3: memref<1x1x16xf32, #tpu.memory_space<vmem>>, %arg4: memref<1x1x16xf32, #tpu.memory_space<vmem>>, %arg5: memref<16x16xbf16, #tpu.memory_space<vmem>>, %arg6: memref<1x2048x16xbf16, #tpu.memory_space<vmem>>, %arg7: memref<1x1x1x16xf32, #tpu.memory_space<vmem>>, %arg8: memref<1x1x1x16xf32, #tpu.memory_space<vmem>>) attributes {dimension_semantics = [#tpu.dimension_semantics<parallel>, #tpu.dimension_semantics<parallel>], iteration_bounds = array<i64: 2, 2>, scalar_prefetch = 0 : i64, scratch_operands = 0 : i64, tpu.core_type = #tpu.core_type<tc>, window_params = [{transform_indices = @transform_0, window_bounds = array<i64: 1, 2048, 16>}, {transform_indices = @transform_1, window_bounds = array<i64: 1, 1, 16>}, {transform_indices = @transform_2, window_bounds = array<i64: 1, 1, 16>}, {pipeline_mode = #tpu.pipeline_mode<synchronous>, transform_indices = @transform_3, window_bounds = array<i64: 16, 16>}, {transform_indices = @transform_4, window_bounds = array<i64: 1, 2048, 16>}, {transform_indices = @transform_5, window_bounds = array<i64: 1, 1, 1, 16>}, {transform_indices = @transform_6, window_bounds = array<i64: 1, 1, 1, 16>}]} {
    %c0 = arith.constant 0 : index
    %c0_0 = arith.constant 0 : index
    %c0_1 = arith.constant 0 : index
    %0 = vector.load %arg2[%c0, %c0_0, %c0_1] : memref<1x2048x16xf32, #tpu.memory_space<vmem>>, vector<1x2048x16xf32>
    %1 = vector.shape_cast %0 : vector<1x2048x16xf32> to vector<2048x16xf32>
    %c0_2 = arith.constant 0 : index
    %c0_3 = arith.constant 0 : index
    %c0_4 = arith.constant 0 : index
    %2 = vector.load %arg3[%c0_2, %c0_3, %c0_4] : memref<1x1x16xf32, #tpu.memory_space<vmem>>, vector<1x1x16xf32>
    %3 = vector.shape_cast %2 : vector<1x1x16xf32> to vector<1x16xf32>
    %4 = vector.broadcast %3 : vector<1x16xf32> to vector<2048x16xf32>
    %5 = arith.mulf %1, %4 : vector<2048x16xf32>
    %c0_5 = arith.constant 0 : index
    %c0_6 = arith.constant 0 : index
    %c0_7 = arith.constant 0 : index
    %6 = vector.load %arg4[%c0_5, %c0_6, %c0_7] : memref<1x1x16xf32, #tpu.memory_space<vmem>>, vector<1x1x16xf32>
    %7 = vector.shape_cast %6 : vector<1x1x16xf32> to vector<1x16xf32>
    %8 = vector.broadcast %7 : vector<1x16xf32> to vector<2048x16xf32>
    %9 = arith.addf %5, %8 : vector<2048x16xf32>
    %cst = arith.constant 0.000000e+00 : f32
    %10 = vector.broadcast %cst : f32 to vector<2048x16xf32>
    %11 = arith.maximumf %9, %10 : vector<2048x16xf32>
    %12 = arith.truncf %11 : vector<2048x16xf32> to vector<2048x16xbf16>
    %c0_8 = arith.constant 0 : index
    %c0_9 = arith.constant 0 : index
    %13 = vector.load %arg5[%c0_8, %c0_9] : memref<16x16xbf16, #tpu.memory_space<vmem>>, vector<16x16xbf16>
    %cst_10 = arith.constant dense<0.000000e+00> : vector<2048x16xf32>
    %14 = tpu.matmul %12, %13, %cst_10 {dimension_numbers = #tpu.dot_dimension_numbers<[1], [0], [0], [1], [0, 0, 1, 1], [], []>} : vector<2048x16xbf16>, vector<16x16xbf16>, vector<2048x16xf32> -> vector<2048x16xf32>
    %15 = arith.truncf %14 : vector<2048x16xf32> to vector<2048x16xbf16>
    %c0_11 = arith.constant 0 : index
    %c0_12 = arith.constant 0 : index
    %c0_13 = arith.constant 0 : index
    %16 = vector.load %arg6[%c0_11, %c0_12, %c0_13] : memref<1x2048x16xbf16, #tpu.memory_space<vmem>>, vector<1x2048x16xbf16>
    %17 = vector.shape_cast %16 : vector<1x2048x16xbf16> to vector<2048x16xbf16>
    %18 = vector.shape_cast %15 : vector<2048x16xbf16> to vector<1x2048x16xbf16>
    tpu.vector_store %arg6[%c0_11, %c0_12, %c0_13], %18 {strides = array<i32>} : memref<1x2048x16xbf16, #tpu.memory_space<vmem>>, vector<1x2048x16xbf16>,
    %cst_14 = arith.constant dense<0.000000e+00> : vector<16xf32>
    %19 = vector.multi_reduction <add>, %14, %cst_14 [0] : vector<2048x16xf32> to vector<16xf32>
    %20 = vector.shape_cast %19 : vector<16xf32> to vector<1x16xf32>
    %c0_15 = arith.constant 0 : index
    %c0_16 = arith.constant 0 : index
    %c0_17 = arith.constant 0 : index
    %c0_18 = arith.constant 0 : index
    %21 = vector.load %arg7[%c0_15, %c0_16, %c0_17, %c0_18] : memref<1x1x1x16xf32, #tpu.memory_space<vmem>>, vector<1x1x1x16xf32>
    %22 = vector.shape_cast %21 : vector<1x1x1x16xf32> to vector<1x16xf32>
    %23 = vector.shape_cast %20 : vector<1x16xf32> to vector<1x1x1x16xf32>
    tpu.vector_store %arg7[%c0_15, %c0_16, %c0_17, %c0_18], %23 {strides = array<i32>} : memref<1x1x1x16xf32, #tpu.memory_space<vmem>>, vector<1x1x1x16xf32>,
    %24 = arith.mulf %14, %14 : vector<2048x16xf32>
    %cst_19 = arith.constant dense<0.000000e+00> : vector<16xf32>
    %25 = vector.multi_reduction <add>, %24, %cst_19 [0] : vector<2048x16xf32> to vector<16xf32>
    %26 = vector.shape_cast %25 : vector<16xf32> to vector<1x16xf32>
    %c0_20 = arith.constant 0 : index
    %c0_21 = arith.constant 0 : index
    %c0_22 = arith.constant 0 : index
    %c0_23 = arith.constant 0 : index
    %27 = vector.load %arg8[%c0_20, %c0_21, %c0_22, %c0_23] : memref<1x1x1x16xf32, #tpu.memory_space<vmem>>, vector<1x1x1x16xf32>
    %28 = vector.shape_cast %27 : vector<1x1x1x16xf32> to vector<1x16xf32>
    %29 = vector.shape_cast %26 : vector<1x16xf32> to vector<1x1x1x16xf32>
    tpu.vector_store %arg8[%c0_20, %c0_21, %c0_22, %c0_23], %29 {strides = array<i32>} : memref<1x1x1x16xf32, #tpu.memory_space<vmem>>, vector<1x1x1x16xf32>,
    return
  }
  func.func @transform_0(%arg0: i32, %arg1: i32) -> (i32, i32, i32) {
    %c0_i32 = arith.constant 0 : i32
    %c0_i32_0 = arith.constant 0 : i32
    return %arg0, %arg1, %c0_i32 : i32, i32, i32
  }
  func.func @transform_1(%arg0: i32, %arg1: i32) -> (i32, i32, i32) {
    %c0_i32 = arith.constant 0 : i32
    %c0_i32_0 = arith.constant 0 : i32
    %c0_i32_1 = arith.constant 0 : i32
    return %arg0, %c0_i32, %c0_i32_0 : i32, i32, i32
  }
  func.func @transform_2(%arg0: i32, %arg1: i32) -> (i32, i32, i32) {
    %c0_i32 = arith.constant 0 : i32
    %c0_i32_0 = arith.constant 0 : i32
    %c0_i32_1 = arith.constant 0 : i32
    return %arg0, %c0_i32, %c0_i32_0 : i32, i32, i32
  }
  func.func @transform_3(%arg0: i32, %arg1: i32) -> (i32, i32) {
    %c0_i32 = arith.constant 0 : i32
    %c0_i32_0 = arith.constant 0 : i32
    %c0_i32_1 = arith.constant 0 : i32
    return %c0_i32, %c0_i32_0 : i32, i32
  }
  func.func @transform_4(%arg0: i32, %arg1: i32) -> (i32, i32, i32) {
    %c0_i32 = arith.constant 0 : i32
    %c0_i32_0 = arith.constant 0 : i32
    return %arg0, %arg1, %c0_i32 : i32, i32, i32
  }
  func.func @transform_5(%arg0: i32, %arg1: i32) -> (i32, i32, i32, i32) {
    %c0_i32 = arith.constant 0 : i32
    %c0_i32_0 = arith.constant 0 : i32
    %c0_i32_1 = arith.constant 0 : i32
    return %arg0, %arg1, %c0_i32, %c0_i32_0 : i32, i32, i32, i32
  }
  func.func @transform_6(%arg0: i32, %arg1: i32) -> (i32, i32, i32, i32) {
    %c0_i32 = arith.constant 0 : i32
    %c0_i32_0 = arith.constant 0 : i32
    %c0_i32_1 = arith.constant 0 : i32
    return %arg0, %arg1, %c0_i32, %c0_i32_0 : i32, i32, i32, i32
  }
}

module attributes {stable_mosaic.version = 11 : i64} {
  func.func @stage2_kernel(%arg0: i32, %arg1: i32, %arg2: i32, %arg3: i32, %arg4: memref<1x4x1x8x1x8x32xbf16, #tpu.memory_space<vmem>>, %arg5: memref<1x32xf32, #tpu.memory_space<vmem>>, %arg6: memref<1x32xf32, #tpu.memory_space<vmem>>, %arg7: memref<4x32x16xbf16, #tpu.memory_space<vmem>>, %arg8: memref<1x256x16xf32, #tpu.memory_space<vmem>>) attributes {dimension_semantics = [#tpu.dimension_semantics<parallel>, #tpu.dimension_semantics<parallel>, #tpu.dimension_semantics<arbitrary>, #tpu.dimension_semantics<arbitrary>], iteration_bounds = array<i64: 2, 2, 2, 2>, scalar_prefetch = 0 : i64, scratch_operands = 0 : i64, tpu.core_type = #tpu.core_type<tc>, window_params = [{transform_indices = @transform_0, window_bounds = array<i64: 1, 4, 1, 8, 1, 8, 32>}, {pipeline_mode = #tpu.pipeline_mode<synchronous>, transform_indices = @transform_1, window_bounds = array<i64: 1, 32>}, {pipeline_mode = #tpu.pipeline_mode<synchronous>, transform_indices = @transform_2, window_bounds = array<i64: 1, 32>}, {pipeline_mode = #tpu.pipeline_mode<synchronous>, transform_indices = @transform_3, window_bounds = array<i64: 4, 32, 16>}, {transform_indices = @transform_4, window_bounds = array<i64: 1, 256, 16>}]} {
    %c0_i32 = arith.constant 0 : i32
    %0 = arith.cmpi eq, %arg2, %c0_i32 : i32
    %c0_i32_0 = arith.constant 0 : i32
    %1 = arith.cmpi eq, %arg3, %c0_i32_0 : i32
    %2 = arith.andi %0, %1 : i1
    %c0 = arith.constant 0 : index
    %c0_1 = arith.constant 0 : index
    %c0_2 = arith.constant 0 : index
    %c0_3 = arith.constant 0 : index
    %c0_4 = arith.constant 0 : index
    %c0_5 = arith.constant 0 : index
    %c0_6 = arith.constant 0 : index
    %3 = vector.load %arg4[%c0, %c0_1, %c0_2, %c0_3, %c0_4, %c0_5, %c0_6] : memref<1x4x1x8x1x8x32xbf16, #tpu.memory_space<vmem>>, vector<1x4x1x8x1x8x32xbf16>
    %4 = arith.extf %3 : vector<1x4x1x8x1x8x32xbf16> to vector<1x4x1x8x1x8x32xf32>
    %5 = vector.shape_cast %4 : vector<1x4x1x8x1x8x32xf32> to vector<256x32xf32>
    %c0_7 = arith.constant 0 : index
    %c0_8 = arith.constant 0 : index
    %6 = vector.load %arg5[%c0_7, %c0_8] : memref<1x32xf32, #tpu.memory_space<vmem>>, vector<1x32xf32>
    %7 = vector.broadcast %6 : vector<1x32xf32> to vector<256x32xf32>
    %8 = arith.mulf %5, %7 : vector<256x32xf32>
    %c0_9 = arith.constant 0 : index
    %c0_10 = arith.constant 0 : index
    %9 = vector.load %arg6[%c0_9, %c0_10] : memref<1x32xf32, #tpu.memory_space<vmem>>, vector<1x32xf32>
    %10 = vector.broadcast %9 : vector<1x32xf32> to vector<256x32xf32>
    %11 = arith.addf %8, %10 : vector<256x32xf32>
    %cst = arith.constant 0.000000e+00 : f32
    %12 = vector.broadcast %cst : f32 to vector<256x32xf32>
    %13 = arith.maximumf %11, %12 : vector<256x32xf32>
    %14 = arith.truncf %13 : vector<256x32xf32> to vector<256x32xbf16>
    %c2_i32 = arith.constant 2 : i32
    %15 = arith.muli %arg2, %c2_i32 : i32
    %16 = arith.addi %15, %arg3 : i32
    %17 = arith.index_cast %16 : i32 to index
    %c0_11 = arith.constant 0 : index
    %c0_12 = arith.constant 0 : index
    %18 = vector.load %arg7[%17, %c0_11, %c0_12] : memref<4x32x16xbf16, #tpu.memory_space<vmem>>, vector<1x32x16xbf16>
    %19 = vector.shape_cast %18 : vector<1x32x16xbf16> to vector<32x16xbf16>
    %cst_13 = arith.constant dense<0.000000e+00> : vector<256x16xf32>
    %20 = tpu.matmul %14, %19, %cst_13 {dimension_numbers = #tpu.dot_dimension_numbers<[1], [0], [0], [1], [0, 0, 1, 1], [], []>} : vector<256x32xbf16>, vector<32x16xbf16>, vector<256x16xf32> -> vector<256x16xf32>
    %21 = arith.extui %2 : i1 to i32
    %c0_i32_14 = arith.constant 0 : i32
    %22 = arith.cmpi ne, %21, %c0_i32_14 : i32
    scf.if %22 {
      %c0_16 = arith.constant 0 : index
      %c0_17 = arith.constant 0 : index
      %c0_18 = arith.constant 0 : index
      %26 = vector.load %arg8[%c0_16, %c0_17, %c0_18] : memref<1x256x16xf32, #tpu.memory_space<vmem>>, vector<1x256x16xf32>
      %27 = vector.shape_cast %26 : vector<1x256x16xf32> to vector<256x16xf32>
      %28 = vector.shape_cast %20 : vector<256x16xf32> to vector<1x256x16xf32>
      tpu.vector_store %arg8[%c0_16, %c0_17, %c0_18], %28 {strides = array<i32>} : memref<1x256x16xf32, #tpu.memory_space<vmem>>, vector<1x256x16xf32>,
    } else {
    }
    %true = arith.constant true
    %23 = arith.xori %2, %true : i1
    %24 = arith.extui %23 : i1 to i32
    %c0_i32_15 = arith.constant 0 : i32
    %25 = arith.cmpi ne, %24, %c0_i32_15 : i32
    scf.if %25 {
      %c0_16 = arith.constant 0 : index
      %c0_17 = arith.constant 0 : index
      %c0_18 = arith.constant 0 : index
      %26 = vector.load %arg8[%c0_16, %c0_17, %c0_18] : memref<1x256x16xf32, #tpu.memory_space<vmem>>, vector<1x256x16xf32>
      %27 = vector.shape_cast %26 : vector<1x256x16xf32> to vector<256x16xf32>
      %28 = arith.addf %27, %20 : vector<256x16xf32>
      %c0_19 = arith.constant 0 : index
      %c0_20 = arith.constant 0 : index
      %c0_21 = arith.constant 0 : index
      %29 = vector.load %arg8[%c0_19, %c0_20, %c0_21] : memref<1x256x16xf32, #tpu.memory_space<vmem>>, vector<1x256x16xf32>
      %30 = vector.shape_cast %29 : vector<1x256x16xf32> to vector<256x16xf32>
      %31 = vector.shape_cast %28 : vector<256x16xf32> to vector<1x256x16xf32>
      tpu.vector_store %arg8[%c0_19, %c0_20, %c0_21], %31 {strides = array<i32>} : memref<1x256x16xf32, #tpu.memory_space<vmem>>, vector<1x256x16xf32>,
    } else {
    }
    return
  }
  func.func @transform_0(%arg0: i32, %arg1: i32, %arg2: i32, %arg3: i32) -> (i32, i32, i32, i32, i32, i32, i32) {
    %c0_i32 = arith.constant 0 : i32
    %c0_i32_0 = arith.constant 0 : i32
    %c0_i32_1 = arith.constant 0 : i32
    %c0_i32_2 = arith.constant 0 : i32
    return %arg0, %arg1, %arg2, %c0_i32, %arg3, %c0_i32_0, %c0_i32_1 : i32, i32, i32, i32, i32, i32, i32
  }
  func.func @transform_1(%arg0: i32, %arg1: i32, %arg2: i32, %arg3: i32) -> (i32, i32) {
    %c0_i32 = arith.constant 0 : i32
    %c0_i32_0 = arith.constant 0 : i32
    %c0_i32_1 = arith.constant 0 : i32
    return %c0_i32, %c0_i32_0 : i32, i32
  }
  func.func @transform_2(%arg0: i32, %arg1: i32, %arg2: i32, %arg3: i32) -> (i32, i32) {
    %c0_i32 = arith.constant 0 : i32
    %c0_i32_0 = arith.constant 0 : i32
    %c0_i32_1 = arith.constant 0 : i32
    return %c0_i32, %c0_i32_0 : i32, i32
  }
  func.func @transform_3(%arg0: i32, %arg1: i32, %arg2: i32, %arg3: i32) -> (i32, i32, i32) {
    %c0_i32 = arith.constant 0 : i32
    %c0_i32_0 = arith.constant 0 : i32
    %c0_i32_1 = arith.constant 0 : i32
    %c0_i32_2 = arith.constant 0 : i32
    return %c0_i32, %c0_i32_0, %c0_i32_1 : i32, i32, i32
  }
  func.func @transform_4(%arg0: i32, %arg1: i32, %arg2: i32, %arg3: i32) -> (i32, i32, i32) {
    %c0_i32 = arith.constant 0 : i32
    %c0_i32_0 = arith.constant 0 : i32
    return %arg0, %arg1, %c0_i32 : i32, i32, i32
  }
}

</mosaic_0001>

<bundles_post_ra>
// kernel: transition_bnin_forward.3
= control target key start
LH: loop header
LB: loop body
LE: loop exit
PB: predicated region body
PF: predicated region fallthrough
CT: control target
= control target key end

     0   :  { %s706_s9 = smov 0   ;;  %s708_s10 = smov 0   ;;  %s902_s0 = inlined_call_operand.vmem [shape: f32[2,16,4096], index: 0, kind: input, shape index: {}]   ;;  %s903_s1 = inlined_call_operand.vmem [shape: f32[2,2,16,1], index: 1, kind: output, shape index: {0}]   ;;  %s904_s2 = inlined_call_operand.vmem [shape: f32[2,2,16,1], index: 2, kind: output, shape index: {1}]  }
   0x1   :  { %s710_s11 = smov 0   ;;  %s712_s12 = smov 0  }
   0x2   :  { %s714_s13 = smov 0   ;;  %s716_s14 = smov 0  }
   0x3   :  { %s718_s15 = smov 0  }
   0x4 LB: > { %s22_s16 = sadd.s32 1, %s681_s13  ;;  %s25_s17 = sadd.s32 1, %s685_s14  ;;  %s689_s15 = sphi %s718_s15, %s13_s15   ;;  %s685_s14 = sphi %s716_s14, %s910_s14   ;;  %s681_s13 = sphi %s714_s13, %s909_s13   ;;  %s677_s12 = sphi %s712_s12, %s908_s12   ;;  %s673_s11 = sphi %s710_s11, %s907_s11   ;;  %s669_s10 = sphi %s708_s10, %s906_s10   ;;  %s665_s9 = sphi %s706_s9, %s905_s9  }
   0x5   : > { %p23_p0 = scmp.ge.s32.totalorder %s22_s16, 2  ;;  %p41_p1 = scmp.ne.s32.totalorder %s669_s10, %s665_s9 }
   0x6   : > { %p42_p2 = scmp.eq.s32.totalorder %s689_s15, 0  ;;  %s34_s21 = sadd.s32 1, %s669_s10 }
   0x7   : > { %s912_s16 = smov (%p23_p0, %s22_s16), 0  ;;  %s914_s17 = smov (!%p23_p0, %s25_s17), %s685_s14 }
   0x8   : > { %p43_p3 = por %p42_p2, %p41_p1  ;;  %p27_p4 = scmp.ge.s32.totalorder %s914_s17, 2 }
   0x9   : > { %s30_s18 = ssub.s32 %s681_s13, %s912_s16  ;;  %p564_p6 = scmp.ge.s32.totalorder %s689_s15, 4 }
   0xa   : > { %s916_s17 = smov (%p27_p4, %s914_s17), 0 }
   0xb   : > { %s29_s19 = ssub.s32 %s685_s14, %s916_s17  ;;  %123 = sbr.rel (%p564_p6) target bundleno = 41 (0x29), region = 16 }
   0xc   : > { %s31_s20 = sor.u32 %s30_s18, %s29_s19 }
   0xd   : > { %p32_p5 = scmp.eq.s32.totalorder %s31_s20, 0 }
   0xf   : > { %s757_s22 = scalar_select %p32_p5, %s669_s10, %s34_s21  }
  0x12   : > { %126 = sbr.rel (!%p43_p3) target bundleno = 41 (0x29), region = 20  ;;  %s128_s23 = sand.u32 (%p43_p3), 1, %s669_s10  }
  0x13   : > { %s566_s24 = sshll.u32 (%p43_p3), %s681_s13, 4  ;;  %s565_s25 = sshll.u32 (%p43_p3), %s128_s23, 8 }
  0x14   : > { %s567_s26 = sshll.u32 (%p43_p3), %s685_s14, 6  ;;  %s771_s4 = scalar_lea.vmem (%p43_p3), [#allocation2], %s565_s25 }
  0x15   : > { %s133_s27 = sadd.s32 (%p43_p3), %s567_s26, %s566_s24 }
  0x16   : > { %s568_s28 = sshll.u32 (%p43_p3), %s133_s27, 3 }
  0x17   : > { %s766_s3 = scalar_lea.vmem (%p43_p3), %s902_s0, %s568_s28 }
  0x18   : > { %v148_v0 = vld [vmem:[%s766_s3] sm:$0xff] (%p43_p3)  ;;  %v150_v1 = vld [vmem:[%s766_s3 + $0x8] sm:$0xff] (%p43_p3)  ;;  %v152_v2 = vld [vmem:[%s766_s3 + $0x10] sm:$0xff] (%p43_p3) }
  0x19   : > { %149 = vst [vmem:[%s771_s4] sm:$0xff] %v148_v0  ;;  %151 = vst [vmem:[%s771_s4 + $0x8] sm:$0xff] %v150_v1  ;;  %v154_v3 = vld [vmem:[%s766_s3 + $0x18] sm:$0xff]  ;;  %v156_v4 = vld [vmem:[%s766_s3 + $0x20] sm:$0xff] }
  0x1a   : > { %153 = vst [vmem:[%s771_s4 + $0x10] sm:$0xff] %v152_v2  ;;  %v158_v5 = vld [vmem:[%s766_s3 + $0x28] sm:$0xff]  ;;  %155 = vst [vmem:[%s771_s4 + $0x18] sm:$0xff] %v154_v3  ;;  %v160_v6 = vld [vmem:[%s766_s3 + $0x30] sm:$0xff] }
  0x1b   : > { %157 = vst [vmem:[%s771_s4 + $0x20] sm:$0xff] %v156_v4  ;;  %159 = vst [vmem:[%s771_s4 + $0x28] sm:$0xff] %v158_v5  ;;  %v162_v7 = vld [vmem:[%s766_s3 + $0x38] sm:$0xff]  ;;  %v164_v8 = vld [vmem:[%s766_s3 + $0x40] sm:$0xff] }
  0x1c   : > { %161 = vst [vmem:[%s771_s4 + $0x30] sm:$0xff] %v160_v6  ;;  %163 = vst [vmem:[%s771_s4 + $0x38] sm:$0xff] %v162_v7  ;;  %v166_v9 = vld [vmem:[%s766_s3 + $0x48] sm:$0xff]  ;;  %v168_v10 = vld [vmem:[%s766_s3 + $0x50] sm:$0xff] }
  0x1d   : > { %165 = vst [vmem:[%s771_s4 + $0x40] sm:$0xff] %v164_v8  ;;  %v170_v11 = vld [vmem:[%s766_s3 + $0x58] sm:$0xff]  ;;  %167 = vst [vmem:[%s771_s4 + $0x48] sm:$0xff] %v166_v9  ;;  %v172_v12 = vld [vmem:[%s766_s3 + $0x60] sm:$0xff] }
  0x1e   : > { %169 = vst [vmem:[%s771_s4 + $0x50] sm:$0xff] %v168_v10  ;;  %171 = vst [vmem:[%s771_s4 + $0x58] sm:$0xff] %v170_v11  ;;  %v174_v13 = vld [vmem:[%s766_s3 + $0x68] sm:$0xff]  ;;  %v176_v14 = vld [vmem:[%s766_s3 + $0x70] sm:$0xff] }
  0x1f   : > { %173 = vst [vmem:[%s771_s4 + $0x60] sm:$0xff] %v172_v12  ;;  %175 = vst [vmem:[%s771_s4 + $0x68] sm:$0xff] %v174_v13  ;;  %v178_v15 = vld [vmem:[%s766_s3 + $0x78] sm:$0xff]  ;;  %v180_v16 = vld [vmem:[%s766_s3 + $0x100] sm:$0xff] }
  0x20   : > { %177 = vst [vmem:[%s771_s4 + $0x70] sm:$0xff] %v176_v14  ;;  %v182_v17 = vld [vmem:[%s766_s3 + $0x108] sm:$0xff]  ;;  %179 = vst [vmem:[%s771_s4 + $0x78] sm:$0xff] %v178_v15  ;;  %v184_v18 = vld [vmem:[%s766_s3 + $0x110] sm:$0xff] }
  0x21   : > { %181 = vst [vmem:[%s771_s4 + $0x80] sm:$0xff] %v180_v16  ;;  %183 = vst [vmem:[%s771_s4 + $0x88] sm:$0xff] %v182_v17  ;;  %v186_v19 = vld [vmem:[%s766_s3 + $0x118] sm:$0xff]  ;;  %v188_v20 = vld [vmem:[%s766_s3 + $0x120] sm:$0xff] }
  0x22   : > { %185 = vst [vmem:[%s771_s4 + $0x90] sm:$0xff] %v184_v18  ;;  %187 = vst [vmem:[%s771_s4 + $0x98] sm:$0xff] %v186_v19  ;;  %v190_v21 = vld [vmem:[%s766_s3 + $0x128] sm:$0xff]  ;;  %v192_v22 = vld [vmem:[%s766_s3 + $0x130] sm:$0xff] }
  0x23   : > { %189 = vst [vmem:[%s771_s4 + $0xa0] sm:$0xff] %v188_v20  ;;  %v194_v23 = vld [vmem:[%s766_s3 + $0x138] sm:$0xff]  ;;  %191 = vst [vmem:[%s771_s4 + $0xa8] sm:$0xff] %v190_v21  ;;  %v196_v24 = vld [vmem:[%s766_s3 + $0x140] sm:$0xff] }
  0x24   : > { %193 = vst [vmem:[%s771_s4 + $0xb0] sm:$0xff] %v192_v22  ;;  %195 = vst [vmem:[%s771_s4 + $0xb8] sm:$0xff] %v194_v23  ;;  %v198_v25 = vld [vmem:[%s766_s3 + $0x148] sm:$0xff]  ;;  %v200_v26 = vld [vmem:[%s766_s3 + $0x150] sm:$0xff] }
  0x25   : > { %197 = vst [vmem:[%s771_s4 + $0xc0] sm:$0xff] %v196_v24  ;;  %199 = vst [vmem:[%s771_s4 + $0xc8] sm:$0xff] %v198_v25  ;;  %v202_v27 = vld [vmem:[%s766_s3 + $0x158] sm:$0xff]  ;;  %v204_v28 = vld [vmem:[%s766_s3 + $0x160] sm:$0xff] }
  0x26   : > { %201 = vst [vmem:[%s771_s4 + $0xd0] sm:$0xff] %v200_v26  ;;  %v206_v29 = vld [vmem:[%s766_s3 + $0x168] sm:$0xff]  ;;  %203 = vst [vmem:[%s771_s4 + $0xd8] sm:$0xff] %v202_v27  ;;  %v208_v30 = vld [vmem:[%s766_s3 + $0x170] sm:$0xff] }
  0x27   : > { %205 = vst [vmem:[%s771_s4 + $0xe0] sm:$0xff] %v204_v28  ;;  %207 = vst [vmem:[%s771_s4 + $0xe8] sm:$0xff] %v206_v29  ;;  %v210_v31 = vld [vmem:[%s766_s3 + $0x178] sm:$0xff] }
  0x28   : > { %209 = vst [vmem:[%s771_s4 + $0xf0] sm:$0xff] %v208_v30  ;;  %211 = vst [vmem:[%s771_s4 + $0xf8] sm:$0xff] %v210_v31 }
  0x29 PF: > { %p569_p7 = scmp.ge.s32.totalorder %s689_s15, 1  ;;  %p216_p8 = scmp.lt.s32.totalorder %s689_s15, 5 }
  0x2b   : > { %p217_p9 = pnand %p569_p7, %p216_p8 }
  0x2c   : > { %s223_s5 = sand.u32 (!%p217_p9), 1, %s665_s9   ;;  %p258_p10 = scmp.lt.s32.totalorder (!%p217_p9), %s677_s12, 1  ;;  %vm342_vm0 = vcmask (!%p217_p9), 7168  }
  0x2d   : > { %220 = sbr.rel (%p217_p9) target bundleno = 227 (0xe3), region = 43  ;;  %s570_s6 = sshll.u32 (!%p217_p9), %s223_s5, 8 }
  0x2e   : > { %s837_s7 = scalar_lea.vmem (!%p217_p9), [#allocation2], %s570_s6  ;;  %p260_p11 = scmp.lt.s32.totalorder (!%p217_p9), %s673_s11, 1 }
  0x2f   : > { %v276_v32 = vld [vmem:[%s837_s7] sm:$0xff] (!%p217_p9)  ;;  %v277_v33 = vld [vmem:[%s837_s7 + $0x8] sm:$0xff] (!%p217_p9)  ;;  %v278_v34 = vld [vmem:[%s837_s7 + $0x10] sm:$0xff] (!%p217_p9) }
  0x30   : > { %v279_v35 = vld [vmem:[%s837_s7 + $0x18] sm:$0xff] (!%p217_p9)  ;;  %v345_v36 = vmul.f32 (!%p217_p9), %v276_v32, %v276_v32  ;;  %v346_v37 = vmul.f32 (!%p217_p9), %v277_v33, %v277_v33  ;;  %v347_v38 = vmul.f32 (!%p217_p9), %v278_v34, %v278_v34  ;;  %v308_v39 = vadd.f32 (!%p217_p9), %v277_v33, %v276_v32  ;;  %v280_v40 = vld [vmem:[%s837_s7 + $0x20] sm:$0xff] (!%p217_p9)  ;;  %v281_v43 = vld [vmem:[%s837_s7 + $0x28] sm:$0xff] (!%p217_p9) }
  0x31   : > { %v348_v41 = vmul.f32 (!%p217_p9), %v279_v35, %v279_v35  ;;  %v349_v45 = vmul.f32 (!%p217_p9), %v280_v40, %v280_v40  ;;  %v292_v47 = vld [vmem:[%s837_s7 + $0x80] sm:$0xff] (!%p217_p9)  ;;  %v293_v48 = vld [vmem:[%s837_s7 + $0x88] sm:$0xff] (!%p217_p9)  ;;  %v282_v49 = vld [vmem:[%s837_s7 + $0x30] sm:$0xff] (!%p217_p9)  ;;  %v350_v52 = vmul.f32 (!%p217_p9), %v281_v43, %v281_v43 }
  0x32   : > { %v377_v42 = vadd.f32 (!%p217_p9), %v346_v37, %v345_v36  ;;  %v309_v44 = vadd.f32 (!%p217_p9), %v308_v39, %v278_v34  ;;  %v294_v51 = vld [vmem:[%s837_s7 + $0x90] sm:$0xff] (!%p217_p9)  ;;  %v361_v54 = vmul.f32 (!%p217_p9), %v292_v47, %v292_v47  ;;  %v362_v55 = vmul.f32 (!%p217_p9), %v293_v48, %v293_v48  ;;  %v283_v56 = vld [vmem:[%s837_s7 + $0x38] sm:$0xff] (!%p217_p9)  ;;  %v284_v62 = vld [vmem:[%s837_s7 + $0x40] sm:$0xff] (!%p217_p9) }
  0x33   : > { %v295_v58 = vld [vmem:[%s837_s7 + $0x98] sm:$0xff] (!%p217_p9)  ;;  %v351_v59 = vmul.f32 (!%p217_p9), %v282_v49, %v282_v49  ;;  %v363_v61 = vmul.f32 (!%p217_p9), %v294_v51, %v294_v51  ;;  %v296_v0 = vld [vmem:[%s837_s7 + $0xa0] sm:$0xff] (!%p217_p9)  ;;  %v352_v1 = vmul.f32 (!%p217_p9), %v283_v56, %v283_v56  ;;  %v285_v5 = vld [vmem:[%s837_s7 + $0x48] sm:$0xff] (!%p217_p9)  ;;  %v325_v8 = vadd.f32 (!%p217_p9), %v293_v48, %v292_v47 }
  0x34   : > { %v378_v46 = vadd.f32 %v377_v42, %v347_v38  ;;  %v310_v50 = vadd.f32 %v309_v44, %v279_v35  ;;  %v364_v3 = vmul.f32 %v295_v58, %v295_v58  ;;  %v394_v4 = vadd.f32 %v362_v55, %v361_v54  ;;  %v297_v7 = vld [vmem:[%s837_s7 + $0xa8] sm:$0xff]  ;;  %v286_v13 = vld [vmem:[%s837_s7 + $0x50] sm:$0xff]  ;;  %v287_v21 = vld [vmem:[%s837_s7 + $0x58] sm:$0xff]  ;;  %s918_s12 = smov (!%p258_p10, %s677_s12), 1  ;;  %s920_s11 = smov (!%p260_p11, %s673_s11), 1 }
  0x35   : > { %v353_v9 = vmul.f32 %v284_v62, %v284_v62  ;;  %v365_v11 = vmul.f32 %v296_v0, %v296_v0  ;;  %v298_v15 = vld [vmem:[%s837_s7 + $0xb0] sm:$0xff]  ;;  %v326_v16 = vadd.f32 %v325_v8, %v294_v51  ;;  %v354_v17 = vmul.f32 %v285_v5, %v285_v5  ;;  %v299_v23 = vld [vmem:[%s837_s7 + $0xb8] sm:$0xff]  ;;  %v288_v29 = vld [vmem:[%s837_s7 + $0x60] sm:$0xff]  ;;  %s571_s8 = sshll.u32 %s920_s11, 1  ;;  %s572_s9 = sshll.u32 %s918_s12, 2 }
  0x36   : > { %v379_v53 = vadd.f32 %v378_v46, %v348_v41  ;;  %v311_v57 = vadd.f32 %v310_v50, %v280_v40  ;;  %v395_v12 = vadd.f32 %v394_v4, %v363_v61  ;;  %v366_v19 = vmul.f32 %v297_v7, %v297_v7  ;;  %v300_v31 = vld [vmem:[%s837_s7 + $0xc0] sm:$0xff]  ;;  %v289_v37 = vld [vmem:[%s837_s7 + $0x68] sm:$0xff]  ;;  %v302_v47 = vld [vmem:[%s837_s7 + $0xd0] sm:$0xff]  ;;  %s264_s18 = sadd.s32 %s572_s9, %s571_s8 }
  0x37   : > { %v327_v24 = vadd.f32 %v326_v16, %v295_v58  ;;  %v355_v25 = vmul.f32 %v286_v13, %v286_v13  ;;  %v367_v27 = vmul.f32 %v298_v15, %v298_v15  ;;  %v356_v33 = vmul.f32 %v287_v21, %v287_v21  ;;  %v301_v39 = vld [vmem:[%s837_s7 + $0xc8] sm:$0xff]  ;;  %v303_v55 = vld [vmem:[%s837_s7 + $0xd8] sm:$0xff]  ;;  %s573_s19 = sshll.u32 %s264_s18, 3 }
  0x38   : > { %v380_v60 = vadd.f32 %v379_v53, %v349_v45  ;;  %v312_v63 = vadd.f32 %v311_v57, %v281_v43  ;;  %v396_v20 = vadd.f32 %v395_v12, %v364_v3  ;;  %v368_v35 = vmul.f32 %v299_v23, %v299_v23  ;;  %v290_v45 = vld [vmem:[%s837_s7 + $0x70] sm:$0xff]  ;;  %v291_v53 = vld [vmem:[%s837_s7 + $0x78] sm:$0xff]  ;;  %s266_s23 = scalar_lea.vmem %s903_s1, %s573_s19  ;;  %s275_s26 = scalar_lea.vmem %s904_s2, %s573_s19 }
  0x39   : > { %v328_v32 = vadd.f32 %v327_v24, %v296_v0  ;;  %v357_v41 = vmul.f32 %v288_v29, %v288_v29  ;;  %v369_v43 = vmul.f32 %v300_v31, %v300_v31  ;;  %v370_v51 = vmul.f32 %v301_v39, %v301_v39  ;;  %v307_v16 = vld [vmem:[%s837_s7 + $0xf8] sm:$0xff] }
  0x3a   : > { %v381_v2 = vadd.f32 %v380_v60, %v350_v52  ;;  %v313_v6 = vadd.f32 %v312_v63, %v282_v49  ;;  %v397_v28 = vadd.f32 %v396_v20, %v365_v11  ;;  %v358_v49 = vmul.f32 %v289_v37, %v289_v37  ;;  %v306_v11 = vld [vmem:[%s837_s7 + $0xf0] sm:$0xff] }
  0x3b   : > { %v329_v40 = vadd.f32 %v328_v32, %v297_v7  ;;  %v359_v57 = vmul.f32 %v290_v45, %v290_v45  ;;  %v360_v0 = vmul.f32 %v291_v53, %v291_v53 }
  0x3c   : > { %v382_v10 = vadd.f32 %v381_v2, %v351_v59  ;;  %v314_v14 = vadd.f32 %v313_v6, %v283_v56  ;;  %v398_v36 = vadd.f32 %v397_v28, %v366_v19  ;;  %v371_v59 = vmul.f32 %v302_v47, %v302_v47 }
  0x3d   : > { %v330_v48 = vadd.f32 %v329_v40, %v298_v15  ;;  %v372_v2 = vmul.f32 %v303_v55, %v303_v55 }
  0x3e   : > { %v383_v18 = vadd.f32 %v382_v10, %v352_v1  ;;  %v315_v22 = vadd.f32 %v314_v14, %v284_v62  ;;  %v399_v44 = vadd.f32 %v398_v36, %v367_v27  ;;  %v304_v62 = vld [vmem:[%s837_s7 + $0xe0] sm:$0xff] }
  0x3f   : > { %v331_v56 = vadd.f32 %v330_v48, %v299_v23  ;;  %v373_v8 = vmul.f32 %v304_v62, %v304_v62 }
  0x40   : > { %v384_v26 = vadd.f32 %v383_v18, %v353_v9  ;;  %v316_v30 = vadd.f32 %v315_v22, %v285_v5  ;;  %v400_v52 = vadd.f32 %v399_v44, %v368_v35  ;;  %v305_v5 = vld [vmem:[%s837_s7 + $0xe8] sm:$0xff]  ;;  %v375_v18 = vmul.f32 %v306_v11, %v306_v11 }
  0x41   : > { %v332_v63 = vadd.f32 %v331_v56, %v300_v31  ;;  %v374_v14 = vmul.f32 %v305_v5, %v305_v5 }
  0x42   : > { %v385_v34 = vadd.f32 %v384_v26, %v354_v17  ;;  %v317_v38 = vadd.f32 %v316_v30, %v286_v13  ;;  %v401_v60 = vadd.f32 %v400_v52, %v369_v43 }
  0x43   : > { %v333_v6 = vadd.f32 %v332_v63, %v301_v39 }
  0x44   : > { %v386_v42 = vadd.f32 %v385_v34, %v355_v25  ;;  %v318_v46 = vadd.f32 %v317_v38, %v287_v21  ;;  %v402_v3 = vadd.f32 %v401_v60, %v370_v51  ;;  %v376_v21 = vmul.f32 %v307_v16, %v307_v16 }
  0x45   : > { %v334_v12 = vadd.f32 %v333_v6, %v302_v47 }
  0x46   : > { %v387_v50 = vadd.f32 %v386_v42, %v356_v33  ;;  %v319_v54 = vadd.f32 %v318_v46, %v288_v29  ;;  %v403_v9 = vadd.f32 %v402_v3, %v371_v59 }
  0x47   : > { %v335_v17 = vadd.f32 %v334_v12, %v303_v55 }
  0x48   : > { %v388_v58 = vadd.f32 %v387_v50, %v357_v41  ;;  %v320_v61 = vadd.f32 %v319_v54, %v289_v37  ;;  %v404_v15 = vadd.f32 %v403_v9, %v372_v2 }
  0x49   : > { %v336_v20 = vadd.f32 %v335_v17, %v304_v62 }
  0x4a   : > { %v389_v1 = vadd.f32 %v388_v58, %v358_v49  ;;  %v321_v4 = vadd.f32 %v320_v61, %v290_v45  ;;  %v405_v19 = vadd.f32 %v404_v15, %v373_v8 }
  0x4b   : > { %v337_v23 = vadd.f32 %v336_v20, %v305_v5 }
  0x4c   : > { %v390_v7 = vadd.f32 %v389_v1, %v359_v57  ;;  %v322_v10 = vadd.f32 %v321_v4, %v291_v53  ;;  %v406_v22 = vadd.f32 %v405_v19, %v374_v14 }
  0x4d   : > { %v338_v25 = vadd.f32 %v337_v23, %v306_v11 }
  0x4e   : > { %v391_v13 = vadd.f32 %v390_v7, %v360_v0  ;;  %323 = vadd.xlane.f32.xlu0 %v322_v10  ;;  %v407_v24 = vadd.f32 %v406_v22, %v375_v18 }
  0x4f   : > { %v339_v27 = vadd.f32 %v338_v25, %v307_v16 }
  0x50   : > { %392 = vadd.xlane.f32.xlu1 %v391_v13  ;;  %v408_v26 = vadd.f32 %v407_v24, %v376_v21 }
  0x52   : > { %340 = vadd.xlane.f32.xlu0 %v339_v27 }
  0x54   : > { %409 = vadd.xlane.f32.xlu1 %v408_v26 }
  0xdb   : > { %v324_v28 = vpop.xlane.xlu0 %323 }
  0xdc   : > { %343 = vst.msk [vmem:[%s266_s23] sm:$0xff] %vm342_vm0, %v324_v28 }
  0xdd   : > { %v393_v29 = vpop.xlane.xlu1 %392 }
  0xde   : > { %411 = vst.msk [vmem:[%s275_s26] sm:$0xff] %vm342_vm0, %v393_v29 }
  0xdf   : > { %v341_v31 = vpop.xlane.xlu0 %340 }
  0xe0   : > { %344 = vst.msk [vmem:[%s266_s23 + $0x8] sm:$0xff] %vm342_vm0, %v341_v31 }
  0xe1   : > { %v410_v30 = vpop.xlane.xlu1 %409 }
  0xe2   : > { %412 = vst.msk [vmem:[%s275_s26 + $0x8] sm:$0xff] %vm342_vm0, %v410_v30 }
  0xe3 PF: > { %s13_s15 = sadd.s32 1, %s689_s15   ;;  %s905_s9 = smov %s669_s10 }
  0xe4   : > { %p10_p12 = scmp.ge.s32.totalorder %s13_s15, 6   ;;  %s906_s10 = smov %s757_s22 }
  0xe5   : > { %s907_s11 = smov %s681_s13  ;;  %s908_s12 = smov %s685_s14 }
  0xe6   : > { %s909_s13 = smov %s912_s16  ;;  %s910_s14 = smov %s916_s17 }
  0xe7   :  { %12 = sbr.rel (!%p10_p12) target bundleno = 4 (0x4), region = 94 }

// kernel: transition_bnin_forward.4
= control target key start
LH: loop header
LB: loop body
LE: loop exit
PB: predicated region body
PF: predicated region fallthrough
CT: control target
= control target key end

     0   :  { %s6908_s21 = smov 0   ;;  %s6910_s22 = smov 0   ;;  %s9825_s0 = inlined_call_operand.vmem [shape: f32[2,4096,16], index: 0, kind: input, shape index: {}]   ;;  %s9826_s1 = inlined_call_operand.vmem [shape: f32[2,1,16], index: 1, kind: input, shape index: {}]   ;;  %s9827_s2 = inlined_call_operand.vmem [shape: f32[2,1,16], index: 2, kind: input, shape index: {}]   ;;  %s9828_s3 = inlined_call_operand.vmem [shape: bf16[16,16], index: 3, kind: input, shape index: {}]   ;;  %s9829_s4 = inlined_call_operand.vmem [shape: bf16[2,4096,16], index: 4, kind: output, shape index: {0}]   ;;  %s9830_s5 = inlined_call_operand.vmem [shape: f32[2,2,1,16], index: 5, kind: output, shape index: {1}]   ;;  %s9831_s6 = inlined_call_operand.vmem [shape: f32[2,2,1,16], index: 6, kind: output, shape index: {2}]  }
   0x1   :  { %s6912_s23 = smov 0   ;;  %s6914_s24 = smov 0  }
   0x2   :  { %s6916_s25 = smov 0  }
   0x3 LB: > { %s26_s26 = sadd.s32 1, %s6863_s23  ;;  %s29_s27 = sadd.s32 1, %s6867_s24  ;;  %s6871_s25 = sphi %s6916_s25, %s17_s25   ;;  %s6867_s24 = sphi %s6914_s24, %s9898_s24   ;;  %s6863_s23 = sphi %s6912_s23, %s9897_s23   ;;  %s6859_s22 = sphi %s6910_s22, %s9896_s22   ;;  %s6855_s21 = sphi %s6908_s21, %s9895_s21  }
   0x4   : > { %p27_p0 = scmp.ge.s32.totalorder %s26_s26, 2  ;;  %p5741_p1 = scmp.ge.s32.totalorder %s6871_s25, 1 }
   0x5   : > { %p258_p2 = scmp.lt.s32.totalorder %s6871_s25, 5 }
   0x6   : > { %s9900_s26 = smov (%p27_p0, %s26_s26), 0  ;;  %s9902_s27 = smov (!%p27_p0, %s29_s27), %s6867_s24 }
   0x7   : > { %p259_p3 = pnand %p5741_p1, %p258_p2  ;;  %p31_p4 = scmp.ge.s32.totalorder %s9902_s27, 2 }
   0x9   : > { %s9904_s27 = smov (%p31_p4, %s9902_s27), 0  ;;  %262 = sbr.rel (%p259_p3) target bundleno = 776 (0x308), region = 36 }
  0x10   : > { %v6824_v0 = vld [vmem:[%s9828_s3] sm:$0xff]   ;;  %s5742_s30 = sshll.u32 %s6855_s21, 8  ;;  %p317_p5 = scmp.lt.s32.totalorder %s6859_s22, 1  ;;  %vm1531_vm0 = vcmask 130048   ;;  %vm3997_vm1 = vcmask 125952   ;;  %vm4771_vm2 = vcmask 122880  }
  0x11   : > { %p319_p6 = scmp.lt.s32.totalorder %s5742_s30, 511  ;;  %6524 = vmatprep.subr.bf16.mxu0 %v6824_v0  ;;  %6782 = vmatprep.subr.bf16.mxu1 %v6824_v0  ;;  %p344_p7 = scmp.lt.s32.totalorder %s6855_s21, 1 }
  0x12   : > { %6525 = vmatpush3.bf16.msra.mxu0 %v6824_v0  ;;  %s9906_s22 = smov (!%p317_p5, %s6859_s22), 1  ;;  %6783 = vmatpush3.bf16.msra.mxu1 %v6824_v0 }
  0x13   : > { %s9908_s30 = smov (!%p319_p6, %s5742_s30), 511  ;;  %s5743_s7 = sshll.u32 %s9906_s22, 9 }
  0x14   : > { %s6951_s10 = scalar_lea.vmem %s9826_s1, %s9906_s22  ;;  %s6953_s11 = sadd.s32 %s5743_s7, %s9908_s30 }
  0x15   : > { %s6959_s14 = scalar_lea.vmem %s9827_s2, %s9906_s22  ;;  %s5744_s15 = sshll.u32 %s6953_s11, 3  ;;  %v6963_v1 = vld [vmem:[%s6951_s10] ss:$0 sm:$0xff] }
  0x16   : > { %s6968_s18 = scalar_lea.vmem %s9825_s0, %s5744_s15  ;;  %v6971_v2 = vld [vmem:[%s6959_s14] ss:$0 sm:$0xff]  ;;  %s5747_s19 = sshll.u32 %s6953_s11, 2 }
  0x17   : > { %v357_v3 = vld [vmem:[%s6968_s18] sm:$0xff]  ;;  %v358_v4 = vld [vmem:[%s6968_s18 + $0x8] sm:$0xff]  ;;  %v359_v5 = vld [vmem:[%s6968_s18 + $0x10] sm:$0xff]  ;;  %s7648_s29 = scalar_lea.vmem %s9829_s4, %s5747_s19  ;;  %s9910_s21 = smov (!%p344_p7, %s6855_s21), 1 }
  0x18   : > { %v620_v6 = vmul.f32 %v6963_v1, %v357_v3  ;;  %v621_v7 = vmul.f32 %v6963_v1, %v358_v4  ;;  %v360_v8 = vld [vmem:[%s6968_s18 + $0x18] sm:$0xff]  ;;  %v622_v9 = vmul.f32 %v6963_v1, %v359_v5  ;;  %v361_v10 = vld [vmem:[%s6968_s18 + $0x20] sm:$0xff]  ;;  %v362_v11 = vld [vmem:[%s6968_s18 + $0x28] sm:$0xff]  ;;  %s5748_s30 = sshll.u32 %s9906_s22, 1 }
  0x19   : > { %v623_v12 = vmul.f32 %v6963_v1, %v360_v8  ;;  %v624_v13 = vmul.f32 %v6963_v1, %v361_v10  ;;  %v625_v14 = vmul.f32 %v6963_v1, %v362_v11  ;;  %v363_v15 = vld [vmem:[%s6968_s18 + $0x30] sm:$0xff]  ;;  %v364_v16 = vld [vmem:[%s6968_s18 + $0x38] sm:$0xff]  ;;  %v365_v25 = vld [vmem:[%s6968_s18 + $0x40] sm:$0xff]  ;;  %s347_s7 = sadd.s32 %s5748_s30, %s9910_s21 }
  0x1a   : > { %v883_v17 = vadd.f32 %v6971_v2, %v620_v6  ;;  %v884_v18 = vadd.f32 %v6971_v2, %v621_v7  ;;  %v885_v19 = vadd.f32 %v6971_v2, %v622_v9  ;;  %v626_v20 = vmul.f32 %v6963_v1, %v363_v15  ;;  %v366_v26 = vld [vmem:[%s6968_s18 + $0x48] sm:$0xff]  ;;  %v367_v38 = vld [vmem:[%s6968_s18 + $0x50] sm:$0xff]  ;;  %v368_v39 = vld [vmem:[%s6968_s18 + $0x58] sm:$0xff]  ;;  %s355_s13 = scalar_lea.vmem %s9831_s6, %s347_s7 }
  0x1b   : > { %v886_v21 = vadd.f32 %v6971_v2, %v623_v12  ;;  %v887_v22 = vadd.f32 %v6971_v2, %v624_v13  ;;  %v888_v23 = vadd.f32 %v6971_v2, %v625_v14  ;;  %v627_v24 = vmul.f32 %v6963_v1, %v364_v16  ;;  %v369_v42 = vld [vmem:[%s6968_s18 + $0x60] sm:$0xff]  ;;  %v370_v43 = vld [vmem:[%s6968_s18 + $0x68] sm:$0xff]  ;;  %v371_v60 = vld [vmem:[%s6968_s18 + $0x70] sm:$0xff] }
  0x1c   : > { %v1139_v27 = vmax.f32 %v883_v17, 0.0  ;;  %v1140_v28 = vmax.f32 %v884_v18, 0.0  ;;  %v1141_v29 = vmax.f32 %v885_v19, 0.0  ;;  %v889_v30 = vadd.f32 %v6971_v2, %v626_v20  ;;  %v372_v61 = vld [vmem:[%s6968_s18 + $0x78] sm:$0xff]  ;;  %v373_v62 = vld [vmem:[%s6968_s18 + $0x80] sm:$0xff]  ;;  %v374_v63 = vld [vmem:[%s6968_s18 + $0x88] sm:$0xff] }
  0x1d   : > { %v1142_v31 = vmax.f32 %v886_v21, 0.0  ;;  %v1143_v32 = vmax.f32 %v887_v22, 0.0  ;;  %v1144_v33 = vmax.f32 %v888_v23, 0.0  ;;  %v890_v34 = vadd.f32 %v6971_v2, %v627_v24  ;;  %v375_v16 = vld [vmem:[%s6968_s18 + $0x90] sm:$0xff]  ;;  %v376_v17 = vld [vmem:[%s6968_s18 + $0x98] sm:$0xff]  ;;  %v377_v18 = vld [vmem:[%s6968_s18 + $0xa0] sm:$0xff] }
  0x1e   : > { %v1395_v35 = vpack.c.bf16 %v1140_v28, %v1139_v27  ;;  %v628_v36 = vmul.f32 %v6963_v1, %v365_v25  ;;  %v629_v37 = vmul.f32 %v6963_v1, %v366_v26  ;;  %v1145_v46 = vmax.f32 %v889_v30, 0.0  ;;  %v378_v19 = vld [vmem:[%s6968_s18 + $0xa8] sm:$0xff] }
  0x1f   : > { %v1396_v40 = vpack.c.bf16 %v1142_v31, %v1141_v29  ;;  %v1397_v41 = vpack.c.bf16 %v1144_v33, %v1143_v32  ;;  %v1146_v47 = vmax.f32 %v890_v34, 0.0  ;;  %v630_v48 = vmul.f32 %v6963_v1, %v367_v38  ;;  %v379_v34 = vld [vmem:[%s6968_s18 + $0xb0] sm:$0xff] }
  0x20   : > { %6526 = vmatprep.mubr.msk.bf16.mxu0 %vm1531_vm0, %v1395_v35  ;;  %v891_v44 = vadd.f32 %v6971_v2, %v628_v36  ;;  %v892_v45 = vadd.f32 %v6971_v2, %v629_v37  ;;  %v631_v49 = vmul.f32 %v6963_v1, %v368_v39  ;;  %v632_v52 = vmul.f32 %v6963_v1, %v369_v42  ;;  %v380_v35 = vld [vmem:[%s6968_s18 + $0xb8] sm:$0xff]  ;;  %v381_v36 = vld [vmem:[%s6968_s18 + $0xc0] sm:$0xff]  ;;  %v382_v37 = vld [vmem:[%s6968_s18 + $0xc8] sm:$0xff] }
  0x21   : > { %6527 = vmatmul.mubr.msk.bf16.vlgmr.msra.gmra.mrb[0].mxu0 %vm1531_vm0, %v1396_v40  ;;  %v633_v53 = vmul.f32 %v6963_v1, %v370_v43  ;;  %v1398_v54 = vpack.c.bf16 %v1146_v47, %v1145_v46  ;;  %v893_v55 = vadd.f32 %v6971_v2, %v630_v48  ;;  %v634_v4 = vmul.f32 %v6963_v1, %v371_v60 }
  0x22   : > { %6530 = vmatprep.mubr.msk.bf16.mxu0 %vm1531_vm0, %v1397_v41  ;;  %v1147_v50 = vmax.f32 %v891_v44, 0.0  ;;  %v1148_v51 = vmax.f32 %v892_v45, 0.0  ;;  %v894_v56 = vadd.f32 %v6971_v2, %v631_v49  ;;  %v895_v58 = vadd.f32 %v6971_v2, %v632_v52  ;;  %v383_v52 = vld [vmem:[%s6968_s18 + $0xd0] sm:$0xff] }
  0x23   : > { %v896_v59 = vadd.f32 %v6971_v2, %v633_v53  ;;  %v1149_v0 = vmax.f32 %v893_v55, 0.0  ;;  %v635_v5 = vmul.f32 %v6963_v1, %v372_v61  ;;  %v636_v8 = vmul.f32 %v6963_v1, %v373_v62  ;;  %v384_v53 = vld [vmem:[%s6968_s18 + $0xd8] sm:$0xff]  ;;  %v386_v55 = vld [vmem:[%s6968_s18 + $0xe8] sm:$0xff] }
  0x24   : > { %v1399_v57 = vpack.c.bf16 %v1148_v51, %v1147_v50  ;;  %v1150_v3 = vmax.f32 %v894_v56, 0.0  ;;  %v1151_v6 = vmax.f32 %v895_v58, 0.0  ;;  %v637_v9 = vmul.f32 %v6963_v1, %v374_v63 }
  0x25   : > { %v1152_v7 = vmax.f32 %v896_v59, 0.0  ;;  %v897_v11 = vadd.f32 %v6971_v2, %v634_v4  ;;  %v898_v12 = vadd.f32 %v6971_v2, %v635_v5  ;;  %v899_v14 = vadd.f32 %v6971_v2, %v636_v8  ;;  %v387_v8 = vld [vmem:[%s6968_s18 + $0xf0] sm:$0xff] }
  0x26   : > { %v1400_v10 = vpack.c.bf16 %v1150_v3, %v1149_v0  ;;  %v900_v15 = vadd.f32 %v6971_v2, %v637_v9  ;;  %v638_v22 = vmul.f32 %v6963_v1, %v375_v16  ;;  %v639_v23 = vmul.f32 %v6963_v1, %v376_v17  ;;  %v388_v9 = vld [vmem:[%s6968_s18 + $0xf8] sm:$0xff] }
  0x27   : > { %v1401_v13 = vpack.c.bf16 %v1152_v7, %v1151_v6  ;;  %v1153_v20 = vmax.f32 %v897_v11, 0.0  ;;  %v1154_v21 = vmax.f32 %v898_v12, 0.0  ;;  %v1155_v24 = vmax.f32 %v899_v14, 0.0  ;;  %v390_v11 = vld [vmem:[%s6968_s18 + $0x108] sm:$0xff] }
  0x28   : > { %v1156_v25 = vmax.f32 %v900_v15, 0.0  ;;  %v640_v26 = vmul.f32 %v6963_v1, %v377_v18  ;;  %v641_v27 = vmul.f32 %v6963_v1, %v378_v19  ;;  %v901_v29 = vadd.f32 %v6971_v2, %v638_v22 }
  0x29   : > { %6531 = vmatmul.mubr.msk.bf16.gmra.mrb[4].mxu0 %vm1531_vm0, %v1398_v54  ;;  %v1402_v28 = vpack.c.bf16 %v1154_v21, %v1153_v20  ;;  %v902_v30 = vadd.f32 %v6971_v2, %v639_v23  ;;  %v642_v40 = vmul.f32 %v6963_v1, %v379_v34  ;;  %v643_v41 = vmul.f32 %v6963_v1, %v380_v35  ;;  %v385_v54 = vld [vmem:[%s6968_s18 + $0xe0] sm:$0xff] }
  0x2a   : > { %6534 = vmatprep.mubr.msk.bf16.mxu0 %vm1531_vm0, %v1399_v57  ;;  %v1403_v31 = vpack.c.bf16 %v1156_v25, %v1155_v24  ;;  %v903_v32 = vadd.f32 %v6971_v2, %v640_v26  ;;  %v904_v33 = vadd.f32 %v6971_v2, %v641_v27  ;;  %v1157_v38 = vmax.f32 %v901_v29, 0.0  ;;  %v391_v26 = vld [vmem:[%s6968_s18 + $0x110] sm:$0xff]  ;;  %v392_v27 = vld [vmem:[%s6968_s18 + $0x118] sm:$0xff]  ;;  %v394_v29 = vld [vmem:[%s6968_s18 + $0x128] sm:$0xff] }
  0x2b   : > { %v1158_v39 = vmax.f32 %v902_v30, 0.0  ;;  %v644_v44 = vmul.f32 %v6963_v1, %v381_v36  ;;  %v645_v45 = vmul.f32 %v6963_v1, %v382_v37  ;;  %v905_v47 = vadd.f32 %v6971_v2, %v642_v40 }
  0x2c   : > { %v1159_v42 = vmax.f32 %v903_v32, 0.0  ;;  %v1160_v43 = vmax.f32 %v904_v33, 0.0  ;;  %v906_v48 = vadd.f32 %v6971_v2, %v643_v41  ;;  %v646_v58 = vmul.f32 %v6963_v1, %v383_v52 }
  0x2d   : > { %v1404_v46 = vpack.c.bf16 %v1158_v39, %v1157_v38  ;;  %v907_v50 = vadd.f32 %v6971_v2, %v644_v44  ;;  %v908_v51 = vadd.f32 %v6971_v2, %v645_v45  ;;  %v1161_v56 = vmax.f32 %v905_v47, 0.0  ;;  %v395_v44 = vld [vmem:[%s6968_s18 + $0x130] sm:$0xff]  ;;  %v396_v45 = vld [vmem:[%s6968_s18 + $0x138] sm:$0xff]  ;;  %v398_v47 = vld [vmem:[%s6968_s18 + $0x148] sm:$0xff] }
  0x2e   : > { %v1405_v49 = vpack.c.bf16 %v1160_v43, %v1159_v42  ;;  %v1162_v57 = vmax.f32 %v906_v48, 0.0  ;;  %v647_v59 = vmul.f32 %v6963_v1, %v384_v53  ;;  %v648_v62 = vmul.f32 %v6963_v1, %v385_v54 }
  0x2f   : > { %v1163_v60 = vmax.f32 %v907_v50, 0.0  ;;  %v1164_v61 = vmax.f32 %v908_v51, 0.0  ;;  %v649_v63 = vmul.f32 %v6963_v1, %v386_v55  ;;  %v909_v3 = vadd.f32 %v6971_v2, %v646_v58 }
  0x30   : > { %v1406_v0 = vpack.c.bf16 %v1162_v57, %v1161_v56  ;;  %v910_v4 = vadd.f32 %v6971_v2, %v647_v59  ;;  %v911_v6 = vadd.f32 %v6971_v2, %v648_v62  ;;  %v650_v14 = vmul.f32 %v6963_v1, %v387_v8  ;;  %v399_v62 = vld [vmem:[%s6968_s18 + $0x150] sm:$0xff] }
  0x31   : > { %6535 = vmatmul.mubr.msk.bf16.gmra.mrb[8].mxu0 %vm1531_vm0, %v1400_v10  ;;  %v1407_v5 = vpack.c.bf16 %v1164_v61, %v1163_v60  ;;  %v912_v7 = vadd.f32 %v6971_v2, %v649_v63  ;;  %v389_v10 = vld [vmem:[%s6968_s18 + $0x100] sm:$0xff]  ;;  %v1165_v12 = vmax.f32 %v909_v3, 0.0  ;;  %v651_v15 = vmul.f32 %v6963_v1, %v388_v9  ;;  %v400_v63 = vld [vmem:[%s6968_s18 + $0x158] sm:$0xff]  ;;  %v402_v3 = vld [vmem:[%s6968_s18 + $0x168] sm:$0xff] }
  0x32   : > { %6538 = vmatprep.mubr.msk.bf16.mxu0 %vm1531_vm0, %v1401_v13  ;;  %v1166_v13 = vmax.f32 %v910_v4, 0.0  ;;  %v1167_v16 = vmax.f32 %v911_v6, 0.0  ;;  %v652_v18 = vmul.f32 %v6963_v1, %v389_v10  ;;  %v653_v19 = vmul.f32 %v6963_v1, %v390_v11 }
  0x33   : > { %v1168_v17 = vmax.f32 %v912_v7, 0.0  ;;  %v913_v21 = vadd.f32 %v6971_v2, %v650_v14  ;;  %v914_v22 = vadd.f32 %v6971_v2, %v651_v15  ;;  %v654_v32 = vmul.f32 %v6963_v1, %v391_v26 }
  0x34   : > { %v1408_v20 = vpack.c.bf16 %v1166_v13, %v1165_v12  ;;  %v915_v24 = vadd.f32 %v6971_v2, %v652_v18  ;;  %v916_v25 = vadd.f32 %v6971_v2, %v653_v19  ;;  %v655_v33 = vmul.f32 %v6963_v1, %v392_v27  ;;  %v403_v18 = vld [vmem:[%s6968_s18 + $0x170] sm:$0xff]  ;;  %v404_v19 = vld [vmem:[%s6968_s18 + $0x178] sm:$0xff] }
  0x35   : > { %v1409_v23 = vpack.c.bf16 %v1168_v17, %v1167_v16  ;;  %v1169_v30 = vmax.f32 %v913_v21, 0.0  ;;  %v657_v37 = vmul.f32 %v6963_v1, %v394_v29  ;;  %v917_v39 = vadd.f32 %v6971_v2, %v654_v32  ;;  %v406_v21 = vld [vmem:[%s6968_s18 + $0x188] sm:$0xff] }
  0x36   : > { %v1171_v34 = vmax.f32 %v915_v24, 0.0  ;;  %v1172_v35 = vmax.f32 %v916_v25, 0.0  ;;  %v918_v40 = vadd.f32 %v6971_v2, %v655_v33  ;;  %v658_v50 = vmul.f32 %v6963_v1, %v395_v44 }
  0x37   : > { %v920_v43 = vadd.f32 %v6971_v2, %v657_v37  ;;  %v1173_v48 = vmax.f32 %v917_v39, 0.0  ;;  %v659_v51 = vmul.f32 %v6963_v1, %v396_v45  ;;  %v661_v55 = vmul.f32 %v6963_v1, %v398_v47  ;;  %v408_v37 = vld [vmem:[%s6968_s18 + $0x198] sm:$0xff]  ;;  %v410_v39 = vld [vmem:[%s6968_s18 + $0x1a8] sm:$0xff] }
  0x38   : > { %v1411_v41 = vpack.c.bf16 %v1172_v35, %v1171_v34  ;;  %v921_v57 = vadd.f32 %v6971_v2, %v658_v50  ;;  %v662_v6 = vmul.f32 %v6963_v1, %v399_v62  ;;  %v663_v7 = vmul.f32 %v6963_v1, %v400_v63 }
  0x39   : > { %6539 = vmatmul.mubr.msk.bf16.gmra.mrb[12].mxu0 %vm1531_vm0, %v1402_v28  ;;  %v393_v28 = vld [vmem:[%s6968_s18 + $0x120] sm:$0xff]  ;;  %v1176_v53 = vmax.f32 %v920_v43, 0.0  ;;  %v922_v58 = vadd.f32 %v6971_v2, %v659_v51  ;;  %v924_v61 = vadd.f32 %v6971_v2, %v661_v55  ;;  %v665_v11 = vmul.f32 %v6963_v1, %v402_v3  ;;  %v412_v55 = vld [vmem:[%s6968_s18 + $0x1b8] sm:$0xff] }
  0x3a   : > { %6542 = vmatprep.mubr.msk.bf16.mxu0 %vm1531_vm0, %v1403_v31  ;;  %v1170_v31 = vmax.f32 %v914_v22, 0.0  ;;  %v656_v36 = vmul.f32 %v6963_v1, %v393_v28  ;;  %v1177_v4 = vmax.f32 %v921_v57, 0.0  ;;  %v925_v13 = vadd.f32 %v6971_v2, %v662_v6  ;;  %v414_v57 = vld [vmem:[%s6968_s18 + $0x1c8] sm:$0xff] }
  0x3b   : > { %v1180_v9 = vmax.f32 %v924_v61, 0.0  ;;  %v926_v14 = vadd.f32 %v6971_v2, %v663_v7  ;;  %v928_v17 = vadd.f32 %v6971_v2, %v665_v11  ;;  %v666_v24 = vmul.f32 %v6963_v1, %v403_v18  ;;  %v416_v11 = vld [vmem:[%s6968_s18 + $0x1d8] sm:$0xff] }
  0x3c   : > { %v1410_v38 = vpack.c.bf16 %v1170_v31, %v1169_v30  ;;  %v919_v42 = vadd.f32 %v6971_v2, %v656_v36  ;;  %v1181_v22 = vmax.f32 %v925_v13, 0.0  ;;  %v667_v25 = vmul.f32 %v6963_v1, %v404_v19  ;;  %v407_v36 = vld [vmem:[%s6968_s18 + $0x190] sm:$0xff]  ;;  %v418_v13 = vld [vmem:[%s6968_s18 + $0x1e8] sm:$0xff] }
  0x3d   : > { %v1184_v27 = vmax.f32 %v928_v17, 0.0  ;;  %v669_v29 = vmul.f32 %v6963_v1, %v406_v21  ;;  %v929_v31 = vadd.f32 %v6971_v2, %v666_v24  ;;  %v671_v43 = vmul.f32 %v6963_v1, %v408_v37 }
  0x3e   : > { %v1175_v52 = vmax.f32 %v919_v42, 0.0  ;;  %v930_v32 = vadd.f32 %v6971_v2, %v667_v25  ;;  %v670_v42 = vmul.f32 %v6963_v1, %v407_v36  ;;  %v673_v47 = vmul.f32 %v6963_v1, %v410_v39 }
  0x3f   : > { %v932_v35 = vadd.f32 %v6971_v2, %v669_v29  ;;  %v934_v50 = vadd.f32 %v6971_v2, %v671_v43  ;;  %v675_v61 = vmul.f32 %v6963_v1, %v412_v55  ;;  %v677_v3 = vmul.f32 %v6963_v1, %v414_v57  ;;  %v420_v29 = vld [vmem:[%s6968_s18 + $0x1f8] sm:$0xff] }
  0x40   : > { %v1413_v59 = vpack.c.bf16 %v1176_v53, %v1175_v52  ;;  %v936_v53 = vadd.f32 %v6971_v2, %v673_v47  ;;  %v679_v17 = vmul.f32 %v6963_v1, %v416_v11  ;;  %v681_v21 = vmul.f32 %v6963_v1, %v418_v13  ;;  %v430_v13 = vld [vmem:[%s6968_s18 + $0x248] sm:$0xff] }
  0x41   : > { %6543 = vmatmul.mubr.msk.bf16.gmra.mrb[16].mxu0 %vm1531_vm0, %v1404_v46  ;;  %v397_v46 = vld [vmem:[%s6968_s18 + $0x140] sm:$0xff]  ;;  %v1188_v45 = vmax.f32 %v932_v35, 0.0  ;;  %v938_v6 = vadd.f32 %v6971_v2, %v675_v61  ;;  %v683_v35 = vmul.f32 %v6963_v1, %v420_v29 }
  0x42   : > { %6546 = vmatprep.mubr.msk.bf16.mxu0 %vm1531_vm0, %v1405_v49  ;;  %v1174_v49 = vmax.f32 %v918_v40, 0.0  ;;  %v660_v54 = vmul.f32 %v6963_v1, %v397_v46  ;;  %v1185_v40 = vmax.f32 %v929_v31, 0.0  ;;  %v1192_v63 = vmax.f32 %v936_v53, 0.0  ;;  %v422_v31 = vld [vmem:[%s6968_s18 + $0x208] sm:$0xff] }
  0x43   : > { %v942_v24 = vadd.f32 %v6971_v2, %v679_v17  ;;  %v685_v39 = vmul.f32 %v6963_v1, %v422_v31  ;;  %v946_v43 = vadd.f32 %v6971_v2, %v683_v35  ;;  %v431_v31 = vld [vmem:[%s6968_s18 + $0x250] sm:$0xff] }
  0x44   : > { %v1412_v56 = vpack.c.bf16 %v1174_v49, %v1173_v48  ;;  %v923_v60 = vadd.f32 %v6971_v2, %v660_v54  ;;  %v933_v49 = vadd.f32 %v6971_v2, %v670_v42  ;;  %v411_v54 = vld [vmem:[%s6968_s18 + $0x1b0] sm:$0xff] }
  0x45   : > { %v948_v47 = vadd.f32 %v6971_v2, %v685_v39  ;;  %v1202_v53 = vmax.f32 %v946_v43, 0.0  ;;  %v489_v39 = vld [vmem:[%s6968_s18 + $0x420] sm:$0xff]  ;;  %v434_v43 = vld [vmem:[%s6968_s18 + $0x268] sm:$0xff] }
  0x46   : > { %v1179_v8 = vmax.f32 %v923_v60, 0.0  ;;  %v674_v60 = vmul.f32 %v6963_v1, %v411_v54 }
  0x48   : > { %v1415_v15 = vpack.c.bf16 %v1180_v9, %v1179_v8  ;;  %v940_v9 = vadd.f32 %v6971_v2, %v677_v3  ;;  %v486_v3 = vld [vmem:[%s6968_s18 + $0x408] sm:$0xff] }
  0x49   : > { %6547 = vmatmul.mubr.msk.bf16.gmra.mrb[20].mxu0 %vm1531_vm0, %v1406_v0  ;;  %v401_v0 = vld [vmem:[%s6968_s18 + $0x160] sm:$0xff] }
  0x4a   : > { %6550 = vmatprep.mubr.msk.bf16.mxu0 %vm1531_vm0, %v1407_v5  ;;  %v1178_v5 = vmax.f32 %v922_v58, 0.0  ;;  %v664_v10 = vmul.f32 %v6963_v1, %v401_v0  ;;  %v1189_v58 = vmax.f32 %v933_v49, 0.0  ;;  %v1196_v19 = vmax.f32 %v940_v9, 0.0  ;;  %v487_v9 = vld [vmem:[%s6968_s18 + $0x410] sm:$0xff] }
  0x4c   : > { %v1414_v12 = vpack.c.bf16 %v1178_v5, %v1177_v4  ;;  %v927_v16 = vadd.f32 %v6971_v2, %v664_v10  ;;  %v937_v5 = vadd.f32 %v6971_v2, %v674_v60  ;;  %v415_v10 = vld [vmem:[%s6968_s18 + $0x1d0] sm:$0xff] }
  0x4d   : > { %v427_v60 = vld [vmem:[%s6968_s18 + $0x230] sm:$0xff] }
  0x4e   : > { %v1183_v26 = vmax.f32 %v927_v16, 0.0  ;;  %v678_v16 = vmul.f32 %v6963_v1, %v415_v10  ;;  %v488_v10 = vld [vmem:[%s6968_s18 + $0x418] sm:$0xff] }
  0x50   : > { %v1417_v33 = vpack.c.bf16 %v1184_v27, %v1183_v26  ;;  %v944_v27 = vadd.f32 %v6971_v2, %v681_v21 }
  0x51   : > { %6551 = vmatmul.mubr.msk.bf16.gmra.mrb[24].mxu0 %vm1531_vm0, %v1408_v20  ;;  %v405_v20 = vld [vmem:[%s6968_s18 + $0x180] sm:$0xff] }
  0x52   : > { %6554 = vmatprep.mubr.msk.bf16.mxu0 %vm1531_vm0, %v1409_v23  ;;  %v1182_v23 = vmax.f32 %v926_v14, 0.0  ;;  %v668_v28 = vmul.f32 %v6963_v1, %v405_v20  ;;  %v1193_v14 = vmax.f32 %v937_v5, 0.0  ;;  %v1200_v37 = vmax.f32 %v944_v27, 0.0 }
  0x54   : > { %v1416_v30 = vpack.c.bf16 %v1182_v23, %v1181_v22  ;;  %v931_v34 = vadd.f32 %v6971_v2, %v668_v28  ;;  %v941_v23 = vadd.f32 %v6971_v2, %v678_v16  ;;  %v419_v28 = vld [vmem:[%s6968_s18 + $0x1f0] sm:$0xff] }
  0x56   : > { %v1187_v44 = vmax.f32 %v931_v34, 0.0  ;;  %v682_v34 = vmul.f32 %v6963_v1, %v419_v28 }
  0x58   : > { %v1419_v51 = vpack.c.bf16 %v1188_v45, %v1187_v44  ;;  %v945_v42 = vadd.f32 %v6971_v2, %v682_v34  ;;  %v424_v44 = vld [vmem:[%s6968_s18 + $0x218] sm:$0xff] }
  0x59   : > { %6555 = vmatmul.mubr.msk.bf16.gmra.mrb[28].mxu0 %vm1531_vm0, %v1410_v38  ;;  %v409_v38 = vld [vmem:[%s6968_s18 + $0x1a0] sm:$0xff] }
  0x5a   : > { %6558 = vmatprep.mubr.msk.bf16.mxu0 %vm1531_vm0, %v1411_v41  ;;  %v1186_v41 = vmax.f32 %v930_v32, 0.0  ;;  %v672_v46 = vmul.f32 %v6963_v1, %v409_v38  ;;  %v1197_v32 = vmax.f32 %v941_v23, 0.0 }
  0x5c   : > { %v1418_v48 = vpack.c.bf16 %v1186_v41, %v1185_v40  ;;  %v935_v52 = vadd.f32 %v6971_v2, %v672_v46  ;;  %v423_v40 = vld [vmem:[%s6968_s18 + $0x210] sm:$0xff] }
  0x5d   : > { %v686_v49 = vmul.f32 %v6963_v1, %v423_v40  ;;  %v490_v40 = vld [vmem:[%s6968_s18 + $0x428] sm:$0xff] }
  0x5e   : > { %v1191_v62 = vmax.f32 %v935_v52, 0.0  ;;  %v1201_v52 = vmax.f32 %v945_v42, 0.0 }
  0x60   : > { %v1421_v7 = vpack.c.bf16 %v1192_v63, %v1191_v62  ;;  %v1426_v61 = vpack.c.bf16 %v1202_v53, %v1201_v52  ;;  %v428_v63 = vld [vmem:[%s6968_s18 + $0x238] sm:$0xff] }
  0x61   : > { %6559 = vmatmul.mubr.msk.bf16.gmra.mrb[32].mxu0 %vm1531_vm0, %v1412_v56  ;;  %v413_v56 = vld [vmem:[%s6968_s18 + $0x1c0] sm:$0xff]  ;;  %v691_v17 = vmul.f32 %v6963_v1, %v428_v63 }
  0x62   : > { %6562 = vmatprep.mubr.msk.bf16.mxu0 %vm1531_vm0, %v1413_v59  ;;  %v1190_v59 = vmax.f32 %v934_v50, 0.0  ;;  %v676_v0 = vmul.f32 %v6963_v1, %v413_v56  ;;  %v426_v50 = vld [vmem:[%s6968_s18 + $0x228] sm:$0xff]  ;;  %v1204_v56 = vmax.f32 %v948_v47, 0.0  ;;  %v492_v47 = vld [vmem:[%s6968_s18 + $0x438] sm:$0xff] }
  0x63   : > { %v689_v57 = vmul.f32 %v6963_v1, %v426_v50  ;;  %v954_v35 = vadd.f32 %v6971_v2, %v691_v17 }
  0x64   : > { %v1420_v4 = vpack.c.bf16 %v1190_v59, %v1189_v58  ;;  %v939_v8 = vadd.f32 %v6971_v2, %v676_v0  ;;  %v949_v58 = vadd.f32 %v6971_v2, %v686_v49  ;;  %v485_v0 = vld [vmem:[%s6968_s18 + $0x400] sm:$0xff] }
  0x65   : > { %v952_v5 = vadd.f32 %v6971_v2, %v689_v57  ;;  %v697_v57 = vmul.f32 %v6963_v1, %v434_v43 }
  0x66   : > { %v1195_v18 = vmax.f32 %v939_v8, 0.0  ;;  %v749_v8 = vmul.f32 %v6963_v1, %v486_v3  ;;  %v1205_v11 = vmax.f32 %v949_v58, 0.0 }
  0x68   : > { %v1423_v25 = vpack.c.bf16 %v1196_v19, %v1195_v18  ;;  %v1012_v19 = vadd.f32 %v6971_v2, %v749_v8 }
  0x69   : > { %6563 = vmatmul.mubr.msk.bf16.gmra.mrb[36].mxu0 %vm1531_vm0, %v1414_v12  ;;  %v417_v12 = vld [vmem:[%s6968_s18 + $0x1e0] sm:$0xff] }
  0x6a   : > { %6566 = vmatprep.mubr.msk.bf16.mxu0 %vm1531_vm0, %v1415_v15  ;;  %v1194_v15 = vmax.f32 %v938_v6, 0.0  ;;  %v680_v20 = vmul.f32 %v6963_v1, %v417_v12  ;;  %v429_v6 = vld [vmem:[%s6968_s18 + $0x240] sm:$0xff]  ;;  %v690_v12 = vmul.f32 %v6963_v1, %v427_v60  ;;  %v1268_v27 = vmax.f32 %v1012_v19, 0.0  ;;  %v438_v19 = vld [vmem:[%s6968_s18 + $0x288] sm:$0xff] }
  0x6b   : > { %v692_v21 = vmul.f32 %v6963_v1, %v429_v6 }
  0x6c   : > { %v1422_v22 = vpack.c.bf16 %v1194_v15, %v1193_v14  ;;  %v943_v26 = vadd.f32 %v6971_v2, %v680_v20  ;;  %v750_v14 = vmul.f32 %v6963_v1, %v487_v9  ;;  %v751_v15 = vmul.f32 %v6963_v1, %v488_v10 }
  0x6e   : > { %v1199_v36 = vmax.f32 %v943_v26, 0.0  ;;  %v1014_v23 = vadd.f32 %v6971_v2, %v751_v15  ;;  %v493_v15 = vld [vmem:[%s6968_s18 + $0x440] sm:$0xff] }
  0x70   : > { %v1425_v45 = vpack.c.bf16 %v1200_v37, %v1199_v36  ;;  %v1270_v29 = vmax.f32 %v1014_v23, 0.0  ;;  %v955_v36 = vadd.f32 %v6971_v2, %v692_v21  ;;  %v433_v37 = vld [vmem:[%s6968_s18 + $0x260] sm:$0xff]  ;;  %v496_v23 = vld [vmem:[%s6968_s18 + $0x458] sm:$0xff] }
  0x71   : > { %6567 = vmatmul.mubr.msk.bf16.gmra.mrb[40].mxu0 %vm1531_vm0, %v1416_v30  ;;  %v421_v30 = vld [vmem:[%s6968_s18 + $0x200] sm:$0xff]  ;;  %v696_v53 = vmul.f32 %v6963_v1, %v433_v37 }
  0x72   : > { %6570 = vmatprep.mubr.msk.bf16.mxu0 %vm1531_vm0, %v1417_v33  ;;  %v1198_v33 = vmax.f32 %v942_v24, 0.0  ;;  %v684_v38 = vmul.f32 %v6963_v1, %v421_v30  ;;  %v1208_v24 = vmax.f32 %v952_v5, 0.0  ;;  %v953_v30 = vadd.f32 %v6971_v2, %v690_v12  ;;  %v436_v5 = vld [vmem:[%s6968_s18 + $0x278] sm:$0xff] }
  0x73   : > { %v1211_v60 = vmax.f32 %v955_v36, 0.0  ;;  %v959_v8 = vadd.f32 %v6971_v2, %v696_v53 }
  0x74   : > { %v1424_v41 = vpack.c.bf16 %v1198_v33, %v1197_v32  ;;  %v947_v46 = vadd.f32 %v6971_v2, %v684_v38  ;;  %v432_v32 = vld [vmem:[%s6968_s18 + $0x258] sm:$0xff]  ;;  %v1209_v52 = vmax.f32 %v953_v30, 0.0  ;;  %v439_v30 = vld [vmem:[%s6968_s18 + $0x290] sm:$0xff] }
  0x75   : > { %v695_v49 = vmul.f32 %v6963_v1, %v432_v32  ;;  %v702_v43 = vmul.f32 %v6963_v1, %v439_v30 }
  0x76   : > { %v1203_v55 = vmax.f32 %v947_v46, 0.0  ;;  %v491_v46 = vld [vmem:[%s6968_s18 + $0x430] sm:$0xff] }
  0x77   : > { %v754_v50 = vmul.f32 %v6963_v1, %v491_v46 }
  0x79   : > { %6571 = vmatmul.mubr.msk.bf16.gmra.mrb[44].mxu0 %vm1531_vm0, %v1418_v48  ;;  %v425_v48 = vld [vmem:[%s6968_s18 + $0x220] sm:$0xff]  ;;  %v1017_v58 = vadd.f32 %v6971_v2, %v754_v50 }
  0x7a   : > { %6574 = vmatprep.mubr.msk.bf16.mxu0 %vm1531_vm0, %v1419_v51  ;;  %v687_v51 = vmul.f32 %v6963_v1, %v424_v44  ;;  %v688_v54 = vmul.f32 %v6963_v1, %v425_v48  ;;  %v752_v44 = vmul.f32 %v6963_v1, %v489_v39  ;;  %v694_v48 = vmul.f32 %v6963_v1, %v431_v31  ;;  %v440_v31 = vld [vmem:[%s6968_s18 + $0x298] sm:$0xff] }
  0x7b   : > { %v1273_v6 = vmax.f32 %v1017_v58, 0.0 }
  0x7c   : > { %v950_v59 = vadd.f32 %v6971_v2, %v687_v51  ;;  %v951_v62 = vadd.f32 %v6971_v2, %v688_v54  ;;  %v755_v51 = vmul.f32 %v6963_v1, %v492_v47  ;;  %v1015_v54 = vadd.f32 %v6971_v2, %v752_v44 }
  0x7d   : > { %v957_v3 = vadd.f32 %v6971_v2, %v694_v48  ;;  %v703_v44 = vmul.f32 %v6963_v1, %v440_v31 }
  0x7e   : > { %v1206_v16 = vmax.f32 %v950_v59, 0.0  ;;  %v1207_v20 = vmax.f32 %v951_v62, 0.0  ;;  %v1018_v59 = vadd.f32 %v6971_v2, %v755_v51  ;;  %v435_v62 = vld [vmem:[%s6968_s18 + $0x270] sm:$0xff]  ;;  %v1271_v63 = vmax.f32 %v1015_v54, 0.0 }
  0x7f   : > { %v698_v12 = vmul.f32 %v6963_v1, %v435_v62  ;;  %v500_v62 = vld [vmem:[%s6968_s18 + $0x478] sm:$0xff] }
  0x80   : > { %v1428_v34 = vpack.c.bf16 %v1206_v16, %v1205_v11  ;;  %v960_v11 = vadd.f32 %v6971_v2, %v697_v57  ;;  %v494_v16 = vld [vmem:[%s6968_s18 + $0x448] sm:$0xff] }
  0x81   : > { %6575 = vmatmul.mubr.msk.bf16.gmra.mrb[48].mxu0 %vm1531_vm0, %v1420_v4  ;;  %v1427_v4 = vpack.c.bf16 %v1204_v56, %v1203_v55  ;;  %v1210_v56 = vmax.f32 %v954_v35, 0.0  ;;  %v757_v21 = vmul.f32 %v6963_v1, %v494_v16  ;;  %v701_v35 = vmul.f32 %v6963_v1, %v438_v19  ;;  %v445_v16 = vld [vmem:[%s6968_s18 + $0x2c0] sm:$0xff] }
  0x82   : > { %6578 = vmatprep.mubr.msk.bf16.mxu0 %vm1531_vm0, %v1421_v7  ;;  %v748_v7 = vmul.f32 %v6963_v1, %v485_v0  ;;  %v708_v31 = vmul.f32 %v6963_v1, %v445_v16 }
  0x83   : > { %v1430_v10 = vpack.c.bf16 %v1210_v56, %v1209_v52  ;;  %v964_v51 = vadd.f32 %v6971_v2, %v701_v35  ;;  %v442_v52 = vld [vmem:[%s6968_s18 + $0x2a8] sm:$0xff] }
  0x84   : > { %v1011_v18 = vadd.f32 %v6971_v2, %v748_v7  ;;  %v1274_v7 = vmax.f32 %v1018_v59, 0.0  ;;  %v498_v56 = vld [vmem:[%s6968_s18 + $0x468] sm:$0xff] }
  0x85   : > { %v502_v35 = vld [vmem:[%s6968_s18 + $0x488] sm:$0xff] }
  0x86   : > { %v1267_v26 = vmax.f32 %v1011_v18, 0.0  ;;  %v699_v18 = vmul.f32 %v6963_v1, %v436_v5  ;;  %v763_v5 = vmul.f32 %v6963_v1, %v500_v62 }
  0x88   : > { %v1459_v33 = vpack.c.bf16 %v1268_v27, %v1267_v26  ;;  %v759_v27 = vmul.f32 %v6963_v1, %v496_v23  ;;  %v962_v39 = vadd.f32 %v6971_v2, %v699_v18 }
  0x89   : > { %6579 = vmatmul.mubr.msk.bf16.gmra.mrb[52].mxu0 %vm1531_vm0, %v1422_v22  ;;  %v1013_v22 = vadd.f32 %v6971_v2, %v750_v14  ;;  %v1462_v14 = vpack.c.bf16 %v1274_v7, %v1273_v6  ;;  %v705_v7 = vmul.f32 %v6963_v1, %v442_v52 }
  0x8a   : > { %6582 = vmatprep.mubr.msk.bf16.mxu0 %vm1531_vm0, %v1423_v25  ;;  %v693_v25 = vmul.f32 %v6963_v1, %v430_v13  ;;  %6654 = vmatprep.mubr.msk.bf16.mxu1 %vm1531_vm0, %v1459_v33  ;;  %v437_v13 = vld [vmem:[%s6968_s18 + $0x280] sm:$0xff]  ;;  %v1020_v33 = vadd.f32 %v6971_v2, %v757_v21  ;;  %v1022_v37 = vadd.f32 %v6971_v2, %v759_v27  ;;  %v1218_v58 = vmax.f32 %v962_v39, 0.0  ;;  %v446_v21 = vld [vmem:[%s6968_s18 + $0x2c8] sm:$0xff]  ;;  %v447_v27 = vld [vmem:[%s6968_s18 + $0x2d0] sm:$0xff] }
  0x8b   : > { %v1269_v28 = vmax.f32 %v1013_v22, 0.0  ;;  %v495_v22 = vld [vmem:[%s6968_s18 + $0x450] sm:$0xff] }
  0x8c   : > { %v956_v42 = vadd.f32 %v6971_v2, %v693_v25  ;;  %v758_v26 = vmul.f32 %v6963_v1, %v495_v22  ;;  %v1278_v46 = vmax.f32 %v1022_v37, 0.0 }
  0x8d   : > { %v1460_v38 = vpack.c.bf16 %v1270_v29, %v1269_v28  ;;  %v1215_v28 = vmax.f32 %v959_v8, 0.0  ;;  %v700_v29 = vmul.f32 %v6963_v1, %v437_v13 }
  0x8e   : > { %v1021_v36 = vadd.f32 %v6971_v2, %v758_v26 }
  0x8f   : > { %6655 = vmatmul.mubr.msk.bf16.vlgmr.msra.gmra.mrb[0].mxu1 %vm1531_vm0, %v1460_v38  ;;  %v1216_v38 = vmax.f32 %v960_v11, 0.0  ;;  %v963_v48 = vadd.f32 %v6971_v2, %v700_v29 }
  0x91   : > { %6583 = vmatmul.mubr.msk.bf16.gmra.mrb[56].mxu0 %vm1531_vm0, %v1424_v41  ;;  %v1429_v41 = vpack.c.bf16 %v1208_v24, %v1207_v20  ;;  %v756_v20 = vmul.f32 %v6963_v1, %v493_v15  ;;  %v1213_v24 = vmax.f32 %v957_v3, 0.0  ;;  %v1433_v57 = vpack.c.bf16 %v1216_v38, %v1215_v28  ;;  %v443_v3 = vld [vmem:[%s6968_s18 + $0x2b0] sm:$0xff] }
  0x92   : > { %6586 = vmatprep.mubr.msk.bf16.mxu0 %vm1531_vm0, %v1425_v45  ;;  %v753_v45 = vmul.f32 %v6963_v1, %v490_v40  ;;  %v441_v40 = vld [vmem:[%s6968_s18 + $0x2a0] sm:$0xff]  ;;  %v1219_v6 = vmax.f32 %v963_v48, 0.0  ;;  %v706_v15 = vmul.f32 %v6963_v1, %v443_v3 }
  0x93   : > { %v1019_v32 = vadd.f32 %v6971_v2, %v756_v20  ;;  %v704_v53 = vmul.f32 %v6963_v1, %v441_v40  ;;  %v503_v40 = vld [vmem:[%s6968_s18 + $0x490] sm:$0xff] }
  0x94   : > { %v1016_v55 = vadd.f32 %v6971_v2, %v753_v45  ;;  %v1277_v45 = vmax.f32 %v1021_v36, 0.0  ;;  %v7336_v36 = vld [vmem:[%s6959_s14] ss:$0 sm:$0xff] }
  0x95   : > { %v967_v11 = vadd.f32 %v6971_v2, %v704_v53  ;;  %v7339_v37 = vadd.f32 %v7336_v36, %v706_v15  ;;  %v971_v53 = vadd.f32 %v7336_v36, %v708_v31  ;;  %v454_v31 = vld [vmem:[%s6968_s18 + $0x308] sm:$0xff] }
  0x96   : > { %v1272_v0 = vmax.f32 %v1016_v55, 0.0  ;;  %v1464_v54 = vpack.c.bf16 %v1278_v46, %v1277_v45  ;;  %v497_v55 = vld [vmem:[%s6968_s18 + $0x460] sm:$0xff] }
  0x97   : > { %v760_v59 = vmul.f32 %v6963_v1, %v497_v55  ;;  %v1223_v30 = vmax.f32 %v967_v11, 0.0 }
  0x98   : > { %v1461_v9 = vpack.c.bf16 %v1272_v0, %v1271_v63  ;;  %v965_v63 = vadd.f32 %v6971_v2, %v702_v43  ;;  %v966_v0 = vadd.f32 %v6971_v2, %v703_v44  ;;  %v449_v44 = vld [vmem:[%s6968_s18 + $0x2e0] sm:$0xff] }
  0x99   : > { %6587 = vmatmul.mubr.msk.bf16.gmra.mrb[60].mxu0 %vm1531_vm0, %v1426_v61  ;;  %v1212_v61 = vmax.f32 %v956_v42, 0.0  ;;  %v1276_v42 = vmax.f32 %v1020_v33, 0.0  ;;  %v1023_v8 = vadd.f32 %v6971_v2, %v760_v59 }
  0x9a   : > { %6590 = vmatprep.mubr.msk.bf16.mxu0 %vm1531_vm0, %v1427_v4  ;;  %v958_v4 = vadd.f32 %v6971_v2, %v695_v49  ;;  %6658 = vmatprep.mubr.msk.bf16.mxu1 %vm1531_vm0, %v1461_v9  ;;  %v1221_v19 = vmax.f32 %v965_v63, 0.0  ;;  %v1222_v20 = vmax.f32 %v966_v0, 0.0 }
  0x9b   : > { %v1431_v17 = vpack.c.bf16 %v1212_v61, %v1211_v60  ;;  %6659 = vmatmul.mubr.msk.bf16.gmra.mrb[4].mxu1 %vm1531_vm0, %v1462_v14  ;;  %v761_v60 = vmul.f32 %v6963_v1, %v498_v56  ;;  %v499_v61 = vld [vmem:[%s6968_s18 + $0x470] sm:$0xff]  ;;  %v1026_v14 = vadd.f32 %v6971_v2, %v763_v5 }
  0x9c   : > { %v1214_v25 = vmax.f32 %v958_v4, 0.0  ;;  %v762_v4 = vmul.f32 %v6963_v1, %v499_v61 }
  0x9d   : > { %v1024_v9 = vadd.f32 %v6971_v2, %v761_v60  ;;  %v1282_v23 = vmax.f32 %v1026_v14, 0.0 }
  0x9e   : > { %v1432_v47 = vpack.c.bf16 %v1214_v25, %v1213_v24  ;;  %v1025_v13 = vadd.f32 %v6971_v2, %v762_v4  ;;  %v968_v25 = vadd.f32 %v6971_v2, %v705_v7  ;;  %v1225_v4 = vmax.f32 %v7339_v37, 0.0  ;;  %v455_v37 = vld [vmem:[%s6968_s18 + $0x310] sm:$0xff] }
  0x9f   : > { %v1280_v18 = vmax.f32 %v1024_v9, 0.0  ;;  %v452_v9 = vld [vmem:[%s6968_s18 + $0x2f8] sm:$0xff] }
  0xa0   : > { %v1281_v22 = vmax.f32 %v1025_v13, 0.0  ;;  %v506_v13 = vld [vmem:[%s6968_s18 + $0x4a8] sm:$0xff] }
  0xa1   : > { %6591 = vmatmul.mubr.msk.bf16.gmra.mrb[64].mxu0 %vm1531_vm0, %v1428_v34  ;;  %v961_v34 = vadd.f32 %v6971_v2, %v698_v12  ;;  %v444_v12 = vld [vmem:[%s6968_s18 + $0x2b8] sm:$0xff]  ;;  %v7342_v2 = vld [vmem:[%s6951_s10] ss:$0 sm:$0xff] }
  0xa2   : > { %6594 = vmatprep.mubr.msk.bf16.mxu0 %vm1531_vm0, %v1429_v41  ;;  %v1275_v41 = vmax.f32 %v1019_v32, 0.0  ;;  %v707_v26 = vmul.f32 %v6963_v1, %v444_v12  ;;  %v448_v32 = vld [vmem:[%s6968_s18 + $0x2d8] sm:$0xff]  ;;  %v1466_v33 = vpack.c.bf16 %v1282_v23, %v1281_v22  ;;  %v709_v38 = vmul.f32 %v7342_v2, %v446_v21  ;;  %v505_v12 = vld [vmem:[%s6968_s18 + $0x4a0] sm:$0xff] }
  0xa3   : > { %v1217_v50 = vmax.f32 %v961_v34, 0.0  ;;  %v501_v34 = vld [vmem:[%s6968_s18 + $0x480] sm:$0xff]  ;;  %v765_v1 = vmul.f32 %v7342_v2, %v502_v35  ;;  %v710_v43 = vmul.f32 %v7342_v2, %v447_v27  ;;  %v766_v45 = vmul.f32 %v7342_v2, %v503_v40 }
  0xa4   : > { %v1463_v49 = vpack.c.bf16 %v1276_v42, %v1275_v41  ;;  %v764_v39 = vmul.f32 %v7342_v2, %v501_v34  ;;  %v504_v41 = vld [vmem:[%s6968_s18 + $0x498] sm:$0xff]  ;;  %v1436_v42 = vpack.c.bf16 %v1222_v20, %v1221_v19  ;;  %v711_v48 = vmul.f32 %v7342_v2, %v448_v32  ;;  %v453_v22 = vld [vmem:[%s6968_s18 + $0x300] sm:$0xff] }
  0xa5   : > { %v1434_v24 = vpack.c.bf16 %v1218_v58, %v1217_v50  ;;  %v767_v46 = vmul.f32 %v7342_v2, %v504_v41  ;;  %v970_v52 = vadd.f32 %v7336_v36, %v707_v26  ;;  %v972_v56 = vadd.f32 %v7336_v36, %v709_v38  ;;  %v451_v58 = vld [vmem:[%s6968_s18 + $0x2f0] sm:$0xff]  ;;  %v508_v19 = vld [vmem:[%s6968_s18 + $0x4b8] sm:$0xff] }
  0xa6   : > { %6662 = vmatprep.mubr.msk.bf16.mxu1 %vm1531_vm0, %v1463_v49  ;;  %v450_v49 = vld [vmem:[%s6968_s18 + $0x2e8] sm:$0xff]  ;;  %v1027_v50 = vadd.f32 %v7336_v36, %v764_v39  ;;  %v973_v61 = vadd.f32 %v7336_v36, %v710_v43  ;;  %v974_v5 = vadd.f32 %v7336_v36, %v711_v48  ;;  %v768_v16 = vmul.f32 %v7342_v2, %v505_v12  ;;  %v456_v38 = vld [vmem:[%s6968_s18 + $0x318] sm:$0xff]  ;;  %v461_v12 = vld [vmem:[%s6968_s18 + $0x340] sm:$0xff] }
  0xa7   : > { %6663 = vmatmul.mubr.msk.bf16.gmra.mrb[8].mxu1 %vm1531_vm0, %v1464_v54  ;;  %v1029_v54 = vadd.f32 %v7336_v36, %v766_v45  ;;  %v1030_v55 = vadd.f32 %v7336_v36, %v767_v46  ;;  %v713_v62 = vmul.f32 %v7342_v2, %v450_v49  ;;  %v1226_v7 = vmax.f32 %v970_v52, 0.0  ;;  %v458_v48 = vld [vmem:[%s6968_s18 + $0x328] sm:$0xff] }
  0xa8   : > { %v1283_v59 = vmax.f32 %v1027_v50, 0.0  ;;  %v1228_v14 = vmax.f32 %v972_v56, 0.0  ;;  %v1229_v20 = vmax.f32 %v973_v61, 0.0  ;;  %v715_v26 = vmul.f32 %v7342_v2, %v452_v9  ;;  %v512_v61 = vld [vmem:[%s6968_s18 + $0x4d8] sm:$0xff] }
  0xa9   : > { %6595 = vmatmul.mubr.msk.bf16.gmra.mrb[68].mxu0 %vm1531_vm0, %v1430_v10  ;;  %v1220_v10 = vmax.f32 %v964_v51, 0.0  ;;  %v1028_v51 = vadd.f32 %v7336_v36, %v765_v1  ;;  %v1285_v63 = vmax.f32 %v1029_v54, 0.0  ;;  %v1286_v0 = vmax.f32 %v1030_v55, 0.0  ;;  %v509_v54 = vld [vmem:[%s6968_s18 + $0x4c0] sm:$0xff]  ;;  %v510_v55 = vld [vmem:[%s6968_s18 + $0x4c8] sm:$0xff] }
  0xaa   : > { %6598 = vmatprep.mubr.msk.bf16.mxu0 %vm1531_vm0, %v1431_v17  ;;  %v1279_v17 = vmax.f32 %v1023_v8, 0.0  ;;  %v1227_v8 = vmax.f32 %v971_v53, 0.0  ;;  %v976_v21 = vadd.f32 %v7336_v36, %v713_v62  ;;  %v1031_v27 = vadd.f32 %v7336_v36, %v768_v16 }
  0xab   : > { %v1435_v29 = vpack.c.bf16 %v1220_v10, %v1219_v6  ;;  %v1284_v60 = vmax.f32 %v1028_v51, 0.0  ;;  %v714_v10 = vmul.f32 %v7342_v2, %v451_v58  ;;  %v1468_v11 = vpack.c.bf16 %v1286_v0, %v1285_v63  ;;  %v459_v0 = vld [vmem:[%s6968_s18 + $0x330] sm:$0xff] }
  0xac   : > { %v1465_v28 = vpack.c.bf16 %v1280_v18, %v1279_v17  ;;  %v769_v17 = vmul.f32 %v7342_v2, %v506_v13  ;;  %v507_v18 = vld [vmem:[%s6968_s18 + $0x4b0] sm:$0xff]  ;;  %v1439_v34 = vpack.c.bf16 %v1228_v14, %v1227_v8  ;;  %v716_v35 = vmul.f32 %v7342_v2, %v453_v22 }
  0xad   : > { %v1467_v6 = vpack.c.bf16 %v1284_v60, %v1283_v59  ;;  %v770_v23 = vmul.f32 %v7342_v2, %v507_v18  ;;  %v1287_v39 = vmax.f32 %v1031_v27, 0.0  ;;  %v1232_v41 = vmax.f32 %v976_v21, 0.0  ;;  %v511_v60 = vld [vmem:[%s6968_s18 + $0x4d0] sm:$0xff] }
  0xae   : > { %6666 = vmatprep.mubr.msk.bf16.mxu1 %vm1531_vm0, %v1465_v28  ;;  %v1032_v28 = vadd.f32 %v7336_v36, %v769_v17  ;;  %v978_v46 = vadd.f32 %v7336_v36, %v715_v26  ;;  %v718_v51 = vmul.f32 %v7342_v2, %v455_v37  ;;  %v719_v52 = vmul.f32 %v7342_v2, %v456_v38  ;;  %v464_v38 = vld [vmem:[%s6968_s18 + $0x358] sm:$0xff] }
  0xaf   : > { %6667 = vmatmul.mubr.msk.bf16.gmra.mrb[12].mxu1 %vm1531_vm0, %v1466_v33  ;;  %v1033_v32 = vadd.f32 %v7336_v36, %v770_v23  ;;  %v7410_v56 = vadd.f32 %v7336_v36, %v716_v35  ;;  %v772_v58 = vmul.f32 %v7342_v2, %v509_v54  ;;  %v773_v59 = vmul.f32 %v7342_v2, %v510_v55 }
  0xb0   : > { %6670 = vmatprep.mubr.msk.bf16.mxu1 %vm1531_vm0, %v1467_v6  ;;  %v1288_v1 = vmax.f32 %v1032_v28, 0.0  ;;  %v721_v63 = vmul.f32 %v7342_v2, %v458_v48  ;;  %v722_v16 = vmul.f32 %v7342_v2, %v459_v0  ;;  %v724_v26 = vmul.f32 %v7342_v2, %v461_v12  ;;  %v517_v12 = vld [vmem:[%s6968_s18 + $0x500] sm:$0xff] }
  0xb1   : > { %6599 = vmatmul.mubr.msk.bf16.gmra.mrb[72].mxu0 %vm1531_vm0, %v1432_v47  ;;  %v1224_v47 = vmax.f32 %v968_v25, 0.0  ;;  %v1230_v25 = vmax.f32 %v974_v5, 0.0  ;;  %v1289_v43 = vmax.f32 %v1033_v32, 0.0  ;;  %v1234_v5 = vmax.f32 %v978_v46, 0.0 }
  0xb2   : > { %6602 = vmatprep.mubr.msk.bf16.mxu0 %vm1531_vm0, %v1433_v57  ;;  %v712_v57 = vmul.f32 %v7342_v2, %v449_v44  ;;  %v1469_v49 = vpack.c.bf16 %v1288_v1, %v1287_v39  ;;  %v1035_v8 = vadd.f32 %v7336_v36, %v772_v58  ;;  %v1036_v9 = vadd.f32 %v7336_v36, %v773_v59 }
  0xb3   : > { %v1437_v3 = vpack.c.bf16 %v1224_v47, %v1223_v30  ;;  %v977_v30 = vadd.f32 %v7336_v36, %v714_v10  ;;  %v7400_v45 = vpack.c.bf16 %v1230_v25, %v1229_v20  ;;  %v717_v47 = vmul.f32 %v7342_v2, %v454_v31  ;;  %v462_v25 = vld [vmem:[%s6968_s18 + $0x348] sm:$0xff]  ;;  %v463_v31 = vld [vmem:[%s6968_s18 + $0x350] sm:$0xff] }
  0xb4   : > { %v975_v15 = vadd.f32 %v7336_v36, %v712_v57  ;;  %v981_v10 = vadd.f32 %v7336_v36, %v718_v51  ;;  %v1291_v17 = vmax.f32 %v1035_v8, 0.0  ;;  %v1292_v18 = vmax.f32 %v1036_v9, 0.0 }
  0xb5   : > { %v1233_v50 = vmax.f32 %v977_v30, 0.0  ;;  %v980_v6 = vadd.f32 %v7336_v36, %v717_v47  ;;  %v985_v37 = vadd.f32 %v7336_v36, %v722_v16  ;;  %v725_v47 = vmul.f32 %v7342_v2, %v462_v25 }
  0xb6   : > { %v1231_v40 = vmax.f32 %v975_v15, 0.0  ;;  %v1471_v27 = vpack.c.bf16 %v1292_v18, %v1291_v17  ;;  %v7459_v48 = vadd.f32 %v7336_v36, %v724_v26  ;;  %v726_v51 = vmul.f32 %v7342_v2, %v463_v31  ;;  %v519_v18 = vld [vmem:[%s6968_s18 + $0x510] sm:$0xff] }
  0xb7   : > { %6671 = vmatmul.mubr.msk.bf16.gmra.mrb[16].mxu1 %vm1531_vm0, %v1468_v11  ;;  %v982_v11 = vadd.f32 %v7336_v36, %v719_v52  ;;  %v7438_v23 = vpack.c.bf16 %v1234_v5, %v1233_v50  ;;  %v1236_v28 = vmax.f32 %v980_v6, 0.0  ;;  %v727_v52 = vmul.f32 %v7342_v2, %v464_v38  ;;  %v468_v6 = vld [vmem:[%s6968_s18 + $0x378] sm:$0xff] }
  0xb8   : > { %6674 = vmatprep.mubr.msk.bf16.mxu1 %vm1531_vm0, %v1469_v49  ;;  %v1441_v62 = vpack.c.bf16 %v1232_v41, %v1231_v40  ;;  %v515_v40 = vld [vmem:[%s6968_s18 + $0x4f0] sm:$0xff]  ;;  %v516_v41 = vld [vmem:[%s6968_s18 + $0x4f8] sm:$0xff]  ;;  %v988_v5 = vadd.f32 %v7336_v36, %v725_v47  ;;  %v1243_v8 = vmax.f32 %v7459_v48, 0.0  ;;  %v989_v9 = vadd.f32 %v7336_v36, %v726_v51 }
  0xb9   : > { %6603 = vmatmul.mubr.msk.bf16.gmra.mrb[76].mxu0 %vm1531_vm0, %v1434_v24  ;;  %v771_v24 = vmul.f32 %v7342_v2, %v508_v19  ;;  %v984_v19 = vadd.f32 %v7336_v36, %v721_v63  ;;  %v1238_v30 = vmax.f32 %v982_v11, 0.0  ;;  %v779_v46 = vmul.f32 %v7342_v2, %v516_v41  ;;  %v467_v63 = vld [vmem:[%s6968_s18 + $0x370] sm:$0xff] }
  0xba   : > { %6606 = vmatprep.mubr.msk.bf16.mxu0 %vm1531_vm0, %v1435_v29  ;;  %v1438_v29 = vpack.c.bf16 %v1226_v7, %v1225_v4  ;;  %v775_v4 = vmul.f32 %v7342_v2, %v512_v61  ;;  %v460_v7 = vld [vmem:[%s6968_s18 + $0x338] sm:$0xff]  ;;  %v466_v61 = vld [vmem:[%s6968_s18 + $0x368] sm:$0xff]  ;;  %v780_v16 = vmul.f32 %v7342_v2, %v517_v12  ;;  %v1244_v25 = vmax.f32 %v988_v5, 0.0  ;;  %v475_v5 = vld [vmem:[%s6968_s18 + $0x3b0] sm:$0xff] }
  0xbb   : > { %v1034_v33 = vadd.f32 %v7336_v36, %v771_v24  ;;  %v723_v20 = vmul.f32 %v7342_v2, %v460_v7  ;;  %v1235_v24 = vmax.f32 %v7410_v56, 0.0  ;;  %v1042_v55 = vadd.f32 %v7336_v36, %v779_v46 }
  0xbc   : > { %v1038_v14 = vadd.f32 %v7336_v36, %v775_v4 }
  0xbd   : > { %v1290_v44 = vmax.f32 %v1034_v33, 0.0  ;;  %v513_v33 = vld [vmem:[%s6968_s18 + $0x4e0] sm:$0xff]  ;;  %v1443_v56 = vpack.c.bf16 %v1236_v28, %v1235_v24  ;;  %v1043_v28 = vadd.f32 %v7336_v36, %v780_v16  ;;  %v476_v16 = vld [vmem:[%s6968_s18 + $0x3b8] sm:$0xff] }
  0xbe   : > { %v1294_v22 = vmax.f32 %v1038_v14, 0.0  ;;  %v776_v39 = vmul.f32 %v7342_v2, %v513_v33  ;;  %v729_v14 = vmul.f32 %v7342_v2, %v466_v61  ;;  %v471_v33 = vld [vmem:[%s6968_s18 + $0x390] sm:$0xff]  ;;  %v524_v61 = vld [vmem:[%s6968_s18 + $0x538] sm:$0xff] }
  0xbf   : > { %v1470_v53 = vpack.c.bf16 %v1290_v44, %v1289_v43  ;;  %v986_v43 = vadd.f32 %v7336_v36, %v723_v20  ;;  %v778_v44 = vmul.f32 %v7342_v2, %v515_v40  ;;  %v734_v47 = vmul.f32 %v7342_v2, %v471_v33 }
  0xc0   : > { %v1039_v49 = vadd.f32 %v7336_v36, %v776_v39  ;;  %v472_v39 = vld [vmem:[%s6968_s18 + $0x398] sm:$0xff]  ;;  %v739_v33 = vmul.f32 %v7342_v2, %v476_v16 }
  0xc1   : > { %6607 = vmatmul.mubr.msk.bf16.gmra.mrb[80].mxu0 %vm1531_vm0, %v1436_v42  ;;  %v457_v42 = vld [vmem:[%s6968_s18 + $0x320] sm:$0xff]  ;;  %6675 = vmatmul.mubr.msk.bf16.gmra.mrb[20].mxu1 %vm1531_vm0, %v1470_v53  ;;  %v1041_v54 = vadd.f32 %v7336_v36, %v778_v44  ;;  %v7514_v44 = vpack.c.bf16 %v1244_v25, %v1243_v8  ;;  %v735_v51 = vmul.f32 %v7342_v2, %v472_v39 }
  0xc2   : > { %6610 = vmatprep.mubr.msk.bf16.mxu0 %vm1531_vm0, %v1437_v3  ;;  %v720_v57 = vmul.f32 %v7342_v2, %v457_v42  ;;  %v774_v3 = vmul.f32 %v7342_v2, %v511_v60  ;;  %6678 = vmatprep.mubr.msk.bf16.mxu1 %vm1531_vm0, %v1471_v27  ;;  %v1240_v42 = vmax.f32 %v984_v19, 0.0  ;;  %v465_v53 = vld [vmem:[%s6968_s18 + $0x360] sm:$0xff]  ;;  %v1295_v58 = vmax.f32 %v1039_v49, 0.0  ;;  %v520_v19 = vld [vmem:[%s6968_s18 + $0x518] sm:$0xff] }
  0xc3   : > { %v1241_v60 = vmax.f32 %v985_v37, 0.0  ;;  %v1297_v0 = vmax.f32 %v1041_v54, 0.0  ;;  %v783_v24 = vmul.f32 %v7342_v2, %v520_v19  ;;  %v469_v27 = vld [vmem:[%s6968_s18 + $0x380] sm:$0xff]  ;;  %v992_v37 = vadd.f32 %v7336_v36, %v729_v14  ;;  %v522_v54 = vld [vmem:[%s6968_s18 + $0x528] sm:$0xff] }
  0xc4   : > { %v1037_v13 = vadd.f32 %v7336_v36, %v774_v3  ;;  %v983_v15 = vadd.f32 %v7336_v36, %v720_v57  ;;  %v1298_v3 = vmax.f32 %v1042_v55, 0.0  ;;  %v732_v41 = vmul.f32 %v7342_v2, %v469_v27  ;;  %v477_v27 = vld [vmem:[%s6968_s18 + $0x3c0] sm:$0xff] }
  0xc5   : > { %v1248_v55 = vmax.f32 %v992_v37, 0.0  ;;  %v7537_v8 = vadd.f32 %v7336_v36, %v734_v47  ;;  %v525_v37 = vld [vmem:[%s6968_s18 + $0x540] sm:$0xff] }
  0xc6   : > { %v1293_v21 = vmax.f32 %v1037_v13, 0.0  ;;  %v1239_v35 = vmax.f32 %v983_v15, 0.0  ;;  %v1474_v11 = vpack.c.bf16 %v1298_v3, %v1297_v0  ;;  %v518_v13 = vld [vmem:[%s6968_s18 + $0x508] sm:$0xff]  ;;  %v730_v15 = vmul.f32 %v7342_v2, %v467_v63 }
  0xc7   : > { %v781_v17 = vmul.f32 %v7342_v2, %v518_v13  ;;  %v995_v0 = vadd.f32 %v7336_v36, %v732_v41  ;;  %v474_v3 = vld [vmem:[%s6968_s18 + $0x3a8] sm:$0xff]  ;;  %v527_v41 = vld [vmem:[%s6968_s18 + $0x550] sm:$0xff] }
  0xc8   : > { %v1472_v32 = vpack.c.bf16 %v1294_v22, %v1293_v21  ;;  %v7475_v4 = vpack.c.bf16 %v1240_v42, %v1239_v35  ;;  %v731_v21 = vmul.f32 %v7342_v2, %v468_v6  ;;  %v782_v22 = vmul.f32 %v7342_v2, %v519_v18 }
  0xc9   : > { %6611 = vmatmul.mubr.msk.bf16.gmra.mrb[84].mxu0 %vm1531_vm0, %v1438_v29  ;;  %v1237_v29 = vmax.f32 %v981_v10, 0.0  ;;  %v990_v10 = vadd.f32 %v7336_v36, %v727_v52  ;;  %v1046_v35 = vadd.f32 %v7336_v36, %v783_v24  ;;  %v993_v38 = vadd.f32 %v7336_v36, %v730_v15 }
  0xca   : > { %6614 = vmatprep.mubr.msk.bf16.mxu0 %vm1531_vm0, %v1439_v34  ;;  %v514_v34 = vld [vmem:[%s6968_s18 + $0x4e8] sm:$0xff]  ;;  %6679 = vmatmul.mubr.msk.bf16.gmra.mrb[24].mxu1 %vm1531_vm0, %v1472_v32  ;;  %v787_v6 = vmul.f32 %v7342_v2, %v524_v61  ;;  %v737_v15 = vmul.f32 %v7342_v2, %v474_v3  ;;  %v1251_v25 = vmax.f32 %v995_v0, 0.0  ;;  %v790_v47 = vmul.f32 %v7342_v2, %v527_v41 }
  0xcb   : > { %v777_v1 = vmul.f32 %v7342_v2, %v514_v34  ;;  %v7471_v57 = vpack.c.bf16 %v1238_v30, %v1237_v29  ;;  %v1044_v29 = vadd.f32 %v7336_v36, %v781_v17  ;;  %v1245_v30 = vmax.f32 %v989_v9, 0.0  ;;  %v470_v32 = vld [vmem:[%s6968_s18 + $0x388] sm:$0xff] }
  0xcc   : > { %v1246_v31 = vmax.f32 %v990_v10, 0.0  ;;  %v1045_v34 = vadd.f32 %v7336_v36, %v782_v22  ;;  %v733_v46 = vmul.f32 %v7342_v2, %v470_v32  ;;  %v1050_v14 = vadd.f32 %v7336_v36, %v787_v6  ;;  %v482_v61 = vld [vmem:[%s6968_s18 + $0x3e8] sm:$0xff] }
  0xcd   : > { %v1040_v50 = vadd.f32 %v7336_v36, %v777_v1  ;;  %v1299_v1 = vmax.f32 %v1043_v28, 0.0  ;;  %v1300_v40 = vmax.f32 %v1044_v29, 0.0  ;;  %v478_v28 = vld [vmem:[%s6968_s18 + $0x3c8] sm:$0xff]  ;;  %v479_v29 = vld [vmem:[%s6968_s18 + $0x3d0] sm:$0xff]  ;;  %v7571_v39 = vadd.f32 %v7336_v36, %v737_v15 }
  0xce   : > { %v1301_v42 = vmax.f32 %v1045_v34, 0.0  ;;  %v7518_v49 = vpack.c.bf16 %v1246_v31, %v1245_v30  ;;  %v1306_v24 = vmax.f32 %v1050_v14, 0.0  ;;  %v480_v34 = vld [vmem:[%s6968_s18 + $0x3d8] sm:$0xff]  ;;  %v745_v15 = vmul.f32 %v7342_v2, %v482_v61 }
  0xcf   : > { %v1296_v59 = vmax.f32 %v1040_v50, 0.0  ;;  %v1475_v48 = vpack.c.bf16 %v1300_v40, %v1299_v1  ;;  %v788_v40 = vmul.f32 %v7342_v2, %v525_v37 }
  0xd1   : > { %6615 = vmatmul.mubr.msk.bf16.gmra.mrb[88].mxu0 %vm1531_vm0, %v7400_v45  ;;  %v1242_v45 = vmax.f32 %v986_v43, 0.0  ;;  %v1473_v7 = vpack.c.bf16 %v1296_v59, %v1295_v58  ;;  %v1302_v43 = vmax.f32 %v1046_v35, 0.0  ;;  %v473_v58 = vld [vmem:[%s6968_s18 + $0x3a0] sm:$0xff] }
  0xd2   : > { %6618 = vmatprep.mubr.msk.bf16.mxu0 %vm1531_vm0, %v1441_v62  ;;  %v728_v62 = vmul.f32 %v7342_v2, %v465_v53  ;;  %v521_v53 = vld [vmem:[%s6968_s18 + $0x520] sm:$0xff]  ;;  %v736_v12 = vmul.f32 %v7342_v2, %v473_v58 }
  0xd3   : > { %6682 = vmatprep.mubr.msk.bf16.mxu1 %vm1531_vm0, %v1473_v7  ;;  %v7492_v20 = vpack.c.bf16 %v1242_v45, %v1241_v60  ;;  %v1476_v52 = vpack.c.bf16 %v1302_v43, %v1301_v42  ;;  %v784_v59 = vmul.f32 %v7342_v2, %v521_v53  ;;  %v785_v60 = vmul.f32 %v7342_v2, %v522_v54  ;;  %v523_v45 = vld [vmem:[%s6968_s18 + $0x530] sm:$0xff]  ;;  %v528_v42 = vld [vmem:[%s6968_s18 + $0x558] sm:$0xff] }
  0xd4   : > { %6683 = vmatmul.mubr.msk.bf16.gmra.mrb[28].mxu1 %vm1531_vm0, %v1474_v11  ;;  %v991_v26 = vadd.f32 %v7336_v36, %v728_v62  ;;  %v786_v62 = vmul.f32 %v7342_v2, %v523_v45  ;;  %v996_v7 = vadd.f32 %v7336_v36, %v733_v46  ;;  %v7544_v11 = vadd.f32 %v7336_v36, %v735_v51  ;;  %v481_v45 = vld [vmem:[%s6968_s18 + $0x3e0] sm:$0xff] }
  0xd5   : > { %6686 = vmatprep.mubr.msk.bf16.mxu1 %vm1531_vm0, %v1475_v48  ;;  %v1047_v9 = vadd.f32 %v7336_v36, %v784_v59  ;;  %v1048_v10 = vadd.f32 %v7336_v36, %v785_v60  ;;  %v7564_v32 = vadd.f32 %v7336_v36, %v736_v12  ;;  %v740_v43 = vmul.f32 %v7342_v2, %v477_v27  ;;  %v532_v27 = vld [vmem:[%s6968_s18 + $0x578] sm:$0xff] }
  0xd6   : > { %v1247_v50 = vmax.f32 %v991_v26, 0.0  ;;  %v1049_v13 = vadd.f32 %v7336_v36, %v786_v62  ;;  %v1252_v26 = vmax.f32 %v996_v7, 0.0  ;;  %v1254_v31 = vmax.f32 %v7544_v11, 0.0  ;;  %v484_v62 = vld [vmem:[%s6968_s18 + $0x3f8] sm:$0xff] }
  0xd7   : > { %v1303_v17 = vmax.f32 %v1047_v9, 0.0  ;;  %v1304_v18 = vmax.f32 %v1048_v10, 0.0  ;;  %v741_v46 = vmul.f32 %v7342_v2, %v478_v28  ;;  %v791_v48 = vmul.f32 %v7342_v2, %v528_v42 }
  0xd8   : > { %v7554_v19 = vpack.c.bf16 %v1248_v55, %v1247_v50  ;;  %v1305_v22 = vmax.f32 %v1049_v13, 0.0  ;;  %v742_v50 = vmul.f32 %v7342_v2, %v479_v29  ;;  %v743_v51 = vmul.f32 %v7342_v2, %v480_v34 }
  0xd9   : > { %6619 = vmatmul.mubr.msk.bf16.gmra.mrb[92].mxu0 %vm1531_vm0, %v7438_v23  ;;  %v994_v23 = vadd.f32 %v7336_v36, %v731_v21  ;;  %v1477_v30 = vpack.c.bf16 %v1304_v18, %v1303_v17  ;;  %v7592_v54 = vpack.c.bf16 %v1252_v26, %v1251_v25  ;;  %v1002_v55 = vadd.f32 %v7336_v36, %v739_v33  ;;  %v530_v17 = vld [vmem:[%s6968_s18 + $0x568] sm:$0xff]  ;;  %v531_v26 = vld [vmem:[%s6968_s18 + $0x570] sm:$0xff] }
  0xda   : > { %6622 = vmatprep.mubr.msk.bf16.mxu0 %vm1531_vm0, %v1443_v56  ;;  %v1249_v56 = vmax.f32 %v993_v38, 0.0  ;;  %v1478_v35 = vpack.c.bf16 %v1306_v24, %v1305_v22  ;;  %v526_v38 = vld [vmem:[%s6968_s18 + $0x548] sm:$0xff]  ;;  %v1054_v58 = vadd.f32 %v7336_v36, %v791_v48  ;;  %v1255_v59 = vmax.f32 %v7564_v32, 0.0 }
  0xdb   : > { %v1250_v63 = vmax.f32 %v994_v23, 0.0  ;;  %v789_v23 = vmul.f32 %v7342_v2, %v526_v38  ;;  %v1256_v60 = vmax.f32 %v7571_v39, 0.0  ;;  %v1004_v3 = vadd.f32 %v7336_v36, %v741_v46 }
  0xdc   : > { %6687 = vmatmul.mubr.msk.bf16.gmra.mrb[32].mxu1 %vm1531_vm0, %v1476_v52  ;;  %v1051_v52 = vadd.f32 %v7336_v36, %v788_v40  ;;  %v1310_v7 = vmax.f32 %v1054_v58, 0.0  ;;  %v1005_v9 = vadd.f32 %v7336_v36, %v742_v50  ;;  %v1006_v10 = vadd.f32 %v7336_v36, %v743_v51 }
  0xdd   : > { %v7556_v21 = vpack.c.bf16 %v1250_v63, %v1249_v56  ;;  %6690 = vmatprep.mubr.msk.bf16.mxu1 %vm1531_vm0, %v1477_v30  ;;  %v1052_v53 = vadd.f32 %v7336_v36, %v789_v23  ;;  %v1053_v56 = vadd.f32 %v7336_v36, %v790_v47  ;;  %v1258_v13 = vmax.f32 %v1002_v55, 0.0 }
  0xde   : > { %v1307_v63 = vmax.f32 %v1051_v52, 0.0  ;;  %v744_v14 = vmul.f32 %v7342_v2, %v481_v45  ;;  %v747_v22 = vmul.f32 %v7342_v2, %v484_v62  ;;  %v793_v25 = vmul.f32 %v7342_v2, %v530_v17 }
  0xdf   : > { %v1308_v0 = vmax.f32 %v1052_v53, 0.0  ;;  %v1309_v6 = vmax.f32 %v1053_v56, 0.0  ;;  %v1260_v29 = vmax.f32 %v1004_v3, 0.0  ;;  %v794_v30 = vmul.f32 %v7342_v2, %v531_v26  ;;  %v533_v56 = vld [vmem:[%s6968_s18 + $0x580] sm:$0xff] }
  0xe0   : > { %v795_v32 = vmul.f32 %v7342_v2, %v532_v27  ;;  %v1261_v33 = vmax.f32 %v1005_v9, 0.0  ;;  %v1262_v34 = vmax.f32 %v1006_v10, 0.0  ;;  %v1056_v37 = vadd.f32 %v7336_v36, %v793_v25 }
  0xe1   : > { %6623 = vmatmul.mubr.msk.bf16.gmra.mrb[96].mxu0 %vm1531_vm0, %v7471_v57  ;;  %v738_v57 = vmul.f32 %v7342_v2, %v475_v5  ;;  %v483_v5 = vld [vmem:[%s6968_s18 + $0x3f0] sm:$0xff]  ;;  %v1479_v12 = vpack.c.bf16 %v1308_v0, %v1307_v63  ;;  %v1480_v16 = vpack.c.bf16 %v1310_v7, %v1309_v6  ;;  %v1007_v38 = vadd.f32 %v7336_v36, %v744_v14  ;;  %v534_v63 = vld [vmem:[%s6968_s18 + $0x588] sm:$0xff]  ;;  %v536_v7 = vld [vmem:[%s6968_s18 + $0x598] sm:$0xff] }
  0xe2   : > { %6626 = vmatprep.mubr.msk.bf16.mxu0 %vm1531_vm0, %v7475_v4  ;;  %v1253_v4 = vmax.f32 %v7537_v8, 0.0  ;;  %v746_v18 = vmul.f32 %v7342_v2, %v483_v5  ;;  %v1008_v39 = vadd.f32 %v7336_v36, %v745_v15  ;;  %v1058_v40 = vadd.f32 %v7336_v36, %v795_v32  ;;  %v535_v6 = vld [vmem:[%s6968_s18 + $0x590] sm:$0xff] }
  0xe3   : > { %v7574_v1 = vadd.f32 %v7336_v36, %v738_v57  ;;  %v529_v57 = vld [vmem:[%s6968_s18 + $0x560] sm:$0xff]  ;;  %v1010_v41 = vadd.f32 %v7336_v36, %v747_v22  ;;  %v7643_v46 = vpack.c.bf16 %v1256_v60, %v1255_v59  ;;  %v7654_v8 = vpack.c.bf16 %v1262_v34, %v1261_v33 }
  0xe4   : > { %6691 = vmatmul.mubr.msk.bf16.gmra.mrb[36].mxu1 %vm1531_vm0, %v1478_v35  ;;  %v792_v24 = vmul.f32 %v7342_v2, %v529_v57  ;;  %v1009_v23 = vadd.f32 %v7336_v36, %v746_v18  ;;  %v1314_v48 = vmax.f32 %v1058_v40, 0.0  ;;  %v1263_v52 = vmax.f32 %v1007_v38, 0.0 }
  0xe5   : > { %6694 = vmatprep.mubr.msk.bf16.mxu1 %vm1531_vm0, %v1479_v12  ;;  %v1264_v53 = vmax.f32 %v1008_v39, 0.0  ;;  %v1266_v61 = vmax.f32 %v1010_v41, 0.0  ;;  %v796_v62 = vmul.f32 %v7342_v2, %v533_v56  ;;  %v798_v18 = vmul.f32 %v7342_v2, %v535_v6 }
  0xe6   : > { %v1055_v35 = vadd.f32 %v7336_v36, %v792_v24  ;;  %v1265_v45 = vmax.f32 %v1009_v23, 0.0  ;;  %v799_v22 = vmul.f32 %v7342_v2, %v536_v7 }
  0xe7   : > { %v7674_v15 = vpack.c.bf16 %v1264_v53, %v1263_v52  ;;  %v1059_v26 = vadd.f32 %v7336_v36, %v796_v62  ;;  %v537_v52 = vld [vmem:[%s6968_s18 + $0x5a0] sm:$0xff] }
  0xe8   : > { %v1311_v42 = vmax.f32 %v1055_v35, 0.0  ;;  %v1062_v23 = vadd.f32 %v7336_v36, %v799_v22 }
  0xe9   : > { %6627 = vmatmul.mubr.msk.bf16.gmra.mrb[100].mxu0 %vm1531_vm0, %v7492_v20  ;;  %v1003_v20 = vadd.f32 %v7336_v36, %v740_v43  ;;  %v1312_v43 = vmax.f32 %v1056_v37, 0.0  ;;  %v1061_v37 = vadd.f32 %v7336_v36, %v798_v18 }
  0xea   : > { %6630 = vmatprep.mubr.msk.bf16.mxu0 %vm1531_vm0, %v7514_v44  ;;  %v1257_v44 = vmax.f32 %v7574_v1, 0.0  ;;  %v1057_v1 = vadd.f32 %v7336_v36, %v794_v30 }
  0xeb   : > { %v1259_v28 = vmax.f32 %v1003_v20, 0.0  ;;  %v1481_v11 = vpack.c.bf16 %v1312_v43, %v1311_v42 }
  0xec   : > { %6695 = vmatmul.mubr.msk.bf16.gmra.mrb[40].mxu1 %vm1531_vm0, %v1480_v16  ;;  %v1313_v47 = vmax.f32 %v1057_v1, 0.0  ;;  %v7650_v50 = vpack.c.bf16 %v1258_v13, %v1257_v44  ;;  %v797_v16 = vmul.f32 %v7342_v2, %v534_v63  ;;  %v538_v63 = vld [vmem:[%s6968_s18 + $0x5a8] sm:$0xff] }
  0xed   : > { %v7652_v51 = vpack.c.bf16 %v1260_v29, %v1259_v28  ;;  %6698 = vmatprep.mubr.msk.bf16.mxu1 %vm1531_vm0, %v1481_v11 }
  0xee   : > { %v1482_v55 = vpack.c.bf16 %v1314_v48, %v1313_v47  ;;  %v1315_v48 = vmax.f32 %v1059_v26, 0.0 }
  0xf1   : > { %6631 = vmatmul.mubr.msk.bf16.gmra.mrb[104].mxu0 %vm1531_vm0, %v7518_v49  ;;  %v7641_v49 = vpack.c.bf16 %v1254_v31, %v1253_v4 }
  0xf2   : > { %6634 = vmatprep.mubr.msk.bf16.mxu0 %vm1531_vm0, %v7554_v19 }
  0xf4   : > { %v6528_v19 = vpop.f32.mrb[0].mxu0  ;;  %6699 = vmatmul.mubr.msk.bf16.gmra.mrb[44].mxu1 %vm1531_vm0, %v1482_v55 }
  0xf5   : > { %v6141_v4 = vpack.c.bf16 %v6528_v19, %v6528_v19  ;;  %v1950_v31 = vpop.f32.mrb[1].mxu0  ;;  %v4775_v0 = vmul.f32 %v6528_v19, %v6528_v19  ;;  %v4257_v13 = vsel %vm1531_vm0, %v6528_v19, 0.0 }
  0xf6   : > { %v6139_v58 = vpack.c.bf16 %v1950_v31, %v1950_v31  ;;  %v4773_v59 = vmul.f32 %v1950_v31, %v1950_v31  ;;  %v6529_v60 = vpop.f32.mrb[2].mxu0  ;;  %v4254_v20 = vsel %vm1531_vm0, %v1950_v31, 0.0 }
  0xf7   : > { %4000 = vst.msk [vmem:[%s7648_s29 + $0x8] sm:$0xf] %vm3997_vm1, %v6141_v4  ;;  %v6142_v3 = vpack.c.bf16 %v6529_v60, %v6529_v60  ;;  %v1953_v5 = vpop.f32.mrb[3].mxu0  ;;  %v4776_v44 = vmul.f32 %v6529_v60, %v6529_v60  ;;  %v5032_v27 = vsel %vm1531_vm0, %v4775_v0, 0.0  ;;  %v4259_v28 = vsel %vm1531_vm0, %v6529_v60, 0.0 }
  0xf8   : > { %3998 = vst.msk [vmem:[%s7648_s29] sm:$0xf] %vm3997_vm1, %v6139_v58  ;;  %v6140_v9 = vpack.c.bf16 %v1953_v5, %v1953_v5  ;;  %v4255_v10 = vsel %vm1531_vm0, %v1953_v5, 0.0  ;;  %v4774_v12 = vmul.f32 %v1953_v5, %v1953_v5  ;;  %v5029_v57 = vsel %vm1531_vm0, %v4773_v59, 0.0 }
  0xf9   : > { %4001 = vst.msk [vmem:[%s7648_s29 + $0xc] sm:$0xf] %vm3997_vm1, %v6142_v3  ;;  %v4256_v14 = vadd.f32 %v4255_v10, %v4254_v20  ;;  %6635 = vmatmul.mubr.msk.bf16.gmra.mrb[108].mxu0 %vm1531_vm0, %v7556_v21  ;;  %v7685_v21 = vpack.c.bf16 %v1266_v61, %v1265_v45  ;;  %v5034_v29 = vsel %vm1531_vm0, %v4776_v44, 0.0  ;;  %v1317_v45 = vmax.f32 %v1061_v37, 0.0 }
  0xfa   : > { %3999 = vst.msk [vmem:[%s7648_s29 + $0x4] sm:$0xf] %vm3997_vm1, %v6140_v9  ;;  %v5030_v17 = vsel %vm1531_vm0, %v4774_v12, 0.0  ;;  %6638 = vmatprep.mubr.msk.bf16.mxu0 %vm1531_vm0, %v7592_v54  ;;  %v1060_v54 = vadd.f32 %v7336_v36, %v797_v16  ;;  %v1318_v61 = vmax.f32 %v1062_v23, 0.0  ;;  %v539_v9 = vld [vmem:[%s6968_s18 + $0x5b0] sm:$0xff] }
  0xfb   : > { %v4258_v24 = vadd.f32 %v4257_v13, %v4256_v14  ;;  %v5031_v25 = vadd.f32 %v5030_v17, %v5029_v57  ;;  %v801_v13 = vmul.f32 %v7342_v2, %v538_v63 }
  0xfc   : > { %v6532_v30 = vpop.f32.mrb[4].mxu0  ;;  %v1316_v58 = vmax.f32 %v1060_v54, 0.0  ;;  %v1484_v44 = vpack.c.bf16 %v1318_v61, %v1317_v45 }
  0xfd   : > { %v4260_v32 = vadd.f32 %v4259_v28, %v4258_v24  ;;  %v5033_v33 = vadd.f32 %v5032_v27, %v5031_v25  ;;  %v6145_v34 = vpack.c.bf16 %v6532_v30, %v6532_v30  ;;  %v1966_v35 = vpop.f32.mrb[5].mxu0  ;;  %v4779_v19 = vmul.f32 %v6532_v30, %v6532_v30 }
  0xfe   : > { %v6143_v38 = vpack.c.bf16 %v1966_v35, %v1966_v35  ;;  %v4261_v39 = vsel %vm1531_vm0, %v1966_v35, 0.0  ;;  %v4777_v1 = vmul.f32 %v1966_v35, %v1966_v35  ;;  %v6533_v40 = vpop.f32.mrb[6].mxu0  ;;  %v4265_v59 = vsel %vm1531_vm0, %v6532_v30, 0.0 }
  0xff   : > { %v5035_v41 = vadd.f32 %v5034_v29, %v5033_v33  ;;  %4004 = vst.msk [vmem:[%s7648_s29 + $0x18] sm:$0xf] %vm3997_vm1, %v6145_v34  ;;  %v4262_v42 = vadd.f32 %v4261_v39, %v4260_v32  ;;  %v6146_v43 = vpack.c.bf16 %v6533_v40, %v6533_v40  ;;  %v1969_v47 = vpop.f32.mrb[7].mxu0  ;;  %v4780_v4 = vmul.f32 %v6533_v40, %v6533_v40 }
 0x100   : > { %4002 = vst.msk [vmem:[%s7648_s29 + $0x10] sm:$0xf] %vm3997_vm1, %v6143_v38  ;;  %v5036_v11 = vsel %vm1531_vm0, %v4777_v1, 0.0  ;;  %v6144_v31 = vpack.c.bf16 %v1969_v47, %v1969_v47  ;;  %v4263_v55 = vsel %vm1531_vm0, %v1969_v47, 0.0  ;;  %v4778_v56 = vmul.f32 %v1969_v47, %v1969_v47  ;;  %v540_v38 = vld [vmem:[%s6968_s18 + $0x5b8] sm:$0xff] }
 0x101   : > { %v5037_v53 = vadd.f32 %v5036_v11, %v5035_v41  ;;  %4005 = vst.msk [vmem:[%s7648_s29 + $0x1c] sm:$0xf] %vm3997_vm1, %v6146_v43  ;;  %6639 = vmatmul.mubr.msk.bf16.gmra.mrb[112].mxu0 %vm1531_vm0, %v7641_v49  ;;  %v4264_v60 = vadd.f32 %v4263_v55, %v4262_v42  ;;  %v4267_v0 = vsel %vm1531_vm0, %v6533_v40, 0.0  ;;  %v1483_v3 = vpack.c.bf16 %v1316_v58, %v1315_v48  ;;  %v541_v41 = vld [vmem:[%s6968_s18 + $0x5c0] sm:$0xff] }
 0x102   : > { %4003 = vst.msk [vmem:[%s7648_s29 + $0x14] sm:$0xf] %vm3997_vm1, %v6144_v31  ;;  %6642 = vmatprep.mubr.msk.bf16.mxu0 %vm1531_vm0, %v7643_v46  ;;  %v5038_v20 = vsel %vm1531_vm0, %v4778_v56, 0.0  ;;  %v800_v49 = vmul.f32 %v7342_v2, %v537_v52  ;;  %v5040_v5 = vsel %vm1531_vm0, %v4779_v19, 0.0  ;;  %v5042_v46 = vsel %vm1531_vm0, %v4780_v4, 0.0  ;;  %v542_v52 = vld [vmem:[%s6968_s18 + $0x5c8] sm:$0xff] }
 0x103   : > { %v4266_v62 = vadd.f32 %v4265_v59, %v4264_v60  ;;  %v5039_v6 = vadd.f32 %v5038_v20, %v5037_v53  ;;  %6702 = vmatprep.mubr.msk.bf16.mxu1 %vm1531_vm0, %v1483_v3  ;;  %v802_v28 = vmul.f32 %v7342_v2, %v539_v9  ;;  %v1064_v37 = vadd.f32 %v7336_v36, %v801_v13 }
 0x104   : > { %v6536_v7 = vpop.f32.mrb[8].mxu0  ;;  %v1063_v14 = vadd.f32 %v7336_v36, %v800_v49  ;;  %6703 = vmatmul.mubr.msk.bf16.gmra.mrb[48].mxu1 %vm1531_vm0, %v1484_v44  ;;  %v803_v31 = vmul.f32 %v7342_v2, %v540_v38  ;;  %v804_v58 = vmul.f32 %v7342_v2, %v541_v41 }
 0x105   : > { %v6149_v10 = vpack.c.bf16 %v6536_v7, %v6536_v7  ;;  %v1982_v12 = vpop.f32.mrb[9].mxu0  ;;  %v4268_v16 = vadd.f32 %v4267_v0, %v4266_v62  ;;  %v5041_v57 = vadd.f32 %v5040_v5, %v5039_v6  ;;  %v4783_v24 = vmul.f32 %v6536_v7, %v6536_v7 }
 0x106   : > { %v6147_v17 = vpack.c.bf16 %v1982_v12, %v1982_v12  ;;  %v4269_v18 = vsel %vm1531_vm0, %v1982_v12, 0.0  ;;  %v6537_v22 = vpop.f32.mrb[10].mxu0  ;;  %v4781_v25 = vmul.f32 %v1982_v12, %v1982_v12  ;;  %v4273_v39 = vsel %vm1531_vm0, %v6536_v7, 0.0 }
 0x107   : > { %4008 = vst.msk [vmem:[%s7648_s29 + $0x28] sm:$0xf] %vm3997_vm1, %v6149_v10  ;;  %v6150_v26 = vpack.c.bf16 %v6537_v22, %v6537_v22  ;;  %v1985_v27 = vpop.f32.mrb[11].mxu0  ;;  %v5043_v29 = vadd.f32 %v5042_v46, %v5041_v57  ;;  %v4270_v30 = vadd.f32 %v4269_v18, %v4268_v16  ;;  %v4784_v54 = vmul.f32 %v6537_v22, %v6537_v22  ;;  %v7764_v10 = vld [vmem:[%s6959_s14] ss:$0 sm:$0xff]  ;;  %v543_v57 = vld [vmem:[%s6968_s18 + $0x5d0] sm:$0xff] }
 0x108   : > { %4006 = vst.msk [vmem:[%s7648_s29 + $0x20] sm:$0xf] %vm3997_vm1, %v6147_v17  ;;  %v6148_v32 = vpack.c.bf16 %v1985_v27, %v1985_v27  ;;  %v5044_v33 = vsel %vm1531_vm0, %v4781_v25, 0.0  ;;  %v4271_v34 = vsel %vm1531_vm0, %v1985_v27, 0.0  ;;  %v4782_v35 = vmul.f32 %v1985_v27, %v1985_v27 }
 0x109   : > { %4009 = vst.msk [vmem:[%s7648_s29 + $0x2c] sm:$0xf] %vm3997_vm1, %v6150_v26  ;;  %6643 = vmatmul.mubr.msk.bf16.gmra.mrb[116].mxu0 %vm1531_vm0, %v7650_v50  ;;  %v5045_v1 = vadd.f32 %v5044_v33, %v5043_v29  ;;  %v4272_v40 = vadd.f32 %v4271_v34, %v4270_v30  ;;  %v1319_v23 = vmax.f32 %v1063_v14, 0.0  ;;  %v5048_v42 = vsel %vm1531_vm0, %v4783_v24, 0.0  ;;  %v544_v29 = vld [vmem:[%s6968_s18 + $0x5d8] sm:$0xff] }
 0x10a   : > { %4007 = vst.msk [vmem:[%s7648_s29 + $0x24] sm:$0xf] %vm3997_vm1, %v6148_v32  ;;  %6646 = vmatprep.mubr.msk.bf16.mxu0 %vm1531_vm0, %v7652_v51  ;;  %v4275_v43 = vsel %vm1531_vm0, %v6537_v22, 0.0  ;;  %v5046_v50 = vsel %vm1531_vm0, %v4782_v35, 0.0  ;;  %v1320_v47 = vmax.f32 %v1064_v37, 0.0  ;;  %v5050_v48 = vsel %vm1531_vm0, %v4784_v54, 0.0 }
 0x10b   : > { %v4274_v19 = vadd.f32 %v4273_v39, %v4272_v40  ;;  %v5047_v11 = vadd.f32 %v5046_v50, %v5045_v1  ;;  %v1065_v56 = vadd.f32 %v7336_v36, %v802_v28  ;;  %v805_v36 = vmul.f32 %v7342_v2, %v542_v52  ;;  %v7781_v33 = vld [vmem:[%s6951_s10] ss:$0 sm:$0xff] }
 0x10c   : > { %v6540_v4 = vpop.f32.mrb[12].mxu0  ;;  %v1485_v55 = vpack.c.bf16 %v1320_v47, %v1319_v23  ;;  %v1066_v2 = vadd.f32 %v7764_v10, %v803_v31  ;;  %v1067_v28 = vadd.f32 %v7764_v10, %v804_v58  ;;  %v806_v34 = vmul.f32 %v7781_v33, %v543_v57  ;;  %v545_v58 = vld [vmem:[%s6968_s18 + $0x5e0] sm:$0xff] }
 0x10d   : > { %v6153_v53 = vpack.c.bf16 %v6540_v4, %v6540_v4  ;;  %v1998_v51 = vpop.f32.mrb[13].mxu0  ;;  %v4276_v59 = vadd.f32 %v4275_v43, %v4274_v19  ;;  %v5049_v60 = vadd.f32 %v5048_v42, %v5047_v11  ;;  %v4787_v0 = vmul.f32 %v6540_v4, %v6540_v4 }
 0x10e   : > { %v6151_v45 = vpack.c.bf16 %v1998_v51, %v1998_v51  ;;  %v4277_v61 = vsel %vm1531_vm0, %v1998_v51, 0.0  ;;  %v6541_v63 = vpop.f32.mrb[14].mxu0  ;;  %v4785_v20 = vmul.f32 %v1998_v51, %v1998_v51  ;;  %6706 = vmatprep.mubr.msk.bf16.mxu1 %vm1531_vm0, %v1485_v55  ;;  %v4281_v12 = vsel %vm1531_vm0, %v6540_v4, 0.0 }
 0x10f   : > { %4012 = vst.msk [vmem:[%s7648_s29 + $0x38] sm:$0xf] %vm3997_vm1, %v6153_v53  ;;  %v6154_v3 = vpack.c.bf16 %v6541_v63, %v6541_v63  ;;  %v2001_v49 = vpop.f32.mrb[15].mxu0  ;;  %v5051_v5 = vadd.f32 %v5050_v48, %v5049_v60  ;;  %v4278_v62 = vadd.f32 %v4277_v61, %v4276_v59  ;;  %v4788_v6 = vmul.f32 %v6541_v63, %v6541_v63  ;;  %v546_v59 = vld [vmem:[%s6968_s18 + $0x5e8] sm:$0xff] }
 0x110   : > { %4010 = vst.msk [vmem:[%s7648_s29 + $0x30] sm:$0xf] %vm3997_vm1, %v6151_v45  ;;  %v6152_v7 = vpack.c.bf16 %v2001_v49, %v2001_v49  ;;  %v5052_v44 = vsel %vm1531_vm0, %v4785_v20, 0.0  ;;  %v4279_v9 = vsel %vm1531_vm0, %v2001_v49, 0.0  ;;  %v4786_v46 = vmul.f32 %v2001_v49, %v2001_v49 }
 0x111   : > { %4013 = vst.msk [vmem:[%s7648_s29 + $0x3c] sm:$0xf] %vm3997_vm1, %v6154_v3  ;;  %6647 = vmatmul.mubr.msk.bf16.gmra.mrb[120].mxu0 %vm1531_vm0, %v7654_v8  ;;  %v5053_v13 = vadd.f32 %v5052_v44, %v5051_v5  ;;  %v4280_v14 = vadd.f32 %v4279_v9, %v4278_v62  ;;  %v1321_v16 = vmax.f32 %v1065_v56, 0.0  ;;  %v5056_v17 = vsel %vm1531_vm0, %v4787_v0, 0.0 }
 0x112   : > { %4011 = vst.msk [vmem:[%s7648_s29 + $0x34] sm:$0xf] %vm3997_vm1, %v6152_v7  ;;  %6650 = vmatprep.mubr.msk.bf16.mxu0 %vm1531_vm0, %v7674_v15  ;;  %v4283_v8 = vsel %vm1531_vm0, %v6541_v63, 0.0  ;;  %v5054_v18 = vsel %vm1531_vm0, %v4786_v46, 0.0  ;;  %v1322_v22 = vmax.f32 %v1066_v2, 0.0  ;;  %v5058_v24 = vsel %vm1531_vm0, %v4788_v6, 0.0 }
 0x113   : > { %v4282_v25 = vadd.f32 %v4281_v12, %v4280_v14  ;;  %v5055_v26 = vadd.f32 %v5054_v18, %v5053_v13  ;;  %v1068_v32 = vadd.f32 %v7764_v10, %v805_v36  ;;  %v807_v43 = vmul.f32 %v7781_v33, %v544_v29 }
 0x114   : > { %v6544_v27 = vpop.f32.mrb[16].mxu0  ;;  %v1486_v54 = vpack.c.bf16 %v1322_v22, %v1321_v16  ;;  %v1323_v52 = vmax.f32 %v1067_v28, 0.0  ;;  %v1069_v63 = vadd.f32 %v7764_v10, %v806_v34  ;;  %v808_v6 = vmul.f32 %v7781_v33, %v545_v58 }
 0x115   : > { %v6157_v15 = vpack.c.bf16 %v6544_v27, %v6544_v27  ;;  %v2014_v30 = vpop.f32.mrb[17].mxu0  ;;  %v4284_v35 = vadd.f32 %v4283_v8, %v4282_v25  ;;  %v5057_v37 = vadd.f32 %v5056_v17, %v5055_v26  ;;  %v4791_v40 = vmul.f32 %v6544_v27, %v6544_v27 }
 0x116   : > { %v6155_v38 = vpack.c.bf16 %v2014_v30, %v2014_v30  ;;  %v4285_v39 = vsel %vm1531_vm0, %v2014_v30, 0.0  ;;  %v6545_v1 = vpop.f32.mrb[18].mxu0  ;;  %v4789_v23 = vmul.f32 %v2014_v30, %v2014_v30  ;;  %6707 = vmatmul.mubr.msk.bf16.gmra.mrb[52].mxu1 %vm1531_vm0, %v1486_v54  ;;  %v4289_v53 = vsel %vm1531_vm0, %v6544_v27, 0.0 }
 0x117   : > { %4016 = vst.msk [vmem:[%s7648_s29 + $0x48] sm:$0xf] %vm3997_vm1, %v6157_v15  ;;  %v6158_v41 = vpack.c.bf16 %v6545_v1, %v6545_v1  ;;  %v2017_v42 = vpop.f32.mrb[19].mxu0  ;;  %v5059_v50 = vadd.f32 %v5058_v24, %v5057_v37  ;;  %v4286_v47 = vadd.f32 %v4285_v39, %v4284_v35  ;;  %v4792_v48 = vmul.f32 %v6545_v1, %v6545_v1 }
 0x118   : > { %4014 = vst.msk [vmem:[%s7648_s29 + $0x40] sm:$0xf] %vm3997_vm1, %v6155_v38  ;;  %v6156_v19 = vpack.c.bf16 %v2017_v42, %v2017_v42  ;;  %v5060_v11 = vsel %vm1531_vm0, %v4789_v23, 0.0  ;;  %v4287_v4 = vsel %vm1531_vm0, %v2017_v42, 0.0  ;;  %v4790_v31 = vmul.f32 %v2017_v42, %v2017_v42  ;;  %v548_v42 = vld [vmem:[%s6968_s18 + $0x5f8] sm:$0xff] }
 0x119   : > { %4017 = vst.msk [vmem:[%s7648_s29 + $0x4c] sm:$0xf] %vm3997_vm1, %v6158_v41  ;;  %6651 = vmatmul.mubr.msk.bf16.gmra.mrb[124].mxu0 %vm1531_vm0, %v7685_v21  ;;  %v5061_v51 = vadd.f32 %v5060_v11, %v5059_v50  ;;  %v4288_v55 = vadd.f32 %v4287_v4, %v4286_v47  ;;  %v1324_v56 = vmax.f32 %v1068_v32, 0.0  ;;  %v5064_v60 = vsel %vm1531_vm0, %v4791_v40, 0.0  ;;  %v547_v32 = vld [vmem:[%s6968_s18 + $0x5f0] sm:$0xff] }
 0x11a   : > { %4015 = vst.msk [vmem:[%s7648_s29 + $0x44] sm:$0xf] %vm3997_vm1, %v6156_v19  ;;  %v4291_v45 = vsel %vm1531_vm0, %v6545_v1, 0.0  ;;  %v5062_v61 = vsel %vm1531_vm0, %v4790_v31, 0.0  ;;  %v5066_v21 = vsel %vm1531_vm0, %v4792_v48, 0.0  ;;  %v1070_v62 = vadd.f32 %v7764_v10, %v807_v43 }
 0x11b   : > { %v4290_v0 = vadd.f32 %v4289_v53, %v4288_v55  ;;  %v5063_v20 = vadd.f32 %v5062_v61, %v5061_v51  ;;  %v1487_v49 = vpack.c.bf16 %v1324_v56, %v1323_v52  ;;  %v809_v7 = vmul.f32 %v7781_v33, %v546_v59 }
 0x11c   : > { %v6548_v3 = vpop.f32.mrb[20].mxu0  ;;  %v1325_v17 = vmax.f32 %v1069_v63, 0.0  ;;  %v1326_v28 = vmax.f32 %v1070_v62, 0.0  ;;  %v1071_v54 = vadd.f32 %v7764_v10, %v808_v6  ;;  %v810_v19 = vmul.f32 %v7781_v33, %v547_v32 }
 0x11d   : > { %v6161_v36 = vpack.c.bf16 %v6548_v3, %v6548_v3  ;;  %v2030_v5 = vpop.f32.mrb[21].mxu0  ;;  %v4292_v44 = vadd.f32 %v4291_v45, %v4290_v0  ;;  %v5065_v9 = vadd.f32 %v5064_v60, %v5063_v20  ;;  %6710 = vmatprep.mubr.msk.bf16.mxu1 %vm1531_vm0, %v1487_v49  ;;  %v4795_v13 = vmul.f32 %v6548_v3, %v6548_v3  ;;  %v549_v49 = vld [vmem:[%s6968_s18 + $0x600] sm:$0xff] }
 0x11e   : > { %v6159_v46 = vpack.c.bf16 %v2030_v5, %v2030_v5  ;;  %v4293_v2 = vsel %vm1531_vm0, %v2030_v5, 0.0  ;;  %v6549_v12 = vpop.f32.mrb[22].mxu0  ;;  %v4793_v14 = vmul.f32 %v2030_v5, %v2030_v5  ;;  %v4297_v29 = vsel %vm1531_vm0, %v6548_v3, 0.0 }
 0x11f   : > { %4020 = vst.msk [vmem:[%s7648_s29 + $0x58] sm:$0xf] %vm3997_vm1, %v6161_v36  ;;  %v6162_v16 = vpack.c.bf16 %v6549_v12, %v6549_v12  ;;  %v2033_v57 = vpop.f32.mrb[23].mxu0  ;;  %v5067_v8 = vadd.f32 %v5066_v21, %v5065_v9  ;;  %v4294_v18 = vadd.f32 %v4293_v2, %v4292_v44  ;;  %v4796_v22 = vmul.f32 %v6549_v12, %v6549_v12 }
 0x120   : > { %4018 = vst.msk [vmem:[%s7648_s29 + $0x50] sm:$0xf] %vm3997_vm1, %v6159_v46  ;;  %v6160_v24 = vpack.c.bf16 %v2033_v57, %v2033_v57  ;;  %v5068_v25 = vsel %vm1531_vm0, %v4793_v14, 0.0  ;;  %v4295_v26 = vsel %vm1531_vm0, %v2033_v57, 0.0  ;;  %v4794_v27 = vmul.f32 %v2033_v57, %v2033_v57 }
 0x121   : > { %4021 = vst.msk [vmem:[%s7648_s29 + $0x5c] sm:$0xf] %vm3997_vm1, %v6162_v16  ;;  %v5069_v15 = vadd.f32 %v5068_v25, %v5067_v8  ;;  %v4296_v30 = vadd.f32 %v4295_v26, %v4294_v18  ;;  %v5072_v34 = vsel %vm1531_vm0, %v4795_v13, 0.0  ;;  %v1488_v37 = vpack.c.bf16 %v1326_v28, %v1325_v17  ;;  %v551_v17 = vld [vmem:[%s6968_s18 + $0x610] sm:$0xff] }
 0x122   : > { %4019 = vst.msk [vmem:[%s7648_s29 + $0x54] sm:$0xf] %vm3997_vm1, %v6160_v24  ;;  %v5070_v35 = vsel %vm1531_vm0, %v4794_v27, 0.0  ;;  %v1072_v38 = vadd.f32 %v7764_v10, %v809_v7  ;;  %v4299_v39 = vsel %vm1531_vm0, %v6549_v12, 0.0  ;;  %v5074_v1 = vsel %vm1531_vm0, %v4796_v22, 0.0  ;;  %v550_v7 = vld [vmem:[%s6968_s18 + $0x608] sm:$0xff] }
 0x123   : > { %v4298_v40 = vadd.f32 %v4297_v29, %v4296_v30  ;;  %v5071_v23 = vadd.f32 %v5070_v35, %v5069_v15  ;;  %6711 = vmatmul.mubr.msk.bf16.gmra.mrb[56].mxu1 %vm1531_vm0, %v1488_v37  ;;  %v1327_v47 = vmax.f32 %v1071_v54, 0.0  ;;  %v811_v59 = vmul.f32 %v7781_v33, %v548_v42 }
 0x124   : > { %v6552_v41 = vpop.f32.mrb[24].mxu0  ;;  %v1328_v48 = vmax.f32 %v1072_v38, 0.0  ;;  %v1073_v6 = vadd.f32 %v7764_v10, %v810_v19  ;;  %v812_v57 = vmul.f32 %v7781_v33, %v549_v49  ;;  %v813_v25 = vmul.f32 %v7781_v33, %v550_v7 }
 0x125   : > { %v6165_v43 = vpack.c.bf16 %v6552_v41, %v6552_v41  ;;  %v2046_v50 = vpop.f32.mrb[25].mxu0  ;;  %v4300_v11 = vadd.f32 %v4299_v39, %v4298_v40  ;;  %v5073_v4 = vadd.f32 %v5072_v34, %v5071_v23  ;;  %v4799_v51 = vmul.f32 %v6552_v41, %v6552_v41 }
 0x126   : > { %v6163_v31 = vpack.c.bf16 %v2046_v50, %v2046_v50  ;;  %v4301_v52 = vsel %vm1531_vm0, %v2046_v50, 0.0  ;;  %v6553_v53 = vpop.f32.mrb[26].mxu0  ;;  %v4797_v55 = vmul.f32 %v2046_v50, %v2046_v50  ;;  %v1489_v3 = vpack.c.bf16 %v1328_v48, %v1327_v47 }
 0x127   : > { %4024 = vst.msk [vmem:[%s7648_s29 + $0x68] sm:$0xf] %vm3997_vm1, %v6165_v43  ;;  %v6166_v56 = vpack.c.bf16 %v6553_v53, %v6553_v53  ;;  %v2049_v58 = vpop.f32.mrb[27].mxu0  ;;  %v5075_v60 = vadd.f32 %v5074_v1, %v5073_v4  ;;  %v4302_v45 = vadd.f32 %v4301_v52, %v4300_v11  ;;  %v4800_v61 = vmul.f32 %v6553_v53, %v6553_v53  ;;  %v552_v43 = vld [vmem:[%s6968_s18 + $0x618] sm:$0xff] }
 0x128   : > { %4022 = vst.msk [vmem:[%s7648_s29 + $0x60] sm:$0xf] %vm3997_vm1, %v6163_v31  ;;  %v6164_v63 = vpack.c.bf16 %v2049_v58, %v2049_v58  ;;  %v5076_v21 = vsel %vm1531_vm0, %v4797_v55, 0.0  ;;  %v4303_v0 = vsel %vm1531_vm0, %v2049_v58, 0.0  ;;  %v4798_v20 = vmul.f32 %v2049_v58, %v2049_v58  ;;  %6714 = vmatprep.mubr.msk.bf16.mxu1 %vm1531_vm0, %v1489_v3 }
 0x129   : > { %4025 = vst.msk [vmem:[%s7648_s29 + $0x6c] sm:$0xf] %vm3997_vm1, %v6166_v56  ;;  %v4305_v36 = vsel %vm1531_vm0, %v6552_v41, 0.0  ;;  %v5077_v5 = vadd.f32 %v5076_v21, %v5075_v60  ;;  %v4304_v62 = vadd.f32 %v4303_v0, %v4302_v45  ;;  %v5080_v44 = vsel %vm1531_vm0, %v4799_v51, 0.0 }
 0x12a   : > { %4023 = vst.msk [vmem:[%s7648_s29 + $0x64] sm:$0xf] %vm3997_vm1, %v6164_v63  ;;  %v4307_v9 = vsel %vm1531_vm0, %v6553_v53, 0.0  ;;  %v5078_v46 = vsel %vm1531_vm0, %v4798_v20, 0.0  ;;  %v1074_v2 = vadd.f32 %v7764_v10, %v811_v59  ;;  %v5082_v12 = vsel %vm1531_vm0, %v4800_v61, 0.0  ;;  %v553_v59 = vld [vmem:[%s6968_s18 + $0x620] sm:$0xff] }
 0x12b   : > { %v4306_v13 = vadd.f32 %v4305_v36, %v4304_v62  ;;  %v5079_v14 = vadd.f32 %v5078_v46, %v5077_v5  ;;  %v1329_v22 = vmax.f32 %v1073_v6, 0.0  ;;  %v814_v35 = vmul.f32 %v7781_v33, %v551_v17 }
 0x12c   : > { %v6556_v16 = vpop.f32.mrb[28].mxu0  ;;  %v1330_v24 = vmax.f32 %v1074_v2, 0.0  ;;  %v1075_v19 = vadd.f32 %v7764_v10, %v812_v57  ;;  %v1076_v52 = vadd.f32 %v7764_v10, %v813_v25  ;;  %v815_v58 = vmul.f32 %v7781_v33, %v552_v43  ;;  %v555_v25 = vld [vmem:[%s6968_s18 + $0x630] sm:$0xff] }
 0x12d   : > { %v6169_v8 = vpack.c.bf16 %v6556_v16, %v6556_v16  ;;  %v2062_v18 = vpop.f32.mrb[29].mxu0  ;;  %v4308_v26 = vadd.f32 %v4307_v9, %v4306_v13  ;;  %v5081_v27 = vadd.f32 %v5080_v44, %v5079_v14  ;;  %v4803_v30 = vmul.f32 %v6556_v16, %v6556_v16  ;;  %v554_v13 = vld [vmem:[%s6968_s18 + $0x628] sm:$0xff] }
 0x12e   : > { %v6167_v28 = vpack.c.bf16 %v2062_v18, %v2062_v18  ;;  %v4309_v29 = vsel %vm1531_vm0, %v2062_v18, 0.0  ;;  %v6557_v15 = vpop.f32.mrb[30].mxu0  ;;  %v4801_v54 = vmul.f32 %v2062_v18, %v2062_v18  ;;  %v1490_v42 = vpack.c.bf16 %v1330_v24, %v1329_v22 }
 0x12f   : > { %4028 = vst.msk [vmem:[%s7648_s29 + $0x78] sm:$0xf] %vm3997_vm1, %v6169_v8  ;;  %v6170_v32 = vpack.c.bf16 %v6557_v15, %v6557_v15  ;;  %v2065_v34 = vpop.f32.mrb[31].mxu0  ;;  %v5083_v37 = vadd.f32 %v5082_v12, %v5081_v27  ;;  %v4310_v38 = vadd.f32 %v4309_v29, %v4308_v26  ;;  %v4804_v39 = vmul.f32 %v6557_v15, %v6557_v15 }
 0x130   : > { %4026 = vst.msk [vmem:[%s7648_s29 + $0x70] sm:$0xf] %vm3997_vm1, %v6167_v28  ;;  %v6168_v1 = vpack.c.bf16 %v2065_v34, %v2065_v34  ;;  %v5084_v40 = vsel %vm1531_vm0, %v4801_v54, 0.0  ;;  %v4311_v23 = vsel %vm1531_vm0, %v2065_v34, 0.0  ;;  %v4802_v41 = vmul.f32 %v2065_v34, %v2065_v34  ;;  %6715 = vmatmul.mubr.msk.bf16.gmra.mrb[60].mxu1 %vm1531_vm0, %v1490_v42 }
 0x131   : > { %4029 = vst.msk [vmem:[%s7648_s29 + $0x7c] sm:$0xf] %vm3997_vm1, %v6170_v32  ;;  %v4313_v50 = vsel %vm1531_vm0, %v6556_v16, 0.0  ;;  %v5085_v47 = vadd.f32 %v5084_v40, %v5083_v37  ;;  %v4312_v48 = vadd.f32 %v4311_v23, %v4310_v38  ;;  %v5088_v11 = vsel %vm1531_vm0, %v4803_v30, 0.0 }
 0x132   : > { %4027 = vst.msk [vmem:[%s7648_s29 + $0x74] sm:$0xf] %vm3997_vm1, %v6168_v1  ;;  %v4315_v4 = vsel %vm1531_vm0, %v6557_v15, 0.0  ;;  %v5086_v31 = vsel %vm1531_vm0, %v4802_v41, 0.0  ;;  %v5090_v53 = vsel %vm1531_vm0, %v4804_v39, 0.0  ;;  %v1331_v61 = vmax.f32 %v1075_v19, 0.0 }
 0x133   : > { %v4314_v51 = vadd.f32 %v4313_v50, %v4312_v48  ;;  %v5087_v55 = vadd.f32 %v5086_v31, %v5085_v47  ;;  %v1332_v63 = vmax.f32 %v1076_v52, 0.0  ;;  %v7882_v21 = vadd.f32 %v7764_v10, %v814_v35 }
 0x134   : > { %v6560_v56 = vpop.f32.mrb[32].mxu0  ;;  %v816_v44 = vmul.f32 %v7781_v33, %v553_v59  ;;  %v1078_v24 = vadd.f32 %v7764_v10, %v815_v58  ;;  %v817_v29 = vmul.f32 %v7781_v33, %v554_v13  ;;  %v818_v1 = vmul.f32 %v7781_v33, %v555_v25  ;;  %v556_v59 = vld [vmem:[%s6968_s18 + $0x638] sm:$0xff] }
 0x135   : > { %v6173_v60 = vpack.c.bf16 %v6560_v56, %v6560_v56  ;;  %v2078_v45 = vpop.f32.mrb[33].mxu0  ;;  %v4316_v0 = vadd.f32 %v4315_v4, %v4314_v51  ;;  %v5089_v20 = vadd.f32 %v5088_v11, %v5087_v55  ;;  %v4807_v5 = vmul.f32 %v6560_v56, %v6560_v56 }
 0x136   : > { %v6171_v3 = vpack.c.bf16 %v2078_v45, %v2078_v45  ;;  %v4317_v49 = vsel %vm1531_vm0, %v2078_v45, 0.0  ;;  %v6561_v36 = vpop.f32.mrb[34].mxu0  ;;  %v4805_v62 = vmul.f32 %v2078_v45, %v2078_v45  ;;  %v1491_v17 = vpack.c.bf16 %v1332_v63, %v1331_v61 }
 0x137   : > { %4032 = vst.msk [vmem:[%s7648_s29 + $0x88] sm:$0xf] %vm3997_vm1, %v6173_v60  ;;  %v6174_v6 = vpack.c.bf16 %v6561_v36, %v6561_v36  ;;  %v2081_v7 = vpop.f32.mrb[35].mxu0  ;;  %v5091_v9 = vadd.f32 %v5090_v53, %v5089_v20  ;;  %v4318_v46 = vadd.f32 %v4317_v49, %v4316_v0  ;;  %v4808_v2 = vmul.f32 %v6561_v36, %v6561_v36 }
 0x138   : > { %4030 = vst.msk [vmem:[%s7648_s29 + $0x80] sm:$0xf] %vm3997_vm1, %v6171_v3  ;;  %v6172_v12 = vpack.c.bf16 %v2081_v7, %v2081_v7  ;;  %v5092_v14 = vsel %vm1531_vm0, %v4805_v62, 0.0  ;;  %v4319_v16 = vsel %vm1531_vm0, %v2081_v7, 0.0  ;;  %v4806_v57 = vmul.f32 %v2081_v7, %v2081_v7  ;;  %6718 = vmatprep.mubr.msk.bf16.mxu1 %vm1531_vm0, %v1491_v17 }
 0x139   : > { %4033 = vst.msk [vmem:[%s7648_s29 + $0x8c] sm:$0xf] %vm3997_vm1, %v6174_v6  ;;  %v4321_v8 = vsel %vm1531_vm0, %v6560_v56, 0.0  ;;  %v5093_v18 = vadd.f32 %v5092_v14, %v5091_v9  ;;  %v4320_v22 = vadd.f32 %v4319_v16, %v4318_v46  ;;  %v5096_v26 = vsel %vm1531_vm0, %v4807_v5, 0.0 }
 0x13a   : > { %4031 = vst.msk [vmem:[%s7648_s29 + $0x84] sm:$0xf] %vm3997_vm1, %v6172_v12  ;;  %v4323_v27 = vsel %vm1531_vm0, %v6561_v36, 0.0  ;;  %v5094_v28 = vsel %vm1531_vm0, %v4806_v57, 0.0  ;;  %v5098_v15 = vsel %vm1531_vm0, %v4808_v2, 0.0  ;;  %v1333_v34 = vmax.f32 %v7882_v21, 0.0 }
 0x13b   : > { %v4322_v30 = vadd.f32 %v4321_v8, %v4320_v22  ;;  %v5095_v54 = vadd.f32 %v5094_v28, %v5093_v18  ;;  %v1334_v38 = vmax.f32 %v1078_v24, 0.0  ;;  %v1079_v39 = vadd.f32 %v7764_v10, %v816_v44  ;;  %v557_v21 = vld [vmem:[%s6968_s18 + $0x640] sm:$0xff]  ;;  %v558_v44 = vld [vmem:[%s6968_s18 + $0x648] sm:$0xff] }
 0x13c   : > { %v6564_v32 = vpop.f32.mrb[36].mxu0  ;;  %v1080_v11 = vadd.f32 %v7764_v10, %v817_v29  ;;  %v819_v7 = vmul.f32 %v7781_v33, %v556_v59  ;;  %v1081_v12 = vadd.f32 %v7764_v10, %v818_v1  ;;  %v820_v13 = vmul.f32 %v7781_v33, %v557_v21  ;;  %v559_v1 = vld [vmem:[%s6968_s18 + $0x650] sm:$0xff] }
 0x13d   : > { %v6177_v35 = vpack.c.bf16 %v6564_v32, %v6564_v32  ;;  %v2094_v37 = vpop.f32.mrb[37].mxu0  ;;  %v4324_v40 = vadd.f32 %v4323_v27, %v4322_v30  ;;  %v5097_v23 = vadd.f32 %v5096_v26, %v5095_v54  ;;  %v4811_v50 = vmul.f32 %v6564_v32, %v6564_v32 }
 0x13e   : > { %v6175_v41 = vpack.c.bf16 %v2094_v37, %v2094_v37  ;;  %v4325_v42 = vsel %vm1531_vm0, %v2094_v37, 0.0  ;;  %v6565_v43 = vpop.f32.mrb[38].mxu0  ;;  %v4809_v47 = vmul.f32 %v2094_v37, %v2094_v37  ;;  %v1492_v58 = vpack.c.bf16 %v1334_v38, %v1333_v34 }
 0x13f   : > { %4036 = vst.msk [vmem:[%s7648_s29 + $0x98] sm:$0xf] %vm3997_vm1, %v6177_v35  ;;  %v6178_v48 = vpack.c.bf16 %v6565_v43, %v6565_v43  ;;  %v2097_v19 = vpop.f32.mrb[39].mxu0  ;;  %v5099_v4 = vadd.f32 %v5098_v15, %v5097_v23  ;;  %v4326_v31 = vadd.f32 %v4325_v42, %v4324_v40  ;;  %v4812_v52 = vmul.f32 %v6565_v43, %v6565_v43 }
 0x140   : > { %4034 = vst.msk [vmem:[%s7648_s29 + $0x90] sm:$0xf] %vm3997_vm1, %v6175_v41  ;;  %v6176_v53 = vpack.c.bf16 %v2097_v19, %v2097_v19  ;;  %v5100_v51 = vsel %vm1531_vm0, %v4809_v47, 0.0  ;;  %v4327_v55 = vsel %vm1531_vm0, %v2097_v19, 0.0  ;;  %v4810_v56 = vmul.f32 %v2097_v19, %v2097_v19  ;;  %6719 = vmatmul.mubr.msk.bf16.gmra.mrb[64].mxu1 %vm1531_vm0, %v1492_v58 }
 0x141   : > { %4037 = vst.msk [vmem:[%s7648_s29 + $0x9c] sm:$0xf] %vm3997_vm1, %v6178_v48  ;;  %v4329_v60 = vsel %vm1531_vm0, %v6564_v32, 0.0  ;;  %v5101_v45 = vadd.f32 %v5100_v51, %v5099_v4  ;;  %v4328_v61 = vadd.f32 %v4327_v55, %v4326_v31  ;;  %v1335_v63 = vmax.f32 %v1079_v39, 0.0 }
 0x142   : > { %4035 = vst.msk [vmem:[%s7648_s29 + $0x94] sm:$0xf] %vm3997_vm1, %v6176_v53  ;;  %v5104_v0 = vsel %vm1531_vm0, %v4811_v50, 0.0  ;;  %v4331_v20 = vsel %vm1531_vm0, %v6565_v43, 0.0  ;;  %v5102_v3 = vsel %vm1531_vm0, %v4810_v56, 0.0  ;;  %v1336_v49 = vmax.f32 %v1080_v11, 0.0 }
 0x143   : > { %v5106_v36 = vsel %vm1531_vm0, %v4812_v52, 0.0  ;;  %v4330_v5 = vadd.f32 %v4329_v60, %v4328_v61  ;;  %v5103_v62 = vadd.f32 %v5102_v3, %v5101_v45  ;;  %v821_v26 = vmul.f32 %v7781_v33, %v558_v44  ;;  %v560_v11 = vld [vmem:[%s6968_s18 + $0x658] sm:$0xff] }
 0x144   : > { %v6568_v6 = vpop.f32.mrb[40].mxu0  ;;  %v1493_v2 = vpack.c.bf16 %v1336_v49, %v1335_v63  ;;  %v1082_v34 = vadd.f32 %v7764_v10, %v819_v7  ;;  %v1337_v39 = vmax.f32 %v1081_v12, 0.0  ;;  %v1083_v19 = vadd.f32 %v7764_v10, %v820_v13  ;;  %v561_v12 = vld [vmem:[%s6968_s18 + $0x660] sm:$0xff]  ;;  %v562_v13 = vld [vmem:[%s6968_s18 + $0x668] sm:$0xff] }
 0x145   : > { %v6181_v9 = vpack.c.bf16 %v6568_v6, %v6568_v6  ;;  %v2110_v46 = vpop.f32.mrb[41].mxu0  ;;  %v4332_v14 = vadd.f32 %v4331_v20, %v4330_v5  ;;  %v5105_v16 = vadd.f32 %v5104_v0, %v5103_v62  ;;  %v4815_v18 = vmul.f32 %v6568_v6, %v6568_v6 }
 0x146   : > { %v6179_v57 = vpack.c.bf16 %v2110_v46, %v2110_v46  ;;  %v4333_v17 = vsel %vm1531_vm0, %v2110_v46, 0.0  ;;  %v6569_v8 = vpop.f32.mrb[42].mxu0  ;;  %v4813_v22 = vmul.f32 %v2110_v46, %v2110_v46  ;;  %6722 = vmatprep.mubr.msk.bf16.mxu1 %vm1531_vm0, %v1493_v2  ;;  %v4337_v35 = vsel %vm1531_vm0, %v6568_v6, 0.0 }
 0x147   : > { %4040 = vst.msk [vmem:[%s7648_s29 + $0xa8] sm:$0xf] %vm3997_vm1, %v6181_v9  ;;  %v6182_v24 = vpack.c.bf16 %v6569_v8, %v6569_v8  ;;  %v2113_v25 = vpop.f32.mrb[43].mxu0  ;;  %v5107_v27 = vadd.f32 %v5106_v36, %v5105_v16  ;;  %v4334_v28 = vadd.f32 %v4333_v17, %v4332_v14  ;;  %v4816_v29 = vmul.f32 %v6569_v8, %v6569_v8 }
 0x148   : > { %4038 = vst.msk [vmem:[%s7648_s29 + $0xa0] sm:$0xf] %vm3997_vm1, %v6179_v57  ;;  %v6180_v15 = vpack.c.bf16 %v2113_v25, %v2113_v25  ;;  %v5108_v30 = vsel %vm1531_vm0, %v4813_v22, 0.0  ;;  %v4335_v54 = vsel %vm1531_vm0, %v2113_v25, 0.0  ;;  %v4814_v32 = vmul.f32 %v2113_v25, %v2113_v25 }
 0x149   : > { %4041 = vst.msk [vmem:[%s7648_s29 + $0xac] sm:$0xf] %vm3997_vm1, %v6182_v24  ;;  %v5109_v37 = vadd.f32 %v5108_v30, %v5107_v27  ;;  %v4336_v38 = vadd.f32 %v4335_v54, %v4334_v28  ;;  %v5112_v40 = vsel %vm1531_vm0, %v4815_v18, 0.0  ;;  %v4339_v23 = vsel %vm1531_vm0, %v6569_v8, 0.0 }
 0x14a   : > { %4039 = vst.msk [vmem:[%s7648_s29 + $0xa4] sm:$0xf] %vm3997_vm1, %v6180_v15  ;;  %v5110_v41 = vsel %vm1531_vm0, %v4814_v32, 0.0  ;;  %v1338_v42 = vmax.f32 %v1082_v34, 0.0  ;;  %v5114_v43 = vsel %vm1531_vm0, %v4816_v29, 0.0  ;;  %v1084_v53 = vadd.f32 %v7764_v10, %v821_v26 }
 0x14b   : > { %v4338_v50 = vadd.f32 %v4337_v35, %v4336_v38  ;;  %v5111_v47 = vadd.f32 %v5110_v41, %v5109_v37  ;;  %v822_v51 = vmul.f32 %v7781_v33, %v559_v1  ;;  %v823_v0 = vmul.f32 %v7781_v33, %v560_v11 }
 0x14c   : > { %v6572_v48 = vpop.f32.mrb[44].mxu0  ;;  %v1494_v52 = vpack.c.bf16 %v1338_v42, %v1337_v39  ;;  %v1339_v7 = vmax.f32 %v1083_v19, 0.0  ;;  %v1340_v2 = vmax.f32 %v1084_v53, 0.0  ;;  %v824_v29 = vmul.f32 %v7781_v33, %v561_v12  ;;  %v563_v53 = vld [vmem:[%s6968_s18 + $0x670] sm:$0xff] }
 0x14d   : > { %v6185_v4 = vpack.c.bf16 %v6572_v48, %v6572_v48  ;;  %v2126_v31 = vpop.f32.mrb[45].mxu0  ;;  %v4340_v55 = vadd.f32 %v4339_v23, %v4338_v50  ;;  %v5113_v56 = vadd.f32 %v5112_v40, %v5111_v47  ;;  %v4819_v45 = vmul.f32 %v6572_v48, %v6572_v48 }
 0x14e   : > { %v6183_v58 = vpack.c.bf16 %v2126_v31, %v2126_v31  ;;  %v4341_v59 = vsel %vm1531_vm0, %v2126_v31, 0.0  ;;  %v6573_v60 = vpop.f32.mrb[46].mxu0  ;;  %v4817_v61 = vmul.f32 %v2126_v31, %v2126_v31  ;;  %6723 = vmatmul.mubr.msk.bf16.gmra.mrb[68].mxu1 %vm1531_vm0, %v1494_v52  ;;  %v4345_v44 = vsel %vm1531_vm0, %v6572_v48, 0.0 }
 0x14f   : > { %4044 = vst.msk [vmem:[%s7648_s29 + $0xb8] sm:$0xf] %vm3997_vm1, %v6185_v4  ;;  %v6186_v63 = vpack.c.bf16 %v6573_v60, %v6573_v60  ;;  %v2129_v21 = vpop.f32.mrb[47].mxu0  ;;  %v5115_v20 = vadd.f32 %v5114_v43, %v5113_v56  ;;  %v4342_v3 = vadd.f32 %v4341_v59, %v4340_v55  ;;  %v4820_v49 = vmul.f32 %v6573_v60, %v6573_v60 }
 0x150   : > { %4042 = vst.msk [vmem:[%s7648_s29 + $0xb0] sm:$0xf] %vm3997_vm1, %v6183_v58  ;;  %v6184_v36 = vpack.c.bf16 %v2129_v21, %v2129_v21  ;;  %v5116_v5 = vsel %vm1531_vm0, %v4817_v61, 0.0  ;;  %v4343_v62 = vsel %vm1531_vm0, %v2129_v21, 0.0  ;;  %v4818_v6 = vmul.f32 %v2129_v21, %v2129_v21  ;;  %v564_v21 = vld [vmem:[%s6968_s18 + $0x678] sm:$0xff] }
 0x151   : > { %4045 = vst.msk [vmem:[%s7648_s29 + $0xbc] sm:$0xf] %vm3997_vm1, %v6186_v63  ;;  %v5117_v9 = vadd.f32 %v5116_v5, %v5115_v20  ;;  %v4344_v46 = vadd.f32 %v4343_v62, %v4342_v3  ;;  %v5120_v14 = vsel %vm1531_vm0, %v4819_v45, 0.0  ;;  %v4347_v16 = vsel %vm1531_vm0, %v6573_v60, 0.0 }
 0x152   : > { %4043 = vst.msk [vmem:[%s7648_s29 + $0xb4] sm:$0xf] %vm3997_vm1, %v6184_v36  ;;  %v5118_v57 = vsel %vm1531_vm0, %v4818_v6, 0.0  ;;  %v1085_v17 = vadd.f32 %v7764_v10, %v822_v51  ;;  %v5122_v8 = vsel %vm1531_vm0, %v4820_v49, 0.0  ;;  %v1495_v25 = vpack.c.bf16 %v1340_v2, %v1339_v7 }
 0x153   : > { %v4346_v18 = vadd.f32 %v4345_v44, %v4344_v46  ;;  %v5119_v22 = vadd.f32 %v5118_v57, %v5117_v9  ;;  %v1086_v28 = vadd.f32 %v7764_v10, %v823_v0  ;;  %v825_v15 = vmul.f32 %v7781_v33, %v562_v13 }
 0x154   : > { %v6576_v24 = vpop.f32.mrb[48].mxu0  ;;  %6726 = vmatprep.mubr.msk.bf16.mxu1 %vm1531_vm0, %v1495_v25  ;;  %v1341_v40 = vmax.f32 %v1085_v17, 0.0  ;;  %v1087_v52 = vadd.f32 %v7764_v10, %v824_v29  ;;  %v826_v36 = vmul.f32 %v7781_v33, %v563_v53  ;;  %v827_v13 = vmul.f32 %v7781_v33, %v564_v21  ;;  %v565_v25 = vld [vmem:[%s6968_s18 + $0x680] sm:$0xff] }
 0x155   : > { %v6189_v26 = vpack.c.bf16 %v6576_v24, %v6576_v24  ;;  %v2142_v27 = vpop.f32.mrb[49].mxu0  ;;  %v4348_v30 = vadd.f32 %v4347_v16, %v4346_v18  ;;  %v5121_v54 = vadd.f32 %v5120_v14, %v5119_v22  ;;  %v4823_v37 = vmul.f32 %v6576_v24, %v6576_v24 }
 0x156   : > { %v6187_v32 = vpack.c.bf16 %v2142_v27, %v2142_v27  ;;  %v4349_v34 = vsel %vm1531_vm0, %v2142_v27, 0.0  ;;  %v6577_v35 = vpop.f32.mrb[50].mxu0  ;;  %v4821_v38 = vmul.f32 %v2142_v27, %v2142_v27  ;;  %v1342_v19 = vmax.f32 %v1086_v28, 0.0 }
 0x157   : > { %4048 = vst.msk [vmem:[%s7648_s29 + $0xc8] sm:$0xf] %vm3997_vm1, %v6189_v26  ;;  %v6190_v39 = vpack.c.bf16 %v6577_v35, %v6577_v35  ;;  %v2145_v1 = vpop.f32.mrb[51].mxu0  ;;  %v5123_v23 = vadd.f32 %v5122_v8, %v5121_v54  ;;  %v4350_v41 = vadd.f32 %v4349_v34, %v4348_v30  ;;  %v4824_v42 = vmul.f32 %v6577_v35, %v6577_v35 }
 0x158   : > { %4046 = vst.msk [vmem:[%s7648_s29 + $0xc0] sm:$0xf] %vm3997_vm1, %v6187_v32  ;;  %v6188_v43 = vpack.c.bf16 %v2145_v1, %v2145_v1  ;;  %v5124_v50 = vsel %vm1531_vm0, %v4821_v38, 0.0  ;;  %v4351_v47 = vsel %vm1531_vm0, %v2145_v1, 0.0  ;;  %v4822_v48 = vmul.f32 %v2145_v1, %v2145_v1 }
 0x159   : > { %4049 = vst.msk [vmem:[%s7648_s29 + $0xcc] sm:$0xf] %vm3997_vm1, %v6190_v39  ;;  %v4353_v11 = vsel %vm1531_vm0, %v6576_v24, 0.0  ;;  %v5125_v4 = vadd.f32 %v5124_v50, %v5123_v23  ;;  %v4352_v31 = vadd.f32 %v4351_v47, %v4350_v41  ;;  %v5128_v51 = vsel %vm1531_vm0, %v4823_v37, 0.0 }
 0x15a   : > { %4047 = vst.msk [vmem:[%s7648_s29 + $0xc4] sm:$0xf] %vm3997_vm1, %v6188_v43  ;;  %v5126_v55 = vsel %vm1531_vm0, %v4822_v48, 0.0  ;;  %v1496_v56 = vpack.c.bf16 %v1342_v19, %v1341_v40  ;;  %v1088_v58 = vadd.f32 %v7764_v10, %v825_v15  ;;  %v4355_v59 = vsel %vm1531_vm0, %v6577_v35, 0.0  ;;  %v566_v15 = vld [vmem:[%s6968_s18 + $0x688] sm:$0xff]  ;;  %v567_v40 = vld [vmem:[%s6968_s18 + $0x690] sm:$0xff] }
 0x15b   : > { %v5130_v60 = vsel %vm1531_vm0, %v4824_v42, 0.0  ;;  %v4354_v45 = vadd.f32 %v4353_v11, %v4352_v31  ;;  %v5127_v61 = vadd.f32 %v5126_v55, %v5125_v4  ;;  %v1343_v3 = vmax.f32 %v1087_v52, 0.0 }
 0x15c   : > { %v6580_v63 = vpop.f32.mrb[52].mxu0  ;;  %6727 = vmatmul.mubr.msk.bf16.gmra.mrb[72].mxu1 %vm1531_vm0, %v1496_v56  ;;  %v1344_v49 = vmax.f32 %v1088_v58, 0.0  ;;  %v1089_v29 = vadd.f32 %v7764_v10, %v826_v36  ;;  %v1090_v34 = vadd.f32 %v7764_v10, %v827_v13  ;;  %v828_v1 = vmul.f32 %v7781_v33, %v565_v25  ;;  %v569_v13 = vld [vmem:[%s6968_s18 + $0x6a0] sm:$0xff] }
 0x15d   : > { %v6193_v0 = vpack.c.bf16 %v6580_v63, %v6580_v63  ;;  %v2158_v20 = vpop.f32.mrb[53].mxu0  ;;  %v4356_v5 = vadd.f32 %v4355_v59, %v4354_v45  ;;  %v5129_v62 = vadd.f32 %v5128_v51, %v5127_v61  ;;  %v4827_v9 = vmul.f32 %v6580_v63, %v6580_v63 }
 0x15e   : > { %v6191_v6 = vpack.c.bf16 %v2158_v20, %v2158_v20  ;;  %v4357_v7 = vsel %vm1531_vm0, %v2158_v20, 0.0  ;;  %v6581_v44 = vpop.f32.mrb[54].mxu0  ;;  %v4825_v46 = vmul.f32 %v2158_v20, %v2158_v20  ;;  %v1497_v24 = vpack.c.bf16 %v1344_v49, %v1343_v3 }
 0x15f   : > { %4052 = vst.msk [vmem:[%s7648_s29 + $0xd8] sm:$0xf] %vm3997_vm1, %v6193_v0  ;;  %v6194_v2 = vpack.c.bf16 %v6581_v44, %v6581_v44  ;;  %v2161_v12 = vpop.f32.mrb[55].mxu0  ;;  %v5131_v14 = vadd.f32 %v5130_v60, %v5129_v62  ;;  %v4358_v16 = vadd.f32 %v4357_v7, %v4356_v5  ;;  %v4828_v57 = vmul.f32 %v6581_v44, %v6581_v44  ;;  %v568_v0 = vld [vmem:[%s6968_s18 + $0x698] sm:$0xff] }
 0x160   : > { %4050 = vst.msk [vmem:[%s7648_s29 + $0xd0] sm:$0xf] %vm3997_vm1, %v6191_v6  ;;  %v6192_v17 = vpack.c.bf16 %v2161_v12, %v2161_v12  ;;  %v5132_v8 = vsel %vm1531_vm0, %v4825_v46, 0.0  ;;  %v4359_v18 = vsel %vm1531_vm0, %v2161_v12, 0.0  ;;  %v4826_v22 = vmul.f32 %v2161_v12, %v2161_v12  ;;  %6730 = vmatprep.mubr.msk.bf16.mxu1 %vm1531_vm0, %v1497_v24 }
 0x161   : > { %4053 = vst.msk [vmem:[%s7648_s29 + $0xdc] sm:$0xf] %vm3997_vm1, %v6194_v2  ;;  %v4361_v26 = vsel %vm1531_vm0, %v6580_v63, 0.0  ;;  %v5133_v27 = vadd.f32 %v5132_v8, %v5131_v14  ;;  %v4360_v28 = vadd.f32 %v4359_v18, %v4358_v16  ;;  %v5136_v30 = vsel %vm1531_vm0, %v4827_v9, 0.0 }
 0x162   : > { %4051 = vst.msk [vmem:[%s7648_s29 + $0xd4] sm:$0xf] %vm3997_vm1, %v6192_v17  ;;  %v4363_v54 = vsel %vm1531_vm0, %v6581_v44, 0.0  ;;  %v5134_v32 = vsel %vm1531_vm0, %v4826_v22, 0.0  ;;  %v5138_v35 = vsel %vm1531_vm0, %v4828_v57, 0.0  ;;  %v1345_v42 = vmax.f32 %v1089_v29, 0.0 }
 0x163   : > { %v4362_v37 = vadd.f32 %v4361_v26, %v4360_v28  ;;  %v5135_v38 = vadd.f32 %v5134_v32, %v5133_v27  ;;  %v1346_v43 = vmax.f32 %v1090_v34, 0.0  ;;  %v829_v50 = vmul.f32 %v7781_v33, %v566_v15 }
 0x164   : > { %v6584_v39 = vpop.f32.mrb[56].mxu0  ;;  %v830_v55 = vmul.f32 %v7781_v33, %v567_v40  ;;  %v1091_v36 = vadd.f32 %v7764_v10, %v828_v1  ;;  %v831_v12 = vmul.f32 %v7781_v33, %v568_v0 }
 0x165   : > { %v6197_v23 = vpack.c.bf16 %v6584_v39, %v6584_v39  ;;  %v2174_v41 = vpop.f32.mrb[57].mxu0  ;;  %v4364_v47 = vadd.f32 %v4363_v54, %v4362_v37  ;;  %v5137_v48 = vadd.f32 %v5136_v30, %v5135_v38  ;;  %v4831_v31 = vmul.f32 %v6584_v39, %v6584_v39 }
 0x166   : > { %v6195_v19 = vpack.c.bf16 %v2174_v41, %v2174_v41  ;;  %v4365_v11 = vsel %vm1531_vm0, %v2174_v41, 0.0  ;;  %v6585_v4 = vpop.f32.mrb[58].mxu0  ;;  %v4829_v52 = vmul.f32 %v2174_v41, %v2174_v41  ;;  %v1498_v21 = vpack.c.bf16 %v1346_v43, %v1345_v42  ;;  %v8070_v41 = vld [vmem:[%s6959_s14] ss:$0 sm:$0xff]  ;;  %v571_v43 = vld [vmem:[%s6968_s18 + $0x6b0] sm:$0xff] }
 0x167   : > { %4056 = vst.msk [vmem:[%s7648_s29 + $0xe8] sm:$0xf] %vm3997_vm1, %v6197_v23  ;;  %v6198_v53 = vpack.c.bf16 %v6585_v4, %v6585_v4  ;;  %v2177_v51 = vpop.f32.mrb[59].mxu0  ;;  %v5139_v56 = vadd.f32 %v5138_v35, %v5137_v48  ;;  %v4366_v58 = vadd.f32 %v4365_v11, %v4364_v47  ;;  %v4832_v59 = vmul.f32 %v6585_v4, %v6585_v4  ;;  %v570_v35 = vld [vmem:[%s6968_s18 + $0x6a8] sm:$0xff]  ;;  %v8081_v11 = vld [vmem:[%s6951_s10] ss:$0 sm:$0xff] }
 0x168   : > { %4054 = vst.msk [vmem:[%s7648_s29 + $0xe0] sm:$0xf] %vm3997_vm1, %v6195_v19  ;;  %v6196_v60 = vpack.c.bf16 %v2177_v51, %v2177_v51  ;;  %v5140_v45 = vsel %vm1531_vm0, %v4829_v52, 0.0  ;;  %v4367_v61 = vsel %vm1531_vm0, %v2177_v51, 0.0  ;;  %v4830_v63 = vmul.f32 %v2177_v51, %v2177_v51  ;;  %6731 = vmatmul.mubr.msk.bf16.gmra.mrb[76].mxu1 %vm1531_vm0, %v1498_v21 }
 0x169   : > { %4057 = vst.msk [vmem:[%s7648_s29 + $0xec] sm:$0xf] %vm3997_vm1, %v6198_v53  ;;  %v4369_v20 = vsel %vm1531_vm0, %v6584_v39, 0.0  ;;  %v5141_v3 = vadd.f32 %v5140_v45, %v5139_v56  ;;  %v4368_v49 = vadd.f32 %v4367_v61, %v4366_v58  ;;  %v5144_v5 = vsel %vm1531_vm0, %v4831_v31, 0.0 }
 0x16a   : > { %4055 = vst.msk [vmem:[%s7648_s29 + $0xe4] sm:$0xf] %vm3997_vm1, %v6196_v60  ;;  %v4371_v62 = vsel %vm1531_vm0, %v6585_v4, 0.0  ;;  %v5142_v6 = vsel %vm1531_vm0, %v4830_v63, 0.0  ;;  %v1092_v7 = vadd.f32 %v7764_v10, %v829_v50  ;;  %v5146_v44 = vsel %vm1531_vm0, %v4832_v59, 0.0  ;;  %v8074_v50 = vpop.f32.mrb[0].mxu1 }
 0x16b   : > { %v4370_v9 = vadd.f32 %v4369_v20, %v4368_v49  ;;  %v5143_v46 = vadd.f32 %v5142_v6, %v5141_v3  ;;  %v1347_v57 = vmax.f32 %v1091_v36, 0.0  ;;  %v8053_v8 = vadd.f32 %v7764_v10, %v830_v55  ;;  %v8084_v31 = vpop.f32.mrb[1].mxu1 }
 0x16c   : > { %v6588_v2 = vpop.f32.mrb[60].mxu0  ;;  %v1348_v17 = vmax.f32 %v1092_v7, 0.0  ;;  %v832_v30 = vmul.f32 %v7781_v33, %v569_v13  ;;  %v1094_v42 = vadd.f32 %v8070_v41, %v831_v12  ;;  %v833_v4 = vmul.f32 %v8081_v11, %v570_v35  ;;  %v8088_v58 = vpop.f32.mrb[2].mxu1 }
 0x16d   : > { %v6201_v14 = vpack.c.bf16 %v6588_v2, %v6588_v2  ;;  %v2190_v16 = vpop.f32.mrb[61].mxu0  ;;  %v4372_v18 = vadd.f32 %v4371_v62, %v4370_v9  ;;  %v5145_v22 = vadd.f32 %v5144_v5, %v5143_v46  ;;  %v4835_v27 = vmul.f32 %v6588_v2, %v6588_v2  ;;  %v8092_v21 = vpop.f32.mrb[3].mxu1 }
 0x16e   : > { %v6199_v24 = vpack.c.bf16 %v2190_v16, %v2190_v16  ;;  %v4373_v25 = vsel %vm1531_vm0, %v2190_v16, 0.0  ;;  %v6589_v26 = vpop.f32.mrb[62].mxu0  ;;  %v4833_v28 = vmul.f32 %v2190_v16, %v2190_v16  ;;  %v1499_v1 = vpack.c.bf16 %v1348_v17, %v1347_v57  ;;  %v572_v17 = vld [vmem:[%s6968_s18 + $0x6b8] sm:$0xff] }
 0x16f   : > { %4060 = vst.msk [vmem:[%s7648_s29 + $0xf8] sm:$0xf] %vm3997_vm1, %v6201_v14  ;;  %v6202_v29 = vpack.c.bf16 %v6589_v26, %v6589_v26  ;;  %v2193_v15 = vpop.f32.mrb[63].mxu0  ;;  %v5147_v10 = vadd.f32 %v5146_v44, %v5145_v22  ;;  %v4374_v54 = vadd.f32 %v4373_v25, %v4372_v18  ;;  %v4836_v32 = vmul.f32 %v6589_v26, %v6589_v26  ;;  %v573_v25 = vld [vmem:[%s6968_s18 + $0x6c0] sm:$0xff] }
 0x170   : > { %4058 = vst.msk [vmem:[%s7648_s29 + $0xf0] sm:$0xf] %vm3997_vm1, %v6199_v24  ;;  %v6200_v34 = vpack.c.bf16 %v2193_v15, %v2193_v15  ;;  %v5148_v37 = vsel %vm1531_vm0, %v4833_v28, 0.0  ;;  %v4375_v38 = vsel %vm1531_vm0, %v2193_v15, 0.0  ;;  %v4834_v39 = vmul.f32 %v2193_v15, %v2193_v15  ;;  %6734 = vmatprep.mubr.msk.bf16.mxu1 %vm1531_vm0, %v1499_v1 }
 0x171   : > { %4061 = vst.msk [vmem:[%s7648_s29 + $0xfc] sm:$0xf] %vm3997_vm1, %v6202_v29  ;;  %v4377_v33 = vsel %vm1531_vm0, %v6588_v2, 0.0  ;;  %v5149_v40 = vadd.f32 %v5148_v37, %v5147_v10  ;;  %v4376_v23 = vadd.f32 %v4375_v38, %v4374_v54  ;;  %v5152_v47 = vsel %vm1531_vm0, %v4835_v27, 0.0  ;;  %v574_v37 = vld [vmem:[%s6968_s18 + $0x6c8] sm:$0xff] }
 0x172   : > { %4059 = vst.msk [vmem:[%s7648_s29 + $0xf4] sm:$0xf] %vm3997_vm1, %v6200_v34  ;;  %v4379_v48 = vsel %vm1531_vm0, %v6589_v26, 0.0  ;;  %v5150_v19 = vsel %vm1531_vm0, %v4834_v39, 0.0  ;;  %v5154_v52 = vsel %vm1531_vm0, %v4836_v32, 0.0  ;;  %v1349_v56 = vmax.f32 %v8053_v8, 0.0 }
 0x173   : > { %v4378_v53 = vadd.f32 %v4377_v33, %v4376_v23  ;;  %v5151_v51 = vadd.f32 %v5150_v19, %v5149_v40  ;;  %v1350_v45 = vmax.f32 %v1094_v42, 0.0  ;;  %v1095_v61 = vadd.f32 %v8070_v41, %v832_v30  ;;  %v8109_v26 = vpop.f32.mrb[4].mxu1 }
 0x174   : > { %v6592_v55 = vpop.f32.mrb[64].mxu0  ;;  %v834_v63 = vmul.f32 %v8081_v11, %v571_v43  ;;  %v1096_v44 = vadd.f32 %v8070_v41, %v833_v4  ;;  %v8115_v30 = vpop.f32.mrb[5].mxu1  ;;  %v835_v35 = vmul.f32 %v8081_v11, %v572_v17  ;;  %v836_v23 = vmul.f32 %v8081_v11, %v573_v25 }
 0x175   : > { %v6205_v59 = vpack.c.bf16 %v6592_v55, %v6592_v55  ;;  %v2206_v60 = vpop.f32.mrb[65].mxu0  ;;  %v4380_v0 = vadd.f32 %v4379_v48, %v4378_v53  ;;  %v5153_v20 = vadd.f32 %v5152_v47, %v5151_v51  ;;  %v4839_v5 = vmul.f32 %v6592_v55, %v6592_v55  ;;  %v8120_v38 = vpop.f32.mrb[6].mxu1 }
 0x176   : > { %v6203_v3 = vpack.c.bf16 %v2206_v60, %v2206_v60  ;;  %v4381_v49 = vsel %vm1531_vm0, %v2206_v60, 0.0  ;;  %v6593_v36 = vpop.f32.mrb[66].mxu0  ;;  %v4837_v62 = vmul.f32 %v2206_v60, %v2206_v60  ;;  %v1500_v57 = vpack.c.bf16 %v1350_v45, %v1349_v56  ;;  %v8124_v42 = vpop.f32.mrb[7].mxu1 }
 0x177   : > { %4064 = vst.msk [vmem:[%s7648_s29 + $0x108] sm:$0xf] %vm3997_vm1, %v6205_v59  ;;  %v6206_v6 = vpack.c.bf16 %v6593_v36, %v6593_v36  ;;  %v2209_v7 = vpop.f32.mrb[67].mxu0  ;;  %v5155_v9 = vadd.f32 %v5154_v52, %v5153_v20  ;;  %v4382_v46 = vadd.f32 %v4381_v49, %v4380_v0  ;;  %v4840_v2 = vmul.f32 %v6593_v36, %v6593_v36 }
 0x178   : > { %4062 = vst.msk [vmem:[%s7648_s29 + $0x100] sm:$0xf] %vm3997_vm1, %v6203_v3  ;;  %v6204_v12 = vpack.c.bf16 %v2209_v7, %v2209_v7  ;;  %v5156_v13 = vsel %vm1531_vm0, %v4837_v62, 0.0  ;;  %v4383_v14 = vsel %vm1531_vm0, %v2209_v7, 0.0  ;;  %v4838_v16 = vmul.f32 %v2209_v7, %v2209_v7  ;;  %6735 = vmatmul.mubr.msk.bf16.gmra.mrb[80].mxu1 %vm1531_vm0, %v1500_v57 }
 0x179   : > { %4065 = vst.msk [vmem:[%s7648_s29 + $0x10c] sm:$0xf] %vm3997_vm1, %v6206_v6  ;;  %v4385_v8 = vsel %vm1531_vm0, %v6592_v55, 0.0  ;;  %v5157_v18 = vadd.f32 %v5156_v13, %v5155_v9  ;;  %v4384_v22 = vadd.f32 %v4383_v14, %v4382_v46  ;;  %v1351_v24 = vmax.f32 %v1095_v61, 0.0  ;;  %v575_v6 = vld [vmem:[%s6968_s18 + $0x6d0] sm:$0xff] }
 0x17a   : > { %4063 = vst.msk [vmem:[%s7648_s29 + $0x104] sm:$0xf] %vm3997_vm1, %v6204_v12  ;;  %v5160_v27 = vsel %vm1531_vm0, %v4839_v5, 0.0  ;;  %v4387_v28 = vsel %vm1531_vm0, %v6593_v36, 0.0  ;;  %v5158_v29 = vsel %vm1531_vm0, %v4838_v16, 0.0  ;;  %v1352_v15 = vmax.f32 %v1096_v44, 0.0 }
 0x17b   : > { %v5162_v10 = vsel %vm1531_vm0, %v4840_v2, 0.0  ;;  %v4386_v54 = vadd.f32 %v4385_v8, %v4384_v22  ;;  %v5159_v32 = vadd.f32 %v5158_v29, %v5157_v18  ;;  %v1097_v40 = vadd.f32 %v8070_v41, %v834_v63  ;;  %v8142_v7 = vpop.f32.mrb[8].mxu1  ;;  %v576_v8 = vld [vmem:[%s6968_s18 + $0x6d8] sm:$0xff] }
 0x17c   : > { %v6596_v34 = vpop.f32.mrb[68].mxu0  ;;  %v1501_v33 = vpack.c.bf16 %v1352_v15, %v1351_v24  ;;  %v837_v56 = vmul.f32 %v8081_v11, %v574_v37  ;;  %v1098_v3 = vadd.f32 %v8070_v41, %v835_v35  ;;  %v8147_v12 = vpop.f32.mrb[9].mxu1  ;;  %v1099_v17 = vadd.f32 %v8070_v41, %v836_v23 }
 0x17d   : > { %v6209_v39 = vpack.c.bf16 %v6596_v34, %v6596_v34  ;;  %v2222_v1 = vpop.f32.mrb[69].mxu0  ;;  %v5161_v43 = vadd.f32 %v5160_v27, %v5159_v32  ;;  %v4388_v48 = vadd.f32 %v4387_v28, %v4386_v54  ;;  %v4843_v52 = vmul.f32 %v6596_v34, %v6596_v34  ;;  %v8152_v18 = vpop.f32.mrb[10].mxu1 }
 0x17e   : > { %v6207_v47 = vpack.c.bf16 %v2222_v1, %v2222_v1  ;;  %v4389_v19 = vsel %vm1531_vm0, %v2222_v1, 0.0  ;;  %v6597_v4 = vpop.f32.mrb[70].mxu0  ;;  %v4841_v53 = vmul.f32 %v2222_v1, %v2222_v1  ;;  %6738 = vmatprep.mubr.msk.bf16.mxu1 %vm1531_vm0, %v1501_v33  ;;  %v4393_v49 = vsel %vm1531_vm0, %v6596_v34, 0.0  ;;  %v8156_v29 = vpop.f32.mrb[11].mxu1 }
 0x17f   : > { %4068 = vst.msk [vmem:[%s7648_s29 + $0x118] sm:$0xf] %vm3997_vm1, %v6209_v39  ;;  %v6210_v51 = vpack.c.bf16 %v6597_v4, %v6597_v4  ;;  %v2225_v55 = vpop.f32.mrb[71].mxu0  ;;  %v4390_v59 = vadd.f32 %v4389_v19, %v4388_v48  ;;  %v5163_v60 = vadd.f32 %v5162_v10, %v5161_v43  ;;  %v4844_v45 = vmul.f32 %v6597_v4, %v6597_v4 }
 0x180   : > { %4066 = vst.msk [vmem:[%s7648_s29 + $0x110] sm:$0xf] %vm3997_vm1, %v6207_v47  ;;  %v6208_v61 = vpack.c.bf16 %v2225_v55, %v2225_v55  ;;  %v5164_v63 = vsel %vm1531_vm0, %v4841_v53, 0.0  ;;  %v4391_v0 = vsel %vm1531_vm0, %v2225_v55, 0.0  ;;  %v4842_v20 = vmul.f32 %v2225_v55, %v2225_v55 }
 0x181   : > { %4069 = vst.msk [vmem:[%s7648_s29 + $0x11c] sm:$0xf] %vm3997_vm1, %v6210_v51  ;;  %v5165_v36 = vadd.f32 %v5164_v63, %v5163_v60  ;;  %v4392_v5 = vadd.f32 %v4391_v0, %v4390_v59  ;;  %v1353_v62 = vmax.f32 %v1097_v40, 0.0  ;;  %v5168_v44 = vsel %vm1531_vm0, %v4843_v52, 0.0  ;;  %v577_v59 = vld [vmem:[%s6968_s18 + $0x6e0] sm:$0xff]  ;;  %v578_v60 = vld [vmem:[%s6968_s18 + $0x6e8] sm:$0xff] }
 0x182   : > { %4067 = vst.msk [vmem:[%s7648_s29 + $0x114] sm:$0xf] %vm3997_vm1, %v6208_v61  ;;  %v4395_v9 = vsel %vm1531_vm0, %v6597_v4, 0.0  ;;  %v5166_v46 = vsel %vm1531_vm0, %v4842_v20, 0.0  ;;  %v1354_v2 = vmax.f32 %v1098_v3, 0.0  ;;  %v5170_v13 = vsel %vm1531_vm0, %v4844_v45, 0.0 }
 0x183   : > { %v4394_v14 = vadd.f32 %v4393_v49, %v4392_v5  ;;  %v5167_v16 = vadd.f32 %v5166_v46, %v5165_v36  ;;  %v1100_v27 = vadd.f32 %v8070_v41, %v837_v56  ;;  %v838_v28 = vmul.f32 %v8081_v11, %v575_v6  ;;  %v8174_v45 = vpop.f32.mrb[12].mxu1 }
 0x184   : > { %v6600_v57 = vpop.f32.mrb[72].mxu0  ;;  %v1502_v25 = vpack.c.bf16 %v1354_v2, %v1353_v62  ;;  %v839_v33 = vmul.f32 %v8081_v11, %v576_v8  ;;  %v1355_v52 = vmax.f32 %v1099_v17, 0.0  ;;  %v8180_v3 = vpop.f32.mrb[13].mxu1 }
 0x185   : > { %v6213_v22 = vpack.c.bf16 %v6600_v57, %v6600_v57  ;;  %v2238_v24 = vpop.f32.mrb[73].mxu0  ;;  %v5169_v15 = vadd.f32 %v5168_v44, %v5167_v16  ;;  %v4396_v54 = vadd.f32 %v4395_v9, %v4394_v14  ;;  %v4847_v35 = vmul.f32 %v6600_v57, %v6600_v57  ;;  %v8183_v44 = vpop.f32.mrb[14].mxu1 }
 0x186   : > { %v6211_v10 = vpack.c.bf16 %v2238_v24, %v2238_v24  ;;  %v4397_v32 = vsel %vm1531_vm0, %v2238_v24, 0.0  ;;  %v6601_v34 = vpop.f32.mrb[74].mxu0  ;;  %v4845_v37 = vmul.f32 %v2238_v24, %v2238_v24  ;;  %6739 = vmatmul.mubr.msk.bf16.gmra.mrb[84].mxu1 %vm1531_vm0, %v1502_v25  ;;  %v4401_v53 = vsel %vm1531_vm0, %v6600_v57, 0.0  ;;  %v8188_v16 = vpop.f32.mrb[15].mxu1 }
 0x187   : > { %4072 = vst.msk [vmem:[%s7648_s29 + $0x128] sm:$0xf] %vm3997_vm1, %v6213_v22  ;;  %v6214_v39 = vpack.c.bf16 %v6601_v34, %v6601_v34  ;;  %v2241_v1 = vpop.f32.mrb[75].mxu0  ;;  %v4398_v40 = vadd.f32 %v4397_v32, %v4396_v54  ;;  %v5171_v23 = vadd.f32 %v5170_v13, %v5169_v15  ;;  %v4848_v43 = vmul.f32 %v6601_v34, %v6601_v34 }
 0x188   : > { %4070 = vst.msk [vmem:[%s7648_s29 + $0x120] sm:$0xf] %vm3997_vm1, %v6211_v10  ;;  %v6212_v47 = vpack.c.bf16 %v2241_v1, %v2241_v1  ;;  %v5172_v48 = vsel %vm1531_vm0, %v4845_v37, 0.0  ;;  %v4399_v19 = vsel %vm1531_vm0, %v2241_v1, 0.0  ;;  %v4846_v4 = vmul.f32 %v2241_v1, %v2241_v1 }
 0x189   : > { %4073 = vst.msk [vmem:[%s7648_s29 + $0x12c] sm:$0xf] %vm3997_vm1, %v6214_v39  ;;  %v5173_v51 = vadd.f32 %v5172_v48, %v5171_v23  ;;  %v4400_v55 = vadd.f32 %v4399_v19, %v4398_v40  ;;  %v1356_v56 = vmax.f32 %v1100_v27, 0.0  ;;  %v5176_v61 = vsel %vm1531_vm0, %v4847_v35, 0.0  ;;  %v579_v48 = vld [vmem:[%s6968_s18 + $0x6f0] sm:$0xff] }
 0x18a   : > { %4071 = vst.msk [vmem:[%s7648_s29 + $0x124] sm:$0xf] %vm3997_vm1, %v6212_v47  ;;  %v4403_v63 = vsel %vm1531_vm0, %v6601_v34, 0.0  ;;  %v5174_v0 = vsel %vm1531_vm0, %v4846_v4, 0.0  ;;  %v1101_v20 = vadd.f32 %v8070_v41, %v838_v28  ;;  %v5178_v49 = vsel %vm1531_vm0, %v4848_v43, 0.0 }
 0x18b   : > { %v4402_v36 = vadd.f32 %v4401_v53, %v4400_v55  ;;  %v5175_v5 = vadd.f32 %v5174_v0, %v5173_v51  ;;  %v1503_v6 = vpack.c.bf16 %v1356_v56, %v1355_v52  ;;  %v1102_v2 = vadd.f32 %v8070_v41, %v839_v33 }
 0x18c   : > { %v6604_v62 = vpop.f32.mrb[76].mxu0  ;;  %v840_v13 = vmul.f32 %v8081_v11, %v577_v59  ;;  %v841_v14 = vmul.f32 %v8081_v11, %v578_v60  ;;  %v1357_v10 = vmax.f32 %v1101_v20, 0.0 }
 0x18d   : > { %v6217_v9 = vpack.c.bf16 %v6604_v62, %v6604_v62  ;;  %v2254_v46 = vpop.f32.mrb[77].mxu0  ;;  %v5177_v57 = vadd.f32 %v5176_v61, %v5175_v5  ;;  %v4404_v8 = vadd.f32 %v4403_v63, %v4402_v36  ;;  %6742 = vmatprep.mubr.msk.bf16.mxu1 %vm1531_vm0, %v1503_v6  ;;  %v4851_v25 = vmul.f32 %v6604_v62, %v6604_v62  ;;  %v580_v61 = vld [vmem:[%s6968_s18 + $0x6f8] sm:$0xff]  ;;  %v8211_v63 = vpop.f32.mrb[16].mxu1 }
 0x18e   : > { %v6215_v17 = vpack.c.bf16 %v2254_v46, %v2254_v46  ;;  %v4405_v22 = vsel %vm1531_vm0, %v2254_v46, 0.0  ;;  %v6605_v24 = vpop.f32.mrb[78].mxu0  ;;  %v4849_v27 = vmul.f32 %v2254_v46, %v2254_v46  ;;  %v1358_v33 = vmax.f32 %v1102_v2, 0.0 }
 0x18f   : > { %4076 = vst.msk [vmem:[%s7648_s29 + $0x138] sm:$0xf] %vm3997_vm1, %v6217_v9  ;;  %v6218_v28 = vpack.c.bf16 %v6605_v24, %v6605_v24  ;;  %v2257_v15 = vpop.f32.mrb[79].mxu0  ;;  %v4406_v54 = vadd.f32 %v4405_v22, %v4404_v8  ;;  %v5179_v32 = vadd.f32 %v5178_v49, %v5177_v57  ;;  %v4852_v34 = vmul.f32 %v6605_v24, %v6605_v24 }
 0x190   : > { %4074 = vst.msk [vmem:[%s7648_s29 + $0x130] sm:$0xf] %vm3997_vm1, %v6215_v17  ;;  %v6216_v35 = vpack.c.bf16 %v2257_v15, %v2257_v15  ;;  %v5180_v37 = vsel %vm1531_vm0, %v4849_v27, 0.0  ;;  %v4407_v39 = vsel %vm1531_vm0, %v2257_v15, 0.0  ;;  %v4850_v1 = vmul.f32 %v2257_v15, %v2257_v15 }
 0x191   : > { %4077 = vst.msk [vmem:[%s7648_s29 + $0x13c] sm:$0xf] %vm3997_vm1, %v6218_v28  ;;  %v4409_v40 = vsel %vm1531_vm0, %v6604_v62, 0.0  ;;  %v5181_v23 = vadd.f32 %v5180_v37, %v5179_v32  ;;  %v4408_v43 = vadd.f32 %v4407_v39, %v4406_v54  ;;  %v1103_v47 = vadd.f32 %v8070_v41, %v840_v13  ;;  %v8215_v62 = vpop.f32.mrb[17].mxu1  ;;  %v581_v37 = vld [vmem:[%s6968_s18 + $0x700] sm:$0xff] }
 0x192   : > { %4075 = vst.msk [vmem:[%s7648_s29 + $0x134] sm:$0xf] %vm3997_vm1, %v6216_v35  ;;  %v5184_v19 = vsel %vm1531_vm0, %v4851_v25, 0.0  ;;  %v5182_v4 = vsel %vm1531_vm0, %v4850_v1, 0.0  ;;  %v1504_v52 = vpack.c.bf16 %v1358_v33, %v1357_v10  ;;  %v1104_v53 = vadd.f32 %v8070_v41, %v841_v14  ;;  %v8218_v14 = vpop.f32.mrb[18].mxu1 }
 0x193   : > { %v4411_v51 = vsel %vm1531_vm0, %v6605_v24, 0.0  ;;  %v5186_v55 = vsel %vm1531_vm0, %v4852_v34, 0.0  ;;  %v4410_v56 = vadd.f32 %v4409_v40, %v4408_v43  ;;  %v5183_v59 = vadd.f32 %v5182_v4, %v5181_v23  ;;  %v8223_v25 = vpop.f32.mrb[19].mxu1  ;;  %v582_v23 = vld [vmem:[%s6968_s18 + $0x708] sm:$0xff] }
 0x194   : > { %v6608_v60 = vpop.f32.mrb[80].mxu0  ;;  %6743 = vmatmul.mubr.msk.bf16.gmra.mrb[88].mxu1 %vm1531_vm0, %v1504_v52  ;;  %v1359_v49 = vmax.f32 %v1103_v47, 0.0  ;;  %v1360_v36 = vmax.f32 %v1104_v53, 0.0  ;;  %v842_v5 = vmul.f32 %v8081_v11, %v579_v48  ;;  %v843_v24 = vmul.f32 %v8081_v11, %v580_v61 }
 0x195   : > { %v6221_v0 = vpack.c.bf16 %v6608_v60, %v6608_v60  ;;  %v2270_v20 = vpop.f32.mrb[81].mxu0  ;;  %v5185_v6 = vadd.f32 %v5184_v19, %v5183_v59  ;;  %v4412_v46 = vadd.f32 %v4411_v51, %v4410_v56  ;;  %v4855_v57 = vmul.f32 %v6608_v60, %v6608_v60  ;;  %v583_v56 = vld [vmem:[%s6968_s18 + $0x710] sm:$0xff] }
 0x196   : > { %v6219_v9 = vpack.c.bf16 %v2270_v20, %v2270_v20  ;;  %v4413_v2 = vsel %vm1531_vm0, %v2270_v20, 0.0  ;;  %v6609_v13 = vpop.f32.mrb[82].mxu0  ;;  %v4853_v17 = vmul.f32 %v2270_v20, %v2270_v20  ;;  %v1505_v35 = vpack.c.bf16 %v1360_v36, %v1359_v49 }
 0x197   : > { %4080 = vst.msk [vmem:[%s7648_s29 + $0x148] sm:$0xf] %vm3997_vm1, %v6221_v0  ;;  %v6222_v8 = vpack.c.bf16 %v6609_v13, %v6609_v13  ;;  %v2273_v22 = vpop.f32.mrb[83].mxu0  ;;  %v4414_v27 = vadd.f32 %v4413_v2, %v4412_v46  ;;  %v5187_v28 = vadd.f32 %v5186_v55, %v5185_v6  ;;  %v4856_v15 = vmul.f32 %v6609_v13, %v6609_v13  ;;  %v8247_v46 = vpop.f32.mrb[20].mxu1 }
 0x198   : > { %4078 = vst.msk [vmem:[%s7648_s29 + $0x140] sm:$0xf] %vm3997_vm1, %v6219_v9  ;;  %v6220_v10 = vpack.c.bf16 %v2273_v22, %v2273_v22  ;;  %v5188_v54 = vsel %vm1531_vm0, %v4853_v17, 0.0  ;;  %v4415_v32 = vsel %vm1531_vm0, %v2273_v22, 0.0  ;;  %v4854_v34 = vmul.f32 %v2273_v22, %v2273_v22  ;;  %6746 = vmatprep.mubr.msk.bf16.mxu1 %vm1531_vm0, %v1505_v35  ;;  %v8252_v22 = vpop.f32.mrb[21].mxu1 }
 0x199   : > { %4081 = vst.msk [vmem:[%s7648_s29 + $0x14c] sm:$0xf] %vm3997_vm1, %v6222_v8  ;;  %v4417_v39 = vsel %vm1531_vm0, %v6608_v60, 0.0  ;;  %v5189_v1 = vadd.f32 %v5188_v54, %v5187_v28  ;;  %v4416_v33 = vadd.f32 %v4415_v32, %v4414_v27  ;;  %v1105_v40 = vadd.f32 %v8070_v41, %v842_v5 }
 0x19a   : > { %4079 = vst.msk [vmem:[%s7648_s29 + $0x144] sm:$0xf] %vm3997_vm1, %v6220_v10  ;;  %v5192_v43 = vsel %vm1531_vm0, %v4855_v57, 0.0  ;;  %v4419_v47 = vsel %vm1531_vm0, %v6609_v13, 0.0  ;;  %v5190_v48 = vsel %vm1531_vm0, %v4854_v34, 0.0  ;;  %v1106_v19 = vadd.f32 %v8070_v41, %v843_v24  ;;  %v8256_v10 = vpop.f32.mrb[22].mxu1 }
 0x19b   : > { %v5194_v4 = vsel %vm1531_vm0, %v4856_v15, 0.0  ;;  %v4418_v52 = vadd.f32 %v4417_v39, %v4416_v33  ;;  %v5191_v53 = vadd.f32 %v5190_v48, %v5189_v1  ;;  %v844_v55 = vmul.f32 %v8081_v11, %v581_v37  ;;  %v584_v37 = vld [vmem:[%s6968_s18 + $0x718] sm:$0xff]  ;;  %v8263_v39 = vpop.f32.mrb[23].mxu1 }
 0x19c   : > { %v6612_v51 = vpop.f32.mrb[84].mxu0  ;;  %v1361_v61 = vmax.f32 %v1105_v40, 0.0  ;;  %v1362_v0 = vmax.f32 %v1106_v19, 0.0  ;;  %v845_v20 = vmul.f32 %v8081_v11, %v582_v23  ;;  %v846_v8 = vmul.f32 %v8081_v11, %v583_v56 }
 0x19d   : > { %v6225_v59 = vpack.c.bf16 %v6612_v51, %v6612_v51  ;;  %v2286_v60 = vpop.f32.mrb[85].mxu0  ;;  %v5193_v49 = vadd.f32 %v5192_v43, %v5191_v53  ;;  %v4420_v5 = vadd.f32 %v4419_v47, %v4418_v52  ;;  %v4859_v2 = vmul.f32 %v6612_v51, %v6612_v51 }
 0x19e   : > { %v6223_v36 = vpack.c.bf16 %v2286_v60, %v2286_v60  ;;  %v4421_v6 = vsel %vm1531_vm0, %v2286_v60, 0.0  ;;  %v6613_v9 = vpop.f32.mrb[86].mxu0  ;;  %v4857_v13 = vmul.f32 %v2286_v60, %v2286_v60  ;;  %v1506_v35 = vpack.c.bf16 %v1362_v0, %v1361_v61 }
 0x19f   : > { %4084 = vst.msk [vmem:[%s7648_s29 + $0x158] sm:$0xf] %vm3997_vm1, %v6225_v59  ;;  %v6226_v57 = vpack.c.bf16 %v6613_v9, %v6613_v9  ;;  %v2289_v17 = vpop.f32.mrb[87].mxu0  ;;  %v4422_v24 = vadd.f32 %v4421_v6, %v4420_v5  ;;  %v5195_v27 = vadd.f32 %v5194_v4, %v5193_v49  ;;  %v4860_v28 = vmul.f32 %v6613_v9, %v6613_v9  ;;  %v585_v59 = vld [vmem:[%s6968_s18 + $0x720] sm:$0xff] }
 0x1a0   : > { %4082 = vst.msk [vmem:[%s7648_s29 + $0x150] sm:$0xf] %vm3997_vm1, %v6223_v36  ;;  %v6224_v15 = vpack.c.bf16 %v2289_v17, %v2289_v17  ;;  %v5196_v54 = vsel %vm1531_vm0, %v4857_v13, 0.0  ;;  %v4423_v32 = vsel %vm1531_vm0, %v2289_v17, 0.0  ;;  %v4858_v34 = vmul.f32 %v2289_v17, %v2289_v17  ;;  %6747 = vmatmul.mubr.msk.bf16.gmra.mrb[92].mxu1 %vm1531_vm0, %v1506_v35 }
 0x1a1   : > { %4085 = vst.msk [vmem:[%s7648_s29 + $0x15c] sm:$0xf] %vm3997_vm1, %v6226_v57  ;;  %v4425_v1 = vsel %vm1531_vm0, %v6612_v51, 0.0  ;;  %v5197_v33 = vadd.f32 %v5196_v54, %v5195_v27  ;;  %v4424_v40 = vadd.f32 %v4423_v32, %v4422_v24  ;;  %v1107_v23 = vadd.f32 %v8070_v41, %v844_v55 }
 0x1a2   : > { %4083 = vst.msk [vmem:[%s7648_s29 + $0x154] sm:$0xf] %vm3997_vm1, %v6224_v15  ;;  %v5200_v43 = vsel %vm1531_vm0, %v4859_v2, 0.0  ;;  %v4427_v47 = vsel %vm1531_vm0, %v6613_v9, 0.0  ;;  %v5198_v48 = vsel %vm1531_vm0, %v4858_v34, 0.0  ;;  %v1108_v19 = vadd.f32 %v8070_v41, %v845_v20  ;;  %v8281_v2 = vpop.f32.mrb[24].mxu1 }
 0x1a3   : > { %v5202_v4 = vsel %vm1531_vm0, %v4860_v28, 0.0  ;;  %v4426_v52 = vadd.f32 %v4425_v1, %v4424_v40  ;;  %v5199_v53 = vadd.f32 %v5198_v48, %v5197_v33  ;;  %v847_v56 = vmul.f32 %v8081_v11, %v584_v37  ;;  %v586_v34 = vld [vmem:[%s6968_s18 + $0x728] sm:$0xff] }
 0x1a4   : > { %v6616_v51 = vpop.f32.mrb[88].mxu0  ;;  %v1363_v61 = vmax.f32 %v1107_v23, 0.0  ;;  %v1364_v0 = vmax.f32 %v1108_v19, 0.0  ;;  %v8278_v49 = vadd.f32 %v8070_v41, %v846_v8  ;;  %v848_v27 = vmul.f32 %v8081_v11, %v585_v59  ;;  %v8286_v8 = vpop.f32.mrb[25].mxu1 }
 0x1a5   : > { %v6229_v55 = vpack.c.bf16 %v6616_v51, %v6616_v51  ;;  %v2302_v60 = vpop.f32.mrb[89].mxu0  ;;  %v5201_v36 = vadd.f32 %v5200_v43, %v5199_v53  ;;  %v4428_v20 = vadd.f32 %v4427_v47, %v4426_v52  ;;  %v4863_v13 = vmul.f32 %v6616_v51, %v6616_v51  ;;  %v8291_v35 = vpop.f32.mrb[26].mxu1 }
 0x1a6   : > { %v6227_v5 = vpack.c.bf16 %v2302_v60, %v2302_v60  ;;  %v4429_v6 = vsel %vm1531_vm0, %v2302_v60, 0.0  ;;  %v6617_v9 = vpop.f32.mrb[90].mxu0  ;;  %v4861_v57 = vmul.f32 %v2302_v60, %v2302_v60  ;;  %v1507_v40 = vpack.c.bf16 %v1364_v0, %v1363_v61  ;;  %v8297_v23 = vpop.f32.mrb[27].mxu1 }
 0x1a7   : > { %4088 = vst.msk [vmem:[%s7648_s29 + $0x168] sm:$0xf] %vm3997_vm1, %v6229_v55  ;;  %v6230_v17 = vpack.c.bf16 %v6617_v9, %v6617_v9  ;;  %v2305_v24 = vpop.f32.mrb[91].mxu0  ;;  %v4430_v28 = vadd.f32 %v4429_v6, %v4428_v20  ;;  %v5203_v15 = vadd.f32 %v5202_v4, %v5201_v36  ;;  %v4864_v54 = vmul.f32 %v6617_v9, %v6617_v9  ;;  %v587_v4 = vld [vmem:[%s6968_s18 + $0x730] sm:$0xff] }
 0x1a8   : > { %4086 = vst.msk [vmem:[%s7648_s29 + $0x160] sm:$0xf] %vm3997_vm1, %v6227_v5  ;;  %v6228_v32 = vpack.c.bf16 %v2305_v24, %v2305_v24  ;;  %v5204_v37 = vsel %vm1531_vm0, %v4861_v57, 0.0  ;;  %v4431_v1 = vsel %vm1531_vm0, %v2305_v24, 0.0  ;;  %v4862_v33 = vmul.f32 %v2305_v24, %v2305_v24  ;;  %6750 = vmatprep.mubr.msk.bf16.mxu1 %vm1531_vm0, %v1507_v40 }
 0x1a9   : > { %4089 = vst.msk [vmem:[%s7648_s29 + $0x16c] sm:$0xf] %vm3997_vm1, %v6230_v17  ;;  %v4433_v43 = vsel %vm1531_vm0, %v6616_v51, 0.0  ;;  %v5205_v47 = vadd.f32 %v5204_v37, %v5203_v15  ;;  %v4432_v48 = vadd.f32 %v4431_v1, %v4430_v28  ;;  %v1110_v19 = vadd.f32 %v8070_v41, %v847_v56  ;;  %v8314_v15 = vpop.f32.mrb[28].mxu1 }
 0x1aa   : > { %4087 = vst.msk [vmem:[%s7648_s29 + $0x164] sm:$0xf] %vm3997_vm1, %v6228_v32  ;;  %v5208_v52 = vsel %vm1531_vm0, %v4863_v13, 0.0  ;;  %v4435_v53 = vsel %vm1531_vm0, %v6617_v9, 0.0  ;;  %v5206_v59 = vsel %vm1531_vm0, %v4862_v33, 0.0  ;;  %v849_v55 = vmul.f32 %v8081_v11, %v586_v34  ;;  %v8319_v37 = vpop.f32.mrb[29].mxu1 }
 0x1ab   : > { %v5210_v60 = vsel %vm1531_vm0, %v4864_v54, 0.0  ;;  %v4434_v51 = vadd.f32 %v4433_v43, %v4432_v48  ;;  %v5207_v61 = vadd.f32 %v5206_v59, %v5205_v47  ;;  %v1365_v36 = vmax.f32 %v8278_v49, 0.0  ;;  %v8323_v47 = vpop.f32.mrb[30].mxu1 }
 0x1ac   : > { %v6620_v0 = vpop.f32.mrb[92].mxu0  ;;  %v1366_v20 = vmax.f32 %v1110_v19, 0.0  ;;  %v1111_v6 = vadd.f32 %v8070_v41, %v848_v27  ;;  %v850_v9 = vmul.f32 %v8081_v11, %v587_v4  ;;  %v1112_v27 = vadd.f32 %v8070_v41, %v849_v55  ;;  %v8330_v59 = vpop.f32.mrb[31].mxu1 }
 0x1ad   : > { %v6233_v56 = vpack.c.bf16 %v6620_v0, %v6620_v0  ;;  %v2318_v5 = vpop.f32.mrb[93].mxu0  ;;  %v5209_v13 = vadd.f32 %v5208_v52, %v5207_v61  ;;  %v4436_v17 = vadd.f32 %v4435_v53, %v4434_v51  ;;  %v4867_v49 = vmul.f32 %v6620_v0, %v6620_v0  ;;  %v588_v53 = vld [vmem:[%s6968_s18 + $0x738] sm:$0xff] }
 0x1ae   : > { %v6231_v57 = vpack.c.bf16 %v2318_v5, %v2318_v5  ;;  %v4437_v24 = vsel %vm1531_vm0, %v2318_v5, 0.0  ;;  %v6621_v28 = vpop.f32.mrb[94].mxu0  ;;  %v4865_v54 = vmul.f32 %v2318_v5, %v2318_v5  ;;  %v1508_v52 = vpack.c.bf16 %v1366_v20, %v1365_v36 }
 0x1af   : > { %4092 = vst.msk [vmem:[%s7648_s29 + $0x178] sm:$0xf] %vm3997_vm1, %v6233_v56  ;;  %v6234_v32 = vpack.c.bf16 %v6621_v28, %v6621_v28  ;;  %v2321_v34 = vpop.f32.mrb[95].mxu0  ;;  %v4438_v1 = vadd.f32 %v4437_v24, %v4436_v17  ;;  %v5211_v33 = vadd.f32 %v5210_v60, %v5209_v13  ;;  %v4868_v40 = vmul.f32 %v6621_v28, %v6621_v28  ;;  %v589_v56 = vld [vmem:[%s6968_s18 + $0x740] sm:$0xff] }
 0x1b0   : > { %4090 = vst.msk [vmem:[%s7648_s29 + $0x170] sm:$0xf] %vm3997_vm1, %v6231_v57  ;;  %v6232_v43 = vpack.c.bf16 %v2321_v34, %v2321_v34  ;;  %v5212_v48 = vsel %vm1531_vm0, %v4865_v54, 0.0  ;;  %v4439_v19 = vsel %vm1531_vm0, %v2321_v34, 0.0  ;;  %v4866_v4 = vmul.f32 %v2321_v34, %v2321_v34  ;;  %6751 = vmatmul.mubr.msk.bf16.gmra.mrb[96].mxu1 %vm1531_vm0, %v1508_v52 }
 0x1b1   : > { %4093 = vst.msk [vmem:[%s7648_s29 + $0x17c] sm:$0xf] %vm3997_vm1, %v6234_v32  ;;  %v4441_v55 = vsel %vm1531_vm0, %v6620_v0, 0.0  ;;  %v5213_v60 = vadd.f32 %v5212_v48, %v5211_v33  ;;  %v4440_v51 = vadd.f32 %v4439_v19, %v4438_v1  ;;  %v1367_v61 = vmax.f32 %v1111_v6, 0.0  ;;  %v590_v32 = vld [vmem:[%s6968_s18 + $0x748] sm:$0xff]  ;;  %v8346_v19 = vpop.f32.mrb[32].mxu1 }
 0x1b2   : > { %4091 = vst.msk [vmem:[%s7648_s29 + $0x174] sm:$0xf] %vm3997_vm1, %v6232_v43  ;;  %v5216_v5 = vsel %vm1531_vm0, %v4867_v49, 0.0  ;;  %v4443_v13 = vsel %vm1531_vm0, %v6621_v28, 0.0  ;;  %v5214_v57 = vsel %vm1531_vm0, %v4866_v4, 0.0  ;;  %v1368_v36 = vmax.f32 %v1112_v27, 0.0 }
 0x1b3   : > { %v5218_v20 = vsel %vm1531_vm0, %v4868_v40, 0.0  ;;  %v4442_v17 = vadd.f32 %v4441_v55, %v4440_v51  ;;  %v5215_v0 = vadd.f32 %v5214_v57, %v5213_v60  ;;  %v851_v54 = vmul.f32 %v8081_v11, %v588_v53  ;;  %v8352_v60 = vpop.f32.mrb[33].mxu1 }
 0x1b4   : > { %v6624_v24 = vpop.f32.mrb[96].mxu0  ;;  %v1509_v1 = vpack.c.bf16 %v1368_v36, %v1367_v61  ;;  %v1113_v49 = vadd.f32 %v8070_v41, %v850_v9  ;;  %v852_v28 = vmul.f32 %v8081_v11, %v589_v56  ;;  %v853_v9 = vmul.f32 %v8081_v11, %v590_v32 }
 0x1b5   : > { %v6237_v6 = vpack.c.bf16 %v6624_v24, %v6624_v24  ;;  %v2334_v34 = vpop.f32.mrb[97].mxu0  ;;  %v5217_v33 = vadd.f32 %v5216_v5, %v5215_v0  ;;  %v4444_v27 = vadd.f32 %v4443_v13, %v4442_v17  ;;  %v4871_v4 = vmul.f32 %v6624_v24, %v6624_v24  ;;  %v8356_v13 = vpop.f32.mrb[34].mxu1 }
 0x1b6   : > { %v6235_v43 = vpack.c.bf16 %v2334_v34, %v2334_v34  ;;  %v4445_v40 = vsel %vm1531_vm0, %v2334_v34, 0.0  ;;  %v6625_v48 = vpop.f32.mrb[98].mxu0  ;;  %v4869_v52 = vmul.f32 %v2334_v34, %v2334_v34  ;;  %6754 = vmatprep.mubr.msk.bf16.mxu1 %vm1531_vm0, %v1509_v1  ;;  %9853 = vst [vmem:[#allocation2_spill] sm:$0xff] %v8356_v13  ;;  %v1114_v0 = vadd.f32 %v8070_v41, %v851_v54  ;;  %v8363_v32 = vpop.f32.mrb[35].mxu1 }
 0x1b7   : > { %4096 = vst.msk [vmem:[%s7648_s29 + $0x188] sm:$0xf] %vm3997_vm1, %v6237_v6  ;;  %v6238_v53 = vpack.c.bf16 %v6625_v48, %v6625_v48  ;;  %v2337_v55 = vpop.f32.mrb[99].mxu0  ;;  %v4446_v51 = vadd.f32 %v4445_v40, %v4444_v27  ;;  %v5219_v61 = vadd.f32 %v5218_v20, %v5217_v33  ;;  %v4872_v56 = vmul.f32 %v6625_v48, %v6625_v48 }
 0x1b8   : > { %4094 = vst.msk [vmem:[%s7648_s29 + $0x180] sm:$0xf] %vm3997_vm1, %v6235_v43  ;;  %v6236_v5 = vpack.c.bf16 %v2337_v55, %v2337_v55  ;;  %v5220_v57 = vsel %vm1531_vm0, %v4869_v52, 0.0  ;;  %v4447_v36 = vsel %vm1531_vm0, %v2337_v55, 0.0  ;;  %v4870_v17 = vmul.f32 %v2337_v55, %v2337_v55  ;;  %9854 = vst [vmem:[#allocation3_spill] sm:$0xff] %v8363_v32 }
 0x1b9   : > { %4097 = vst.msk [vmem:[%s7648_s29 + $0x18c] sm:$0xf] %vm3997_vm1, %v6238_v53  ;;  %v5221_v6 = vadd.f32 %v5220_v57, %v5219_v61  ;;  %v4448_v20 = vadd.f32 %v4447_v36, %v4446_v51  ;;  %v1369_v34 = vmax.f32 %v1113_v49, 0.0  ;;  %v4449_v1 = vsel %vm1531_vm0, %v6624_v24, 0.0  ;;  %v591_v61 = vld [vmem:[%s6968_s18 + $0x750] sm:$0xff]  ;;  %v592_v57 = vld [vmem:[%s6968_s18 + $0x758] sm:$0xff] }
 0x1ba   : > { %4095 = vst.msk [vmem:[%s7648_s29 + $0x184] sm:$0xf] %vm3997_vm1, %v6236_v5  ;;  %v5224_v33 = vsel %vm1531_vm0, %v4871_v4, 0.0  ;;  %v5222_v43 = vsel %vm1531_vm0, %v4870_v17, 0.0  ;;  %v1370_v27 = vmax.f32 %v1114_v0, 0.0  ;;  %v4451_v40 = vsel %vm1531_vm0, %v6625_v48, 0.0 }
 0x1bb   : > { %v5226_v52 = vsel %vm1531_vm0, %v4872_v56, 0.0  ;;  %v4450_v54 = vadd.f32 %v4449_v1, %v4448_v20  ;;  %v5223_v53 = vadd.f32 %v5222_v43, %v5221_v6  ;;  %v1115_v24 = vadd.f32 %v8070_v41, %v852_v28  ;;  %v8377_v20 = vpop.f32.mrb[36].mxu1 }
 0x1bc   : > { %v6628_v55 = vpop.f32.mrb[100].mxu0  ;;  %v1510_v49 = vpack.c.bf16 %v1370_v27, %v1369_v34  ;;  %v1116_v4 = vadd.f32 %v8070_v41, %v853_v9  ;;  %9855 = vst [vmem:[#allocation4_spill] sm:$0xff] %v8377_v20  ;;  %v854_v28 = vmul.f32 %v8081_v11, %v591_v61  ;;  %v855_v9 = vmul.f32 %v8081_v11, %v592_v57  ;;  %v8384_v34 = vpop.f32.mrb[37].mxu1 }
 0x1bd   : > { %v6241_v5 = vpack.c.bf16 %v6628_v55, %v6628_v55  ;;  %v2350_v51 = vpop.f32.mrb[101].mxu0  ;;  %v5225_v36 = vadd.f32 %v5224_v33, %v5223_v53  ;;  %v4452_v0 = vadd.f32 %v4451_v40, %v4450_v54  ;;  %9856 = vst [vmem:[#allocation5_spill] sm:$0xff] %v8384_v34  ;;  %v4875_v33 = vmul.f32 %v6628_v55, %v6628_v55  ;;  %v8388_v53 = vpop.f32.mrb[38].mxu1 }
 0x1be   : > { %v6239_v17 = vpack.c.bf16 %v2350_v51, %v2350_v51  ;;  %v4453_v48 = vsel %vm1531_vm0, %v2350_v51, 0.0  ;;  %v6629_v56 = vpop.f32.mrb[102].mxu0  ;;  %v4873_v6 = vmul.f32 %v2350_v51, %v2350_v51  ;;  %6755 = vmatmul.mubr.msk.bf16.gmra.mrb[100].mxu1 %vm1531_vm0, %v1510_v49  ;;  %9857 = vst [vmem:[#allocation6_spill] sm:$0xff] %v8388_v53  ;;  %v1371_v49 = vmax.f32 %v1115_v24, 0.0  ;;  %v8394_v11 = vpop.f32.mrb[39].mxu1 }
 0x1bf   : > { %4100 = vst.msk [vmem:[%s7648_s29 + $0x198] sm:$0xf] %vm3997_vm1, %v6241_v5  ;;  %v6242_v1 = vpack.c.bf16 %v6629_v56, %v6629_v56  ;;  %v2353_v43 = vpop.f32.mrb[103].mxu0  ;;  %v4454_v27 = vadd.f32 %v4453_v48, %v4452_v0  ;;  %v5227_v40 = vadd.f32 %v5226_v52, %v5225_v36  ;;  %9858 = vst [vmem:[#allocation7_spill] sm:$0xff] %v8394_v11  ;;  %v4457_v57 = vsel %vm1531_vm0, %v6628_v55, 0.0 }
 0x1c0   : > { %4098 = vst.msk [vmem:[%s7648_s29 + $0x190] sm:$0xf] %vm3997_vm1, %v6239_v17  ;;  %v6240_v54 = vpack.c.bf16 %v2353_v43, %v2353_v43  ;;  %v5228_v5 = vsel %vm1531_vm0, %v4873_v6, 0.0  ;;  %v4455_v51 = vsel %vm1531_vm0, %v2353_v43, 0.0  ;;  %v4874_v61 = vmul.f32 %v2353_v43, %v2353_v43 }
 0x1c1   : > { %4101 = vst.msk [vmem:[%s7648_s29 + $0x19c] sm:$0xf] %vm3997_vm1, %v6242_v1  ;;  %v5229_v34 = vadd.f32 %v5228_v5, %v5227_v40  ;;  %v4456_v52 = vadd.f32 %v4455_v51, %v4454_v27  ;;  %v1372_v36 = vmax.f32 %v1116_v4, 0.0  ;;  %v4876_v17 = vmul.f32 %v6629_v56, %v6629_v56 }
 0x1c2   : > { %4099 = vst.msk [vmem:[%s7648_s29 + $0x194] sm:$0xf] %vm3997_vm1, %v6240_v54  ;;  %v5230_v0 = vsel %vm1531_vm0, %v4874_v61, 0.0  ;;  %v1117_v48 = vadd.f32 %v8070_v41, %v854_v28  ;;  %v6269_v6 = vpack.c.bf16 %v8074_v50, %v8074_v50  ;;  %v5232_v55 = vsel %vm1531_vm0, %v4875_v33, 0.0 }
 0x1c3   : > { %v4458_v1 = vadd.f32 %v4457_v57, %v4456_v52  ;;  %v5231_v24 = vadd.f32 %v5230_v0, %v5229_v34  ;;  %v1511_v11 = vpack.c.bf16 %v1372_v36, %v1371_v49  ;;  %v4459_v40 = vsel %vm1531_vm0, %v6629_v56, 0.0  ;;  %v8410_v49 = vpop.f32.mrb[40].mxu1 }
 0x1c4   : > { %v6632_v43 = vpop.f32.mrb[104].mxu0  ;;  %v1118_v4 = vadd.f32 %v8070_v41, %v855_v9  ;;  %4128 = vst.msk [vmem:[%s7648_s29 + $0x208] sm:$0xf] %vm3997_vm1, %v6269_v6  ;;  %9859 = vst [vmem:[#allocation8_spill] sm:$0xff] %v8410_v49  ;;  %v5234_v56 = vsel %vm1531_vm0, %v4876_v17, 0.0  ;;  %v1373_v57 = vmax.f32 %v1117_v48, 0.0 }
 0x1c5   : > { %v6245_v54 = vpack.c.bf16 %v6632_v43, %v6632_v43  ;;  %v2366_v27 = vpop.f32.mrb[105].mxu0  ;;  %v5233_v28 = vadd.f32 %v5232_v55, %v5231_v24  ;;  %v4460_v51 = vadd.f32 %v4459_v40, %v4458_v1  ;;  %6758 = vmatprep.mubr.msk.bf16.mxu1 %vm1531_vm0, %v1511_v11  ;;  %v8415_v52 = vpop.f32.mrb[41].mxu1  ;;  %v4879_v36 = vmul.f32 %v6632_v43, %v6632_v43 }
 0x1c6   : > { %v6243_v5 = vpack.c.bf16 %v2366_v27, %v2366_v27  ;;  %v4461_v61 = vsel %vm1531_vm0, %v2366_v27, 0.0  ;;  %v6633_v34 = vpop.f32.mrb[106].mxu0  ;;  %v4877_v33 = vmul.f32 %v2366_v27, %v2366_v27  ;;  %9860 = vst [vmem:[#allocation9_spill] sm:$0xff] %v8415_v52  ;;  %v8419_v1 = vpop.f32.mrb[42].mxu1  ;;  %v1374_v40 = vmax.f32 %v1118_v4, 0.0 }
 0x1c7   : > { %4104 = vst.msk [vmem:[%s7648_s29 + $0x1a8] sm:$0xf] %vm3997_vm1, %v6245_v54  ;;  %v6246_v41 = vpack.c.bf16 %v6633_v34, %v6633_v34  ;;  %v2369_v9 = vpop.f32.mrb[107].mxu0  ;;  %v4462_v0 = vadd.f32 %v4461_v61, %v4460_v51  ;;  %v5235_v6 = vadd.f32 %v5234_v56, %v5233_v28  ;;  %9861 = vst [vmem:[#allocation10_spill] sm:$0xff] %v8419_v1  ;;  %v8425_v48 = vpop.f32.mrb[43].mxu1  ;;  %v4465_v54 = vsel %vm1531_vm0, %v6632_v43, 0.0 }
 0x1c8   : > { %4102 = vst.msk [vmem:[%s7648_s29 + $0x1a0] sm:$0xf] %vm3997_vm1, %v6243_v5  ;;  %v6244_v11 = vpack.c.bf16 %v2369_v9, %v2369_v9  ;;  %v5236_v24 = vsel %vm1531_vm0, %v4877_v33, 0.0  ;;  %v4463_v17 = vsel %vm1531_vm0, %v2369_v9, 0.0  ;;  %v4878_v55 = vmul.f32 %v2369_v9, %v2369_v9  ;;  %9862 = vst [vmem:[#allocation11_spill] sm:$0xff] %v8425_v48 }
 0x1c9   : > { %4105 = vst.msk [vmem:[%s7648_s29 + $0x1ac] sm:$0xf] %vm3997_vm1, %v6246_v41  ;;  %v5237_v27 = vadd.f32 %v5236_v24, %v5235_v6  ;;  %v4464_v28 = vadd.f32 %v4463_v17, %v4462_v0  ;;  %v4880_v5 = vmul.f32 %v6633_v34, %v6633_v34  ;;  %v1512_v61 = vpack.c.bf16 %v1374_v40, %v1373_v57 }
 0x1ca   : > { %4103 = vst.msk [vmem:[%s7648_s29 + $0x1a4] sm:$0xf] %vm3997_vm1, %v6244_v11  ;;  %v5238_v51 = vsel %vm1531_vm0, %v4878_v55, 0.0  ;;  %v6267_v56 = vpack.c.bf16 %v8084_v31, %v8084_v31  ;;  %v5240_v9 = vsel %vm1531_vm0, %v4879_v36, 0.0  ;;  %v4467_v43 = vsel %vm1531_vm0, %v6633_v34, 0.0  ;;  %v8441_v36 = vpop.f32.mrb[44].mxu1 }
 0x1cb   : > { %v4466_v33 = vadd.f32 %v4465_v54, %v4464_v28  ;;  %v5239_v41 = vadd.f32 %v5238_v51, %v5237_v27  ;;  %6759 = vmatmul.mubr.msk.bf16.gmra.mrb[104].mxu1 %vm1531_vm0, %v1512_v61  ;;  %v6270_v57 = vpack.c.bf16 %v8088_v58, %v8088_v58  ;;  %9863 = vst [vmem:[#allocation12_spill] sm:$0xff] %v8441_v36  ;;  %v5242_v34 = vsel %vm1531_vm0, %v4880_v5, 0.0  ;;  %v8448_v28 = vpop.f32.mrb[45].mxu1  ;;  %v8487_v36 = vld [vmem:[%s6951_s10] ss:$0 sm:$0xff]  ;;  %s348_s10 = scalar_lea.vmem %s9830_s5, %s347_s7 }
 0x1cc   : > { %v6636_v4 = vpop.f32.mrb[108].mxu0  ;;  %4126 = vst.msk [vmem:[%s7648_s29 + $0x200] sm:$0xf] %vm3997_vm1, %v6267_v56  ;;  %9864 = vst [vmem:[#allocation13_spill] sm:$0xff] %v8448_v28 }
 0x1cd   : > { %v6249_v48 = vpack.c.bf16 %v6636_v4, %v6636_v4  ;;  %v2382_v6 = vpop.f32.mrb[109].mxu0  ;;  %v5241_v0 = vadd.f32 %v5240_v9, %v5239_v41  ;;  %v4468_v24 = vadd.f32 %v4467_v43, %v4466_v33  ;;  %4129 = vst.msk [vmem:[%s7648_s29 + $0x20c] sm:$0xf] %vm3997_vm1, %v6270_v57  ;;  %v4883_v51 = vmul.f32 %v6636_v4, %v6636_v4  ;;  %v8452_v41 = vpop.f32.mrb[46].mxu1 }
 0x1ce   : > { %v6247_v11 = vpack.c.bf16 %v2382_v6, %v2382_v6  ;;  %v4469_v17 = vsel %vm1531_vm0, %v2382_v6, 0.0  ;;  %v6637_v55 = vpop.f32.mrb[110].mxu0  ;;  %v4881_v40 = vmul.f32 %v2382_v6, %v2382_v6  ;;  %9865 = vst [vmem:[#allocation14_spill] sm:$0xff] %v8452_v41  ;;  %v8458_v6 = vpop.f32.mrb[47].mxu1 }
 0x1cf   : > { %4108 = vst.msk [vmem:[%s7648_s29 + $0x1b8] sm:$0xf] %vm3997_vm1, %v6249_v48  ;;  %v6250_v54 = vpack.c.bf16 %v6637_v55, %v6637_v55  ;;  %v2385_v27 = vpop.f32.mrb[111].mxu0  ;;  %v4470_v61 = vadd.f32 %v4469_v17, %v4468_v24  ;;  %v5243_v56 = vadd.f32 %v5242_v34, %v5241_v0  ;;  %v4884_v48 = vmul.f32 %v6637_v55, %v6637_v55 }
 0x1d0   : > { %4106 = vst.msk [vmem:[%s7648_s29 + $0x1b0] sm:$0xf] %vm3997_vm1, %v6247_v11  ;;  %v6248_v33 = vpack.c.bf16 %v2385_v27, %v2385_v27  ;;  %v5244_v5 = vsel %vm1531_vm0, %v4881_v40, 0.0  ;;  %v4471_v9 = vsel %vm1531_vm0, %v2385_v27, 0.0  ;;  %v4882_v43 = vmul.f32 %v2385_v27, %v2385_v27  ;;  %9866 = vst [vmem:[#allocation15_spill] sm:$0xff] %v8458_v6 }
 0x1d1   : > { %4109 = vst.msk [vmem:[%s7648_s29 + $0x1bc] sm:$0xf] %vm3997_vm1, %v6250_v54  ;;  %v5245_v57 = vadd.f32 %v5244_v5, %v5243_v56  ;;  %v4472_v11 = vadd.f32 %v4471_v9, %v4470_v61  ;;  %v4473_v0 = vsel %vm1531_vm0, %v6636_v4, 0.0  ;;  %v8466_v17 = vsel %vm1531_vm0, %v8074_v50, 0.0  ;;  %v593_v4 = vld [vmem:[%s6968_s18 + $0x760] sm:$0xff] }
 0x1d2   : > { %4107 = vst.msk [vmem:[%s7648_s29 + $0x1b4] sm:$0xf] %vm3997_vm1, %v6248_v33  ;;  %v5246_v24 = vsel %vm1531_vm0, %v4882_v43, 0.0  ;;  %v6268_v34 = vpack.c.bf16 %v8092_v21, %v8092_v21  ;;  %v4903_v56 = vmul.f32 %v8074_v50, %v8074_v50  ;;  %v8474_v61 = vsel %vm1531_vm0, %v8084_v31, 0.0 }
 0x1d3   : > { %v4474_v40 = vadd.f32 %v4473_v0, %v4472_v11  ;;  %v5247_v54 = vadd.f32 %v5246_v24, %v5245_v57  ;;  %v5248_v33 = vsel %vm1531_vm0, %v4883_v51, 0.0  ;;  %v4475_v5 = vsel %vm1531_vm0, %v6637_v55, 0.0 }
 0x1d4   : > { %v6640_v27 = vpop.f32.mrb[112].mxu0  ;;  %v5250_v9 = vsel %vm1531_vm0, %v4884_v48, 0.0  ;;  %4127 = vst.msk [vmem:[%s7648_s29 + $0x204] sm:$0xf] %vm3997_vm1, %v6268_v34  ;;  %v594_v48 = vld [vmem:[%s6968_s18 + $0x768] sm:$0xff]  ;;  %v856_v1 = vmul.f32 %v8487_v36, %v593_v4 }
 0x1d5   : > { %v6253_v43 = vpack.c.bf16 %v6640_v27, %v6640_v27  ;;  %v2398_v57 = vpop.f32.mrb[113].mxu0  ;;  %v5249_v11 = vadd.f32 %v5248_v33, %v5247_v54  ;;  %v4476_v0 = vadd.f32 %v4475_v5, %v4474_v40  ;;  %v4887_v51 = vmul.f32 %v6640_v27, %v6640_v27 }
 0x1d6   : > { %v6251_v50 = vpack.c.bf16 %v2398_v57, %v2398_v57  ;;  %v4477_v24 = vsel %vm1531_vm0, %v2398_v57, 0.0  ;;  %v6641_v6 = vpop.f32.mrb[114].mxu0  ;;  %v4885_v41 = vmul.f32 %v2398_v57, %v2398_v57  ;;  %v8493_v33 = vsel %vm1531_vm0, %v4903_v56, 0.0 }
 0x1d7   : > { %4112 = vst.msk [vmem:[%s7648_s29 + $0x1c8] sm:$0xf] %vm3997_vm1, %v6253_v43  ;;  %v6254_v55 = vpack.c.bf16 %v6641_v6, %v6641_v6  ;;  %v2401_v28 = vpop.f32.mrb[115].mxu0  ;;  %v4478_v34 = vadd.f32 %v4477_v24, %v4476_v0  ;;  %v5251_v40 = vadd.f32 %v5250_v9, %v5249_v11  ;;  %v4888_v43 = vmul.f32 %v6641_v6, %v6641_v6  ;;  %v8499_v49 = vpop.f32.mrb[48].mxu1 }
 0x1d8   : > { %4110 = vst.msk [vmem:[%s7648_s29 + $0x1c0] sm:$0xf] %vm3997_vm1, %v6251_v50  ;;  %v6252_v54 = vpack.c.bf16 %v2401_v28, %v2401_v28  ;;  %v5252_v5 = vsel %vm1531_vm0, %v4885_v41, 0.0  ;;  %v4479_v57 = vsel %vm1531_vm0, %v2401_v28, 0.0  ;;  %v4886_v52 = vmul.f32 %v2401_v28, %v2401_v28  ;;  %9867 = vst [vmem:[#allocation16_spill] sm:$0xff] %v8499_v49  ;;  %v595_v41 = vld [vmem:[%s6968_s18 + $0x770] sm:$0xff] }
 0x1d9   : > { %4113 = vst.msk [vmem:[%s7648_s29 + $0x1cc] sm:$0xf] %vm3997_vm1, %v6254_v55  ;;  %v5253_v4 = vadd.f32 %v5252_v5, %v5251_v40  ;;  %v4480_v9 = vadd.f32 %v4479_v57, %v4478_v34  ;;  %v4901_v56 = vmul.f32 %v8084_v31, %v8084_v31  ;;  %v857_v11 = vmul.f32 %v8487_v36, %v594_v48  ;;  %v8507_v50 = vpop.f32.mrb[49].mxu1  ;;  %v8513_v55 = vld [vmem:[%s6959_s14] ss:$0 sm:$0xff]  ;;  %v596_v57 = vld [vmem:[%s6968_s18 + $0x778] sm:$0xff] }
 0x1da   : > { %4111 = vst.msk [vmem:[%s7648_s29 + $0x1c4] sm:$0xf] %vm3997_vm1, %v6252_v54  ;;  %9868 = vst [vmem:[#allocation17_spill] sm:$0xff] %v8507_v50  ;;  %v4481_v0 = vsel %vm1531_vm0, %v6640_v27, 0.0  ;;  %v5256_v24 = vsel %vm1531_vm0, %v4887_v51, 0.0  ;;  %v5254_v28 = vsel %vm1531_vm0, %v4886_v52, 0.0  ;;  %v1119_v40 = vadd.f32 %v8513_v55, %v856_v1 }
 0x1db   : > { %v8516_v54 = vpop.f32.mrb[50].mxu1  ;;  %v4483_v34 = vsel %vm1531_vm0, %v6641_v6, 0.0  ;;  %v4482_v31 = vadd.f32 %v4481_v0, %v4480_v9  ;;  %v5255_v48 = vadd.f32 %v5254_v28, %v5253_v4  ;;  %v6273_v27 = vpack.c.bf16 %v8109_v26, %v8109_v26 }
 0x1dc   : > { %9869 = vst [vmem:[#allocation18_spill] sm:$0xff] %v8516_v54  ;;  %v6644_v5 = vpop.f32.mrb[116].mxu0  ;;  %v8522_v51 = vpop.f32.mrb[51].mxu1  ;;  %v5258_v52 = vsel %vm1531_vm0, %v4888_v43, 0.0  ;;  %v1120_v1 = vadd.f32 %v8513_v55, %v857_v11  ;;  %v858_v6 = vmul.f32 %v8487_v36, %v595_v41  ;;  %v1375_v20 = vmax.f32 %v1119_v40, 0.0 }
 0x1dd   : > { %9870 = vst [vmem:[#allocation19_spill] sm:$0xff] %v8522_v51  ;;  %v6257_v50 = vpack.c.bf16 %v6644_v5, %v6644_v5  ;;  %v2414_v49 = vpop.f32.mrb[117].mxu0  ;;  %v5257_v9 = vadd.f32 %v5256_v24, %v5255_v48  ;;  %v4484_v4 = vadd.f32 %v4483_v34, %v4482_v31  ;;  %4132 = vst.msk [vmem:[%s7648_s29 + $0x218] sm:$0xf] %vm3997_vm1, %v6273_v27  ;;  %v4489_v27 = vsel %vm1531_vm0, %v6644_v5, 0.0 }
 0x1de   : > { %v6255_v0 = vpack.c.bf16 %v2414_v49, %v2414_v49  ;;  %v4485_v28 = vsel %vm1531_vm0, %v2414_v49, 0.0  ;;  %v6645_v54 = vpop.f32.mrb[118].mxu0  ;;  %v4889_v51 = vmul.f32 %v2414_v49, %v2414_v49  ;;  %v859_v11 = vmul.f32 %v8487_v36, %v596_v57 }
 0x1df   : > { %4116 = vst.msk [vmem:[%s7648_s29 + $0x1d8] sm:$0xf] %vm3997_vm1, %v6257_v50  ;;  %v6258_v43 = vpack.c.bf16 %v6645_v54, %v6645_v54  ;;  %v2417_v53 = vpop.f32.mrb[119].mxu0  ;;  %v4891_v32 = vmul.f32 %v6644_v5, %v6644_v5  ;;  %v4486_v41 = vadd.f32 %v4485_v28, %v4484_v4  ;;  %v5259_v24 = vadd.f32 %v5258_v52, %v5257_v9 }
 0x1e0   : > { %4114 = vst.msk [vmem:[%s7648_s29 + $0x1d0] sm:$0xf] %vm3997_vm1, %v6255_v0  ;;  %v6256_v34 = vpack.c.bf16 %v2417_v53, %v2417_v53  ;;  %v5260_v31 = vsel %vm1531_vm0, %v4889_v51, 0.0  ;;  %v4487_v48 = vsel %vm1531_vm0, %v2417_v53, 0.0  ;;  %v4890_v50 = vmul.f32 %v2417_v53, %v2417_v53 }
 0x1e1   : > { %4117 = vst.msk [vmem:[%s7648_s29 + $0x1dc] sm:$0xf] %vm3997_vm1, %v6258_v43  ;;  %v1376_v49 = vmax.f32 %v1120_v1, 0.0  ;;  %v5261_v13 = vadd.f32 %v5260_v31, %v5259_v24  ;;  %v4488_v40 = vadd.f32 %v4487_v48, %v4486_v41  ;;  %v1121_v57 = vadd.f32 %v8513_v55, %v858_v6 }
 0x1e2   : > { %4115 = vst.msk [vmem:[%s7648_s29 + $0x1d4] sm:$0xf] %vm3997_vm1, %v6256_v34  ;;  %v4892_v0 = vmul.f32 %v6645_v54, %v6645_v54  ;;  %v5262_v52 = vsel %vm1531_vm0, %v4890_v50, 0.0  ;;  %v1122_v51 = vadd.f32 %v8513_v55, %v859_v11  ;;  %v5264_v4 = vsel %vm1531_vm0, %v4891_v32, 0.0 }
 0x1e3   : > { %v1513_v9 = vpack.c.bf16 %v1376_v49, %v1375_v20  ;;  %v4490_v28 = vadd.f32 %v4489_v27, %v4488_v40  ;;  %v5263_v53 = vadd.f32 %v5262_v52, %v5261_v13  ;;  %v8547_v5 = vsel %vm1531_vm0, %v4901_v56, 0.0 }
 0x1e4   : > { %v6648_v1 = vpop.f32.mrb[120].mxu0  ;;  %v4491_v43 = vsel %vm1531_vm0, %v6645_v54, 0.0  ;;  %v1377_v6 = vmax.f32 %v1121_v57, 0.0  ;;  %v1378_v20 = vmax.f32 %v1122_v51, 0.0  ;;  %v5266_v48 = vsel %vm1531_vm0, %v4892_v0, 0.0 }
 0x1e5   : > { %v6261_v41 = vpack.c.bf16 %v6648_v1, %v6648_v1  ;;  %v2430_v24 = vpop.f32.mrb[121].mxu0  ;;  %6762 = vmatprep.mubr.msk.bf16.mxu1 %vm1531_vm0, %v1513_v9  ;;  %v5265_v34 = vadd.f32 %v5264_v4, %v5263_v53  ;;  %v4492_v32 = vadd.f32 %v4491_v43, %v4490_v28  ;;  %v4904_v49 = vmul.f32 %v8088_v58, %v8088_v58 }
 0x1e6   : > { %v6259_v11 = vpack.c.bf16 %v2430_v24, %v2430_v24  ;;  %v4493_v31 = vsel %vm1531_vm0, %v2430_v24, 0.0  ;;  %v6649_v13 = vpop.f32.mrb[122].mxu0  ;;  %v4893_v56 = vmul.f32 %v2430_v24, %v2430_v24  ;;  %v4895_v27 = vmul.f32 %v6648_v1, %v6648_v1 }
 0x1e7   : > { %4120 = vst.msk [vmem:[%s7648_s29 + $0x1e8] sm:$0xf] %vm3997_vm1, %v6261_v41  ;;  %v6262_v54 = vpack.c.bf16 %v6649_v13, %v6649_v13  ;;  %v2433_v50 = vpop.f32.mrb[123].mxu0  ;;  %v4494_v40 = vadd.f32 %v4493_v31, %v4492_v32  ;;  %v5267_v57 = vadd.f32 %v5266_v48, %v5265_v34  ;;  %v1514_v4 = vpack.c.bf16 %v1378_v20, %v1377_v6 }
 0x1e8   : > { %4118 = vst.msk [vmem:[%s7648_s29 + $0x1e0] sm:$0xf] %vm3997_vm1, %v6259_v11  ;;  %v6260_v52 = vpack.c.bf16 %v2433_v50, %v2433_v50  ;;  %v5268_v9 = vsel %vm1531_vm0, %v4893_v56, 0.0  ;;  %v4495_v0 = vsel %vm1531_vm0, %v2433_v50, 0.0  ;;  %v4894_v51 = vmul.f32 %v2433_v50, %v2433_v50 }
 0x1e9   : > { %4121 = vst.msk [vmem:[%s7648_s29 + $0x1ec] sm:$0xf] %vm3997_vm1, %v6262_v54  ;;  %v5269_v28 = vadd.f32 %v5268_v9, %v5267_v57  ;;  %v4496_v53 = vadd.f32 %v4495_v0, %v4494_v40  ;;  %v8567_v43 = vsel %vm1531_vm0, %v8088_v58, 0.0  ;;  %v8571_v41 = vsel %vm1531_vm0, %v8092_v21, 0.0  ;;  %v8573_v24 = vpop.f32.mrb[52].mxu1  ;;  %6763 = vmatmul.mubr.msk.bf16.gmra.mrb[108].mxu1 %vm1531_vm0, %v1514_v4 }
 0x1ea   : > { %4119 = vst.msk [vmem:[%s7648_s29 + $0x1e4] sm:$0xf] %vm3997_vm1, %v6260_v52  ;;  %v4497_v34 = vsel %vm1531_vm0, %v6648_v1, 0.0  ;;  %v4896_v11 = vmul.f32 %v6649_v13, %v6649_v13  ;;  %v5270_v6 = vsel %vm1531_vm0, %v4894_v51, 0.0  ;;  %v6271_v20 = vpack.c.bf16 %v8115_v30, %v8115_v30  ;;  %v8580_v32 = vpop.f32.mrb[53].mxu1 }
 0x1eb   : > { %9871 = vst [vmem:[#allocation20_spill] sm:$0xff] %v8580_v32  ;;  %v4498_v58 = vadd.f32 %v4497_v34, %v4496_v53  ;;  %v5271_v31 = vadd.f32 %v5270_v6, %v5269_v28  ;;  %v4902_v56 = vmul.f32 %v8092_v21, %v8092_v21  ;;  %v6274_v1 = vpack.c.bf16 %v8120_v38, %v8120_v38  ;;  %v8586_v54 = vpop.f32.mrb[54].mxu1 }
 0x1ec   : > { %v6652_v48 = vpop.f32.mrb[124].mxu0  ;;  %9872 = vst [vmem:[#allocation21_spill] sm:$0xff] %v8586_v54  ;;  %v5272_v50 = vsel %vm1531_vm0, %v4895_v27, 0.0  ;;  %v4499_v40 = vsel %vm1531_vm0, %v6649_v13, 0.0  ;;  %v8591_v9 = vsel %vm1531_vm0, %v4904_v49, 0.0  ;;  %v8595_v0 = vpop.f32.mrb[55].mxu1 }
 0x1ed   : > { %v6265_v57 = vpack.c.bf16 %v6652_v48, %v6652_v48  ;;  %v2446_v52 = vpop.f32.mrb[125].mxu0  ;;  %4130 = vst.msk [vmem:[%s7648_s29 + $0x210] sm:$0xf] %vm3997_vm1, %v6271_v20  ;;  %9873 = vst [vmem:[#allocation22_spill] sm:$0xff] %v8595_v0  ;;  %v5273_v21 = vadd.f32 %v5272_v50, %v5271_v31  ;;  %v4500_v4 = vadd.f32 %v4499_v40, %v4498_v58  ;;  %v5274_v13 = vsel %vm1531_vm0, %v4896_v11, 0.0 }
 0x1ee   : > { %v6263_v51 = vpack.c.bf16 %v2446_v52, %v2446_v52  ;;  %v4501_v28 = vsel %vm1531_vm0, %v2446_v52, 0.0  ;;  %v6653_v53 = vpop.f32.mrb[126].mxu0  ;;  %4133 = vst.msk [vmem:[%s7648_s29 + $0x21c] sm:$0xf] %vm3997_vm1, %v6274_v1  ;;  %v4899_v49 = vmul.f32 %v6652_v48, %v6652_v48  ;;  %v4897_v27 = vmul.f32 %v2446_v52, %v2446_v52  ;;  %v597_v52 = vld [vmem:[%s6968_s18 + $0x780] sm:$0xff] }
 0x1ef   : > { %4124 = vst.msk [vmem:[%s7648_s29 + $0x1f8] sm:$0xf] %vm3997_vm1, %v6265_v57  ;;  %v6266_v34 = vpack.c.bf16 %v6653_v53, %v6653_v53  ;;  %v2449_v6 = vpop.f32.mrb[127].mxu0  ;;  %v4502_v20 = vadd.f32 %v4501_v28, %v4500_v4  ;;  %v5275_v58 = vadd.f32 %v5274_v13, %v5273_v21  ;;  %v5286_v1 = vsel %vm1531_vm0, %v4902_v56, 0.0  ;;  %v599_v13 = vld [vmem:[%s6968_s18 + $0x790] sm:$0xff] }
 0x1f0   : > { %4122 = vst.msk [vmem:[%s7648_s29 + $0x1f0] sm:$0xf] %vm3997_vm1, %v6263_v51  ;;  %v6264_v31 = vpack.c.bf16 %v2449_v6, %v2449_v6  ;;  %v5276_v11 = vsel %vm1531_vm0, %v4897_v27, 0.0  ;;  %v4503_v50 = vsel %vm1531_vm0, %v2449_v6, 0.0  ;;  %v4898_v40 = vmul.f32 %v2449_v6, %v2449_v6  ;;  %v598_v51 = vld [vmem:[%s6968_s18 + $0x788] sm:$0xff]  ;;  %v600_v27 = vld [vmem:[%s6968_s18 + $0x798] sm:$0xff] }
 0x1f1   : > { %4125 = vst.msk [vmem:[%s7648_s29 + $0x1fc] sm:$0xf] %vm3997_vm1, %v6266_v34  ;;  %v8612_v57 = vsel %vm1531_vm0, %v8109_v26, 0.0  ;;  %v5277_v4 = vadd.f32 %v5276_v11, %v5275_v58  ;;  %v4504_v21 = vadd.f32 %v4503_v50, %v4502_v20  ;;  %v4907_v56 = vmul.f32 %v8109_v26, %v8109_v26 }
 0x1f2   : > { %4123 = vst.msk [vmem:[%s7648_s29 + $0x1f4] sm:$0xf] %vm3997_vm1, %v6264_v31  ;;  %v6272_v28 = vpack.c.bf16 %v8124_v42, %v8124_v42  ;;  %v4505_v34 = vsel %vm1531_vm0, %v6652_v48, 0.0  ;;  %v5280_v6 = vsel %vm1531_vm0, %v4899_v49, 0.0  ;;  %v4900_v0 = vmul.f32 %v6653_v53, %v6653_v53 }
 0x1f3   : > { %v5278_v54 = vsel %vm1531_vm0, %v4898_v40, 0.0  ;;  %v4506_v32 = vadd.f32 %v4505_v34, %v4504_v21  ;;  %v860_v20 = vmul.f32 %v8487_v36, %v597_v52  ;;  %v861_v26 = vmul.f32 %v8487_v36, %v598_v51 }
 0x1f4   : > { %v5279_v58 = vadd.f32 %v5278_v54, %v5277_v4  ;;  %4131 = vst.msk [vmem:[%s7648_s29 + $0x214] sm:$0xf] %vm3997_vm1, %v6272_v28  ;;  %v4507_v31 = vsel %vm1531_vm0, %v6653_v53, 0.0  ;;  %v862_v11 = vmul.f32 %v8487_v36, %v599_v13  ;;  %v863_v48 = vmul.f32 %v8487_v36, %v600_v27 }
 0x1f5   : > { %v6277_v49 = vpack.c.bf16 %v8142_v7, %v8142_v7  ;;  %v4508_v50 = vadd.f32 %v4507_v31, %v4506_v32  ;;  %v1123_v54 = vadd.f32 %v8513_v55, %v860_v20  ;;  %v1124_v4 = vadd.f32 %v8513_v55, %v861_v26 }
 0x1f6   : > { %v5281_v40 = vadd.f32 %v5280_v6, %v5279_v58  ;;  %v5282_v21 = vsel %vm1531_vm0, %v4900_v0, 0.0  ;;  %v4905_v52 = vmul.f32 %v8115_v30, %v8115_v30  ;;  %v1125_v53 = vadd.f32 %v8513_v55, %v862_v11  ;;  %v8646_v34 = vpop.f32.mrb[56].mxu1 }
 0x1f7   : > { %v1126_v51 = vadd.f32 %v8513_v55, %v863_v48  ;;  %4136 = vst.msk [vmem:[%s7648_s29 + $0x228] sm:$0xf] %vm3997_vm1, %v6277_v49  ;;  %v4510_v32 = vadd.f32 %v8474_v61, %v4508_v50  ;;  %v1379_v13 = vmax.f32 %v1123_v54, 0.0  ;;  %v1380_v27 = vmax.f32 %v1124_v4, 0.0  ;;  %v8652_v26 = vpop.f32.mrb[57].mxu1  ;;  %v601_v49 = vld [vmem:[%s6968_s18 + $0x7a0] sm:$0xff] }
 0x1f8   : > { %v5283_v28 = vadd.f32 %v5282_v21, %v5281_v40  ;;  %v4908_v0 = vmul.f32 %v8120_v38, %v8120_v38  ;;  %v1381_v6 = vmax.f32 %v1125_v53, 0.0  ;;  %v6275_v20 = vpack.c.bf16 %v8147_v12, %v8147_v12  ;;  %v8659_v50 = vpop.f32.mrb[58].mxu1 }
 0x1f9   : > { %v1382_v58 = vmax.f32 %v1126_v51, 0.0  ;;  %v4512_v61 = vadd.f32 %v8571_v41, %v4510_v32  ;;  %v4906_v11 = vmul.f32 %v8124_v42, %v8124_v42  ;;  %v1515_v48 = vpack.c.bf16 %v1380_v27, %v1379_v13  ;;  %v602_v41 = vld [vmem:[%s6968_s18 + $0x7a8] sm:$0xff]  ;;  %v8669_v21 = vpop.f32.mrb[59].mxu1  ;;  %v604_v32 = vld [vmem:[%s6968_s18 + $0x7b8] sm:$0xff] }
 0x1fa   : > { %v5285_v31 = vadd.f32 %v8547_v5, %v5283_v28  ;;  %v5296_v40 = vsel %vm1531_vm0, %v4907_v56, 0.0  ;;  %v4517_v54 = vsel %vm1531_vm0, %v8115_v30, 0.0  ;;  %4134 = vst.msk [vmem:[%s7648_s29 + $0x220] sm:$0xf] %vm3997_vm1, %v6275_v20  ;;  %v6278_v5 = vpack.c.bf16 %v8152_v18, %v8152_v18  ;;  %v603_v28 = vld [vmem:[%s6968_s18 + $0x7b0] sm:$0xff] }
 0x1fb   : > { %v1516_v4 = vpack.c.bf16 %v1382_v58, %v1381_v6  ;;  %v4514_v53 = vadd.f32 %v8466_v17, %v4512_v61  ;;  %v4523_v56 = vsel %vm1531_vm0, %v8120_v38, 0.0  ;;  %6766 = vmatprep.mubr.msk.bf16.mxu1 %vm1531_vm0, %v1515_v48  ;;  %v6276_v30 = vpack.c.bf16 %v8156_v29, %v8156_v29 }
 0x1fc   : > { %v5287_v51 = vadd.f32 %v5286_v1, %v5285_v31  ;;  %v5292_v13 = vsel %vm1531_vm0, %v4905_v52, 0.0  ;;  %v5298_v27 = vsel %vm1531_vm0, %v4908_v0, 0.0  ;;  %v4519_v6 = vsel %vm1531_vm0, %v8124_v42, 0.0  ;;  %4137 = vst.msk [vmem:[%s7648_s29 + $0x22c] sm:$0xf] %vm3997_vm1, %v6278_v5 }
 0x1fd   : > { %6767 = vmatmul.mubr.msk.bf16.gmra.mrb[112].mxu1 %vm1531_vm0, %v1516_v4  ;;  %v864_v38 = vmul.f32 %v8487_v36, %v601_v49  ;;  %v4516_v17 = vadd.f32 %v8567_v43, %v4514_v53  ;;  %v5294_v58 = vsel %vm1531_vm0, %v4906_v11, 0.0  ;;  %4135 = vst.msk [vmem:[%s7648_s29 + $0x224] sm:$0xf] %vm3997_vm1, %v6276_v30  ;;  %v865_v52 = vmul.f32 %v8487_v36, %v602_v41 }
 0x1fe   : > { %v5289_v1 = vadd.f32 %v8493_v33, %v5287_v51  ;;  %v8695_v0 = vsel %vm1531_vm0, %v8142_v7, 0.0  ;;  %v866_v20 = vmul.f32 %v8487_v36, %v603_v28  ;;  %v867_v31 = vmul.f32 %v8487_v36, %v604_v32 }
 0x1ff   : > { %v1127_v42 = vadd.f32 %v8513_v55, %v864_v38  ;;  %v4518_v33 = vadd.f32 %v4517_v54, %v4516_v17  ;;  %v1128_v61 = vadd.f32 %v8513_v55, %v865_v52  ;;  %v6281_v11 = vpack.c.bf16 %v8174_v45, %v8174_v45  ;;  %v605_v17 = vld [vmem:[%s6968_s18 + $0x7c0] sm:$0xff] }
 0x200   : > { %v5291_v43 = vadd.f32 %v8591_v9, %v5289_v1  ;;  %v4911_v48 = vmul.f32 %v8142_v7, %v8142_v7  ;;  %v1129_v4 = vadd.f32 %v8513_v55, %v866_v20  ;;  %v1130_v5 = vadd.f32 %v8513_v55, %v867_v31  ;;  %v606_v20 = vld [vmem:[%s6968_s18 + $0x7c8] sm:$0xff] }
 0x201   : > { %v1383_v49 = vmax.f32 %v1127_v42, 0.0  ;;  %v4520_v53 = vadd.f32 %v4519_v6, %v4518_v33  ;;  %v4909_v9 = vmul.f32 %v8147_v12, %v8147_v12  ;;  %v1384_v54 = vmax.f32 %v1128_v61, 0.0  ;;  %4140 = vst.msk [vmem:[%s7648_s29 + $0x238] sm:$0xf] %vm3997_vm1, %v6281_v11  ;;  %v608_v61 = vld [vmem:[%s6968_s18 + $0x7d8] sm:$0xff] }
 0x202   : > { %v5293_v41 = vadd.f32 %v5292_v13, %v5291_v43  ;;  %v4912_v51 = vmul.f32 %v8152_v18, %v8152_v18  ;;  %v1385_v7 = vmax.f32 %v1129_v4, 0.0  ;;  %v1386_v30 = vmax.f32 %v1130_v5, 0.0 }
 0x203   : > { %v6279_v28 = vpack.c.bf16 %v8180_v3, %v8180_v3  ;;  %v4522_v32 = vadd.f32 %v8612_v57, %v4520_v53  ;;  %v4910_v6 = vmul.f32 %v8156_v29, %v8156_v29  ;;  %v1517_v38 = vpack.c.bf16 %v1384_v54, %v1383_v49  ;;  %v8735_v11 = vpop.f32.mrb[60].mxu1 }
 0x204   : > { %v5295_v13 = vadd.f32 %v5294_v58, %v5293_v41  ;;  %v5304_v1 = vsel %vm1531_vm0, %v4911_v48, 0.0  ;;  %v4525_v52 = vsel %vm1531_vm0, %v8147_v12, 0.0  ;;  %v1518_v42 = vpack.c.bf16 %v1386_v30, %v1385_v7  ;;  %v607_v12 = vld [vmem:[%s6968_s18 + $0x7d0] sm:$0xff] }
 0x205   : > { %4138 = vst.msk [vmem:[%s7648_s29 + $0x230] sm:$0xf] %vm3997_vm1, %v6279_v28  ;;  %v6282_v57 = vpack.c.bf16 %v8183_v44, %v8183_v44  ;;  %v4524_v58 = vadd.f32 %v4523_v56, %v4522_v32  ;;  %v4531_v43 = vsel %vm1531_vm0, %v8152_v18, 0.0  ;;  %6770 = vmatprep.mubr.msk.bf16.mxu1 %vm1531_vm0, %v1517_v38  ;;  %v6280_v33 = vpack.c.bf16 %v8188_v16, %v8188_v16  ;;  %v8745_v56 = vpop.f32.mrb[61].mxu1 }
 0x206   : > { %v5297_v31 = vadd.f32 %v5296_v40, %v5295_v13  ;;  %v5300_v48 = vsel %vm1531_vm0, %v4909_v9, 0.0  ;;  %v5306_v49 = vsel %vm1531_vm0, %v4912_v51, 0.0  ;;  %v4527_v40 = vsel %vm1531_vm0, %v8156_v29, 0.0  ;;  %6771 = vmatmul.mubr.msk.bf16.gmra.mrb[116].mxu1 %vm1531_vm0, %v1518_v42  ;;  %v8751_v9 = vpop.f32.mrb[62].mxu1 }
 0x207   : > { %4141 = vst.msk [vmem:[%s7648_s29 + $0x23c] sm:$0xf] %vm3997_vm1, %v6282_v57  ;;  %v868_v18 = vmul.f32 %v8487_v36, %v605_v17  ;;  %v4526_v5 = vadd.f32 %v4525_v52, %v4524_v58  ;;  %v5302_v41 = vsel %vm1531_vm0, %v4910_v6, 0.0  ;;  %4139 = vst.msk [vmem:[%s7648_s29 + $0x234] sm:$0xf] %vm3997_vm1, %v6280_v33  ;;  %v869_v53 = vmul.f32 %v8487_v36, %v606_v20 }
 0x208   : > { %v5299_v4 = vadd.f32 %v5298_v27, %v5297_v31  ;;  %v4915_v29 = vmul.f32 %v8174_v45, %v8174_v45  ;;  %v870_v51 = vmul.f32 %v8487_v36, %v607_v12  ;;  %v871_v7 = vmul.f32 %v8487_v36, %v608_v61  ;;  %v8758_v27 = vpop.f32.mrb[63].mxu1 }
 0x209   : > { %v1131_v54 = vadd.f32 %v8513_v55, %v868_v18  ;;  %v4528_v28 = vadd.f32 %v4527_v40, %v4526_v5  ;;  %v1132_v32 = vadd.f32 %v8513_v55, %v869_v53  ;;  %v6285_v13 = vpack.c.bf16 %v8211_v63, %v8211_v63  ;;  %v609_v18 = vld [vmem:[%s6968_s18 + $0x7e0] sm:$0xff]  ;;  %v610_v53 = vld [vmem:[%s6968_s18 + $0x7e8] sm:$0xff] }
 0x20a   : > { %v5301_v30 = vadd.f32 %v5300_v48, %v5299_v4  ;;  %v4913_v6 = vmul.f32 %v8180_v3, %v8180_v3  ;;  %v1133_v17 = vadd.f32 %v8513_v55, %v870_v51  ;;  %v1134_v52 = vadd.f32 %v8513_v55, %v871_v7  ;;  %v611_v7 = vld [vmem:[%s6968_s18 + $0x7f0] sm:$0xff] }
 0x20b   : > { %v1387_v38 = vmax.f32 %v1131_v54, 0.0  ;;  %v4530_v42 = vadd.f32 %v8695_v0, %v4528_v28  ;;  %v4533_v20 = vsel %vm1531_vm0, %v8180_v3, 0.0  ;;  %v1388_v58 = vmax.f32 %v1132_v32, 0.0  ;;  %4144 = vst.msk [vmem:[%s7648_s29 + $0x248] sm:$0xf] %vm3997_vm1, %v6285_v13 }
 0x20c   : > { %v5303_v57 = vadd.f32 %v5302_v41, %v5301_v30  ;;  %v4916_v31 = vmul.f32 %v8183_v44, %v8183_v44  ;;  %v1389_v33 = vmax.f32 %v1133_v17, 0.0  ;;  %v1390_v12 = vmax.f32 %v1134_v52, 0.0  ;;  %v612_v30 = vld [vmem:[%s6968_s18 + $0x7f8] sm:$0xff] }
 0x20d   : > { %v6283_v61 = vpack.c.bf16 %v8215_v62, %v8215_v62  ;;  %v4532_v48 = vadd.f32 %v4531_v43, %v4530_v42  ;;  %v4537_v40 = vsel %vm1531_vm0, %v8174_v45, 0.0  ;;  %v1519_v3 = vpack.c.bf16 %v1388_v58, %v1387_v38 }
 0x20e   : > { %v5305_v0 = vadd.f32 %v5304_v1, %v5303_v57  ;;  %v5308_v4 = vsel %vm1531_vm0, %v4913_v6, 0.0  ;;  %v4914_v5 = vmul.f32 %v8188_v16, %v8188_v16  ;;  %v1520_v41 = vpack.c.bf16 %v1390_v12, %v1389_v33 }
 0x20f   : > { %4142 = vst.msk [vmem:[%s7648_s29 + $0x240] sm:$0xf] %vm3997_vm1, %v6283_v61  ;;  %v6286_v43 = vpack.c.bf16 %v8218_v14, %v8218_v14  ;;  %v5312_v54 = vsel %vm1531_vm0, %v4915_v29, 0.0  ;;  %v4534_v45 = vadd.f32 %v4533_v20, %v4532_v48  ;;  %6774 = vmatprep.mubr.msk.bf16.mxu1 %vm1531_vm0, %v1519_v3  ;;  %v6284_v51 = vpack.c.bf16 %v8223_v25, %v8223_v25 }
 0x210   : > { %v5307_v1 = vadd.f32 %v5306_v49, %v5305_v0  ;;  %v4539_v28 = vsel %vm1531_vm0, %v8183_v44, 0.0  ;;  %v5314_v32 = vsel %vm1531_vm0, %v4916_v31, 0.0  ;;  %v4535_v13 = vsel %vm1531_vm0, %v8188_v16, 0.0  ;;  %6775 = vmatmul.mubr.msk.bf16.gmra.mrb[120].mxu1 %vm1531_vm0, %v1520_v41 }
 0x211   : > { %4145 = vst.msk [vmem:[%s7648_s29 + $0x24c] sm:$0xf] %vm3997_vm1, %v6286_v43  ;;  %v872_v49 = vmul.f32 %v8487_v36, %v609_v18  ;;  %v4536_v6 = vadd.f32 %v4535_v13, %v4534_v45  ;;  %v4917_v38 = vmul.f32 %v8215_v62, %v8215_v62  ;;  %4143 = vst.msk [vmem:[%s7648_s29 + $0x244] sm:$0xf] %vm3997_vm1, %v6284_v51  ;;  %v5310_v17 = vsel %vm1531_vm0, %v4914_v5, 0.0 }
 0x212   : > { %v5309_v29 = vadd.f32 %v5308_v4, %v5307_v1  ;;  %v873_v44 = vmul.f32 %v8487_v36, %v610_v53  ;;  %v874_v52 = vmul.f32 %v8487_v36, %v611_v7  ;;  %v875_v42 = vmul.f32 %v8487_v36, %v612_v30 }
 0x213   : > { %v1135_v16 = vadd.f32 %v8513_v55, %v872_v49  ;;  %v4538_v57 = vadd.f32 %v4537_v40, %v4536_v6  ;;  %v6289_v31 = vpack.c.bf16 %v8247_v46, %v8247_v46  ;;  %v4541_v33 = vsel %vm1531_vm0, %v8215_v62, 0.0  ;;  %v8821_v40 = vpop.f32.mrb[64].mxu1 }
 0x214   : > { %v5311_v20 = vadd.f32 %v5310_v17, %v5309_v29  ;;  %v1136_v58 = vadd.f32 %v8513_v55, %v873_v44  ;;  %v1137_v61 = vadd.f32 %v8513_v55, %v874_v52  ;;  %v1138_v48 = vadd.f32 %v8513_v55, %v875_v42  ;;  %v8827_v43 = vpop.f32.mrb[65].mxu1 }
 0x215   : > { %v1391_v12 = vmax.f32 %v1135_v16, 0.0  ;;  %v4540_v0 = vadd.f32 %v4539_v28, %v4538_v57  ;;  %v5316_v18 = vsel %vm1531_vm0, %v4917_v38, 0.0  ;;  %4148 = vst.msk [vmem:[%s7648_s29 + $0x258] sm:$0xf] %vm3997_vm1, %v6289_v31  ;;  %v4918_v4 = vmul.f32 %v8223_v25, %v8223_v25 }
 0x216   : > { %v5313_v3 = vadd.f32 %v5312_v54, %v5311_v20  ;;  %v1392_v36 = vmax.f32 %v1136_v58, 0.0  ;;  %v1393_v5 = vmax.f32 %v1137_v61, 0.0  ;;  %v1394_v62 = vmax.f32 %v1138_v48, 0.0  ;;  %v8829_v54 = vpop.f32.mrb[66].mxu1 }
 0x217   : > { %v6287_v41 = vpack.c.bf16 %v8252_v22, %v8252_v22  ;;  %v4542_v53 = vadd.f32 %v4541_v33, %v4540_v0  ;;  %v4919_v45 = vmul.f32 %v8211_v63, %v8211_v63  ;;  %v4543_v51 = vsel %vm1531_vm0, %v8223_v25, 0.0  ;;  %v8839_v28 = vpop.f32.mrb[67].mxu1 }
 0x218   : > { %v5315_v55 = vadd.f32 %v5314_v32, %v5313_v3  ;;  %v1521_v1 = vpack.c.bf16 %v1392_v36, %v1391_v12  ;;  %v1522_v7 = vpack.c.bf16 %v1394_v62, %v1393_v5  ;;  %v6290_v30 = vpack.c.bf16 %v8256_v10, %v8256_v10 }
 0x219   : > { %4146 = vst.msk [vmem:[%s7648_s29 + $0x250] sm:$0xf] %vm3997_vm1, %v6287_v41  ;;  %v4545_v32 = vsel %vm1531_vm0, %v8211_v63, 0.0  ;;  %v4544_v49 = vadd.f32 %v4543_v51, %v4542_v53  ;;  %v6288_v25 = vpack.c.bf16 %v8263_v39, %v8263_v39  ;;  %v4920_v29 = vmul.f32 %v8218_v14, %v8218_v14 }
 0x21a   : > { %v5317_v13 = vadd.f32 %v5316_v18, %v5315_v55  ;;  %6778 = vmatprep.mubr.msk.bf16.mxu1 %vm1531_vm0, %v1521_v1  ;;  %v5318_v6 = vsel %vm1531_vm0, %v4918_v4, 0.0  ;;  %v4921_v38 = vmul.f32 %v8252_v22, %v8252_v22  ;;  %4149 = vst.msk [vmem:[%s7648_s29 + $0x25c] sm:$0xf] %vm3997_vm1, %v6290_v30  ;;  %v6293_v63 = vpack.c.bf16 %v8281_v2, %v8281_v2 }
 0x21b   : > { %6779 = vmatmul.mubr.msk.bf16.gmra.mrb[124].mxu1 %vm1531_vm0, %v1522_v7  ;;  %v4546_v44 = vadd.f32 %v4545_v32, %v4544_v49  ;;  %4147 = vst.msk [vmem:[%s7648_s29 + $0x254] sm:$0xf] %vm3997_vm1, %v6288_v25  ;;  %v5320_v16 = vsel %vm1531_vm0, %v4919_v45, 0.0  ;;  %v4547_v52 = vsel %vm1531_vm0, %v8218_v14, 0.0  ;;  %v4549_v42 = vsel %vm1531_vm0, %v8252_v22, 0.0 }
 0x21c   : > { %v5319_v17 = vadd.f32 %v5318_v6, %v5317_v13  ;;  %4152 = vst.msk [vmem:[%s7648_s29 + $0x268] sm:$0xf] %vm3997_vm1, %v6293_v63  ;;  %v6291_v57 = vpack.c.bf16 %v8286_v8, %v8286_v8  ;;  %v6294_v31 = vpack.c.bf16 %v8291_v35, %v8291_v35  ;;  %v5322_v33 = vsel %vm1531_vm0, %v4920_v29, 0.0 }
 0x21d   : > { %v4548_v20 = vadd.f32 %v4547_v52, %v4546_v44  ;;  %v5324_v12 = vsel %vm1531_vm0, %v4921_v38, 0.0  ;;  %v4922_v14 = vmul.f32 %v8263_v39, %v8263_v39  ;;  %v6292_v22 = vpack.c.bf16 %v8297_v23, %v8297_v23 }
 0x21e   : > { %v5321_v58 = vadd.f32 %v5320_v16, %v5319_v17  ;;  %4150 = vst.msk [vmem:[%s7648_s29 + $0x260] sm:$0xf] %vm3997_vm1, %v6291_v57  ;;  %4153 = vst.msk [vmem:[%s7648_s29 + $0x26c] sm:$0xf] %vm3997_vm1, %v6294_v31  ;;  %v4923_v0 = vmul.f32 %v8247_v46, %v8247_v46  ;;  %v4551_v3 = vsel %vm1531_vm0, %v8263_v39, 0.0  ;;  %v6297_v18 = vpack.c.bf16 %v8314_v15, %v8314_v15  ;;  %v9874_v57 = vld [vmem:[#allocation2_spill] sm:$0xff] }
 0x21f   : > { %v4550_v48 = vadd.f32 %v4549_v42, %v4548_v20  ;;  %4151 = vst.msk [vmem:[%s7648_s29 + $0x264] sm:$0xf] %vm3997_vm1, %v6292_v22  ;;  %v4553_v36 = vsel %vm1531_vm0, %v8247_v46, 0.0  ;;  %v6295_v62 = vpack.c.bf16 %v8319_v37, %v8319_v37  ;;  %v4924_v39 = vmul.f32 %v8256_v10, %v8256_v10 }
 0x220   : > { %v5323_v61 = vadd.f32 %v5322_v33, %v5321_v58  ;;  %v5326_v55 = vsel %vm1531_vm0, %v4922_v14, 0.0  ;;  %v4925_v53 = vmul.f32 %v8286_v8, %v8286_v8  ;;  %4156 = vst.msk [vmem:[%s7648_s29 + $0x278] sm:$0xf] %vm3997_vm1, %v6297_v18  ;;  %v6298_v46 = vpack.c.bf16 %v8323_v47, %v8323_v47 }
 0x221   : > { %v4552_v5 = vadd.f32 %v4551_v3, %v4550_v48  ;;  %v8891_v41 = vpop.f32.mrb[68].mxu1  ;;  %4154 = vst.msk [vmem:[%s7648_s29 + $0x270] sm:$0xf] %vm3997_vm1, %v6295_v62  ;;  %v5328_v30 = vsel %vm1531_vm0, %v4923_v0, 0.0  ;;  %v4555_v32 = vsel %vm1531_vm0, %v8256_v10, 0.0  ;;  %v4557_v13 = vsel %vm1531_vm0, %v8286_v8, 0.0 }
 0x222   : > { %v5325_v4 = vadd.f32 %v5324_v12, %v5323_v61  ;;  %v8902_v1 = vpop.f32.mrb[69].mxu1  ;;  %4157 = vst.msk [vmem:[%s7648_s29 + $0x27c] sm:$0xf] %vm3997_vm1, %v6298_v46  ;;  %v6296_v49 = vpack.c.bf16 %v8330_v59, %v8330_v59  ;;  %v6301_v38 = vpack.c.bf16 %v8346_v19, %v8346_v19  ;;  %v5330_v63 = vsel %vm1531_vm0, %v4924_v39, 0.0  ;;  %v9875_v12 = vld [vmem:[#allocation3_spill] sm:$0xff]  ;;  %v9876_v48 = vld [vmem:[#allocation4_spill] sm:$0xff] }
 0x223   : > { %v4554_v45 = vadd.f32 %v4553_v36, %v4552_v5  ;;  %v8906_v7 = vpop.f32.mrb[70].mxu1  ;;  %v5332_v10 = vsel %vm1531_vm0, %v4925_v53, 0.0  ;;  %v4926_v8 = vmul.f32 %v8297_v23, %v8297_v23  ;;  %v6299_v44 = vpack.c.bf16 %v8352_v60, %v8352_v60  ;;  %v9877_v5 = vld [vmem:[#allocation5_spill] sm:$0xff]  ;;  %v9878_v53 = vld [vmem:[#allocation6_spill] sm:$0xff] }
 0x224   : > { %v5327_v51 = vadd.f32 %v5326_v55, %v5325_v4  ;;  %v8917_v25 = vpop.f32.mrb[71].mxu1  ;;  %4155 = vst.msk [vmem:[%s7648_s29 + $0x274] sm:$0xf] %vm3997_vm1, %v6296_v49  ;;  %4160 = vst.msk [vmem:[%s7648_s29 + $0x288] sm:$0xf] %vm3997_vm1, %v6301_v38  ;;  %v4927_v52 = vmul.f32 %v8281_v2, %v8281_v2  ;;  %v4559_v42 = vsel %vm1531_vm0, %v8297_v23, 0.0  ;;  %v6302_v20 = vpack.c.bf16 %v9874_v57, %v9874_v57 }
 0x225   : > { %v4556_v29 = vadd.f32 %v4555_v32, %v4554_v45  ;;  %4158 = vst.msk [vmem:[%s7648_s29 + $0x280] sm:$0xf] %vm3997_vm1, %v6299_v44  ;;  %v4561_v58 = vsel %vm1531_vm0, %v8281_v2, 0.0  ;;  %v6300_v14 = vpack.c.bf16 %v9875_v12, %v9875_v12  ;;  %v4928_v22 = vmul.f32 %v8291_v35, %v8291_v35  ;;  %v9880_v38 = vld [vmem:[#allocation8_spill] sm:$0xff] }
 0x226   : > { %v5329_v6 = vadd.f32 %v5328_v30, %v5327_v51  ;;  %v5334_v61 = vsel %vm1531_vm0, %v4926_v8, 0.0  ;;  %v4929_v23 = vmul.f32 %v8319_v37, %v8319_v37  ;;  %4161 = vst.msk [vmem:[%s7648_s29 + $0x28c] sm:$0xf] %vm3997_vm1, %v6302_v20  ;;  %v6305_v0 = vpack.c.bf16 %v9876_v48, %v9876_v48 }
 0x227   : > { %v4558_v16 = vadd.f32 %v4557_v13, %v4556_v29  ;;  %4159 = vst.msk [vmem:[%s7648_s29 + $0x284] sm:$0xf] %vm3997_vm1, %v6300_v14  ;;  %v5336_v18 = vsel %vm1531_vm0, %v4927_v52, 0.0  ;;  %v4563_v36 = vsel %vm1531_vm0, %v8291_v35, 0.0  ;;  %v4565_v4 = vsel %vm1531_vm0, %v8319_v37, 0.0  ;;  %v9879_v37 = vld [vmem:[#allocation7_spill] sm:$0xff] }
 0x228   : > { %v5331_v17 = vadd.f32 %v5330_v63, %v5329_v6  ;;  %4164 = vst.msk [vmem:[%s7648_s29 + $0x298] sm:$0xf] %vm3997_vm1, %v6305_v0  ;;  %v6303_v62 = vpack.c.bf16 %v9877_v5, %v9877_v5  ;;  %v6306_v46 = vpack.c.bf16 %v9878_v53, %v9878_v53  ;;  %v5338_v45 = vsel %vm1531_vm0, %v4928_v22, 0.0 }
 0x229   : > { %v4560_v33 = vadd.f32 %v4559_v42, %v4558_v16  ;;  %v5340_v51 = vsel %vm1531_vm0, %v4929_v23, 0.0  ;;  %v4930_v35 = vmul.f32 %v8330_v59, %v8330_v59  ;;  %v6304_v30 = vpack.c.bf16 %v9879_v37, %v9879_v37  ;;  %v9881_v16 = vld [vmem:[#allocation9_spill] sm:$0xff] }
 0x22a   : > { %v5333_v31 = vadd.f32 %v5332_v10, %v5331_v17  ;;  %4162 = vst.msk [vmem:[%s7648_s29 + $0x290] sm:$0xf] %vm3997_vm1, %v6303_v62  ;;  %4165 = vst.msk [vmem:[%s7648_s29 + $0x29c] sm:$0xf] %vm3997_vm1, %v6306_v46  ;;  %v4931_v29 = vmul.f32 %v8314_v15, %v8314_v15  ;;  %v4567_v6 = vsel %vm1531_vm0, %v8330_v59, 0.0  ;;  %v6309_v63 = vpack.c.bf16 %v9880_v38, %v9880_v38 }
 0x22b   : > { %v4562_v2 = vadd.f32 %v4561_v58, %v4560_v33  ;;  %4163 = vst.msk [vmem:[%s7648_s29 + $0x294] sm:$0xf] %vm3997_vm1, %v6304_v30  ;;  %v4569_v8 = vsel %vm1531_vm0, %v8314_v15, 0.0  ;;  %v6307_v52 = vpack.c.bf16 %v9881_v16, %v9881_v16  ;;  %v4932_v59 = vmul.f32 %v8323_v47, %v8323_v47 }
 0x22c   : > { %v5335_v3 = vadd.f32 %v5334_v61, %v5333_v31  ;;  %v5342_v20 = vsel %vm1531_vm0, %v4930_v35, 0.0  ;;  %v4933_v58 = vmul.f32 %v8352_v60, %v8352_v60  ;;  %4168 = vst.msk [vmem:[%s7648_s29 + $0x2a8] sm:$0xf] %vm3997_vm1, %v6309_v63  ;;  %v9882_v31 = vld [vmem:[#allocation10_spill] sm:$0xff]  ;;  %v5344_v61 = vsel %vm1531_vm0, %v4931_v29, 0.0 }
 0x22d   : > { %v4564_v39 = vadd.f32 %v4563_v36, %v4562_v2  ;;  %v6310_v15 = vpack.c.bf16 %v9882_v31, %v9882_v31  ;;  %4166 = vst.msk [vmem:[%s7648_s29 + $0x2a0] sm:$0xf] %vm3997_vm1, %v6307_v52  ;;  %v4571_v23 = vsel %vm1531_vm0, %v8323_v47, 0.0  ;;  %v4573_v0 = vsel %vm1531_vm0, %v8352_v60, 0.0  ;;  %v9883_v2 = vld [vmem:[#allocation11_spill] sm:$0xff]  ;;  %v9885_v60 = vld [vmem:[#allocation13_spill] sm:$0xff] }
 0x22e   : > { %v5337_v55 = vadd.f32 %v5336_v18, %v5335_v3  ;;  %v6308_v3 = vpack.c.bf16 %v9883_v2, %v9883_v2  ;;  %v4934_v47 = vmul.f32 %v9875_v12, %v9875_v12  ;;  %v6311_v46 = vpack.c.bf16 %v9885_v60, %v9885_v60 }
 0x22f   : > { %v4566_v13 = vadd.f32 %v4565_v4, %v4564_v39  ;;  %v8975_v49 = vpop.f32.mrb[72].mxu1  ;;  %4169 = vst.msk [vmem:[%s7648_s29 + $0x2ac] sm:$0xf] %vm3997_vm1, %v6310_v15  ;;  %v9884_v4 = vld [vmem:[#allocation12_spill] sm:$0xff]  ;;  %v5346_v39 = vsel %vm1531_vm0, %v4932_v59, 0.0  ;;  %v4935_v35 = vmul.f32 %v8346_v19, %v8346_v19  ;;  %v4575_v30 = vsel %vm1531_vm0, %v9875_v12, 0.0 }
 0x230   : > { %v5339_v32 = vadd.f32 %v5338_v45, %v5337_v55  ;;  %v8985_v10 = vpop.f32.mrb[73].mxu1  ;;  %v6313_v62 = vpack.c.bf16 %v9884_v4, %v9884_v4  ;;  %v5348_v55 = vsel %vm1531_vm0, %v4933_v58, 0.0  ;;  %4167 = vst.msk [vmem:[%s7648_s29 + $0x2a4] sm:$0xf] %vm3997_vm1, %v6308_v3  ;;  %4170 = vst.msk [vmem:[%s7648_s29 + $0x2b0] sm:$0xf] %vm3997_vm1, %v6311_v46  ;;  %v4937_v12 = vmul.f32 %v9877_v5, %v9877_v5 }
 0x231   : > { %v4568_v17 = vadd.f32 %v4567_v6, %v4566_v13  ;;  %v8991_v42 = vpop.f32.mrb[74].mxu1  ;;  %v4577_v29 = vsel %vm1531_vm0, %v8346_v19, 0.0  ;;  %v5350_v52 = vsel %vm1531_vm0, %v4934_v47, 0.0  ;;  %v9888_v59 = vld [vmem:[#allocation16_spill] sm:$0xff]  ;;  %v5352_v15 = vsel %vm1531_vm0, %v4935_v35, 0.0 }
 0x232   : > { %v5341_v44 = vadd.f32 %v5340_v51, %v5339_v32  ;;  %v9002_v33 = vpop.f32.mrb[75].mxu1  ;;  %4172 = vst.msk [vmem:[%s7648_s29 + $0x2b8] sm:$0xf] %vm3997_vm1, %v6313_v62  ;;  %v9886_v32 = vld [vmem:[#allocation14_spill] sm:$0xff] }
 0x233   : > { %v4570_v14 = vadd.f32 %v4569_v8, %v4568_v17  ;;  %v6314_v13 = vpack.c.bf16 %v9886_v32, %v9886_v32  ;;  %v9887_v8 = vld [vmem:[#allocation15_spill] sm:$0xff]  ;;  %v4936_v17 = vmul.f32 %v9874_v57, %v9874_v57 }
 0x234   : > { %v5343_v22 = vadd.f32 %v5342_v20, %v5341_v44  ;;  %v6312_v44 = vpack.c.bf16 %v9887_v8, %v9887_v8  ;;  %v6317_v20 = vpack.c.bf16 %v9888_v59, %v9888_v59 }
 0x235   : > { %v4572_v18 = vadd.f32 %v4571_v23, %v4570_v14  ;;  %4173 = vst.msk [vmem:[%s7648_s29 + $0x2bc] sm:$0xf] %vm3997_vm1, %v6314_v13  ;;  %v4579_v14 = vsel %vm1531_vm0, %v9874_v57, 0.0  ;;  %v5356_v57 = vsel %vm1531_vm0, %v4937_v12, 0.0  ;;  %v4583_v13 = vsel %vm1531_vm0, %v9879_v37, 0.0 }
 0x236   : > { %v5345_v36 = vadd.f32 %v5344_v61, %v5343_v22  ;;  %4171 = vst.msk [vmem:[%s7648_s29 + $0x2b4] sm:$0xf] %vm3997_vm1, %v6312_v44  ;;  %v4581_v22 = vsel %vm1531_vm0, %v9877_v5, 0.0  ;;  %4176 = vst.msk [vmem:[%s7648_s29 + $0x2c8] sm:$0xf] %vm3997_vm1, %v6317_v20  ;;  %v9889_v61 = vld [vmem:[#allocation17_spill] sm:$0xff]  ;;  %v4938_v5 = vmul.f32 %v9879_v37, %v9879_v37  ;;  %v4940_v20 = vmul.f32 %v9878_v53, %v9878_v53 }
 0x237   : > { %v4574_v51 = vadd.f32 %v4573_v0, %v4572_v18  ;;  %v6315_v23 = vpack.c.bf16 %v9889_v61, %v9889_v61  ;;  %v9890_v18 = vld [vmem:[#allocation18_spill] sm:$0xff] }
 0x238   : > { %v5347_v45 = vadd.f32 %v5346_v39, %v5345_v36  ;;  %v6318_v36 = vpack.c.bf16 %v9890_v18, %v9890_v18  ;;  %v5354_v39 = vsel %vm1531_vm0, %v4936_v17, 0.0  ;;  %v5358_v37 = vsel %vm1531_vm0, %v4938_v5, 0.0 }
 0x239   : > { %v4576_v63 = vadd.f32 %v4575_v30, %v4574_v51  ;;  %4174 = vst.msk [vmem:[%s7648_s29 + $0x2c0] sm:$0xf] %vm3997_vm1, %v6315_v23  ;;  %v4939_v30 = vmul.f32 %v9876_v48, %v9876_v48  ;;  %v4587_v23 = vsel %vm1531_vm0, %v9878_v53, 0.0  ;;  %v6325_v5 = vpack.c.bf16 %v8646_v34, %v8646_v34 }
 0x23a   : > { %v5349_v6 = vadd.f32 %v5348_v55, %v5347_v45  ;;  %v9891_v55 = vld [vmem:[#allocation19_spill] sm:$0xff]  ;;  %4177 = vst.msk [vmem:[%s7648_s29 + $0x2cc] sm:$0xf] %vm3997_vm1, %v6318_v36  ;;  %v4942_v53 = vmul.f32 %v9883_v2, %v9883_v2 }
 0x23b   : > { %v4578_v19 = vadd.f32 %v4577_v29, %v4576_v63  ;;  %v9061_v62 = vpop.f32.mrb[76].mxu1  ;;  %v6316_v47 = vpack.c.bf16 %v9891_v55, %v9891_v55  ;;  %v6321_v29 = vpack.c.bf16 %v8573_v24, %v8573_v24  ;;  %v4585_v63 = vsel %vm1531_vm0, %v9876_v48, 0.0  ;;  %4184 = vst.msk [vmem:[%s7648_s29 + $0x2e8] sm:$0xf] %vm3997_vm1, %v6325_v5 }
 0x23c   : > { %v5351_v58 = vadd.f32 %v5350_v52, %v5349_v6  ;;  %v9071_v46 = vpop.f32.mrb[77].mxu1  ;;  %v9892_v52 = vld [vmem:[#allocation20_spill] sm:$0xff] }
 0x23d   : > { %v4580_v0 = vadd.f32 %v4579_v14, %v4578_v19  ;;  %v9075_v35 = vpop.f32.mrb[78].mxu1  ;;  %4175 = vst.msk [vmem:[%s7648_s29 + $0x2c4] sm:$0xf] %vm3997_vm1, %v6316_v47  ;;  %v6319_v12 = vpack.c.bf16 %v9892_v52, %v9892_v52  ;;  %v4941_v19 = vmul.f32 %v9881_v16, %v9881_v16  ;;  %4180 = vst.msk [vmem:[%s7648_s29 + $0x2d8] sm:$0xf] %vm3997_vm1, %v6321_v29  ;;  %v5362_v47 = vsel %vm1531_vm0, %v4940_v20, 0.0 }
 0x23e   : > { %v5353_v3 = vadd.f32 %v5352_v15, %v5351_v58  ;;  %v9085_v6 = vpop.f32.mrb[79].mxu1  ;;  %v9893_v58 = vld [vmem:[#allocation21_spill] sm:$0xff]  ;;  %v4591_v29 = vsel %vm1531_vm0, %v9883_v2, 0.0  ;;  %v6324_v20 = vpack.c.bf16 %v8669_v21, %v8669_v21  ;;  %v4945_v2 = vmul.f32 %v9885_v60, %v9885_v60 }
 0x23f   : > { %v4582_v51 = vadd.f32 %v4581_v22, %v4580_v0  ;;  %v6322_v15 = vpack.c.bf16 %v9893_v58, %v9893_v58  ;;  %4178 = vst.msk [vmem:[%s7648_s29 + $0x2d0] sm:$0xf] %vm3997_vm1, %v6319_v12  ;;  %v5360_v22 = vsel %vm1531_vm0, %v4939_v30, 0.0  ;;  %v4589_v0 = vsel %vm1531_vm0, %v9881_v16, 0.0 }
 0x240   : > { %v5355_v45 = vadd.f32 %v5354_v39, %v5353_v3  ;;  %v9894_v3 = vld [vmem:[#allocation22_spill] sm:$0xff]  ;;  %v6323_v16 = vpack.c.bf16 %v8652_v26, %v8652_v26  ;;  %4183 = vst.msk [vmem:[%s7648_s29 + $0x2e4] sm:$0xf] %vm3997_vm1, %v6324_v20 }
 0x241   : > { %v4584_v17 = vadd.f32 %v4583_v13, %v4582_v51  ;;  %4181 = vst.msk [vmem:[%s7648_s29 + $0x2dc] sm:$0xf] %vm3997_vm1, %v6322_v15  ;;  %v6320_v36 = vpack.c.bf16 %v9894_v3, %v9894_v3  ;;  %v4943_v13 = vmul.f32 %v9880_v38, %v9880_v38  ;;  %v6329_v15 = vpack.c.bf16 %v8735_v11, %v8735_v11 }
 0x242   : > { %v5357_v44 = vadd.f32 %v5356_v57, %v5355_v45  ;;  %v5364_v45 = vsel %vm1531_vm0, %v4941_v19, 0.0  ;;  %4182 = vst.msk [vmem:[%s7648_s29 + $0x2e0] sm:$0xf] %vm3997_vm1, %v6323_v16  ;;  %v5366_v19 = vsel %vm1531_vm0, %v4942_v53, 0.0 }
 0x243   : > { %v4586_v48 = vadd.f32 %v4585_v63, %v4584_v17  ;;  %4179 = vst.msk [vmem:[%s7648_s29 + $0x2d4] sm:$0xf] %vm3997_vm1, %v6320_v36  ;;  %v6326_v63 = vpack.c.bf16 %v8659_v50, %v8659_v50  ;;  %4188 = vst.msk [vmem:[%s7648_s29 + $0x2f8] sm:$0xf] %vm3997_vm1, %v6329_v15  ;;  %v6334_v15 = vpack.c.bf16 %v8829_v54, %v8829_v54 }
 0x244   : > { %v5359_v14 = vadd.f32 %v5358_v37, %v5357_v44  ;;  %v4593_v44 = vsel %vm1531_vm0, %v9880_v38, 0.0  ;;  %v4944_v37 = vmul.f32 %v9882_v31, %v9882_v31 }
 0x245   : > { %v4588_v39 = vadd.f32 %v4587_v23, %v4586_v48  ;;  %4185 = vst.msk [vmem:[%s7648_s29 + $0x2ec] sm:$0xf] %vm3997_vm1, %v6326_v63  ;;  %v4597_v23 = vsel %vm1531_vm0, %v9885_v60, 0.0  ;;  %v4946_v60 = vmul.f32 %v9887_v8, %v9887_v8  ;;  %v6333_v63 = vpack.c.bf16 %v8821_v40, %v8821_v40  ;;  %4193 = vst.msk [vmem:[%s7648_s29 + $0x30c] sm:$0xf] %vm3997_vm1, %v6334_v15 }
 0x246   : > { %v5361_v57 = vadd.f32 %v5360_v22, %v5359_v14  ;;  %v5368_v14 = vsel %vm1531_vm0, %v4943_v13, 0.0  ;;  %v4595_v22 = vsel %vm1531_vm0, %v9882_v31, 0.0  ;;  %v5372_v31 = vsel %vm1531_vm0, %v4945_v2, 0.0 }
 0x247   : > { %v4590_v30 = vadd.f32 %v4589_v0, %v4588_v39  ;;  %v6327_v0 = vpack.c.bf16 %v8745_v56, %v8745_v56  ;;  %v4947_v13 = vmul.f32 %v9884_v4, %v9884_v4  ;;  %v4949_v2 = vmul.f32 %v9889_v61, %v9889_v61  ;;  %4192 = vst.msk [vmem:[%s7648_s29 + $0x308] sm:$0xf] %vm3997_vm1, %v6333_v63 }
 0x248   : > { %v5363_v51 = vadd.f32 %v5362_v47, %v5361_v57  ;;  %v6330_v57 = vpack.c.bf16 %v8751_v9, %v8751_v9  ;;  %v5370_v47 = vsel %vm1531_vm0, %v4944_v37, 0.0  ;;  %v6331_v37 = vpack.c.bf16 %v8827_v43, %v8827_v43 }
 0x249   : > { %v4592_v12 = vadd.f32 %v4591_v29, %v4590_v30  ;;  %4186 = vst.msk [vmem:[%s7648_s29 + $0x2f0] sm:$0xf] %vm3997_vm1, %v6327_v0  ;;  %v4599_v29 = vsel %vm1531_vm0, %v9887_v8, 0.0  ;;  %v5374_v8 = vsel %vm1531_vm0, %v4946_v60, 0.0 }
 0x24a   : > { %v5365_v17 = vadd.f32 %v5364_v45, %v5363_v51  ;;  %v6328_v45 = vpack.c.bf16 %v8758_v27, %v8758_v27  ;;  %4189 = vst.msk [vmem:[%s7648_s29 + $0x2fc] sm:$0xf] %vm3997_vm1, %v6330_v57  ;;  %4190 = vst.msk [vmem:[%s7648_s29 + $0x300] sm:$0xf] %vm3997_vm1, %v6331_v37  ;;  %v4953_v37 = vmul.f32 %v9892_v52, %v9892_v52 }
 0x24b   : > { %v4594_v38 = vadd.f32 %v4593_v44, %v4592_v12  ;;  %v9157_v5 = vpop.f32.mrb[80].mxu1 }
 0x24c   : > { %v5367_v48 = vadd.f32 %v5366_v19, %v5365_v17  ;;  %v9167_v53 = vpop.f32.mrb[81].mxu1  ;;  %4187 = vst.msk [vmem:[%s7648_s29 + $0x2f4] sm:$0xf] %vm3997_vm1, %v6328_v45  ;;  %v4601_v17 = vsel %vm1531_vm0, %v9884_v4, 0.0  ;;  %v4948_v19 = vmul.f32 %v9886_v32, %v9886_v32  ;;  %v4951_v45 = vmul.f32 %v9888_v59, %v9888_v59 }
 0x24d   : > { %v4596_v36 = vadd.f32 %v4595_v22, %v4594_v38  ;;  %v9171_v30 = vpop.f32.mrb[82].mxu1  ;;  %v4605_v22 = vsel %vm1531_vm0, %v9889_v61, 0.0  ;;  %v6335_v61 = vpack.c.bf16 %v8902_v1, %v8902_v1 }
 0x24e   : > { %v5369_v39 = vadd.f32 %v5368_v14, %v5367_v48  ;;  %v9181_v44 = vpop.f32.mrb[83].mxu1  ;;  %v5376_v48 = vsel %vm1531_vm0, %v4947_v13, 0.0  ;;  %v4603_v14 = vsel %vm1531_vm0, %v9886_v32, 0.0  ;;  %v5378_v57 = vsel %vm1531_vm0, %v4948_v19, 0.0 }
 0x24f   : > { %v4598_v51 = vadd.f32 %v4597_v23, %v4596_v36  ;;  %v6332_v23 = vpack.c.bf16 %v8839_v28, %v8839_v28  ;;  %v4950_v32 = vmul.f32 %v9891_v55, %v9891_v55  ;;  %4194 = vst.msk [vmem:[%s7648_s29 + $0x310] sm:$0xf] %vm3997_vm1, %v6335_v61  ;;  %v4609_v13 = vsel %vm1531_vm0, %v9888_v59, 0.0 }
 0x250   : > { %v5371_v16 = vadd.f32 %v5370_v47, %v5369_v39  ;;  %v6337_v39 = vpack.c.bf16 %v8891_v41, %v8891_v41  ;;  %v5380_v47 = vsel %vm1531_vm0, %v4949_v2, 0.0  ;;  %v6341_v59 = vpack.c.bf16 %v8975_v49, %v8975_v49 }
 0x251   : > { %v4600_v20 = vadd.f32 %v4599_v29, %v4598_v51  ;;  %4191 = vst.msk [vmem:[%s7648_s29 + $0x304] sm:$0xf] %vm3997_vm1, %v6332_v23  ;;  %v6338_v51 = vpack.c.bf16 %v8906_v7, %v8906_v7  ;;  %v4955_v61 = vmul.f32 %v8573_v24, %v8573_v24 }
 0x252   : > { %v5373_v12 = vadd.f32 %v5372_v31, %v5371_v16  ;;  %4196 = vst.msk [vmem:[%s7648_s29 + $0x318] sm:$0xf] %vm3997_vm1, %v6337_v39  ;;  %v4607_v16 = vsel %vm1531_vm0, %v9891_v55, 0.0  ;;  %v4952_v55 = vmul.f32 %v9890_v18, %v9890_v18  ;;  %4200 = vst.msk [vmem:[%s7648_s29 + $0x328] sm:$0xf] %vm3997_vm1, %v6341_v59  ;;  %v4621_v59 = vsel %vm1531_vm0, %v8652_v26, 0.0 }
 0x253   : > { %v4602_v4 = vadd.f32 %v4601_v17, %v4600_v20  ;;  %v6336_v17 = vpack.c.bf16 %v8917_v25, %v8917_v25  ;;  %v5382_v20 = vsel %vm1531_vm0, %v4950_v32, 0.0  ;;  %4197 = vst.msk [vmem:[%s7648_s29 + $0x31c] sm:$0xf] %vm3997_vm1, %v6338_v51 }
 0x254   : > { %v5375_v38 = vadd.f32 %v5374_v8, %v5373_v12  ;;  %v5386_v39 = vsel %vm1531_vm0, %v4952_v55, 0.0 }
 0x255   : > { %v4604_v0 = vadd.f32 %v4603_v14, %v4602_v4  ;;  %4195 = vst.msk [vmem:[%s7648_s29 + $0x314] sm:$0xf] %vm3997_vm1, %v6336_v17  ;;  %v5384_v4 = vsel %vm1531_vm0, %v4951_v45, 0.0  ;;  %v6339_v14 = vpack.c.bf16 %v8985_v10, %v8985_v10  ;;  %v4617_v45 = vsel %vm1531_vm0, %v8573_v24, 0.0 }
 0x256   : > { %v5377_v36 = vadd.f32 %v5376_v48, %v5375_v38  ;;  %v4611_v38 = vsel %vm1531_vm0, %v9890_v18, 0.0  ;;  %v4613_v48 = vsel %vm1531_vm0, %v9892_v52, 0.0  ;;  %v5388_v18 = vsel %vm1531_vm0, %v4953_v37, 0.0 }
 0x257   : > { %v4606_v60 = vadd.f32 %v4605_v22, %v4604_v0  ;;  %v4954_v52 = vmul.f32 %v9894_v3, %v9894_v3  ;;  %4198 = vst.msk [vmem:[%s7648_s29 + $0x320] sm:$0xf] %vm3997_vm1, %v6339_v14  ;;  %v6346_v17 = vpack.c.bf16 %v9075_v35, %v9075_v35  ;;  %v4619_v37 = vsel %vm1531_vm0, %v9893_v58, 0.0 }
 0x258   : > { %v5379_v31 = vadd.f32 %v5378_v57, %v5377_v36  ;;  %v6342_v36 = vpack.c.bf16 %v8991_v42, %v8991_v42  ;;  %v6340_v57 = vpack.c.bf16 %v9002_v33, %v9002_v33 }
 0x259   : > { %v4608_v63 = vadd.f32 %v4607_v16, %v4606_v60  ;;  %v9231_v12 = vpop.f32.mrb[84].mxu1  ;;  %v6345_v60 = vpack.c.bf16 %v9061_v62, %v9061_v62  ;;  %4205 = vst.msk [vmem:[%s7648_s29 + $0x33c] sm:$0xf] %vm3997_vm1, %v6346_v17  ;;  %v4629_v17 = vsel %vm1531_vm0, %v8745_v56, 0.0 }
 0x25a   : > { %v5381_v29 = vadd.f32 %v5380_v47, %v5379_v31  ;;  %v9242_v19 = vpop.f32.mrb[85].mxu1  ;;  %4201 = vst.msk [vmem:[%s7648_s29 + $0x32c] sm:$0xf] %vm3997_vm1, %v6342_v36  ;;  %v4615_v31 = vsel %vm1531_vm0, %v9894_v3, 0.0  ;;  %4199 = vst.msk [vmem:[%s7648_s29 + $0x324] sm:$0xf] %vm3997_vm1, %v6340_v57  ;;  %v4957_v3 = vmul.f32 %v8652_v26, %v8652_v26  ;;  %v6347_v26 = vpack.c.bf16 %v9167_v53, %v9167_v53 }
 0x25b   : > { %v4610_v8 = vadd.f32 %v4609_v13, %v4608_v63  ;;  %v9246_v15 = vpop.f32.mrb[86].mxu1  ;;  %v6343_v13 = vpack.c.bf16 %v9071_v46, %v9071_v46  ;;  %v5390_v63 = vsel %vm1531_vm0, %v4954_v52, 0.0  ;;  %4204 = vst.msk [vmem:[%s7648_s29 + $0x338] sm:$0xf] %vm3997_vm1, %v6345_v60  ;;  %v6350_v52 = vpack.c.bf16 %v9171_v30, %v9171_v30 }
 0x25c   : > { %v5383_v2 = vadd.f32 %v5382_v20, %v5381_v29  ;;  %v9257_v22 = vpop.f32.mrb[87].mxu1  ;;  %v4956_v29 = vmul.f32 %v9893_v58, %v9893_v58  ;;  %v5392_v20 = vsel %vm1531_vm0, %v4955_v61, 0.0  ;;  %v5396_v14 = vsel %vm1531_vm0, %v4957_v3, 0.0  ;;  %4206 = vst.msk [vmem:[%s7648_s29 + $0x340] sm:$0xf] %vm3997_vm1, %v6347_v26 }
 0x25d   : > { %v4612_v23 = vadd.f32 %v4611_v38, %v4610_v8  ;;  %4202 = vst.msk [vmem:[%s7648_s29 + $0x330] sm:$0xf] %vm3997_vm1, %v6343_v13  ;;  %v6344_v8 = vpack.c.bf16 %v9085_v6, %v9085_v6  ;;  %v6349_v38 = vpack.c.bf16 %v9157_v5, %v9157_v5  ;;  %v4958_v58 = vmul.f32 %v8669_v21, %v8669_v21 }
 0x25e   : > { %v5385_v0 = vadd.f32 %v5384_v4, %v5383_v2  ;;  %4209 = vst.msk [vmem:[%s7648_s29 + $0x34c] sm:$0xf] %vm3997_vm1, %v6350_v52  ;;  %v4627_v3 = vsel %vm1531_vm0, %v8659_v50, 0.0 }
 0x25f   : > { %v4614_v32 = vadd.f32 %v4613_v48, %v4612_v23  ;;  %v5394_v48 = vsel %vm1531_vm0, %v4956_v29, 0.0  ;;  %4203 = vst.msk [vmem:[%s7648_s29 + $0x334] sm:$0xf] %vm3997_vm1, %v6344_v8  ;;  %4208 = vst.msk [vmem:[%s7648_s29 + $0x348] sm:$0xf] %vm3997_vm1, %v6349_v38  ;;  %v4963_v38 = vmul.f32 %v8735_v11, %v8735_v11 }
 0x260   : > { %v5387_v47 = vadd.f32 %v5386_v39, %v5385_v0  ;;  %v4959_v39 = vmul.f32 %v8646_v34, %v8646_v34 }
 0x261   : > { %v4616_v51 = vadd.f32 %v4615_v31, %v4614_v32  ;;  %v6348_v31 = vpack.c.bf16 %v9181_v44, %v9181_v44 }
 0x262   : > { %v5389_v16 = vadd.f32 %v5388_v18, %v5387_v47  ;;  %v4623_v18 = vsel %vm1531_vm0, %v8669_v21, 0.0  ;;  %v4625_v47 = vsel %vm1531_vm0, %v8646_v34, 0.0  ;;  %v4960_v21 = vmul.f32 %v8659_v50, %v8659_v50 }
 0x263   : > { %v4618_v24 = vadd.f32 %v4617_v45, %v4616_v51  ;;  %v5398_v45 = vsel %vm1531_vm0, %v4958_v58, 0.0  ;;  %v6353_v34 = vpack.c.bf16 %v9231_v12, %v9231_v12  ;;  %4207 = vst.msk [vmem:[%s7648_s29 + $0x344] sm:$0xf] %vm3997_vm1, %v6348_v31  ;;  %v4962_v50 = vmul.f32 %v8758_v27, %v8758_v27 }
 0x264   : > { %v5391_v55 = vadd.f32 %v5390_v63, %v5389_v16  ;;  %v4961_v16 = vmul.f32 %v8745_v56, %v8745_v56  ;;  %v5400_v63 = vsel %vm1531_vm0, %v4959_v39, 0.0  ;;  %v6352_v56 = vpack.c.bf16 %v9257_v22, %v9257_v22 }
 0x265   : > { %v4620_v2 = vadd.f32 %v4619_v37, %v4618_v24  ;;  %4212 = vst.msk [vmem:[%s7648_s29 + $0x358] sm:$0xf] %vm3997_vm1, %v6353_v34  ;;  %v6351_v24 = vpack.c.bf16 %v9242_v19, %v9242_v19  ;;  %v6354_v37 = vpack.c.bf16 %v9246_v15, %v9246_v15  ;;  %v4633_v58 = vsel %vm1531_vm0, %v8735_v11, 0.0 }
 0x266   : > { %v5393_v4 = vadd.f32 %v5392_v20, %v5391_v55  ;;  %v5404_v8 = vsel %vm1531_vm0, %v4961_v16, 0.0  ;;  %4211 = vst.msk [vmem:[%s7648_s29 + $0x354] sm:$0xf] %vm3997_vm1, %v6352_v56  ;;  %v4964_v39 = vmul.f32 %v8751_v9, %v8751_v9  ;;  %v4637_v31 = vsel %vm1531_vm0, %v8827_v43, 0.0 }
 0x267   : > { %v4622_v0 = vadd.f32 %v4621_v59, %v4620_v2  ;;  %v9315_v36 = vpop.f32.mrb[88].mxu1  ;;  %v5402_v59 = vsel %vm1531_vm0, %v4960_v21, 0.0  ;;  %4210 = vst.msk [vmem:[%s7648_s29 + $0x350] sm:$0xf] %vm3997_vm1, %v6351_v24  ;;  %4213 = vst.msk [vmem:[%s7648_s29 + $0x35c] sm:$0xf] %vm3997_vm1, %v6354_v37 }
 0x268   : > { %v5395_v23 = vadd.f32 %v5394_v48, %v5393_v4  ;;  %v9325_v57 = vpop.f32.mrb[89].mxu1  ;;  %v4631_v48 = vsel %vm1531_vm0, %v8758_v27, 0.0  ;;  %v4965_v27 = vmul.f32 %v8827_v43, %v8827_v43  ;;  %v4639_v37 = vsel %vm1531_vm0, %v8839_v28, 0.0 }
 0x269   : > { %v4624_v61 = vadd.f32 %v4623_v18, %v4622_v0  ;;  %v9331_v60 = vpop.f32.mrb[90].mxu1  ;;  %v6355_v0 = vpack.c.bf16 %v9325_v57, %v9325_v57  ;;  %v5406_v18 = vsel %vm1531_vm0, %v4962_v50, 0.0  ;;  %v4641_v50 = vsel %vm1531_vm0, %v8821_v40, 0.0 }
 0x26a   : > { %v5397_v32 = vadd.f32 %v5396_v14, %v5395_v23  ;;  %v9342_v51 = vpop.f32.mrb[91].mxu1  ;;  %v6357_v14 = vpack.c.bf16 %v9315_v36, %v9315_v36  ;;  %v6358_v52 = vpack.c.bf16 %v9331_v60, %v9331_v60 }
 0x26b   : > { %v4626_v13 = vadd.f32 %v4625_v47, %v4624_v61  ;;  %4214 = vst.msk [vmem:[%s7648_s29 + $0x360] sm:$0xf] %vm3997_vm1, %v6355_v0  ;;  %v4635_v61 = vsel %vm1531_vm0, %v8751_v9, 0.0  ;;  %v6356_v21 = vpack.c.bf16 %v9342_v51, %v9342_v51  ;;  %v4966_v9 = vmul.f32 %v8839_v28, %v8839_v28 }
 0x26c   : > { %v5399_v29 = vadd.f32 %v5398_v45, %v5397_v32  ;;  %4216 = vst.msk [vmem:[%s7648_s29 + $0x368] sm:$0xf] %vm3997_vm1, %v6357_v14  ;;  %v5408_v32 = vsel %vm1531_vm0, %v4963_v38, 0.0  ;;  %4217 = vst.msk [vmem:[%s7648_s29 + $0x36c] sm:$0xf] %vm3997_vm1, %v6358_v52  ;;  %v4969_v38 = vmul.f32 %v8902_v1, %v8902_v1  ;;  %v4970_v52 = vmul.f32 %v8917_v25, %v8917_v25 }
 0x26d   : > { %v4628_v55 = vadd.f32 %v4627_v3, %v4626_v13  ;;  %v5410_v13 = vsel %vm1531_vm0, %v4964_v39, 0.0  ;;  %4215 = vst.msk [vmem:[%s7648_s29 + $0x364] sm:$0xf] %vm3997_vm1, %v6356_v21  ;;  %v5414_v28 = vsel %vm1531_vm0, %v4966_v9, 0.0  ;;  %v4972_v21 = vmul.f32 %v8906_v7, %v8906_v7 }
 0x26e   : > { %v5401_v20 = vadd.f32 %v5400_v63, %v5399_v29  ;;  %v5412_v29 = vsel %vm1531_vm0, %v4965_v27, 0.0  ;;  %v5420_v27 = vsel %vm1531_vm0, %v4969_v38, 0.0 }
 0x26f   : > { %v4630_v4 = vadd.f32 %v4629_v17, %v4628_v55 }
 0x270   : > { %v5403_v2 = vadd.f32 %v5402_v59, %v5401_v20  ;;  %v4967_v20 = vmul.f32 %v8821_v40, %v8821_v40 }
 0x271   : > { %v4632_v23 = vadd.f32 %v4631_v48, %v4630_v4  ;;  %v4968_v4 = vmul.f32 %v8829_v54, %v8829_v54 }
 0x272   : > { %v5405_v26 = vadd.f32 %v5404_v8, %v5403_v2  ;;  %v5416_v40 = vsel %vm1531_vm0, %v4967_v20, 0.0 }
 0x273   : > { %v4634_v11 = vadd.f32 %v4633_v58, %v4632_v23  ;;  %v9399_v34 = vpop.f32.mrb[92].mxu1  ;;  %v4645_v23 = vsel %vm1531_vm0, %v8902_v1, 0.0 }
 0x274   : > { %v5407_v47 = vadd.f32 %v5406_v18, %v5405_v26  ;;  %v6361_v43 = vpack.c.bf16 %v9399_v34, %v9399_v34  ;;  %v9409_v63 = vpop.f32.mrb[93].mxu1  ;;  %v4643_v26 = vsel %vm1531_vm0, %v8829_v54, 0.0  ;;  %v5418_v18 = vsel %vm1531_vm0, %v4968_v4, 0.0 }
 0x275   : > { %v4636_v45 = vadd.f32 %v4635_v61, %v4634_v11  ;;  %v6359_v24 = vpack.c.bf16 %v9409_v63, %v9409_v63  ;;  %v9413_v55 = vpop.f32.mrb[94].mxu1  ;;  %v4647_v54 = vsel %vm1531_vm0, %v8917_v25, 0.0  ;;  %v4651_v25 = vsel %vm1531_vm0, %v8906_v7, 0.0 }
 0x276   : > { %v5409_v16 = vadd.f32 %v5408_v32, %v5407_v47  ;;  %4220 = vst.msk [vmem:[%s7648_s29 + $0x378] sm:$0xf] %vm3997_vm1, %v6361_v43  ;;  %v6362_v59 = vpack.c.bf16 %v9413_v55, %v9413_v55  ;;  %v9423_v8 = vpop.f32.mrb[95].mxu1  ;;  %v4971_v32 = vmul.f32 %v8891_v41, %v8891_v41  ;;  %v4653_v43 = vsel %vm1531_vm0, %v8985_v10, 0.0 }
 0x277   : > { %v4638_v17 = vadd.f32 %v4637_v31, %v4636_v45  ;;  %4218 = vst.msk [vmem:[%s7648_s29 + $0x370] sm:$0xf] %vm3997_vm1, %v6359_v24  ;;  %v6360_v48 = vpack.c.bf16 %v9423_v8, %v9423_v8  ;;  %v4649_v31 = vsel %vm1531_vm0, %v8891_v41, 0.0  ;;  %v5422_v45 = vsel %vm1531_vm0, %v4970_v52, 0.0 }
 0x278   : > { %v5411_v3 = vadd.f32 %v5410_v13, %v5409_v16  ;;  %4221 = vst.msk [vmem:[%s7648_s29 + $0x37c] sm:$0xf] %vm3997_vm1, %v6362_v59  ;;  %v4973_v16 = vmul.f32 %v8985_v10, %v8985_v10  ;;  %v5424_v9 = vsel %vm1531_vm0, %v4971_v32, 0.0  ;;  %v5426_v24 = vsel %vm1531_vm0, %v4972_v21, 0.0 }
 0x279   : > { %v4640_v2 = vadd.f32 %v4639_v37, %v4638_v17  ;;  %4219 = vst.msk [vmem:[%s7648_s29 + $0x374] sm:$0xf] %vm3997_vm1, %v6360_v48  ;;  %v4974_v37 = vmul.f32 %v9002_v33, %v9002_v33  ;;  %v4975_v4 = vmul.f32 %v8975_v49, %v8975_v49  ;;  %v4659_v52 = vsel %vm1531_vm0, %v8991_v42, 0.0 }
 0x27a   : > { %v5413_v56 = vadd.f32 %v5412_v29, %v5411_v3  ;;  %v5428_v20 = vsel %vm1531_vm0, %v4973_v16, 0.0  ;;  %v4979_v21 = vmul.f32 %v9061_v62, %v9061_v62 }
 0x27b   : > { %v4642_v14 = vadd.f32 %v4641_v50, %v4640_v2 }
 0x27c   : > { %v5415_v58 = vadd.f32 %v5414_v28, %v5413_v56  ;;  %v4655_v28 = vsel %vm1531_vm0, %v9002_v33, 0.0  ;;  %v4976_v33 = vmul.f32 %v8991_v42, %v8991_v42  ;;  %v4663_v42 = vsel %vm1531_vm0, %v9085_v6, 0.0 }
 0x27d   : > { %v4644_v39 = vadd.f32 %v4643_v26, %v4642_v14  ;;  %v4657_v26 = vsel %vm1531_vm0, %v8975_v49, 0.0  ;;  %v4661_v49 = vsel %vm1531_vm0, %v9071_v46, 0.0 }
 0x27e   : > { %v5417_v0 = vadd.f32 %v5416_v40, %v5415_v58  ;;  %v5434_v32 = vsel %vm1531_vm0, %v4976_v33, 0.0 }
 0x27f   : > { %v4646_v11 = vadd.f32 %v4645_v23, %v4644_v39  ;;  %v5430_v23 = vsel %vm1531_vm0, %v4974_v37, 0.0  ;;  %v4667_v37 = vsel %vm1531_vm0, %v9075_v35, 0.0 }
 0x280   : > { %v5419_v47 = vadd.f32 %v5418_v18, %v5417_v0  ;;  %v4977_v0 = vmul.f32 %v9071_v46, %v9071_v46  ;;  %v4665_v46 = vsel %vm1531_vm0, %v9061_v62, 0.0 }
 0x281   : > { %v4648_v61 = vadd.f32 %v4647_v54, %v4646_v11 }
 0x282   : > { %v5421_v1 = vadd.f32 %v5420_v27, %v5419_v47  ;;  %v5432_v27 = vsel %vm1531_vm0, %v4975_v4, 0.0  ;;  %v5436_v54 = vsel %vm1531_vm0, %v4977_v0, 0.0  ;;  %v4673_v0 = vsel %vm1531_vm0, %v9157_v5, 0.0 }
 0x283   : > { %v4650_v13 = vadd.f32 %v4649_v31, %v4648_v61  ;;  %v9465_v17 = vpop.f32.mrb[96].mxu1 }
 0x284   : > { %v5423_v29 = vadd.f32 %v5422_v45, %v5421_v1  ;;  %v6365_v59 = vpack.c.bf16 %v9465_v17, %v9465_v17  ;;  %v9473_v7 = vpop.f32.mrb[97].mxu1  ;;  %v4978_v1 = vmul.f32 %v9085_v6, %v9085_v6 }
 0x285   : > { %v4652_v3 = vadd.f32 %v4651_v25, %v4650_v13  ;;  %v6363_v10 = vpack.c.bf16 %v9473_v7, %v9473_v7  ;;  %v9477_v2 = vpop.f32.mrb[98].mxu1  ;;  %v4981_v25 = vmul.f32 %v9167_v53, %v9167_v53 }
 0x286   : > { %v5425_v41 = vadd.f32 %v5424_v9, %v5423_v29  ;;  %4224 = vst.msk [vmem:[%s7648_s29 + $0x388] sm:$0xf] %vm3997_vm1, %v6365_v59  ;;  %v6366_v38 = vpack.c.bf16 %v9477_v2, %v9477_v2  ;;  %v9487_v48 = vpop.f32.mrb[99].mxu1  ;;  %v4980_v29 = vmul.f32 %v9075_v35, %v9075_v35  ;;  %v5438_v9 = vsel %vm1531_vm0, %v4978_v1, 0.0 }
 0x287   : > { %v4654_v50 = vadd.f32 %v4653_v43, %v4652_v3  ;;  %4222 = vst.msk [vmem:[%s7648_s29 + $0x380] sm:$0xf] %vm3997_vm1, %v6363_v10  ;;  %v6364_v40 = vpack.c.bf16 %v9487_v48, %v9487_v48  ;;  %v4669_v59 = vsel %vm1531_vm0, %v9167_v53, 0.0  ;;  %v5444_v35 = vsel %vm1531_vm0, %v4981_v25, 0.0 }
 0x288   : > { %v5427_v56 = vadd.f32 %v5426_v24, %v5425_v41  ;;  %4225 = vst.msk [vmem:[%s7648_s29 + $0x38c] sm:$0xf] %vm3997_vm1, %v6366_v38  ;;  %v5442_v38 = vsel %vm1531_vm0, %v4980_v29, 0.0  ;;  %v4982_v53 = vmul.f32 %v9181_v44, %v9181_v44 }
 0x289   : > { %v4656_v58 = vadd.f32 %v4655_v28, %v4654_v50  ;;  %4223 = vst.msk [vmem:[%s7648_s29 + $0x384] sm:$0xf] %vm3997_vm1, %v6364_v40  ;;  %v4983_v40 = vmul.f32 %v9157_v5, %v9157_v5 }
 0x28a   : > { %v5429_v14 = vadd.f32 %v5428_v20, %v5427_v56  ;;  %v5440_v20 = vsel %vm1531_vm0, %v4979_v21, 0.0 }
 0x28b   : > { %v4658_v39 = vadd.f32 %v4657_v26, %v4656_v58  ;;  %v4671_v26 = vsel %vm1531_vm0, %v9181_v44, 0.0  ;;  %v4675_v44 = vsel %vm1531_vm0, %v9171_v30, 0.0 }
 0x28c   : > { %v5431_v18 = vadd.f32 %v5430_v23, %v5429_v14 }
 0x28d   : > { %v4660_v47 = vadd.f32 %v4659_v52, %v4658_v39  ;;  %v4984_v39 = vmul.f32 %v9171_v30, %v9171_v30  ;;  %v4987_v30 = vmul.f32 %v9231_v12, %v9231_v12 }
 0x28e   : > { %v5433_v11 = vadd.f32 %v5432_v27, %v5431_v18  ;;  %v5446_v18 = vsel %vm1531_vm0, %v4982_v53, 0.0  ;;  %v4985_v27 = vmul.f32 %v9242_v19, %v9242_v19 }
 0x28f   : > { %v4662_v61 = vadd.f32 %v4661_v49, %v4660_v47  ;;  %v4677_v47 = vsel %vm1531_vm0, %v9242_v19, 0.0  ;;  %v4679_v19 = vsel %vm1531_vm0, %v9257_v22, 0.0 }
 0x290   : > { %v5435_v31 = vadd.f32 %v5434_v32, %v5433_v11  ;;  %v5448_v11 = vsel %vm1531_vm0, %v4983_v40, 0.0  ;;  %v5452_v1 = vsel %vm1531_vm0, %v4985_v27, 0.0 }
 0x291   : > { %v4664_v16 = vadd.f32 %v4663_v42, %v4662_v61  ;;  %v9519_v13 = vpop.f32.mrb[100].mxu1  ;;  %v4986_v61 = vmul.f32 %v9257_v22, %v9257_v22  ;;  %v4988_v22 = vmul.f32 %v9246_v15, %v9246_v15 }
 0x292   : > { %v5437_v45 = vadd.f32 %v5436_v54, %v5435_v31  ;;  %v6369_v6 = vpack.c.bf16 %v9519_v13, %v9519_v13  ;;  %v9528_v43 = vpop.f32.mrb[101].mxu1  ;;  %v5450_v54 = vsel %vm1531_vm0, %v4984_v39, 0.0 }
 0x293   : > { %v4666_v62 = vadd.f32 %v4665_v46, %v4664_v16  ;;  %v6367_v3 = vpack.c.bf16 %v9528_v43, %v9528_v43  ;;  %v9532_v24 = vpop.f32.mrb[102].mxu1  ;;  %v4681_v16 = vsel %vm1531_vm0, %v9231_v12, 0.0 }
 0x294   : > { %v5439_v41 = vadd.f32 %v5438_v9, %v5437_v45  ;;  %4228 = vst.msk [vmem:[%s7648_s29 + $0x398] sm:$0xf] %vm3997_vm1, %v6369_v6  ;;  %v6370_v50 = vpack.c.bf16 %v9532_v24, %v9532_v24  ;;  %v9543_v56 = vpop.f32.mrb[103].mxu1 }
 0x295   : > { %v4668_v4 = vadd.f32 %v4667_v37, %v4666_v62  ;;  %4226 = vst.msk [vmem:[%s7648_s29 + $0x390] sm:$0xf] %vm3997_vm1, %v6367_v3  ;;  %v6368_v28 = vpack.c.bf16 %v9543_v56, %v9543_v56  ;;  %v5454_v62 = vsel %vm1531_vm0, %v4986_v61, 0.0  ;;  %v4995_v61 = vmul.f32 %v9399_v34, %v9399_v34 }
 0x296   : > { %v5441_v10 = vadd.f32 %v5440_v20, %v5439_v41  ;;  %4229 = vst.msk [vmem:[%s7648_s29 + $0x39c] sm:$0xf] %vm3997_vm1, %v6370_v50  ;;  %v4989_v41 = vmul.f32 %v9325_v57, %v9325_v57  ;;  %v5456_v50 = vsel %vm1531_vm0, %v4987_v30, 0.0  ;;  %v4996_v30 = vmul.f32 %v9413_v55, %v9413_v55 }
 0x297   : > { %v4670_v14 = vadd.f32 %v4669_v59, %v4668_v4  ;;  %4227 = vst.msk [vmem:[%s7648_s29 + $0x394] sm:$0xf] %vm3997_vm1, %v6368_v28  ;;  %v4685_v4 = vsel %vm1531_vm0, %v9325_v57, 0.0  ;;  %v4687_v57 = vsel %vm1531_vm0, %v9342_v51, 0.0 }
 0x298   : > { %v5443_v58 = vadd.f32 %v5442_v38, %v5441_v10  ;;  %v4683_v10 = vsel %vm1531_vm0, %v9246_v15, 0.0  ;;  %v5460_v53 = vsel %vm1531_vm0, %v4989_v41, 0.0  ;;  %v4991_v15 = vmul.f32 %v9315_v36, %v9315_v36 }
 0x299   : > { %v4672_v23 = vadd.f32 %v4671_v26, %v4670_v14  ;;  %v4990_v14 = vmul.f32 %v9342_v51, %v9342_v51  ;;  %v4691_v51 = vsel %vm1531_vm0, %v9331_v60, 0.0 }
 0x29a   : > { %v5445_v33 = vadd.f32 %v5444_v35, %v5443_v58  ;;  %v5458_v35 = vsel %vm1531_vm0, %v4988_v22, 0.0 }
 0x29b   : > { %v4674_v52 = vadd.f32 %v4673_v0, %v4672_v23  ;;  %v4689_v23 = vsel %vm1531_vm0, %v9315_v36, 0.0  ;;  %v4992_v0 = vmul.f32 %v9331_v60, %v9331_v60  ;;  %v5462_v39 = vsel %vm1531_vm0, %v4990_v14, 0.0 }
 0x29c   : > { %v5447_v49 = vadd.f32 %v5446_v18, %v5445_v33  ;;  %v4993_v18 = vmul.f32 %v9409_v63, %v9409_v63  ;;  %v4695_v60 = vsel %vm1531_vm0, %v9423_v8, 0.0 }
 0x29d   : > { %v4676_v5 = vadd.f32 %v4675_v44, %v4674_v52 }
 0x29e   : > { %v5449_v32 = vadd.f32 %v5448_v11, %v5447_v49  ;;  %v9577_v42 = vpop.f32.mrb[104].mxu1  ;;  %v5464_v49 = vsel %vm1531_vm0, %v4991_v15, 0.0  ;;  %v4693_v11 = vsel %vm1531_vm0, %v9409_v63, 0.0  ;;  %v4697_v63 = vsel %vm1531_vm0, %v9399_v34, 0.0 }
 0x29f   : > { %v4678_v31 = vadd.f32 %v4677_v47, %v4676_v5  ;;  %v6373_v46 = vpack.c.bf16 %v9577_v42, %v9577_v42  ;;  %v9585_v45 = vpop.f32.mrb[105].mxu1  ;;  %v5466_v47 = vsel %vm1531_vm0, %v4992_v0, 0.0  ;;  %v4994_v5 = vmul.f32 %v9423_v8, %v9423_v8 }
 0x2a0   : > { %v5451_v21 = vadd.f32 %v5450_v54, %v5449_v32  ;;  %v6371_v25 = vpack.c.bf16 %v9585_v45, %v9585_v45  ;;  %v9591_v6 = vpop.f32.mrb[106].mxu1  ;;  %v5468_v32 = vsel %vm1531_vm0, %v4993_v18, 0.0  ;;  %v4699_v8 = vsel %vm1531_vm0, %v9413_v55, 0.0 }
 0x2a1   : > { %v4680_v9 = vadd.f32 %v4679_v19, %v4678_v31  ;;  %4232 = vst.msk [vmem:[%s7648_s29 + $0x3a8] sm:$0xf] %vm3997_vm1, %v6373_v46  ;;  %v6374_v12 = vpack.c.bf16 %v9591_v6, %v9591_v6  ;;  %v9602_v3 = vpop.f32.mrb[107].mxu1  ;;  %v5470_v19 = vsel %vm1531_vm0, %v4994_v5, 0.0  ;;  %v4997_v46 = vmul.f32 %v9473_v7, %v9473_v7 }
 0x2a2   : > { %v5453_v29 = vadd.f32 %v5452_v1, %v5451_v21  ;;  %4230 = vst.msk [vmem:[%s7648_s29 + $0x3a0] sm:$0xf] %vm3997_vm1, %v6371_v25  ;;  %v6372_v59 = vpack.c.bf16 %v9602_v3, %v9602_v3  ;;  %v4701_v25 = vsel %vm1531_vm0, %v9473_v7, 0.0  ;;  %v4703_v55 = vsel %vm1531_vm0, %v9487_v48, 0.0 }
 0x2a3   : > { %v4682_v20 = vadd.f32 %v4681_v16, %v4680_v9  ;;  %4233 = vst.msk [vmem:[%s7648_s29 + $0x3ac] sm:$0xf] %vm3997_vm1, %v6374_v12  ;;  %v5472_v9 = vsel %vm1531_vm0, %v4995_v61, 0.0  ;;  %v5476_v41 = vsel %vm1531_vm0, %v4997_v46, 0.0  ;;  %v4998_v12 = vmul.f32 %v9487_v48, %v9487_v48 }
 0x2a4   : > { %v5455_v37 = vadd.f32 %v5454_v62, %v5453_v29  ;;  %4231 = vst.msk [vmem:[%s7648_s29 + $0x3a4] sm:$0xf] %vm3997_vm1, %v6372_v59  ;;  %v5474_v62 = vsel %vm1531_vm0, %v4996_v30, 0.0  ;;  %v4999_v59 = vmul.f32 %v9465_v17, %v9465_v17  ;;  %v4705_v7 = vsel %vm1531_vm0, %v9465_v17, 0.0 }
 0x2a5   : > { %v4684_v38 = vadd.f32 %v4683_v10, %v4682_v20  ;;  %v4707_v48 = vsel %vm1531_vm0, %v9477_v2, 0.0 }
 0x2a6   : > { %v5457_v28 = vadd.f32 %v5456_v50, %v5455_v37  ;;  %v5480_v14 = vsel %vm1531_vm0, %v4999_v59, 0.0 }
 0x2a7   : > { %v4686_v58 = vadd.f32 %v4685_v4, %v4684_v38  ;;  %v5000_v4 = vmul.f32 %v9477_v2, %v9477_v2  ;;  %v5001_v38 = vmul.f32 %v9528_v43, %v9528_v43 }
 0x2a8   : > { %v5459_v40 = vadd.f32 %v5458_v35, %v5457_v28  ;;  %v5478_v28 = vsel %vm1531_vm0, %v4998_v12, 0.0 }
 0x2a9   : > { %v4688_v33 = vadd.f32 %v4687_v57, %v4686_v58  ;;  %v4709_v58 = vsel %vm1531_vm0, %v9528_v43, 0.0  ;;  %v5482_v57 = vsel %vm1531_vm0, %v5000_v4, 0.0  ;;  %v5003_v43 = vmul.f32 %v9519_v13, %v9519_v13 }
 0x2aa   : > { %v5461_v26 = vadd.f32 %v5460_v53, %v5459_v40 }
 0x2ab   : > { %v4690_v27 = vadd.f32 %v4689_v23, %v4688_v33  ;;  %v5002_v33 = vmul.f32 %v9543_v56, %v9543_v56  ;;  %v5488_v61 = vsel %vm1531_vm0, %v5003_v43, 0.0 }
 0x2ac   : > { %v5463_v52 = vadd.f32 %v5462_v39, %v5461_v26  ;;  %v5484_v26 = vsel %vm1531_vm0, %v5001_v38, 0.0 }
 0x2ad   : > { %v4692_v36 = vadd.f32 %v4691_v51, %v4690_v27  ;;  %v5486_v5 = vsel %vm1531_vm0, %v5002_v33, 0.0 }
 0x2ae   : > { %v5465_v44 = vadd.f32 %v5464_v49, %v5463_v52  ;;  %v4711_v52 = vsel %vm1531_vm0, %v9543_v56, 0.0  ;;  %v5005_v56 = vmul.f32 %v9585_v45, %v9585_v45 }
 0x2af   : > { %v4694_v54 = vadd.f32 %v4693_v11, %v4692_v36 }
 0x2b0   : > { %v5467_v1 = vadd.f32 %v5466_v47, %v5465_v44  ;;  %v4713_v47 = vsel %vm1531_vm0, %v9519_v13, 0.0  ;;  %v4717_v13 = vsel %vm1531_vm0, %v9585_v45, 0.0  ;;  %v5492_v30 = vsel %vm1531_vm0, %v5005_v56, 0.0 }
 0x2b1   : > { %v4696_v21 = vadd.f32 %v4695_v60, %v4694_v54  ;;  %v4715_v60 = vsel %vm1531_vm0, %v9532_v24, 0.0  ;;  %v4721_v45 = vsel %vm1531_vm0, %v9577_v42, 0.0 }
 0x2b2   : > { %v5469_v31 = vadd.f32 %v5468_v32, %v5467_v1  ;;  %v5004_v32 = vmul.f32 %v9532_v24, %v9532_v24  ;;  %v4719_v24 = vsel %vm1531_vm0, %v9602_v3, 0.0 }
 0x2b3   : > { %v4698_v16 = vadd.f32 %v4697_v63, %v4696_v21 }
 0x2b4   : > { %v5471_v29 = vadd.f32 %v5470_v19, %v5469_v31  ;;  %v5490_v63 = vsel %vm1531_vm0, %v5004_v32, 0.0  ;;  %v5006_v19 = vmul.f32 %v9602_v3, %v9602_v3 }
 0x2b5   : > { %v4700_v34 = vadd.f32 %v4699_v8, %v4698_v16 }
 0x2b6   : > { %v5473_v22 = vadd.f32 %v5472_v9, %v5471_v29  ;;  %v5007_v29 = vmul.f32 %v9577_v42, %v9577_v42 }
 0x2b7   : > { %v4702_v20 = vadd.f32 %v4701_v25, %v4700_v34  ;;  %v5008_v25 = vmul.f32 %v9591_v6, %v9591_v6 }
 0x2b8   : > { %v5475_v37 = vadd.f32 %v5474_v62, %v5473_v22  ;;  %v5494_v22 = vsel %vm1531_vm0, %v5006_v19, 0.0  ;;  %v5496_v12 = vsel %vm1531_vm0, %v5007_v29, 0.0 }
 0x2b9   : > { %v4704_v10 = vadd.f32 %v4703_v55, %v4702_v20  ;;  %v4723_v20 = vsel %vm1531_vm0, %v9591_v6, 0.0  ;;  %v5498_v55 = vsel %vm1531_vm0, %v5008_v25, 0.0 }
 0x2ba   : > { %v5477_v50 = vadd.f32 %v5476_v41, %v5475_v37 }
 0x2bb   : > { %v4706_v35 = vadd.f32 %v4705_v7, %v4704_v10 }
 0x2bc   : > { %v5479_v53 = vadd.f32 %v5478_v28, %v5477_v50  ;;  %v6764_v15 = vpop.f32.mrb[108].mxu1 }
 0x2bd   : > { %v4708_v40 = vadd.f32 %v4707_v48, %v4706_v35  ;;  %v6377_v23 = vpack.c.bf16 %v6764_v15, %v6764_v15  ;;  %v2894_v0 = vpop.f32.mrb[109].mxu1  ;;  %v5011_v28 = vmul.f32 %v6764_v15, %v6764_v15  ;;  %v4729_v6 = vsel %vm1531_vm0, %v6764_v15, 0.0 }
 0x2be   : > { %v5481_v17 = vadd.f32 %v5480_v14, %v5479_v53  ;;  %v6375_v2 = vpack.c.bf16 %v2894_v0, %v2894_v0  ;;  %v9681_v27 = vpop.f32.mrb[110].mxu1  ;;  %v5009_v34 = vmul.f32 %v2894_v0, %v2894_v0  ;;  %v4725_v3 = vsel %vm1531_vm0, %v2894_v0, 0.0 }
 0x2bf   : > { %v4710_v39 = vadd.f32 %v4709_v58, %v4708_v40  ;;  %4236 = vst.msk [vmem:[%s7648_s29 + $0x3b8] sm:$0xf] %vm3997_vm1, %v6377_v23  ;;  %v6378_v49 = vpack.c.bf16 %v9681_v27, %v9681_v27  ;;  %v2897_v51 = vpop.f32.mrb[111].mxu1  ;;  %v5012_v40 = vmul.f32 %v9681_v27, %v9681_v27 }
 0x2c0   : > { %v5483_v18 = vadd.f32 %v5482_v57, %v5481_v17  ;;  %4234 = vst.msk [vmem:[%s7648_s29 + $0x3b0] sm:$0xf] %vm3997_vm1, %v6375_v2  ;;  %v6376_v36 = vpack.c.bf16 %v2897_v51, %v2897_v51  ;;  %v5500_v42 = vsel %vm1531_vm0, %v5009_v34, 0.0  ;;  %v5010_v50 = vmul.f32 %v2897_v51, %v2897_v51 }
 0x2c1   : > { %v4712_v44 = vadd.f32 %v4711_v52, %v4710_v39  ;;  %4237 = vst.msk [vmem:[%s7648_s29 + $0x3bc] sm:$0xf] %vm3997_vm1, %v6378_v49  ;;  %v4727_v38 = vsel %vm1531_vm0, %v2897_v51, 0.0  ;;  %v4731_v2 = vsel %vm1531_vm0, %v9681_v27, 0.0  ;;  %v5506_v51 = vsel %vm1531_vm0, %v5012_v40, 0.0 }
 0x2c2   : > { %v5485_v11 = vadd.f32 %v5484_v26, %v5483_v18  ;;  %4235 = vst.msk [vmem:[%s7648_s29 + $0x3b4] sm:$0xf] %vm3997_vm1, %v6376_v36  ;;  %v5502_v57 = vsel %vm1531_vm0, %v5010_v50, 0.0  ;;  %v5504_v18 = vsel %vm1531_vm0, %v5011_v28, 0.0 }
 0x2c3   : > { %v4714_v54 = vadd.f32 %v4713_v47, %v4712_v44 }
 0x2c4   : > { %v5487_v1 = vadd.f32 %v5486_v5, %v5485_v11 }
 0x2c5   : > { %v4716_v21 = vadd.f32 %v4715_v60, %v4714_v54 }
 0x2c6   : > { %v5489_v31 = vadd.f32 %v5488_v61, %v5487_v1 }
 0x2c7   : > { %v4718_v46 = vadd.f32 %v4717_v13, %v4716_v21 }
 0x2c8   : > { %v5491_v16 = vadd.f32 %v5490_v63, %v5489_v31 }
 0x2c9   : > { %v4720_v8 = vadd.f32 %v4719_v24, %v4718_v46 }
 0x2ca   : > { %v5493_v9 = vadd.f32 %v5492_v30, %v5491_v16 }
 0x2cb   : > { %v4722_v62 = vadd.f32 %v4721_v45, %v4720_v8 }
 0x2cc   : > { %v5495_v41 = vadd.f32 %v5494_v22, %v5493_v9 }
 0x2cd   : > { %v4724_v59 = vadd.f32 %v4723_v20, %v4722_v62 }
 0x2ce   : > { %v5497_v37 = vadd.f32 %v5496_v12, %v5495_v41 }
 0x2cf   : > { %v4726_v10 = vadd.f32 %v4725_v3, %v4724_v59 }
 0x2d0   : > { %v5499_v7 = vadd.f32 %v5498_v55, %v5497_v37  ;;  %v6768_v4 = vpop.f32.mrb[112].mxu1 }
 0x2d1   : > { %v6381_v35 = vpack.c.bf16 %v6768_v4, %v6768_v4  ;;  %v2910_v53 = vpop.f32.mrb[113].mxu1  ;;  %v4728_v48 = vadd.f32 %v4727_v38, %v4726_v10  ;;  %v5015_v36 = vmul.f32 %v6768_v4, %v6768_v4  ;;  %v4737_v1 = vsel %vm1531_vm0, %v6768_v4, 0.0 }
 0x2d2   : > { %v5501_v14 = vadd.f32 %v5500_v42, %v5499_v7  ;;  %v6379_v58 = vpack.c.bf16 %v2910_v53, %v2910_v53  ;;  %v6769_v17 = vpop.f32.mrb[114].mxu1  ;;  %v5013_v26 = vmul.f32 %v2910_v53, %v2910_v53  ;;  %v4733_v43 = vsel %vm1531_vm0, %v2910_v53, 0.0 }
 0x2d3   : > { %4240 = vst.msk [vmem:[%s7648_s29 + $0x3c8] sm:$0xf] %vm3997_vm1, %v6381_v35  ;;  %v6382_v33 = vpack.c.bf16 %v6769_v17, %v6769_v17  ;;  %v2913_v23 = vpop.f32.mrb[115].mxu1  ;;  %v4730_v0 = vadd.f32 %v4729_v6, %v4728_v48  ;;  %v5016_v61 = vmul.f32 %v6769_v17, %v6769_v17  ;;  %v5512_v21 = vsel %vm1531_vm0, %v5015_v36, 0.0 }
 0x2d4   : > { %v5503_v39 = vadd.f32 %v5502_v57, %v5501_v14  ;;  %4238 = vst.msk [vmem:[%s7648_s29 + $0x3c0] sm:$0xf] %vm3997_vm1, %v6379_v58  ;;  %v6380_v15 = vpack.c.bf16 %v2913_v23, %v2913_v23  ;;  %v5508_v11 = vsel %vm1531_vm0, %v5013_v26, 0.0  ;;  %v5014_v44 = vmul.f32 %v2913_v23, %v2913_v23 }
 0x2d5   : > { %4241 = vst.msk [vmem:[%s7648_s29 + $0x3cc] sm:$0xf] %vm3997_vm1, %v6382_v33  ;;  %v4732_v49 = vadd.f32 %v4731_v2, %v4730_v0  ;;  %v4735_v5 = vsel %vm1531_vm0, %v2913_v23, 0.0  ;;  %v4739_v16 = vsel %vm1531_vm0, %v6769_v17, 0.0  ;;  %v5514_v34 = vsel %vm1531_vm0, %v5016_v61, 0.0 }
 0x2d6   : > { %v5505_v52 = vadd.f32 %v5504_v18, %v5503_v39  ;;  %4239 = vst.msk [vmem:[%s7648_s29 + $0x3c4] sm:$0xf] %vm3997_vm1, %v6380_v15  ;;  %v5510_v60 = vsel %vm1531_vm0, %v5014_v44, 0.0 }
 0x2d7   : > { %v4734_v47 = vadd.f32 %v4733_v43, %v4732_v49 }
 0x2d8   : > { %v5507_v32 = vadd.f32 %v5506_v51, %v5505_v52 }
 0x2d9   : > { %v4736_v56 = vadd.f32 %v4735_v5, %v4734_v47  ;;  %v6772_v54 = vpop.f32.mrb[116].mxu1 }
 0x2da   : > { %v5509_v27 = vadd.f32 %v5508_v11, %v5507_v32  ;;  %v6385_v13 = vpack.c.bf16 %v6772_v54, %v6772_v54  ;;  %v2926_v31 = vpop.f32.mrb[117].mxu1  ;;  %v5019_v3 = vmul.f32 %v6772_v54, %v6772_v54  ;;  %v4745_v42 = vsel %vm1531_vm0, %v6772_v54, 0.0 }
 0x2db   : > { %v4738_v63 = vadd.f32 %v4737_v1, %v4736_v56  ;;  %v6383_v19 = vpack.c.bf16 %v2926_v31, %v2926_v31  ;;  %v6773_v46 = vpop.f32.mrb[118].mxu1  ;;  %v4741_v29 = vsel %vm1531_vm0, %v2926_v31, 0.0  ;;  %v5017_v24 = vmul.f32 %v2926_v31, %v2926_v31 }
 0x2dc   : > { %v5511_v30 = vadd.f32 %v5510_v60, %v5509_v27  ;;  %4244 = vst.msk [vmem:[%s7648_s29 + $0x3d8] sm:$0xf] %vm3997_vm1, %v6385_v13  ;;  %v6386_v9 = vpack.c.bf16 %v6773_v46, %v6773_v46  ;;  %v2929_v8 = vpop.f32.mrb[119].mxu1  ;;  %v5020_v50 = vmul.f32 %v6773_v46, %v6773_v46  ;;  %v5520_v38 = vsel %vm1531_vm0, %v5019_v3, 0.0 }
 0x2dd   : > { %4242 = vst.msk [vmem:[%s7648_s29 + $0x3d0] sm:$0xf] %vm3997_vm1, %v6383_v19  ;;  %v4740_v25 = vadd.f32 %v4739_v16, %v4738_v63  ;;  %v6384_v22 = vpack.c.bf16 %v2929_v8, %v2929_v8  ;;  %v5516_v62 = vsel %vm1531_vm0, %v5017_v24, 0.0  ;;  %v5018_v41 = vmul.f32 %v2929_v8, %v2929_v8 }
 0x2de   : > { %v5513_v45 = vadd.f32 %v5512_v21, %v5511_v30  ;;  %4245 = vst.msk [vmem:[%s7648_s29 + $0x3dc] sm:$0xf] %vm3997_vm1, %v6386_v9  ;;  %v4743_v37 = vsel %vm1531_vm0, %v2929_v8, 0.0  ;;  %v4747_v35 = vsel %vm1531_vm0, %v6773_v46, 0.0  ;;  %v5522_v57 = vsel %vm1531_vm0, %v5020_v50, 0.0 }
 0x2df   : > { %v4742_v12 = vadd.f32 %v4741_v29, %v4740_v25  ;;  %4243 = vst.msk [vmem:[%s7648_s29 + $0x3d4] sm:$0xf] %vm3997_vm1, %v6384_v22  ;;  %v5518_v10 = vsel %vm1531_vm0, %v5018_v41, 0.0 }
 0x2e0   : > { %v5515_v20 = vadd.f32 %v5514_v34, %v5513_v45 }
 0x2e1   : > { %v4744_v55 = vadd.f32 %v4743_v37, %v4742_v12 }
 0x2e2   : > { %v5517_v59 = vadd.f32 %v5516_v62, %v5515_v20 }
 0x2e3   : > { %v4746_v7 = vadd.f32 %v4745_v42, %v4744_v55  ;;  %v6776_v28 = vpop.f32.mrb[120].mxu1 }
 0x2e4   : > { %v5519_v4 = vadd.f32 %v5518_v10, %v5517_v59  ;;  %v6389_v53 = vpack.c.bf16 %v6776_v28, %v6776_v28  ;;  %v2942_v6 = vpop.f32.mrb[121].mxu1  ;;  %v5023_v18 = vmul.f32 %v6776_v28, %v6776_v28  ;;  %v4753_v11 = vsel %vm1531_vm0, %v6776_v28, 0.0 }
 0x2e5   : > { %v6387_v48 = vpack.c.bf16 %v2942_v6, %v2942_v6  ;;  %v4748_v58 = vadd.f32 %v4747_v35, %v4746_v7  ;;  %v4749_v17 = vsel %vm1531_vm0, %v2942_v6, 0.0  ;;  %v6777_v40 = vpop.f32.mrb[122].mxu1  ;;  %v5021_v26 = vmul.f32 %v2942_v6, %v2942_v6 }
 0x2e6   : > { %v5521_v14 = vadd.f32 %v5520_v38, %v5519_v4  ;;  %4248 = vst.msk [vmem:[%s7648_s29 + $0x3e8] sm:$0xf] %vm3997_vm1, %v6389_v53  ;;  %v6390_v33 = vpack.c.bf16 %v6777_v40, %v6777_v40  ;;  %v2945_v23 = vpop.f32.mrb[123].mxu1  ;;  %v5024_v44 = vmul.f32 %v6777_v40, %v6777_v40  ;;  %v5528_v5 = vsel %vm1531_vm0, %v5023_v18, 0.0 }
 0x2e7   : > { %4246 = vst.msk [vmem:[%s7648_s29 + $0x3e0] sm:$0xf] %vm3997_vm1, %v6387_v48  ;;  %v4750_v0 = vadd.f32 %v4749_v17, %v4748_v58  ;;  %v6388_v15 = vpack.c.bf16 %v2945_v23, %v2945_v23  ;;  %v5524_v2 = vsel %vm1531_vm0, %v5021_v26, 0.0  ;;  %v4751_v43 = vsel %vm1531_vm0, %v2945_v23, 0.0 }
 0x2e8   : > { %v5523_v39 = vadd.f32 %v5522_v57, %v5521_v14  ;;  %4249 = vst.msk [vmem:[%s7648_s29 + $0x3ec] sm:$0xf] %vm3997_vm1, %v6390_v33  ;;  %v5022_v52 = vmul.f32 %v2945_v23, %v2945_v23  ;;  %v4755_v27 = vsel %vm1531_vm0, %v6777_v40, 0.0  ;;  %v5530_v61 = vsel %vm1531_vm0, %v5024_v44, 0.0 }
 0x2e9   : > { %4247 = vst.msk [vmem:[%s7648_s29 + $0x3e4] sm:$0xf] %vm3997_vm1, %v6388_v15  ;;  %v4752_v51 = vadd.f32 %v4751_v43, %v4750_v0 }
 0x2ea   : > { %v5525_v49 = vadd.f32 %v5524_v2, %v5523_v39  ;;  %v5526_v36 = vsel %vm1531_vm0, %v5022_v52, 0.0 }
 0x2eb   : > { %v4754_v47 = vadd.f32 %v4753_v11, %v4752_v51 }
 0x2ec   : > { %v5527_v32 = vadd.f32 %v5526_v36, %v5525_v49 }
 0x2ed   : > { %v4756_v1 = vadd.f32 %v4755_v27, %v4754_v47 }
 0x2ee   : > { %v5529_v56 = vadd.f32 %v5528_v5, %v5527_v32  ;;  %v6780_v54 = vpop.f32.mrb[124].mxu1 }
 0x2ef   : > { %v6393_v60 = vpack.c.bf16 %v6780_v54, %v6780_v54  ;;  %v2958_v13 = vpop.f32.mrb[125].mxu1  ;;  %v5027_v45 = vmul.f32 %v6780_v54, %v6780_v54  ;;  %v4761_v62 = vsel %vm1531_vm0, %v6780_v54, 0.0 }
 0x2f0   : > { %v6391_v31 = vpack.c.bf16 %v2958_v13, %v2958_v13  ;;  %v4757_v21 = vsel %vm1531_vm0, %v2958_v13, 0.0  ;;  %v5025_v63 = vmul.f32 %v2958_v13, %v2958_v13  ;;  %v5531_v30 = vadd.f32 %v5530_v61, %v5529_v56  ;;  %v6781_v19 = vpop.f32.mrb[126].mxu1 }
 0x2f1   : > { %4252 = vst.msk [vmem:[%s7648_s29 + $0x3f8] sm:$0xf] %vm3997_vm1, %v6393_v60  ;;  %v4758_v46 = vadd.f32 %v4757_v21, %v4756_v1  ;;  %v6394_v16 = vpack.c.bf16 %v6781_v19, %v6781_v19  ;;  %v2961_v29 = vpop.f32.mrb[127].mxu1  ;;  %v5028_v41 = vmul.f32 %v6781_v19, %v6781_v19  ;;  %v4763_v3 = vsel %vm1531_vm0, %v6781_v19, 0.0 }
 0x2f2   : > { %4250 = vst.msk [vmem:[%s7648_s29 + $0x3f0] sm:$0xf] %vm3997_vm1, %v6391_v31  ;;  %v5532_v24 = vsel %vm1531_vm0, %v5025_v63, 0.0  ;;  %v6392_v9 = vpack.c.bf16 %v2961_v29, %v2961_v29  ;;  %v4759_v8 = vsel %vm1531_vm0, %v2961_v29, 0.0  ;;  %v5026_v34 = vmul.f32 %v2961_v29, %v2961_v29 }
 0x2f3   : > { %v5533_v25 = vadd.f32 %v5532_v24, %v5531_v30  ;;  %4253 = vst.msk [vmem:[%s7648_s29 + $0x3fc] sm:$0xf] %vm3997_vm1, %v6394_v16  ;;  %v4760_v22 = vadd.f32 %v4759_v8, %v4758_v46  ;;  %v5536_v59 = vsel %vm1531_vm0, %v5027_v45, 0.0  ;;  %v5538_v50 = vsel %vm1531_vm0, %v5028_v41, 0.0 }
 0x2f4   : > { %4251 = vst.msk [vmem:[%s7648_s29 + $0x3f4] sm:$0xf] %vm3997_vm1, %v6392_v9  ;;  %v5534_v20 = vsel %vm1531_vm0, %v5026_v34, 0.0 }
 0x2f5   : > { %v4762_v12 = vadd.f32 %v4761_v62, %v4760_v22  ;;  %v5535_v37 = vadd.f32 %v5534_v20, %v5533_v25 }
 0x2f7   : > { %v4764_v55 = vadd.f32 %v4763_v3, %v4762_v12  ;;  %v5537_v42 = vadd.f32 %v5536_v59, %v5535_v37 }
 0x2f9   : > { %v4765_v10 = vrot.slane %v4764_v55, 4  ;;  %v5539_v7 = vadd.f32 %v5538_v50, %v5537_v42 }
 0x2fb   : > { %v4766_v4 = vadd.f32 %v4765_v10, %v4764_v55  ;;  %v5540_v28 = vrot.slane %v5539_v7, 4 }
 0x2fd   : > { %v4767_v38 = vrot.slane %v4766_v4, 2  ;;  %v5541_v35 = vadd.f32 %v5540_v28, %v5539_v7 }
 0x2ff   : > { %v4768_v53 = vadd.f32 %v4767_v38, %v4766_v4  ;;  %v5542_v6 = vrot.slane %v5541_v35, 2 }
 0x301   : > { %v4769_v14 = vrot.slane %v4768_v53, 1  ;;  %v5543_v48 = vadd.f32 %v5542_v6, %v5541_v35 }
 0x303   : > { %v4770_v58 = vadd.f32 %v4769_v14, %v4768_v53  ;;  %v5544_v17 = vrot.slane %v5543_v48, 1 }
 0x305   : > { %4772 = vst.msk [vmem:[%s348_s10] sm:$0x1] %vm4771_vm2, %v4770_v58  ;;  %v5545_v40 = vadd.f32 %v5544_v17, %v5543_v48 }
 0x307   : > { %5546 = vst.msk [vmem:[%s355_s13] sm:$0x1] %vm4771_vm2, %v5545_v40 }
 0x308 PF: > { %s17_s25 = sadd.s32 1, %s6871_s25   ;;  %s9895_s21 = smov %s6863_s23 }
 0x309   : > { %p14_p8 = scmp.ge.s32.totalorder %s17_s25, 6   ;;  %s9896_s22 = smov %s6867_s24 }
 0x30a   : > { %s9897_s23 = smov %s9900_s26  ;;  %s9898_s24 = smov %s9904_s27 }
 0x30b   :  { %16 = sbr.rel (!%p14_p8) target bundleno = 3 (0x3), region = 96 }

// kernel: transition_bnin_forward.5
= control target key start
LH: loop header
LB: loop body
LE: loop exit
PB: predicated region body
PF: predicated region fallthrough
CT: control target
= control target key end

     0   :  { %s2092_s0 = inlined_call_operand.vmem [shape: bf16[2,8,2,8,2,8,32], index: 0, kind: input, shape index: {}]   ;;  %s2093_s1 = inlined_call_operand.vmem [shape: f32[1,32], index: 1, kind: input, shape index: {}]   ;;  %s2094_s2 = inlined_call_operand.vmem [shape: f32[1,32], index: 2, kind: input, shape index: {}]   ;;  %s2095_s3 = inlined_call_operand.vmem [shape: bf16[4,32,16], index: 3, kind: input, shape index: {}]   ;;  %s2096_s4 = inlined_call_operand.vmem [shape: f32[2,512,16], index: 4, kind: output, shape index: {}]  }
   0x1   :  { %2100 = sst [smem:[#allocation6_spill]] %s2092_s0 }
   0x2   :  { %s1469_s15 = smov 0   ;;  %s1471_s16 = smov 0  }
   0x3   :  { %s1473_s17 = smov 0   ;;  %s1475_s18 = smov 0  }
   0x4   :  { %s1477_s19 = smov 0   ;;  %s1479_s20 = smov 0  }
   0x5   :  { %s1481_s21 = smov 0   ;;  %s1483_s22 = smov 0  }
   0x6   :  { %s1485_s23 = smov 0   ;;  %s1487_s24 = smov 0  }
   0x7   :  { %s1489_s25 = smov 0  }
   0x8 LB: > { %s29_s26 = sadd.s32 1, %s1426_s21  ;;  %s32_s27 = sadd.s32 1, %s1430_s22  ;;  %s1442_s25 = sphi %s1489_s25, %s14_s25   ;;  %s1438_s24 = sphi %s1487_s24, %s2119_s24   ;;  %s1434_s23 = sphi %s1485_s23, %s2118_s23   ;;  %s1430_s22 = sphi %s1483_s22, %s2117_s22   ;;  %s1426_s21 = sphi %s1481_s21, %s2116_s21   ;;  %s1422_s20 = sphi %s1479_s20, %s2115_s20   ;;  %s1418_s19 = sphi %s1477_s19, %s2114_s19   ;;  %s1414_s18 = sphi %s1475_s18, %s2113_s18   ;;  %s1410_s17 = sphi %s1473_s17, %s2112_s17   ;;  %s1406_s16 = sphi %s1471_s16, %s2111_s16   ;;  %s1402_s15 = sphi %s1469_s15, %s2110_s15  }
   0x9   : > { %p30_p0 = scmp.ge.s32.totalorder %s29_s26, 2  ;;  %s36_s28 = sadd.s32 1, %s1434_s23 }
   0xa   : > { %p60_p1 = scmp.ne.s32.totalorder %s1406_s16, %s1402_s15  ;;  %p61_p3 = scmp.eq.s32.totalorder %s1442_s25, 0 }
   0xb   : > { %s2121_s27 = smov (!%p30_p0, %s32_s27), %s1430_s22  ;;  %s40_s30 = sadd.s32 1, %s1438_s24 }
   0xc   : > { %p34_p2 = scmp.ge.s32.totalorder %s2121_s27, 2  ;;  %p1532_p4 = por %p61_p3, %p60_p1 }
   0xd   : > { %s2125_s26 = smov (%p30_p0, %s29_s26), 0  ;;  %s53_s12 = sadd.s32 1, %s1406_s16 }
   0xe   : > { %s2123_s28 = smov (!%p34_p2, %s36_s28), %s1434_s23  ;;  %s2131_s27 = smov (%p34_p2, %s2121_s27), 0 }
   0xf   : > { %p38_p5 = scmp.ge.s32.totalorder %s2123_s28, 2  ;;  %2103 = sst [smem:[#allocation4_spill]] %s2131_s27 }
  0x10   : > { %s47_s6 = ssub.s32 %s1430_s22, %s2131_s27  ;;  %s49_s8 = ssub.s32 %s1426_s21, %s2125_s26 }
  0x11   : > { %s2127_s28 = smov (%p38_p5, %s2123_s28), 0  ;;  %s2129_s30 = smov (!%p38_p5, %s40_s30), %s1438_s24 }
  0x12   : > { %2102 = sst [smem:[#allocation3_spill]] %s2127_s28  ;;  %p42_p6 = scmp.ge.s32.totalorder %s2129_s30, 2 }
  0x13   : > { %s45_s5 = ssub.s32 %s1434_s23, %s2127_s28  ;;  %p1090_p8 = scmp.ge.s32.totalorder %s1442_s25, 16 }
  0x14   : > { %s2133_s30 = smov (%p42_p6, %s2129_s30), 0 }
  0x15   : > { %2104 = sst [smem:[#allocation5_spill]] %s2133_s30  ;;  %s44_s7 = ssub.s32 %s1438_s24, %s2133_s30 }
  0x16   : > { %s46_s9 = sor.u32 %s45_s5, %s44_s7  ;;  %186 = sbr.rel (%p1090_p8) target bundleno = 62 (0x3e), region = 28 }
  0x17   : > { %s48_s10 = sor.u32 %s47_s6, %s46_s9 }
  0x18   : > { %s50_s11 = sor.u32 %s49_s8, %s48_s10 }
  0x19   : > { %p51_p7 = scmp.eq.s32.totalorder %s50_s11, 0 }
  0x1b   : > { %s1556_s13 = scalar_select %p51_p7, %s1406_s16, %s53_s12  }
  0x1d   : > { %189 = sbr.rel (!%p1532_p4) target bundleno = 62 (0x3e), region = 32  ;;  %s191_s14 = sand.u32 (%p1532_p4), 1, %s1406_s16  }
  0x1e   : > { %s1093_s30 = sshll.u32 (%p1532_p4), %s1430_s22, 4  ;;  %s1091_s6 = sshll.u32 (%p1532_p4), %s191_s14, 7 }
  0x1f   : > { %s196_s5 = sadd.s32 (%p1532_p4), %s1426_s21, %s1093_s30  ;;  %s1127_s7 = sshll.u32 (%p1532_p4), %s1434_s23, 7 }
  0x20   : > { %s198_s8 = sadd.s32 (%p1532_p4), %s1127_s7, %s196_s5  ;;  %s1095_s9 = sshll.u32 (%p1532_p4), %s1438_s24, 8 }
  0x21   : > { %s200_s10 = sadd.s32 (%p1532_p4), %s1095_s9, %s198_s8  ;;  %s2105_s0 = sld [smem:[#allocation6_spill]] (%p1532_p4) }
  0x22   : > { %s1096_s11 = sshll.u32 (%p1532_p4), %s200_s10, 2  ;;  %s1574_s29 = scalar_lea.vmem (%p1532_p4), [#allocation2], %s1091_s6 }
  0x27   : > { %s1569_s27 = scalar_lea.vmem %s2105_s0, %s1096_s11 }
  0x28   : > { %v218_v0 = vld [vmem:[%s1569_s27] sm:$0xf]  ;;  %v220_v1 = vld [vmem:[%s1569_s27 + $0x8] sm:$0xf]  ;;  %v222_v2 = vld [vmem:[%s1569_s27 + $0x10] sm:$0xf] }
  0x29   : > { %219 = vst [vmem:[%s1574_s29] sm:$0xf] %v218_v0  ;;  %221 = vst [vmem:[%s1574_s29 + $0x4] sm:$0xf] %v220_v1  ;;  %v224_v3 = vld [vmem:[%s1569_s27 + $0x18] sm:$0xf] }
  0x2a   : > { %223 = vst [vmem:[%s1574_s29 + $0x8] sm:$0xf] %v222_v2  ;;  %v226_v4 = vld [vmem:[%s1569_s27 + $0x20] sm:$0xf]  ;;  %v228_v5 = vld [vmem:[%s1569_s27 + $0x28] sm:$0xf] }
  0x2b   : > { %225 = vst [vmem:[%s1574_s29 + $0xc] sm:$0xf] %v224_v3  ;;  %227 = vst [vmem:[%s1574_s29 + $0x10] sm:$0xf] %v226_v4  ;;  %v230_v6 = vld [vmem:[%s1569_s27 + $0x30] sm:$0xf] }
  0x2c   : > { %229 = vst [vmem:[%s1574_s29 + $0x14] sm:$0xf] %v228_v5  ;;  %v232_v7 = vld [vmem:[%s1569_s27 + $0x38] sm:$0xf]  ;;  %v234_v8 = vld [vmem:[%s1569_s27 + $0x80] sm:$0xf] }
  0x2d   : > { %231 = vst [vmem:[%s1574_s29 + $0x18] sm:$0xf] %v230_v6  ;;  %233 = vst [vmem:[%s1574_s29 + $0x1c] sm:$0xf] %v232_v7  ;;  %v236_v9 = vld [vmem:[%s1569_s27 + $0x88] sm:$0xf] }
  0x2e   : > { %235 = vst [vmem:[%s1574_s29 + $0x20] sm:$0xf] %v234_v8  ;;  %v238_v10 = vld [vmem:[%s1569_s27 + $0x90] sm:$0xf]  ;;  %v240_v11 = vld [vmem:[%s1569_s27 + $0x98] sm:$0xf] }
  0x2f   : > { %237 = vst [vmem:[%s1574_s29 + $0x24] sm:$0xf] %v236_v9  ;;  %239 = vst [vmem:[%s1574_s29 + $0x28] sm:$0xf] %v238_v10  ;;  %v242_v12 = vld [vmem:[%s1569_s27 + $0xa0] sm:$0xf] }
  0x30   : > { %241 = vst [vmem:[%s1574_s29 + $0x2c] sm:$0xf] %v240_v11  ;;  %v244_v13 = vld [vmem:[%s1569_s27 + $0xa8] sm:$0xf]  ;;  %v246_v14 = vld [vmem:[%s1569_s27 + $0xb0] sm:$0xf] }
  0x31   : > { %243 = vst [vmem:[%s1574_s29 + $0x30] sm:$0xf] %v242_v12  ;;  %245 = vst [vmem:[%s1574_s29 + $0x34] sm:$0xf] %v244_v13  ;;  %v248_v15 = vld [vmem:[%s1569_s27 + $0xb8] sm:$0xf] }
  0x32   : > { %247 = vst [vmem:[%s1574_s29 + $0x38] sm:$0xf] %v246_v14  ;;  %v250_v16 = vld [vmem:[%s1569_s27 + $0x100] sm:$0xf]  ;;  %v252_v17 = vld [vmem:[%s1569_s27 + $0x108] sm:$0xf] }
  0x33   : > { %249 = vst [vmem:[%s1574_s29 + $0x3c] sm:$0xf] %v248_v15  ;;  %251 = vst [vmem:[%s1574_s29 + $0x40] sm:$0xf] %v250_v16  ;;  %v254_v18 = vld [vmem:[%s1569_s27 + $0x110] sm:$0xf] }
  0x34   : > { %253 = vst [vmem:[%s1574_s29 + $0x44] sm:$0xf] %v252_v17  ;;  %v256_v19 = vld [vmem:[%s1569_s27 + $0x118] sm:$0xf]  ;;  %v258_v20 = vld [vmem:[%s1569_s27 + $0x120] sm:$0xf] }
  0x35   : > { %255 = vst [vmem:[%s1574_s29 + $0x48] sm:$0xf] %v254_v18  ;;  %257 = vst [vmem:[%s1574_s29 + $0x4c] sm:$0xf] %v256_v19  ;;  %v260_v21 = vld [vmem:[%s1569_s27 + $0x128] sm:$0xf] }
  0x36   : > { %259 = vst [vmem:[%s1574_s29 + $0x50] sm:$0xf] %v258_v20  ;;  %v262_v22 = vld [vmem:[%s1569_s27 + $0x130] sm:$0xf]  ;;  %v264_v23 = vld [vmem:[%s1569_s27 + $0x138] sm:$0xf] }
  0x37   : > { %261 = vst [vmem:[%s1574_s29 + $0x54] sm:$0xf] %v260_v21  ;;  %263 = vst [vmem:[%s1574_s29 + $0x58] sm:$0xf] %v262_v22  ;;  %v266_v24 = vld [vmem:[%s1569_s27 + $0x180] sm:$0xf] }
  0x38   : > { %265 = vst [vmem:[%s1574_s29 + $0x5c] sm:$0xf] %v264_v23  ;;  %v268_v25 = vld [vmem:[%s1569_s27 + $0x188] sm:$0xf]  ;;  %v270_v26 = vld [vmem:[%s1569_s27 + $0x190] sm:$0xf] }
  0x39   : > { %267 = vst [vmem:[%s1574_s29 + $0x60] sm:$0xf] %v266_v24  ;;  %269 = vst [vmem:[%s1574_s29 + $0x64] sm:$0xf] %v268_v25  ;;  %v272_v27 = vld [vmem:[%s1569_s27 + $0x198] sm:$0xf] }
  0x3a   : > { %271 = vst [vmem:[%s1574_s29 + $0x68] sm:$0xf] %v270_v26  ;;  %v274_v28 = vld [vmem:[%s1569_s27 + $0x1a0] sm:$0xf]  ;;  %v276_v29 = vld [vmem:[%s1569_s27 + $0x1a8] sm:$0xf] }
  0x3b   : > { %273 = vst [vmem:[%s1574_s29 + $0x6c] sm:$0xf] %v272_v27  ;;  %275 = vst [vmem:[%s1574_s29 + $0x70] sm:$0xf] %v274_v28  ;;  %v278_v30 = vld [vmem:[%s1569_s27 + $0x1b0] sm:$0xf] }
  0x3c   : > { %277 = vst [vmem:[%s1574_s29 + $0x74] sm:$0xf] %v276_v29  ;;  %v280_v31 = vld [vmem:[%s1569_s27 + $0x1b8] sm:$0xf]  ;;  %279 = vst [vmem:[%s1574_s29 + $0x78] sm:$0xf] %v278_v30 }
  0x3d   : > { %281 = vst [vmem:[%s1574_s29 + $0x7c] sm:$0xf] %v280_v31 }
  0x3e PF: > { %p1097_p9 = scmp.ge.s32.totalorder %s1442_s25, 1  ;;  %p367_p10 = scmp.lt.s32.totalorder %s1442_s25, 17 }
  0x40   : > { %p368_p11 = pnand %p1097_p9, %p367_p10 }
  0x41   : > { %s1099_s28 = sshll.u32 (!%p368_p11), %s1418_s19, 5  ;;  %p405_p12 = scmp.lt.s32.totalorder (!%p368_p11), %s1422_s20, 1  ;;  %v1662_v33 = vld [vmem:[%s2093_s1] ss:$0 sm:$0xff] (!%p368_p11)  ;;  %vm630_vm0 = vcmask (!%p368_p11), 261120  }
  0x42   : > { %371 = sbr.rel (%p368_p11) target bundleno = 353 (0x161), region = 73  ;;  %p407_p13 = scmp.lt.s32.totalorder (!%p368_p11), %s1099_s28, 63  ;;  %v1673_v43 = vld [vmem:[%s2094_s2] ss:$0 sm:$0xff] (!%p368_p11) }
  0x43   : > { %p415_p0 = scmp.eq.s32.totalorder (!%p368_p11), %s1414_s18, 0  ;;  %p416_p1 = scmp.eq.s32.totalorder (!%p368_p11), %s1410_s17, 0 }
  0x44   : > { %s1104_s14 = sshll.u32 (!%p368_p11), %s1414_s18, 1  ;;  %s374_s11 = sand.u32 (!%p368_p11), 1, %s1402_s15  }
  0x45   : > { %p1645_p2 = pnand (!%p368_p11), %p416_p1, %p415_p0  ;;  %s610_s19 = sadd.s32 (!%p368_p11), %s1410_s17, %s1104_s14 }
  0x46   : > { %s1128_s10 = sshll.u32 (!%p368_p11), %s610_s19, 4  ;;  %s1098_s0 = sshll.u32 (!%p368_p11), %s374_s11, 7 }
  0x49   : > { %s2135_s20 = smov (!%p405_p12, %s1422_s20), 1  ;;  %s2137_s28 = smov (!%p407_p13, %s1099_s28), 63 }
  0x4a   : > { %s1100_s27 = sshll.u32 %s2135_s20, 6  ;;  %s613_s20 = scalar_lea.vmem %s2095_s3, %s1128_s10  ;;  %vm842_vm1 = vcmask (!%p1645_p2), 130048  }
  0x4b   : > { %s410_s30 = sadd.s32 %s1100_s27, %s2137_s28  ;;  %v1354_v32 = vld [vmem:[%s613_s20] sm:$0xff]   ;;  %v1355_v34 = vld [vmem:[%s613_s20 + $0x8] sm:$0xff]   ;;  %s1664_s27 = scalar_lea.vmem [#allocation2], %s1098_s0 }
  0x4c   : > { %s1101_s5 = sshll.u32 %s410_s30, 3  ;;  %1226 = vmatprep.subr.bf16.mxu0 %v1354_v32  ;;  %1262 = vmatprep.subr.bf16.mxu1 %v1354_v32  ;;  %v1130_v35 = vld [vmem:[%s1664_s27] sm:$0xff]   ;;  %v1193_v37 = vld [vmem:[%s1664_s27 + $0x8] sm:$0xff]   ;;  %v1194_v48 = vld [vmem:[%s1664_s27 + $0x10] sm:$0xff]  }
  0x4d   : > { %s1652_s9 = scalar_lea.vmem %s2096_s4, %s1101_s5  ;;  %v1200_v36 = vld [vmem:[%s1664_s27 + $0x40] sm:$0xff]   ;;  %1227 = vmatpush3.bf16.msra.mxu0 %v1354_v32  ;;  %1264 = vmatpush3.bf16.msra.mxu1 %v1354_v32  ;;  %v1131_v38 = vunpack.c.l.bf16 %v1130_v35  ;;  %v1132_v39 = vunpack.c.h.bf16 %v1130_v35  ;;  %v1201_v42 = vld [vmem:[%s1664_s27 + $0x48] sm:$0xff]   ;;  %v1135_v44 = vunpack.c.l.bf16 %v1193_v37  ;;  %v1136_v45 = vunpack.c.h.bf16 %v1193_v37  ;;  %v1202_v5 = vld [vmem:[%s1664_s27 + $0x50] sm:$0xff]  }
  0x4e   : > { %v1163_v40 = vunpack.c.l.bf16 %v1200_v36  ;;  %v1164_v41 = vunpack.c.h.bf16 %v1200_v36  ;;  %1228 = vmatprep.subr.bf16.mxu0 %v1355_v34  ;;  %1263 = vmatprep.subr.bf16.mxu1 %v1355_v34  ;;  %v1167_v46 = vunpack.c.l.bf16 %v1201_v42  ;;  %v1168_v47 = vunpack.c.h.bf16 %v1201_v42  ;;  %v1195_v10 = vld [vmem:[%s1664_s27 + $0x18] sm:$0xff]   ;;  %v1196_v28 = vld [vmem:[%s1664_s27 + $0x20] sm:$0xff]  }
  0x4f   : > { %v490_v49 = vmul.f32 %v1131_v38, %v1662_v33  ;;  %v491_v50 = vmul.f32 %v1132_v39, %v1662_v33  ;;  %v492_v53 = vmul.f32 %v1135_v44, %v1662_v33  ;;  %v493_v54 = vmul.f32 %v1136_v45, %v1662_v33  ;;  %v1203_v15 = vld [vmem:[%s1664_s27 + $0x58] sm:$0xff]  }
  0x50   : > { %v506_v51 = vmul.f32 %v1163_v40, %v1662_v33  ;;  %v507_v52 = vmul.f32 %v1164_v41, %v1662_v33  ;;  %v508_v55 = vmul.f32 %v1167_v46, %v1662_v33  ;;  %v509_v56 = vmul.f32 %v1168_v47, %v1662_v33  ;;  %v1204_v47 = vld [vmem:[%s1664_s27 + $0x60] sm:$0xff]  }
  0x51   : > { %1229 = vmatpush3.bf16.msra.mxu0 %v1355_v34  ;;  %1265 = vmatpush3.bf16.msra.mxu1 %v1355_v34  ;;  %v529_v57 = vadd.f32 %v1673_v43, %v490_v49  ;;  %v530_v58 = vadd.f32 %v1673_v43, %v491_v50  ;;  %v1139_v60 = vunpack.c.l.bf16 %v1194_v48  ;;  %v531_v62 = vadd.f32 %v1673_v43, %v492_v53 }
  0x52   : > { %v545_v59 = vadd.f32 %v1673_v43, %v506_v51  ;;  %v546_v61 = vadd.f32 %v1673_v43, %v507_v52  ;;  %v532_v63 = vadd.f32 %v1673_v43, %v493_v54  ;;  %v547_v0 = vadd.f32 %v1673_v43, %v508_v55  ;;  %v1197_v52 = vld [vmem:[%s1664_s27 + $0x28] sm:$0xff]  }
  0x53   : > { %v561_v1 = vmax.f32 %v529_v57, 0.0  ;;  %v562_v2 = vmax.f32 %v530_v58, 0.0  ;;  %v548_v4 = vadd.f32 %v1673_v43, %v509_v56  ;;  %v563_v7 = vmax.f32 %v531_v62, 0.0 }
  0x54   : > { %v577_v3 = vmax.f32 %v545_v59, 0.0  ;;  %v578_v6 = vmax.f32 %v546_v61, 0.0  ;;  %v564_v8 = vmax.f32 %v532_v63, 0.0  ;;  %v579_v9 = vmax.f32 %v547_v0, 0.0  ;;  %v1205_v61 = vld [vmem:[%s1664_s27 + $0x68] sm:$0xff]  }
  0x55   : > { %v593_v11 = vpack.c.bf16 %v562_v2, %v561_v1  ;;  %v580_v12 = vmax.f32 %v548_v4, 0.0  ;;  %v1140_v13 = vunpack.c.h.bf16 %v1194_v48  ;;  %v494_v14 = vmul.f32 %v1139_v60, %v1662_v33 }
  0x56   : > { %v601_v16 = vpack.c.bf16 %v578_v6, %v577_v3  ;;  %v594_v17 = vpack.c.bf16 %v564_v8, %v563_v7  ;;  %v1171_v18 = vunpack.c.l.bf16 %v1202_v5  ;;  %v1172_v19 = vunpack.c.h.bf16 %v1202_v5  ;;  %v1198_v6 = vld [vmem:[%s1664_s27 + $0x30] sm:$0xff]  }
  0x57   : > { %1230 = vmatprep.mubr.msk.bf16.mxu0 %vm630_vm0, %v593_v11  ;;  %v602_v20 = vpack.c.bf16 %v580_v12, %v579_v9  ;;  %v495_v21 = vmul.f32 %v1140_v13, %v1662_v33  ;;  %v533_v22 = vadd.f32 %v1673_v43, %v494_v14  ;;  %v1143_v23 = vunpack.c.l.bf16 %v1195_v10 }
  0x58   : > { %1246 = vmatprep.mubr.msk.bf16.mxu1 %vm630_vm0, %v601_v16  ;;  %1231 = vmatmul.mubr.msk.bf16.vlgmr.msra.gmra.mrb[0].mxu0 %vm630_vm0, %v594_v17  ;;  %v510_v24 = vmul.f32 %v1171_v18, %v1662_v33  ;;  %v511_v25 = vmul.f32 %v1172_v19, %v1662_v33  ;;  %v1144_v26 = vunpack.c.h.bf16 %v1195_v10  ;;  %v1175_v27 = vunpack.c.l.bf16 %v1203_v15  ;;  %v1206_v19 = vld [vmem:[%s1664_s27 + $0x70] sm:$0xff]  }
  0x59   : > { %1247 = vmatmul.mubr.msk.bf16.vlgmr.msra.gmra.mrb[0].mxu1 %vm630_vm0, %v602_v20  ;;  %v534_v29 = vadd.f32 %v1673_v43, %v495_v21  ;;  %v565_v30 = vmax.f32 %v533_v22, 0.0  ;;  %v496_v31 = vmul.f32 %v1143_v23, %v1662_v33  ;;  %v1176_v32 = vunpack.c.h.bf16 %v1203_v15 }
  0x5a   : > { %v549_v34 = vadd.f32 %v1673_v43, %v510_v24  ;;  %v550_v35 = vadd.f32 %v1673_v43, %v511_v25  ;;  %v497_v36 = vmul.f32 %v1144_v26, %v1662_v33  ;;  %v512_v37 = vmul.f32 %v1175_v27, %v1662_v33 }
  0x5b   : > { %v566_v38 = vmax.f32 %v534_v29, 0.0  ;;  %v535_v39 = vadd.f32 %v1673_v43, %v496_v31  ;;  %v513_v40 = vmul.f32 %v1176_v32, %v1662_v33  ;;  %v1147_v41 = vunpack.c.l.bf16 %v1196_v28 }
  0x5c   : > { %v581_v42 = vmax.f32 %v549_v34, 0.0  ;;  %v582_v44 = vmax.f32 %v550_v35, 0.0  ;;  %v536_v45 = vadd.f32 %v1673_v43, %v497_v36  ;;  %v551_v46 = vadd.f32 %v1673_v43, %v512_v37  ;;  %v1207_v34 = vld [vmem:[%s1664_s27 + $0x78] sm:$0xff]  }
  0x5d   : > { %v595_v48 = vpack.c.bf16 %v566_v38, %v565_v30  ;;  %v567_v49 = vmax.f32 %v535_v39, 0.0  ;;  %v552_v50 = vadd.f32 %v1673_v43, %v513_v40  ;;  %v1148_v51 = vunpack.c.h.bf16 %v1196_v28  ;;  %v1199_v28 = vld [vmem:[%s1664_s27 + $0x38] sm:$0xff]  }
  0x5e   : > { %v603_v53 = vpack.c.bf16 %v582_v44, %v581_v42  ;;  %v568_v54 = vmax.f32 %v536_v45, 0.0  ;;  %v583_v55 = vmax.f32 %v551_v46, 0.0  ;;  %v498_v56 = vmul.f32 %v1147_v41, %v1662_v33 }
  0x5f   : > { %1234 = vmatprep.mubr.msk.bf16.mxu0 %vm630_vm0, %v595_v48  ;;  %v584_v57 = vmax.f32 %v552_v50, 0.0  ;;  %v499_v58 = vmul.f32 %v1148_v51, %v1662_v33  ;;  %v1179_v59 = vunpack.c.l.bf16 %v1204_v47  ;;  %v1180_v60 = vunpack.c.h.bf16 %v1204_v47 }
  0x60   : > { %1250 = vmatprep.mubr.msk.bf16.mxu1 %vm630_vm0, %v603_v53  ;;  %v596_v62 = vpack.c.bf16 %v568_v54, %v567_v49  ;;  %v537_v63 = vadd.f32 %v1673_v43, %v498_v56  ;;  %v1151_v0 = vunpack.c.l.bf16 %v1197_v52  ;;  %v1152_v1 = vunpack.c.h.bf16 %v1197_v52 }
  0x61   : > { %v604_v2 = vpack.c.bf16 %v584_v57, %v583_v55  ;;  %v538_v3 = vadd.f32 %v1673_v43, %v499_v58  ;;  %v514_v4 = vmul.f32 %v1179_v59, %v1662_v33  ;;  %v515_v5 = vmul.f32 %v1180_v60, %v1662_v33 }
  0x62   : > { %1235 = vmatmul.mubr.msk.bf16.gmra.mrb[4].mxu0 %vm630_vm0, %v596_v62  ;;  %v569_v7 = vmax.f32 %v537_v63, 0.0  ;;  %v500_v8 = vmul.f32 %v1151_v0, %v1662_v33  ;;  %v501_v9 = vmul.f32 %v1152_v1, %v1662_v33  ;;  %v1183_v10 = vunpack.c.l.bf16 %v1205_v61 }
  0x63   : > { %1251 = vmatmul.mubr.msk.bf16.gmra.mrb[4].mxu1 %vm630_vm0, %v604_v2  ;;  %v570_v11 = vmax.f32 %v538_v3, 0.0  ;;  %v553_v12 = vadd.f32 %v1673_v43, %v514_v4  ;;  %v554_v13 = vadd.f32 %v1673_v43, %v515_v5  ;;  %v1184_v14 = vunpack.c.h.bf16 %v1205_v61 }
  0x64   : > { %v539_v15 = vadd.f32 %v1673_v43, %v500_v8  ;;  %v540_v16 = vadd.f32 %v1673_v43, %v501_v9  ;;  %v516_v17 = vmul.f32 %v1183_v10, %v1662_v33  ;;  %v1155_v18 = vunpack.c.l.bf16 %v1198_v6 }
  0x65   : > { %v597_v20 = vpack.c.bf16 %v570_v11, %v569_v7  ;;  %v585_v21 = vmax.f32 %v553_v12, 0.0  ;;  %v586_v22 = vmax.f32 %v554_v13, 0.0  ;;  %v517_v23 = vmul.f32 %v1184_v14, %v1662_v33 }
  0x66   : > { %v571_v24 = vmax.f32 %v539_v15, 0.0  ;;  %v572_v25 = vmax.f32 %v540_v16, 0.0  ;;  %v555_v26 = vadd.f32 %v1673_v43, %v516_v17  ;;  %v1156_v27 = vunpack.c.h.bf16 %v1198_v6 }
  0x67   : > { %1238 = vmatprep.mubr.msk.bf16.mxu0 %vm630_vm0, %v597_v20  ;;  %v605_v29 = vpack.c.bf16 %v586_v22, %v585_v21  ;;  %v556_v30 = vadd.f32 %v1673_v43, %v517_v23  ;;  %v502_v31 = vmul.f32 %v1155_v18, %v1662_v33  ;;  %v1187_v32 = vunpack.c.l.bf16 %v1206_v19 }
  0x68   : > { %v598_v35 = vpack.c.bf16 %v572_v25, %v571_v24  ;;  %v587_v36 = vmax.f32 %v555_v26, 0.0  ;;  %v503_v37 = vmul.f32 %v1156_v27, %v1662_v33  ;;  %v1188_v38 = vunpack.c.h.bf16 %v1206_v19 }
  0x69   : > { %1254 = vmatprep.mubr.msk.bf16.mxu1 %vm630_vm0, %v605_v29  ;;  %v588_v39 = vmax.f32 %v556_v30, 0.0  ;;  %v541_v40 = vadd.f32 %v1673_v43, %v502_v31  ;;  %v518_v41 = vmul.f32 %v1187_v32, %v1662_v33  ;;  %v1159_v42 = vunpack.c.l.bf16 %v1199_v28 }
  0x6a   : > { %1239 = vmatmul.mubr.msk.bf16.gmra.mrb[8].mxu0 %vm630_vm0, %v598_v35  ;;  %v542_v44 = vadd.f32 %v1673_v43, %v503_v37  ;;  %v519_v45 = vmul.f32 %v1188_v38, %v1662_v33  ;;  %v1160_v46 = vunpack.c.h.bf16 %v1199_v28  ;;  %v1191_v47 = vunpack.c.l.bf16 %v1207_v34 }
  0x6b   : > { %v606_v48 = vpack.c.bf16 %v588_v39, %v587_v36  ;;  %v573_v49 = vmax.f32 %v541_v40, 0.0  ;;  %v557_v50 = vadd.f32 %v1673_v43, %v518_v41  ;;  %v504_v51 = vmul.f32 %v1159_v42, %v1662_v33 }
  0x6c   : > { %v574_v52 = vmax.f32 %v542_v44, 0.0  ;;  %v558_v53 = vadd.f32 %v1673_v43, %v519_v45  ;;  %v505_v54 = vmul.f32 %v1160_v46, %v1662_v33  ;;  %v1192_v55 = vunpack.c.h.bf16 %v1207_v34 }
  0x6d   : > { %1255 = vmatmul.mubr.msk.bf16.gmra.mrb[8].mxu1 %vm630_vm0, %v606_v48  ;;  %v589_v56 = vmax.f32 %v557_v50, 0.0  ;;  %v543_v57 = vadd.f32 %v1673_v43, %v504_v51  ;;  %v520_v58 = vmul.f32 %v1191_v47, %v1662_v33 }
  0x6e   : > { %v599_v59 = vpack.c.bf16 %v574_v52, %v573_v49  ;;  %v590_v60 = vmax.f32 %v558_v53, 0.0  ;;  %v544_v61 = vadd.f32 %v1673_v43, %v505_v54  ;;  %v521_v62 = vmul.f32 %v1192_v55, %v1662_v33 }
  0x6f   : > { %v575_v63 = vmax.f32 %v543_v57, 0.0  ;;  %v559_v0 = vadd.f32 %v1673_v43, %v520_v58 }
  0x70   : > { %1242 = vmatprep.mubr.msk.bf16.mxu0 %vm630_vm0, %v599_v59  ;;  %v607_v1 = vpack.c.bf16 %v590_v60, %v589_v56  ;;  %v576_v2 = vmax.f32 %v544_v61, 0.0  ;;  %v560_v3 = vadd.f32 %v1673_v43, %v521_v62 }
  0x71   : > { %v591_v4 = vmax.f32 %v559_v0, 0.0 }
  0x72   : > { %1258 = vmatprep.mubr.msk.bf16.mxu1 %vm630_vm0, %v607_v1  ;;  %v600_v5 = vpack.c.bf16 %v576_v2, %v575_v63  ;;  %v592_v6 = vmax.f32 %v560_v3, 0.0 }
  0x74   : > { %1243 = vmatmul.mubr.msk.bf16.gmra.mrb[12].mxu0 %vm630_vm0, %v600_v5  ;;  %v608_v7 = vpack.c.bf16 %v592_v6, %v591_v4 }
  0x76   : > { %1259 = vmatmul.mubr.msk.bf16.gmra.mrb[12].mxu1 %vm630_vm0, %v608_v7 }
 0x12b   : > { %v1767_v33 = vpop.f32.mrb[0].mxu0 }
 0x12c   : > { %v1769_v8 = vpop.f32.mrb[0].mxu1  ;;  %v1771_v9 = vpop.f32.mrb[1].mxu0  ;;  %845 = vst.msk [vmem:[%s1652_s9 + $0x10] sm:$0xff] (!%p1645_p2), %vm842_vm1, %v1767_v33 }
 0x12d   : > { %v1773_v10 = vpop.f32.mrb[1].mxu1  ;;  %v1775_v11 = vpop.f32.mrb[2].mxu0  ;;  %843 = vst.msk [vmem:[%s1652_s9] sm:$0xff] (!%p1645_p2), %vm842_vm1, %v1771_v9  ;;  %861 = vst.msk [vmem:[%s1652_s9 + $0x90] sm:$0xff] (!%p1645_p2), %vm842_vm1, %v1769_v8 }
 0x12e   : > { %v1777_v43 = vpop.f32.mrb[2].mxu1  ;;  %v1779_v12 = vpop.f32.mrb[3].mxu0  ;;  %846 = vst.msk [vmem:[%s1652_s9 + $0x18] sm:$0xff] (!%p1645_p2), %vm842_vm1, %v1775_v11  ;;  %859 = vst.msk [vmem:[%s1652_s9 + $0x80] sm:$0xff] (!%p1645_p2), %vm842_vm1, %v1773_v10 }
 0x12f   : > { %v1781_v13 = vpop.f32.mrb[3].mxu1  ;;  %844 = vst.msk [vmem:[%s1652_s9 + $0x8] sm:$0xff] (!%p1645_p2), %vm842_vm1, %v1779_v12  ;;  %862 = vst.msk [vmem:[%s1652_s9 + $0x98] sm:$0xff] (!%p1645_p2), %vm842_vm1, %v1777_v43 }
 0x130   : > { %860 = vst.msk [vmem:[%s1652_s9 + $0x88] sm:$0xff] (!%p1645_p2), %vm842_vm1, %v1781_v13 }
 0x135   : > { %v1783_v14 = vpop.f32.mrb[4].mxu0 }
 0x136   : > { %v1785_v15 = vpop.f32.mrb[4].mxu1  ;;  %v1787_v16 = vpop.f32.mrb[5].mxu0  ;;  %849 = vst.msk [vmem:[%s1652_s9 + $0x30] sm:$0xff] (!%p1645_p2), %vm842_vm1, %v1783_v14 }
 0x137   : > { %v1789_v17 = vpop.f32.mrb[5].mxu1  ;;  %v1791_v18 = vpop.f32.mrb[6].mxu0  ;;  %847 = vst.msk [vmem:[%s1652_s9 + $0x20] sm:$0xff] (!%p1645_p2), %vm842_vm1, %v1787_v16  ;;  %865 = vst.msk [vmem:[%s1652_s9 + $0xb0] sm:$0xff] (!%p1645_p2), %vm842_vm1, %v1785_v15 }
 0x138   : > { %v1793_v19 = vpop.f32.mrb[6].mxu1  ;;  %v1795_v20 = vpop.f32.mrb[7].mxu0  ;;  %850 = vst.msk [vmem:[%s1652_s9 + $0x38] sm:$0xff] (!%p1645_p2), %vm842_vm1, %v1791_v18  ;;  %863 = vst.msk [vmem:[%s1652_s9 + $0xa0] sm:$0xff] (!%p1645_p2), %vm842_vm1, %v1789_v17 }
 0x139   : > { %v1797_v21 = vpop.f32.mrb[7].mxu1  ;;  %848 = vst.msk [vmem:[%s1652_s9 + $0x28] sm:$0xff] (!%p1645_p2), %vm842_vm1, %v1795_v20  ;;  %866 = vst.msk [vmem:[%s1652_s9 + $0xb8] sm:$0xff] (!%p1645_p2), %vm842_vm1, %v1793_v19 }
 0x13a   : > { %864 = vst.msk [vmem:[%s1652_s9 + $0xa8] sm:$0xff] (!%p1645_p2), %vm842_vm1, %v1797_v21 }
 0x13d   : > { %v1799_v22 = vpop.f32.mrb[8].mxu0 }
 0x13e   : > { %v1801_v23 = vpop.f32.mrb[9].mxu0  ;;  %853 = vst.msk [vmem:[%s1652_s9 + $0x50] sm:$0xff] (!%p1645_p2), %vm842_vm1, %v1799_v22 }
 0x13f   : > { %v1803_v24 = vpop.f32.mrb[10].mxu0  ;;  %851 = vst.msk [vmem:[%s1652_s9 + $0x40] sm:$0xff] (!%p1645_p2), %vm842_vm1, %v1801_v23 }
 0x140   : > { %v1805_v25 = vpop.f32.mrb[8].mxu1  ;;  %v1807_v26 = vpop.f32.mrb[11].mxu0  ;;  %854 = vst.msk [vmem:[%s1652_s9 + $0x58] sm:$0xff] (!%p1645_p2), %vm842_vm1, %v1803_v24 }
 0x141   : > { %v1809_v27 = vpop.f32.mrb[9].mxu1  ;;  %852 = vst.msk [vmem:[%s1652_s9 + $0x48] sm:$0xff] (!%p1645_p2), %vm842_vm1, %v1807_v26  ;;  %869 = vst.msk [vmem:[%s1652_s9 + $0xd0] sm:$0xff] (!%p1645_p2), %vm842_vm1, %v1805_v25 }
 0x142   : > { %v1811_v28 = vpop.f32.mrb[10].mxu1  ;;  %867 = vst.msk [vmem:[%s1652_s9 + $0xc0] sm:$0xff] (!%p1645_p2), %vm842_vm1, %v1809_v27 }
 0x143   : > { %v1813_v29 = vpop.f32.mrb[11].mxu1  ;;  %870 = vst.msk [vmem:[%s1652_s9 + $0xd8] sm:$0xff] (!%p1645_p2), %vm842_vm1, %v1811_v28 }
 0x144   : > { %868 = vst.msk [vmem:[%s1652_s9 + $0xc8] sm:$0xff] (!%p1645_p2), %vm842_vm1, %v1813_v29 }
 0x146   : > { %841 = sbr.rel (%p1645_p2) target bundleno = 334 (0x14e), region = 81 }
 0x147   : > { %v1815_v30 = vpop.f32.mrb[12].mxu0 }
 0x148   : > { %v1817_v31 = vpop.f32.mrb[13].mxu0  ;;  %857 = vst.msk [vmem:[%s1652_s9 + $0x70] sm:$0xff] (!%p1645_p2), %vm842_vm1, %v1815_v30 }
 0x149   : > { %v1819_v32 = vpop.f32.mrb[12].mxu1  ;;  %v1821_v34 = vpop.f32.mrb[14].mxu0  ;;  %855 = vst.msk [vmem:[%s1652_s9 + $0x60] sm:$0xff] (!%p1645_p2), %vm842_vm1, %v1817_v31 }
 0x14a   : > { %v1823_v35 = vpop.f32.mrb[13].mxu1  ;;  %v1825_v36 = vpop.f32.mrb[15].mxu0  ;;  %858 = vst.msk [vmem:[%s1652_s9 + $0x78] sm:$0xff] (!%p1645_p2), %vm842_vm1, %v1821_v34  ;;  %873 = vst.msk [vmem:[%s1652_s9 + $0xf0] sm:$0xff] (!%p1645_p2), %vm842_vm1, %v1819_v32 }
 0x14b   : > { %v1827_v37 = vpop.f32.mrb[14].mxu1  ;;  %856 = vst.msk [vmem:[%s1652_s9 + $0x68] sm:$0xff] (!%p1645_p2), %vm842_vm1, %v1825_v36  ;;  %871 = vst.msk [vmem:[%s1652_s9 + $0xe0] sm:$0xff] (!%p1645_p2), %vm842_vm1, %v1823_v35 }
 0x14c   : > { %v1829_v38 = vpop.f32.mrb[15].mxu1  ;;  %874 = vst.msk [vmem:[%s1652_s9 + $0xf8] sm:$0xff] (!%p1645_p2), %vm842_vm1, %v1827_v37 }
 0x14d   : > { %872 = vst.msk [vmem:[%s1652_s9 + $0xe8] sm:$0xff] %vm842_vm1, %v1829_v38 }
 0x14e PF: > { %877 = sbr.rel (!%p1645_p2) target bundleno = 353 (0x161), region = 85  ;;  %v878_v39 = vld [vmem:[%s1652_s9] sm:$0xff] (%p1645_p2)  ;;  %vm942_vm2 = vcmask (%p1645_p2), 130048   ;;  %v879_v40 = vld [vmem:[%s1652_s9 + $0x8] sm:$0xff] (%p1645_p2)  ;;  %v880_v41 = vld [vmem:[%s1652_s9 + $0x10] sm:$0xff] (%p1645_p2) }
 0x14f   : > { %v910_v42 = vadd.f32 (%p1645_p2), %v878_v39, %v1771_v9  ;;  %v911_v44 = vadd.f32 (%p1645_p2), %v879_v40, %v1779_v12  ;;  %v912_v45 = vadd.f32 (%p1645_p2), %v1767_v33, %v880_v41  ;;  %v881_v46 = vld [vmem:[%s1652_s9 + $0x18] sm:$0xff] (%p1645_p2)  ;;  %v882_v47 = vld [vmem:[%s1652_s9 + $0x20] sm:$0xff] (%p1645_p2)  ;;  %v883_v48 = vld [vmem:[%s1652_s9 + $0x28] sm:$0xff] (%p1645_p2) }
 0x150   : > { %v913_v49 = vadd.f32 (%p1645_p2), %v1775_v11, %v881_v46  ;;  %v914_v50 = vadd.f32 (%p1645_p2), %v882_v47, %v1787_v16  ;;  %v915_v51 = vadd.f32 (%p1645_p2), %v883_v48, %v1795_v20  ;;  %v884_v52 = vld [vmem:[%s1652_s9 + $0x30] sm:$0xff] (%p1645_p2)  ;;  %v885_v53 = vld [vmem:[%s1652_s9 + $0x38] sm:$0xff] (%p1645_p2)  ;;  %v886_v54 = vld [vmem:[%s1652_s9 + $0x40] sm:$0xff] (%p1645_p2) }
 0x151   : > { %943 = vst.msk [vmem:[%s1652_s9] sm:$0xff] (%p1645_p2), %vm942_vm2, %v910_v42  ;;  %944 = vst.msk [vmem:[%s1652_s9 + $0x8] sm:$0xff] (%p1645_p2), %vm942_vm2, %v911_v44  ;;  %v916_v55 = vadd.f32 (%p1645_p2), %v1783_v14, %v884_v52  ;;  %v917_v56 = vadd.f32 (%p1645_p2), %v1791_v18, %v885_v53  ;;  %v918_v57 = vadd.f32 (%p1645_p2), %v886_v54, %v1801_v23  ;;  %v887_v58 = vld [vmem:[%s1652_s9 + $0x48] sm:$0xff] (%p1645_p2)  ;;  %v888_v59 = vld [vmem:[%s1652_s9 + $0x50] sm:$0xff] (%p1645_p2) }
 0x152   : > { %945 = vst.msk [vmem:[%s1652_s9 + $0x10] sm:$0xff] (%p1645_p2), %vm942_vm2, %v912_v45  ;;  %v889_v60 = vld [vmem:[%s1652_s9 + $0x58] sm:$0xff] (%p1645_p2)  ;;  %946 = vst.msk [vmem:[%s1652_s9 + $0x18] sm:$0xff] (%p1645_p2), %vm942_vm2, %v913_v49  ;;  %v919_v61 = vadd.f32 (%p1645_p2), %v887_v58, %v1807_v26  ;;  %v920_v62 = vadd.f32 (%p1645_p2), %v1799_v22, %v888_v59  ;;  %v890_v0 = vld [vmem:[%s1652_s9 + $0x60] sm:$0xff] (%p1645_p2) }
 0x153   : > { %947 = vst.msk [vmem:[%s1652_s9 + $0x20] sm:$0xff] (%p1645_p2), %vm942_vm2, %v914_v50  ;;  %948 = vst.msk [vmem:[%s1652_s9 + $0x28] sm:$0xff] (%p1645_p2), %vm942_vm2, %v915_v51  ;;  %v921_v63 = vadd.f32 (%p1645_p2), %v1803_v24, %v889_v60  ;;  %v891_v1 = vld [vmem:[%s1652_s9 + $0x68] sm:$0xff] (%p1645_p2)  ;;  %v892_v2 = vld [vmem:[%s1652_s9 + $0x70] sm:$0xff] (%p1645_p2)  ;;  %v922_v3 = vadd.f32 (%p1645_p2), %v890_v0, %v1817_v31 }
 0x154   : > { %949 = vst.msk [vmem:[%s1652_s9 + $0x30] sm:$0xff] (%p1645_p2), %vm942_vm2, %v916_v55  ;;  %950 = vst.msk [vmem:[%s1652_s9 + $0x38] sm:$0xff] (%p1645_p2), %vm942_vm2, %v917_v56  ;;  %v923_v4 = vadd.f32 (%p1645_p2), %v891_v1, %v1825_v36  ;;  %v924_v5 = vadd.f32 (%p1645_p2), %v1815_v30, %v892_v2  ;;  %v893_v6 = vld [vmem:[%s1652_s9 + $0x78] sm:$0xff] (%p1645_p2)  ;;  %v894_v7 = vld [vmem:[%s1652_s9 + $0x80] sm:$0xff] (%p1645_p2) }
 0x155   : > { %951 = vst.msk [vmem:[%s1652_s9 + $0x40] sm:$0xff] %vm942_vm2, %v918_v57  ;;  %v895_v33 = vld [vmem:[%s1652_s9 + $0x88] sm:$0xff]  ;;  %952 = vst.msk [vmem:[%s1652_s9 + $0x48] sm:$0xff] %vm942_vm2, %v919_v61  ;;  %v925_v9 = vadd.f32 %v1821_v34, %v893_v6  ;;  %v926_v11 = vadd.f32 %v894_v7, %v1773_v10  ;;  %v896_v14 = vld [vmem:[%s1652_s9 + $0x90] sm:$0xff] }
 0x156   : > { %953 = vst.msk [vmem:[%s1652_s9 + $0x50] sm:$0xff] %vm942_vm2, %v920_v62  ;;  %954 = vst.msk [vmem:[%s1652_s9 + $0x58] sm:$0xff] %vm942_vm2, %v921_v63  ;;  %v927_v12 = vadd.f32 %v895_v33, %v1781_v13  ;;  %v897_v16 = vld [vmem:[%s1652_s9 + $0x98] sm:$0xff]  ;;  %v898_v18 = vld [vmem:[%s1652_s9 + $0xa0] sm:$0xff]  ;;  %v928_v20 = vadd.f32 %v1769_v8, %v896_v14 }
 0x157   : > { %955 = vst.msk [vmem:[%s1652_s9 + $0x60] sm:$0xff] %vm942_vm2, %v922_v3  ;;  %956 = vst.msk [vmem:[%s1652_s9 + $0x68] sm:$0xff] %vm942_vm2, %v923_v4  ;;  %v929_v10 = vadd.f32 %v1777_v43, %v897_v16  ;;  %v930_v13 = vadd.f32 %v898_v18, %v1789_v17  ;;  %v899_v22 = vld [vmem:[%s1652_s9 + $0xa8] sm:$0xff]  ;;  %v900_v23 = vld [vmem:[%s1652_s9 + $0xb0] sm:$0xff] }
 0x158   : > { %957 = vst.msk [vmem:[%s1652_s9 + $0x70] sm:$0xff] %vm942_vm2, %v924_v5  ;;  %v901_v24 = vld [vmem:[%s1652_s9 + $0xb8] sm:$0xff]  ;;  %958 = vst.msk [vmem:[%s1652_s9 + $0x78] sm:$0xff] %vm942_vm2, %v925_v9  ;;  %v931_v8 = vadd.f32 %v899_v22, %v1797_v21  ;;  %v932_v43 = vadd.f32 %v1785_v15, %v900_v23  ;;  %v902_v26 = vld [vmem:[%s1652_s9 + $0xc0] sm:$0xff] }
 0x159   : > { %959 = vst.msk [vmem:[%s1652_s9 + $0x80] sm:$0xff] %vm942_vm2, %v926_v11  ;;  %960 = vst.msk [vmem:[%s1652_s9 + $0x88] sm:$0xff] %vm942_vm2, %v927_v12  ;;  %v933_v17 = vadd.f32 %v1793_v19, %v901_v24  ;;  %v903_v30 = vld [vmem:[%s1652_s9 + $0xc8] sm:$0xff]  ;;  %v904_v31 = vld [vmem:[%s1652_s9 + $0xd0] sm:$0xff]  ;;  %v934_v21 = vadd.f32 %v902_v26, %v1809_v27 }
 0x15a   : > { %961 = vst.msk [vmem:[%s1652_s9 + $0x90] sm:$0xff] %vm942_vm2, %v928_v20  ;;  %962 = vst.msk [vmem:[%s1652_s9 + $0x98] sm:$0xff] %vm942_vm2, %v929_v10  ;;  %v935_v15 = vadd.f32 %v903_v30, %v1813_v29  ;;  %v936_v19 = vadd.f32 %v1805_v25, %v904_v31  ;;  %v905_v34 = vld [vmem:[%s1652_s9 + $0xd8] sm:$0xff]  ;;  %v906_v36 = vld [vmem:[%s1652_s9 + $0xe0] sm:$0xff] }
 0x15b   : > { %963 = vst.msk [vmem:[%s1652_s9 + $0xa0] sm:$0xff] %vm942_vm2, %v930_v13  ;;  %v907_v39 = vld [vmem:[%s1652_s9 + $0xe8] sm:$0xff]  ;;  %964 = vst.msk [vmem:[%s1652_s9 + $0xa8] sm:$0xff] %vm942_vm2, %v931_v8  ;;  %v937_v27 = vadd.f32 %v1811_v28, %v905_v34  ;;  %v938_v29 = vadd.f32 %v906_v36, %v1823_v35  ;;  %v908_v40 = vld [vmem:[%s1652_s9 + $0xf0] sm:$0xff] }
 0x15c   : > { %965 = vst.msk [vmem:[%s1652_s9 + $0xb0] sm:$0xff] %vm942_vm2, %v932_v43  ;;  %966 = vst.msk [vmem:[%s1652_s9 + $0xb8] sm:$0xff] %vm942_vm2, %v933_v17  ;;  %v939_v25 = vadd.f32 %v907_v39, %v1829_v38  ;;  %v909_v41 = vld [vmem:[%s1652_s9 + $0xf8] sm:$0xff]  ;;  %v940_v42 = vadd.f32 %v1819_v32, %v908_v40 }
 0x15d   : > { %967 = vst.msk [vmem:[%s1652_s9 + $0xc0] sm:$0xff] %vm942_vm2, %v934_v21  ;;  %968 = vst.msk [vmem:[%s1652_s9 + $0xc8] sm:$0xff] %vm942_vm2, %v935_v15  ;;  %v941_v44 = vadd.f32 %v1827_v37, %v909_v41 }
 0x15e   : > { %969 = vst.msk [vmem:[%s1652_s9 + $0xd0] sm:$0xff] %vm942_vm2, %v936_v19  ;;  %970 = vst.msk [vmem:[%s1652_s9 + $0xd8] sm:$0xff] %vm942_vm2, %v937_v27 }
 0x15f   : > { %971 = vst.msk [vmem:[%s1652_s9 + $0xe0] sm:$0xff] %vm942_vm2, %v938_v29  ;;  %972 = vst.msk [vmem:[%s1652_s9 + $0xe8] sm:$0xff] %vm942_vm2, %v939_v25 }
 0x160   : > { %973 = vst.msk [vmem:[%s1652_s9 + $0xf0] sm:$0xff] %vm942_vm2, %v940_v42  ;;  %974 = vst.msk [vmem:[%s1652_s9 + $0xf8] sm:$0xff] %vm942_vm2, %v941_v44 }
 0x161 PF: > { %s14_s25 = sadd.s32 1, %s1442_s25   ;;  %s2107_s30 = sld [smem:[#allocation4_spill]] }
 0x162   : > { %p11_p3 = scmp.ge.s32.totalorder %s14_s25, 18   ;;  %s2108_s14 = sld [smem:[#allocation3_spill]] }
 0x163   : > { %s2109_s5 = sld [smem:[#allocation5_spill]]  ;;  %s2110_s15 = smov %s1406_s16 }
 0x164   : > { %s2111_s16 = smov %s1556_s13  ;;  %s2112_s17 = smov %s1426_s21 }
 0x165   : > { %s2113_s18 = smov %s1430_s22  ;;  %s2114_s19 = smov %s1434_s23 }
 0x166   : > { %s2115_s20 = smov %s1438_s24  ;;  %s2116_s21 = smov %s2125_s26 }
 0x167   : > { %s2117_s22 = smov %s2107_s30  ;;  %13 = sbr.rel (!%p11_p3) target bundleno = 8 (0x8), region = 121 }
 0x168   : > { %s2118_s23 = smov %s2108_s14 }
 0x169   : > { %s2119_s24 = smov %s2109_s5 }

</bundles_post_ra>
